<compile_context>
chip_gen: v7x
topology: tpu7x:2x2x1
jax: 0.10.0
libtpu: 0.0.40
codegen_flags: <defaults>
</compile_context>

<pallas_src>
import jax
import jax.numpy as jnp
from jax.experimental import pallas as pl
from jax.experimental.pallas import tpu as pltpu

# ----------------------------- model dimensions -----------------------------
N_CHANNELS = 4
N_OUTPUTS = 8
BATCH = 2
H_IN = 6          # conv1 -> 2, maxpool2d -> 1 (squeezed)
W_IN = 972        # 972 -> 968 -> 484 -> 480 -> 240 -> 236 -> 118

K2D = 5
K1D = 5
C1, C2, C3 = 32, 32, 64

H1 = H_IN - K2D + 1          # 2
W1 = W_IN - K2D + 1          # 968
L1 = W1 // 2                 # 484
L2 = L1 - K1D + 1            # 480
L3 = L2 // 2                 # 240
L4 = L3 - K1D + 1            # 236
L5 = L4 // 2                 # 118
FLAT = C3 * L5               # 7552 == 59 * 128
FC1, FC2 = 128, 32

# ----------------------------- polyphase layout ------------------------------
P1 = W1 // 8                 # 121  conv1 per-phase width
P2 = L2 // 4                 # 120  conv2 per-phase width
P3 = L4 // 2                 # 118  conv3 per-phase width (== L5)
PHW = W_IN // 8 + 1          # 122  padded per-phase input width
NROW = H_IN * N_CHANNELS     # 24   input rows = h*4 + c
RPAD = 32                    # rows padded to 32
K1F = K2D * RPAD             # 160  folded conv1 contraction (both H rows)
K2F = K1D * C1               # 160
K3F = K1D * C2               # 160
CG = 8                       # fc1 channels per tile
CT = C3 // CG                # 8   fc1 channel tiles


# ------------------------------ Pallas kernel --------------------------------
def kspacenet_kernel(xp_ref, w1_ref, b1_ref, w2_ref, b2_ref, w3_ref, b3_ref,
                     wf1_hbm, bf1_ref, wf2_ref, bf2_ref, wf3_ref, bf3_ref,
                     o_ref, wf1_vmem, wf1_sem):
    f32 = jnp.float32
    bf16 = jnp.bfloat16
    n = o_ref.shape[0]

    # Kick off the fc1 weight DMA (HBM -> VMEM scratch); it completes behind the
    # conv-tower matmuls below and is fetched exactly once per call.
    wf1_copy = pltpu.make_async_copy(wf1_hbm, wf1_vmem, wf1_sem)
    wf1_copy.start()

    def conv_tower(s):
        # Deduplicated width-121 views of the 8 input phases (lane offsets 0/1).
        xp0 = [xp_ref[s, p, :, 0:P1] for p in range(8)]          # (32, 121) bf16
        xp1 = [xp_ref[s, p, :, 1:1 + P1] for p in range(4)]

        def xpiece(idx):                                          # tap view
            return xp0[idx] if idx < 8 else xp1[idx - 8]

        # conv1: Conv2d(4->32,5); both H output rows folded into one M=64 dot.
        def conv1_phase(r):
            patch = jnp.concatenate([xpiece(r + kw) for kw in range(K2D)],
                                    axis=0)                       # (160, 121)
            return jnp.dot(w1_ref[...], patch,
                           preferred_element_type=f32)            # (64, 121)

        # MaxPool2d(2): max over the two H rows (sublane halves) and adjacent
        # W-phases, then bias + ReLU; keep 4 W-phases in bf16.
        a1 = []
        for q in range(4):
            y0 = conv1_phase(2 * q)
            y1 = conv1_phase(2 * q + 1)
            m = jnp.maximum(jnp.maximum(y0[:C1], y0[C1:]),
                            jnp.maximum(y1[:C1], y1[C1:]))
            a1.append(jnp.maximum(m + b1_ref[...], 0.0).astype(bf16))   # (32,121)

        # conv2: Conv1d(32->32,5) folded to K=160, 4 phases; pool -> 2 phases.
        a1s = [[a[:, d:d + P2] for a in a1] for d in range(2)]    # [shift][phase]

        def conv2_phase(r):
            patch = jnp.concatenate(
                [a1s[(r + k) // 4][(r + k) % 4] for k in range(K1D)], axis=0)
            return jnp.dot(w2_ref[...], patch,
                           preferred_element_type=f32)            # (32, 120)

        a2 = []
        for q in range(2):
            m = jnp.maximum(conv2_phase(2 * q), conv2_phase(2 * q + 1))
            a2.append(jnp.maximum(m + b2_ref[...], 0.0).astype(bf16))   # (32,120)

        # conv3: Conv1d(32->64,5) folded to K=160, 2 phases; pool -> (64, 118).
        a2s = [[a[:, d:d + P3] for a in a2] for d in range(3)]

        def conv3_phase(r):
            patch = jnp.concatenate(
                [a2s[(r + k) // 2][(r + k) % 2] for k in range(K1D)], axis=0)
            return jnp.dot(w3_ref[...], patch,
                           preferred_element_type=f32)            # (64, 118)

        m = jnp.maximum(conv3_phase(0), conv3_phase(1))
        return jnp.maximum(m + b3_ref[...], 0.0)                  # (64, 118) f32

    feats = [conv_tower(s) for s in range(n)]

    # The fc1 weight must be resident before the head.
    wf1_copy.wait()

    # fc1 over the flattened (64ch x 118pos) features without materializing the
    # flatten: per 8-channel tile one (n*8,118)x(118,8*128) matmul, then a
    # per-sample diagonal-block reduction.
    acc = None
    for t in range(CT):
        lhs = jnp.concatenate([f[CG * t:CG * (t + 1), :] for f in feats],
                              axis=0).astype(bf16)                # (n*8, 118)
        p = jnp.dot(lhs, wf1_vmem[t], preferred_element_type=f32)  # (n*8, 1024)
        acc = p if acc is None else acc + p

    rows = []
    for s in range(n):
        h = bf1_ref[...]                                          # (1, 128)
        for j in range(CG):
            h = h + acc[s * CG + j:s * CG + j + 1, j * FC1:(j + 1) * FC1]
        rows.append(h)
    h = jnp.maximum(jnp.concatenate(rows, axis=0), 0.0)           # (n, 128)

    h = jnp.dot(h, wf2_ref[...], preferred_element_type=f32) + bf2_ref[...]
    h = jnp.dot(h, wf3_ref[...], preferred_element_type=f32) + bf3_ref[...]

    # F.normalize(p=2, dim=1) with eps=1e-12, via rsqrt (EUP slot).
    ss = jnp.sum(h * h, axis=1, keepdims=True)
    o_ref[...] = h * jax.lax.rsqrt(jnp.maximum(ss, 1e-24))


# --------------------------- weight / input packing ---------------------------
def pack_params(params):
    """One-time repack of the PyTorch-layout weights into kernel layouts."""
    (w1, b1, w2, b2, w3, b3, wf1, bf1, wf2, bf2, wf3, bf3) = params

    # conv1 folded over the 5 kw taps with BOTH H output rows stacked (M=64):
    # column = kw*32 + row, row = (kh + i)*4 + c  (unused rows carry 0 weights).
    w1t = jnp.transpose(w1, (3, 2, 1, 0)).reshape(K2D, K2D * N_CHANNELS, C1)
    w1h0 = jnp.pad(w1t, ((0, 0), (0, RPAD - K2D * N_CHANNELS), (0, 0)))
    w1h1 = jnp.pad(w1t, ((0, 0), (N_CHANNELS,
                                  RPAD - K2D * N_CHANNELS - N_CHANNELS), (0, 0)))
    w1p = (jnp.concatenate([w1h0, w1h1], axis=2)
           .reshape(K1F, 2 * C1).T.astype(jnp.bfloat16))          # (64, 160)

    # conv2 / conv3 folded over taps: column = k*Cin + c.
    w2f = jnp.transpose(w2, (2, 1, 0)).reshape(K2F, C2).T.astype(jnp.bfloat16)
    w3f = jnp.transpose(w3, (2, 1, 0)).reshape(K3F, C3).T.astype(jnp.bfloat16)

    # fc1 in channel-tile layout: wf1p[t, l, j*128 + o] = wf1[o, (8t+j)*118 + l].
    wp = wf1.reshape(FC1, C3, L5).transpose(1, 2, 0)              # (64, 118, 128)
    wp = wp.reshape(CT, CG, L5, FC1).transpose(0, 2, 1, 3)        # (8, 118, 8, 128)
    wf1p = wp.reshape(CT, L5, CG * FC1).astype(jnp.bfloat16)      # (8, 118, 1024)

    return (w1p, b1.reshape(C1, 1), w2f, b2.reshape(C2, 1), w3f, b3.reshape(C3, 1),
            wf1p, bf1.reshape(1, FC1), wf2.T, bf2.reshape(1, FC2),
            wf3.T, bf3.reshape(1, N_OUTPUTS))


def kspacenet_forward(x, packed):
    (w1p, b1c, w2f, b2c, w3f, b3c, wf1p, bf1r, wf2t, bf2r, wf3t, bf3r) = packed
    n = x.shape[0]

    # Polyphase input layout (pure layout plumbing): rows = h*4 + c, 8 W-phases,
    # zero padded, cast to bf16 (matmul operand precision).
    xpad = jnp.pad(x, ((0, 0), (0, 0), (0, 0), (0, 8 * PHW - W_IN)))
    xph = xpad.reshape(n, N_CHANNELS, H_IN, PHW, 8)
    xph = jnp.transpose(xph, (0, 4, 2, 1, 3)).reshape(n, 8, NROW, PHW)
    xph = jnp.pad(xph, ((0, 0), (0, 0), (0, RPAD - NROW), (0, 0))).astype(jnp.bfloat16)

    grid_spec = pltpu.PrefetchScalarGridSpec(
        num_scalar_prefetch=0,
        grid=(1,),
        in_specs=[
            pl.BlockSpec((n, 8, RPAD, PHW), lambda i: (0, 0, 0, 0)),
            pl.BlockSpec((2 * C1, K1F), lambda i: (0, 0)),
            pl.BlockSpec((C1, 1), lambda i: (0, 0)),
            pl.BlockSpec((C2, K2F), lambda i: (0, 0)),
            pl.BlockSpec((C2, 1), lambda i: (0, 0)),
            pl.BlockSpec((C3, K3F), lambda i: (0, 0)),
            pl.BlockSpec((C3, 1), lambda i: (0, 0)),
            pl.BlockSpec(memory_space=pl.ANY),          # fc1 weight stays in HBM
            pl.BlockSpec((1, FC1), lambda i: (0, 0)),
            pl.BlockSpec((FC1, FC2), lambda i: (0, 0)),
            pl.BlockSpec((1, FC2), lambda i: (0, 0)),
            pl.BlockSpec((FC2, N_OUTPUTS), lambda i: (0, 0)),
            pl.BlockSpec((1, N_OUTPUTS), lambda i: (0, 0)),
        ],
        out_specs=pl.BlockSpec((n, N_OUTPUTS), lambda i: (0, 0)),
        scratch_shapes=[
            pltpu.VMEM((CT, L5, CG * FC1), jnp.bfloat16),   # fc1 weight landing buf
            pltpu.SemaphoreType.DMA,
        ],
    )
    return pl.pallas_call(
        kspacenet_kernel,
        out_shape=jax.ShapeDtypeStruct((n, N_OUTPUTS), jnp.float32),
        grid_spec=grid_spec,
        compiler_params=pltpu.CompilerParams(dimension_semantics=("arbitrary",)),
    )(xph, w1p, b1c, w2f, b2c, w3f, b3c, wf1p, bf1r, wf2t, bf2r, wf3t, bf3r)


# --------------------------- pure-JAX reference -------------------------------
def reference_forward(x, params):
    (w1, b1, w2, b2, w3, b3, wf1, bf1, wf2, bf2, wf3, bf3) = params
    n = x.shape[0]
    out = jnp.zeros((n, C1, H1, W1), jnp.float32)
    for kh in range(K2D):
        for kw in range(K2D):
            out = out + jnp.einsum('nchw,oc->nohw',
                                   x[:, :, kh:kh + H1, kw:kw + W1], w1[:, :, kh, kw])
    out = out + b1[None, :, None, None]
    out = jnp.maximum(out[:, :, 0::2, :], out[:, :, 1::2, :])
    out = jnp.maximum(out[..., 0::2], out[..., 1::2])
    a = jnp.maximum(out, 0.0)[:, :, 0, :]                 # (N, 32, 484)

    out = jnp.zeros((n, C2, L2), jnp.float32)
    for k in range(K1D):
        out = out + jnp.einsum('ncl,oc->nol', a[:, :, k:k + L2], w2[:, :, k])
    out = out + b2[None, :, None]
    out = jnp.maximum(out[..., 0::2], out[..., 1::2])
    a = jnp.maximum(out, 0.0)                              # (N, 32, 240)

    out = jnp.zeros((n, C3, L4), jnp.float32)
    for k in range(K1D):
        out = out + jnp.einsum('ncl,oc->nol', a[:, :, k:k + L4], w3[:, :, k])
    out = out + b3[None, :, None]
    out = jnp.maximum(out[..., 0::2], out[..., 1::2])
    a = jnp.maximum(out, 0.0)                              # (N, 64, 118)

    h = jnp.maximum(a.reshape(n, FLAT) @ wf1.T + bf1, 0.0)
    h = h @ wf2.T + bf2
    h = h @ wf3.T + bf3
    nrm = jnp.sqrt(jnp.sum(h * h, axis=1, keepdims=True))
    return h / jnp.maximum(nrm, 1e-12)


# ---------------------------------- main --------------------------------------
def _uniform(key, shape, fan_in):
    bound = 1.0 / (fan_in ** 0.5)
    return jax.random.uniform(key, shape, jnp.float32, -bound, bound)


if __name__ == "__main__":
    root = jax.random.PRNGKey(0)
    ks = jax.random.split(root, 13)

    w1 = _uniform(ks[0], (C1, N_CHANNELS, K2D, K2D), N_CHANNELS * K2D * K2D)
    b1 = _uniform(ks[1], (C1,), N_CHANNELS * K2D * K2D)
    w2 = _uniform(ks[2], (C2, C1, K1D), C1 * K1D)
    b2 = _uniform(ks[3], (C2,), C1 * K1D)
    w3 = _uniform(ks[4], (C3, C2, K1D), C2 * K1D)
    b3 = _uniform(ks[5], (C3,), C2 * K1D)
    wf1 = _uniform(ks[6], (FC1, FLAT), FLAT)
    bf1 = _uniform(ks[7], (FC1,), FLAT)
    wf2 = _uniform(ks[8], (FC2, FC1), FC1)
    bf2 = _uniform(ks[9], (FC2,), FC1)
    wf3 = _uniform(ks[10], (N_OUTPUTS, FC2), FC2)
    bf3 = _uniform(ks[11], (N_OUTPUTS,), FC2)
    params = (w1, b1, w2, b2, w3, b3, wf1, bf1, wf2, bf2, wf3, bf3)

    x = jax.random.normal(ks[12], (BATCH, N_CHANNELS, H_IN, W_IN), jnp.float32)

    packed = jax.block_until_ready(pack_params(params))   # once, reused per call
    fwd = jax.jit(kspacenet_forward)

    out = jax.block_until_ready(fwd(x, packed))
    assert out.shape == (BATCH, N_OUTPUTS), out.shape

    ref = reference_forward(x, params)
    err = float(jnp.max(jnp.abs(out - ref)))
    assert err < 3e-2, f"mismatch vs reference: {err}"

    print("KERNEL_OK")
</pallas_src>

<mosaic_0001>
module attributes {stable_mosaic.version = 11 : i64} {
  func.func @kspacenet_kernel(%arg0: i32, %arg1: memref<2x8x32x122xbf16, #tpu.memory_space<vmem>>, %arg2: memref<64x160xbf16, #tpu.memory_space<vmem>>, %arg3: memref<32x1xf32, #tpu.memory_space<vmem>>, %arg4: memref<32x160xbf16, #tpu.memory_space<vmem>>, %arg5: memref<32x1xf32, #tpu.memory_space<vmem>>, %arg6: memref<64x160xbf16, #tpu.memory_space<vmem>>, %arg7: memref<64x1xf32, #tpu.memory_space<vmem>>, %arg8: memref<8x118x1024xbf16, #tpu.memory_space<any>>, %arg9: memref<1x128xf32, #tpu.memory_space<vmem>>, %arg10: memref<128x32xf32, #tpu.memory_space<vmem>>, %arg11: memref<1x32xf32, #tpu.memory_space<vmem>>, %arg12: memref<32x8xf32, #tpu.memory_space<vmem>>, %arg13: memref<1x8xf32, #tpu.memory_space<vmem>>, %arg14: memref<2x8xf32, #tpu.memory_space<vmem>>, %arg15: memref<8x118x1024xbf16, #tpu.memory_space<vmem>>, %arg16: memref<!tpu.dma_semaphore, #tpu.memory_space<semaphore_mem>>) attributes {dimension_semantics = [#tpu.dimension_semantics<arbitrary>], iteration_bounds = array<i64: 1>, scalar_prefetch = 0 : i64, scratch_operands = 2 : i64, tpu.core_type = #tpu.core_type<tc>, window_params = [{pipeline_mode = #tpu.pipeline_mode<synchronous>, transform_indices = @transform_0, window_bounds = array<i64: 2, 8, 32, 122>}, {pipeline_mode = #tpu.pipeline_mode<synchronous>, transform_indices = @transform_1, window_bounds = array<i64: 64, 160>}, {pipeline_mode = #tpu.pipeline_mode<synchronous>, transform_indices = @transform_2, window_bounds = array<i64: 32, 1>}, {pipeline_mode = #tpu.pipeline_mode<synchronous>, transform_indices = @transform_3, window_bounds = array<i64: 32, 160>}, {pipeline_mode = #tpu.pipeline_mode<synchronous>, transform_indices = @transform_4, window_bounds = array<i64: 32, 1>}, {pipeline_mode = #tpu.pipeline_mode<synchronous>, transform_indices = @transform_5, window_bounds = array<i64: 64, 160>}, {pipeline_mode = #tpu.pipeline_mode<synchronous>, transform_indices = @transform_6, window_bounds = array<i64: 64, 1>}, {}, {pipeline_mode = #tpu.pipeline_mode<synchronous>, transform_indices = @transform_8, window_bounds = array<i64: 1, 128>}, {pipeline_mode = #tpu.pipeline_mode<synchronous>, transform_indices = @transform_9, window_bounds = array<i64: 128, 32>}, {pipeline_mode = #tpu.pipeline_mode<synchronous>, transform_indices = @transform_10, window_bounds = array<i64: 1, 32>}, {pipeline_mode = #tpu.pipeline_mode<synchronous>, transform_indices = @transform_11, window_bounds = array<i64: 32, 8>}, {pipeline_mode = #tpu.pipeline_mode<synchronous>, transform_indices = @transform_12, window_bounds = array<i64: 1, 8>}, {pipeline_mode = #tpu.pipeline_mode<synchronous>, transform_indices = @transform_13, window_bounds = array<i64: 2, 8>}]} {
    tpu.enqueue_dma source(%arg8 : memref<8x118x1024xbf16, #tpu.memory_space<any>>) target(%arg15 : memref<8x118x1024xbf16, #tpu.memory_space<vmem>>) target_semaphore(%arg16 : memref<!tpu.dma_semaphore, #tpu.memory_space<semaphore_mem>>)
    %c0 = arith.constant 0 : index
    %c0_0 = arith.constant 0 : index
    %c0_1 = arith.constant 0 : index
    %c0_2 = arith.constant 0 : index
    %0 = vector.load %arg1[%c0, %c0_0, %c0_1, %c0_2] : memref<2x8x32x122xbf16, #tpu.memory_space<vmem>>, vector<1x1x32x121xbf16>
    %1 = vector.shape_cast %0 : vector<1x1x32x121xbf16> to vector<32x121xbf16>
    %c0_3 = arith.constant 0 : index
    %c1 = arith.constant 1 : index
    %c0_4 = arith.constant 0 : index
    %c0_5 = arith.constant 0 : index
    %2 = vector.load %arg1[%c0_3, %c1, %c0_4, %c0_5] : memref<2x8x32x122xbf16, #tpu.memory_space<vmem>>, vector<1x1x32x121xbf16>
    %3 = vector.shape_cast %2 : vector<1x1x32x121xbf16> to vector<32x121xbf16>
    %c0_6 = arith.constant 0 : index
    %c2 = arith.constant 2 : index
    %c0_7 = arith.constant 0 : index
    %c0_8 = arith.constant 0 : index
    %4 = vector.load %arg1[%c0_6, %c2, %c0_7, %c0_8] : memref<2x8x32x122xbf16, #tpu.memory_space<vmem>>, vector<1x1x32x121xbf16>
    %5 = vector.shape_cast %4 : vector<1x1x32x121xbf16> to vector<32x121xbf16>
    %c0_9 = arith.constant 0 : index
    %c3 = arith.constant 3 : index
    %c0_10 = arith.constant 0 : index
    %c0_11 = arith.constant 0 : index
    %6 = vector.load %arg1[%c0_9, %c3, %c0_10, %c0_11] : memref<2x8x32x122xbf16, #tpu.memory_space<vmem>>, vector<1x1x32x121xbf16>
    %7 = vector.shape_cast %6 : vector<1x1x32x121xbf16> to vector<32x121xbf16>
    %c0_12 = arith.constant 0 : index
    %c4 = arith.constant 4 : index
    %c0_13 = arith.constant 0 : index
    %c0_14 = arith.constant 0 : index
    %8 = vector.load %arg1[%c0_12, %c4, %c0_13, %c0_14] : memref<2x8x32x122xbf16, #tpu.memory_space<vmem>>, vector<1x1x32x121xbf16>
    %9 = vector.shape_cast %8 : vector<1x1x32x121xbf16> to vector<32x121xbf16>
    %c0_15 = arith.constant 0 : index
    %c5 = arith.constant 5 : index
    %c0_16 = arith.constant 0 : index
    %c0_17 = arith.constant 0 : index
    %10 = vector.load %arg1[%c0_15, %c5, %c0_16, %c0_17] : memref<2x8x32x122xbf16, #tpu.memory_space<vmem>>, vector<1x1x32x121xbf16>
    %11 = vector.shape_cast %10 : vector<1x1x32x121xbf16> to vector<32x121xbf16>
    %c0_18 = arith.constant 0 : index
    %c6 = arith.constant 6 : index
    %c0_19 = arith.constant 0 : index
    %c0_20 = arith.constant 0 : index
    %12 = vector.load %arg1[%c0_18, %c6, %c0_19, %c0_20] : memref<2x8x32x122xbf16, #tpu.memory_space<vmem>>, vector<1x1x32x121xbf16>
    %13 = vector.shape_cast %12 : vector<1x1x32x121xbf16> to vector<32x121xbf16>
    %c0_21 = arith.constant 0 : index
    %c7 = arith.constant 7 : index
    %c0_22 = arith.constant 0 : index
    %c0_23 = arith.constant 0 : index
    %14 = vector.load %arg1[%c0_21, %c7, %c0_22, %c0_23] : memref<2x8x32x122xbf16, #tpu.memory_space<vmem>>, vector<1x1x32x121xbf16>
    %15 = vector.shape_cast %14 : vector<1x1x32x121xbf16> to vector<32x121xbf16>
    %c0_24 = arith.constant 0 : index
    %c0_25 = arith.constant 0 : index
    %c0_26 = arith.constant 0 : index
    %c1_27 = arith.constant 1 : index
    %16 = vector.load %arg1[%c0_24, %c0_25, %c0_26, %c1_27] : memref<2x8x32x122xbf16, #tpu.memory_space<vmem>>, vector<1x1x32x121xbf16>
    %17 = vector.shape_cast %16 : vector<1x1x32x121xbf16> to vector<32x121xbf16>
    %c0_28 = arith.constant 0 : index
    %c1_29 = arith.constant 1 : index
    %c0_30 = arith.constant 0 : index
    %c1_31 = arith.constant 1 : index
    %18 = vector.load %arg1[%c0_28, %c1_29, %c0_30, %c1_31] : memref<2x8x32x122xbf16, #tpu.memory_space<vmem>>, vector<1x1x32x121xbf16>
    %19 = vector.shape_cast %18 : vector<1x1x32x121xbf16> to vector<32x121xbf16>
    %c0_32 = arith.constant 0 : index
    %c2_33 = arith.constant 2 : index
    %c0_34 = arith.constant 0 : index
    %c1_35 = arith.constant 1 : index
    %20 = vector.load %arg1[%c0_32, %c2_33, %c0_34, %c1_35] : memref<2x8x32x122xbf16, #tpu.memory_space<vmem>>, vector<1x1x32x121xbf16>
    %21 = vector.shape_cast %20 : vector<1x1x32x121xbf16> to vector<32x121xbf16>
    %c0_36 = arith.constant 0 : index
    %c3_37 = arith.constant 3 : index
    %c0_38 = arith.constant 0 : index
    %c1_39 = arith.constant 1 : index
    %22 = vector.load %arg1[%c0_36, %c3_37, %c0_38, %c1_39] : memref<2x8x32x122xbf16, #tpu.memory_space<vmem>>, vector<1x1x32x121xbf16>
    %23 = vector.shape_cast %22 : vector<1x1x32x121xbf16> to vector<32x121xbf16>
    %24 = tpu.concatenate %1, %3, %5, %7, %9 in 0 : vector<32x121xbf16>, vector<32x121xbf16>, vector<32x121xbf16>, vector<32x121xbf16>, vector<32x121xbf16> -> vector<160x121xbf16>
    %c0_40 = arith.constant 0 : index
    %c0_41 = arith.constant 0 : index
    %25 = vector.load %arg2[%c0_40, %c0_41] : memref<64x160xbf16, #tpu.memory_space<vmem>>, vector<64x160xbf16>
    %cst = arith.constant dense<0.000000e+00> : vector<64x121xf32>
    %26 = tpu.matmul %25, %24, %cst {dimension_numbers = #tpu.dot_dimension_numbers<[1], [0], [0], [1], [0, 0, 1, 1], [], []>} : vector<64x160xbf16>, vector<160x121xbf16>, vector<64x121xf32> -> vector<64x121xf32>
    %27 = tpu.concatenate %3, %5, %7, %9, %11 in 0 : vector<32x121xbf16>, vector<32x121xbf16>, vector<32x121xbf16>, vector<32x121xbf16>, vector<32x121xbf16> -> vector<160x121xbf16>
    %c0_42 = arith.constant 0 : index
    %c0_43 = arith.constant 0 : index
    %28 = vector.load %arg2[%c0_42, %c0_43] : memref<64x160xbf16, #tpu.memory_space<vmem>>, vector<64x160xbf16>
    %cst_44 = arith.constant dense<0.000000e+00> : vector<64x121xf32>
    %29 = tpu.matmul %28, %27, %cst_44 {dimension_numbers = #tpu.dot_dimension_numbers<[1], [0], [0], [1], [0, 0, 1, 1], [], []>} : vector<64x160xbf16>, vector<160x121xbf16>, vector<64x121xf32> -> vector<64x121xf32>
    %30 = vector.extract_strided_slice %26 {offsets = [0, 0], sizes = [32, 121], strides = [1, 1]} : vector<64x121xf32> to vector<32x121xf32>
    %31 = vector.extract_strided_slice %26 {offsets = [32, 0], sizes = [32, 121], strides = [1, 1]} : vector<64x121xf32> to vector<32x121xf32>
    %32 = arith.maximumf %30, %31 : vector<32x121xf32>
    %33 = vector.extract_strided_slice %29 {offsets = [0, 0], sizes = [32, 121], strides = [1, 1]} : vector<64x121xf32> to vector<32x121xf32>
    %34 = vector.extract_strided_slice %29 {offsets = [32, 0], sizes = [32, 121], strides = [1, 1]} : vector<64x121xf32> to vector<32x121xf32>
    %35 = arith.maximumf %33, %34 : vector<32x121xf32>
    %36 = arith.maximumf %32, %35 : vector<32x121xf32>
    %c0_45 = arith.constant 0 : index
    %c0_46 = arith.constant 0 : index
    %37 = vector.load %arg3[%c0_45, %c0_46] : memref<32x1xf32, #tpu.memory_space<vmem>>, vector<32x1xf32>
    %38 = vector.broadcast %37 : vector<32x1xf32> to vector<32x121xf32>
    %39 = arith.addf %36, %38 : vector<32x121xf32>
    %cst_47 = arith.constant 0.000000e+00 : f32
    %40 = vector.broadcast %cst_47 : f32 to vector<32x121xf32>
    %41 = arith.maximumf %39, %40 : vector<32x121xf32>
    %42 = arith.truncf %41 : vector<32x121xf32> to vector<32x121xbf16>
    %43 = tpu.concatenate %5, %7, %9, %11, %13 in 0 : vector<32x121xbf16>, vector<32x121xbf16>, vector<32x121xbf16>, vector<32x121xbf16>, vector<32x121xbf16> -> vector<160x121xbf16>
    %c0_48 = arith.constant 0 : index
    %c0_49 = arith.constant 0 : index
    %44 = vector.load %arg2[%c0_48, %c0_49] : memref<64x160xbf16, #tpu.memory_space<vmem>>, vector<64x160xbf16>
    %cst_50 = arith.constant dense<0.000000e+00> : vector<64x121xf32>
    %45 = tpu.matmul %44, %43, %cst_50 {dimension_numbers = #tpu.dot_dimension_numbers<[1], [0], [0], [1], [0, 0, 1, 1], [], []>} : vector<64x160xbf16>, vector<160x121xbf16>, vector<64x121xf32> -> vector<64x121xf32>
    %46 = tpu.concatenate %7, %9, %11, %13, %15 in 0 : vector<32x121xbf16>, vector<32x121xbf16>, vector<32x121xbf16>, vector<32x121xbf16>, vector<32x121xbf16> -> vector<160x121xbf16>
    %c0_51 = arith.constant 0 : index
    %c0_52 = arith.constant 0 : index
    %47 = vector.load %arg2[%c0_51, %c0_52] : memref<64x160xbf16, #tpu.memory_space<vmem>>, vector<64x160xbf16>
    %cst_53 = arith.constant dense<0.000000e+00> : vector<64x121xf32>
    %48 = tpu.matmul %47, %46, %cst_53 {dimension_numbers = #tpu.dot_dimension_numbers<[1], [0], [0], [1], [0, 0, 1, 1], [], []>} : vector<64x160xbf16>, vector<160x121xbf16>, vector<64x121xf32> -> vector<64x121xf32>
    %49 = vector.extract_strided_slice %45 {offsets = [0, 0], sizes = [32, 121], strides = [1, 1]} : vector<64x121xf32> to vector<32x121xf32>
    %50 = vector.extract_strided_slice %45 {offsets = [32, 0], sizes = [32, 121], strides = [1, 1]} : vector<64x121xf32> to vector<32x121xf32>
    %51 = arith.maximumf %49, %50 : vector<32x121xf32>
    %52 = vector.extract_strided_slice %48 {offsets = [0, 0], sizes = [32, 121], strides = [1, 1]} : vector<64x121xf32> to vector<32x121xf32>
    %53 = vector.extract_strided_slice %48 {offsets = [32, 0], sizes = [32, 121], strides = [1, 1]} : vector<64x121xf32> to vector<32x121xf32>
    %54 = arith.maximumf %52, %53 : vector<32x121xf32>
    %55 = arith.maximumf %51, %54 : vector<32x121xf32>
    %c0_54 = arith.constant 0 : index
    %c0_55 = arith.constant 0 : index
    %56 = vector.load %arg3[%c0_54, %c0_55] : memref<32x1xf32, #tpu.memory_space<vmem>>, vector<32x1xf32>
    %57 = vector.broadcast %56 : vector<32x1xf32> to vector<32x121xf32>
    %58 = arith.addf %55, %57 : vector<32x121xf32>
    %cst_56 = arith.constant 0.000000e+00 : f32
    %59 = vector.broadcast %cst_56 : f32 to vector<32x121xf32>
    %60 = arith.maximumf %58, %59 : vector<32x121xf32>
    %61 = arith.truncf %60 : vector<32x121xf32> to vector<32x121xbf16>
    %62 = tpu.concatenate %9, %11, %13, %15, %17 in 0 : vector<32x121xbf16>, vector<32x121xbf16>, vector<32x121xbf16>, vector<32x121xbf16>, vector<32x121xbf16> -> vector<160x121xbf16>
    %c0_57 = arith.constant 0 : index
    %c0_58 = arith.constant 0 : index
    %63 = vector.load %arg2[%c0_57, %c0_58] : memref<64x160xbf16, #tpu.memory_space<vmem>>, vector<64x160xbf16>
    %cst_59 = arith.constant dense<0.000000e+00> : vector<64x121xf32>
    %64 = tpu.matmul %63, %62, %cst_59 {dimension_numbers = #tpu.dot_dimension_numbers<[1], [0], [0], [1], [0, 0, 1, 1], [], []>} : vector<64x160xbf16>, vector<160x121xbf16>, vector<64x121xf32> -> vector<64x121xf32>
    %65 = tpu.concatenate %11, %13, %15, %17, %19 in 0 : vector<32x121xbf16>, vector<32x121xbf16>, vector<32x121xbf16>, vector<32x121xbf16>, vector<32x121xbf16> -> vector<160x121xbf16>
    %c0_60 = arith.constant 0 : index
    %c0_61 = arith.constant 0 : index
    %66 = vector.load %arg2[%c0_60, %c0_61] : memref<64x160xbf16, #tpu.memory_space<vmem>>, vector<64x160xbf16>
    %cst_62 = arith.constant dense<0.000000e+00> : vector<64x121xf32>
    %67 = tpu.matmul %66, %65, %cst_62 {dimension_numbers = #tpu.dot_dimension_numbers<[1], [0], [0], [1], [0, 0, 1, 1], [], []>} : vector<64x160xbf16>, vector<160x121xbf16>, vector<64x121xf32> -> vector<64x121xf32>
    %68 = vector.extract_strided_slice %64 {offsets = [0, 0], sizes = [32, 121], strides = [1, 1]} : vector<64x121xf32> to vector<32x121xf32>
    %69 = vector.extract_strided_slice %64 {offsets = [32, 0], sizes = [32, 121], strides = [1, 1]} : vector<64x121xf32> to vector<32x121xf32>
    %70 = arith.maximumf %68, %69 : vector<32x121xf32>
    %71 = vector.extract_strided_slice %67 {offsets = [0, 0], sizes = [32, 121], strides = [1, 1]} : vector<64x121xf32> to vector<32x121xf32>
    %72 = vector.extract_strided_slice %67 {offsets = [32, 0], sizes = [32, 121], strides = [1, 1]} : vector<64x121xf32> to vector<32x121xf32>
    %73 = arith.maximumf %71, %72 : vector<32x121xf32>
    %74 = arith.maximumf %70, %73 : vector<32x121xf32>
    %c0_63 = arith.constant 0 : index
    %c0_64 = arith.constant 0 : index
    %75 = vector.load %arg3[%c0_63, %c0_64] : memref<32x1xf32, #tpu.memory_space<vmem>>, vector<32x1xf32>
    %76 = vector.broadcast %75 : vector<32x1xf32> to vector<32x121xf32>
    %77 = arith.addf %74, %76 : vector<32x121xf32>
    %cst_65 = arith.constant 0.000000e+00 : f32
    %78 = vector.broadcast %cst_65 : f32 to vector<32x121xf32>
    %79 = arith.maximumf %77, %78 : vector<32x121xf32>
    %80 = arith.truncf %79 : vector<32x121xf32> to vector<32x121xbf16>
    %81 = tpu.concatenate %13, %15, %17, %19, %21 in 0 : vector<32x121xbf16>, vector<32x121xbf16>, vector<32x121xbf16>, vector<32x121xbf16>, vector<32x121xbf16> -> vector<160x121xbf16>
    %c0_66 = arith.constant 0 : index
    %c0_67 = arith.constant 0 : index
    %82 = vector.load %arg2[%c0_66, %c0_67] : memref<64x160xbf16, #tpu.memory_space<vmem>>, vector<64x160xbf16>
    %cst_68 = arith.constant dense<0.000000e+00> : vector<64x121xf32>
    %83 = tpu.matmul %82, %81, %cst_68 {dimension_numbers = #tpu.dot_dimension_numbers<[1], [0], [0], [1], [0, 0, 1, 1], [], []>} : vector<64x160xbf16>, vector<160x121xbf16>, vector<64x121xf32> -> vector<64x121xf32>
    %84 = tpu.concatenate %15, %17, %19, %21, %23 in 0 : vector<32x121xbf16>, vector<32x121xbf16>, vector<32x121xbf16>, vector<32x121xbf16>, vector<32x121xbf16> -> vector<160x121xbf16>
    %c0_69 = arith.constant 0 : index
    %c0_70 = arith.constant 0 : index
    %85 = vector.load %arg2[%c0_69, %c0_70] : memref<64x160xbf16, #tpu.memory_space<vmem>>, vector<64x160xbf16>
    %cst_71 = arith.constant dense<0.000000e+00> : vector<64x121xf32>
    %86 = tpu.matmul %85, %84, %cst_71 {dimension_numbers = #tpu.dot_dimension_numbers<[1], [0], [0], [1], [0, 0, 1, 1], [], []>} : vector<64x160xbf16>, vector<160x121xbf16>, vector<64x121xf32> -> vector<64x121xf32>
    %87 = vector.extract_strided_slice %83 {offsets = [0, 0], sizes = [32, 121], strides = [1, 1]} : vector<64x121xf32> to vector<32x121xf32>
    %88 = vector.extract_strided_slice %83 {offsets = [32, 0], sizes = [32, 121], strides = [1, 1]} : vector<64x121xf32> to vector<32x121xf32>
    %89 = arith.maximumf %87, %88 : vector<32x121xf32>
    %90 = vector.extract_strided_slice %86 {offsets = [0, 0], sizes = [32, 121], strides = [1, 1]} : vector<64x121xf32> to vector<32x121xf32>
    %91 = vector.extract_strided_slice %86 {offsets = [32, 0], sizes = [32, 121], strides = [1, 1]} : vector<64x121xf32> to vector<32x121xf32>
    %92 = arith.maximumf %90, %91 : vector<32x121xf32>
    %93 = arith.maximumf %89, %92 : vector<32x121xf32>
    %c0_72 = arith.constant 0 : index
    %c0_73 = arith.constant 0 : index
    %94 = vector.load %arg3[%c0_72, %c0_73] : memref<32x1xf32, #tpu.memory_space<vmem>>, vector<32x1xf32>
    %95 = vector.broadcast %94 : vector<32x1xf32> to vector<32x121xf32>
    %96 = arith.addf %93, %95 : vector<32x121xf32>
    %cst_74 = arith.constant 0.000000e+00 : f32
    %97 = vector.broadcast %cst_74 : f32 to vector<32x121xf32>
    %98 = arith.maximumf %96, %97 : vector<32x121xf32>
    %99 = arith.truncf %98 : vector<32x121xf32> to vector<32x121xbf16>
    %100 = vector.extract_strided_slice %42 {offsets = [0, 0], sizes = [32, 120], strides = [1, 1]} : vector<32x121xbf16> to vector<32x120xbf16>
    %101 = vector.extract_strided_slice %61 {offsets = [0, 0], sizes = [32, 120], strides = [1, 1]} : vector<32x121xbf16> to vector<32x120xbf16>
    %102 = vector.extract_strided_slice %80 {offsets = [0, 0], sizes = [32, 120], strides = [1, 1]} : vector<32x121xbf16> to vector<32x120xbf16>
    %103 = vector.extract_strided_slice %99 {offsets = [0, 0], sizes = [32, 120], strides = [1, 1]} : vector<32x121xbf16> to vector<32x120xbf16>
    %104 = vector.extract_strided_slice %42 {offsets = [0, 1], sizes = [32, 120], strides = [1, 1]} : vector<32x121xbf16> to vector<32x120xbf16>
    %105 = vector.extract_strided_slice %61 {offsets = [0, 1], sizes = [32, 120], strides = [1, 1]} : vector<32x121xbf16> to vector<32x120xbf16>
    %106 = vector.extract_strided_slice %80 {offsets = [0, 1], sizes = [32, 120], strides = [1, 1]} : vector<32x121xbf16> to vector<32x120xbf16>
    %107 = vector.extract_strided_slice %99 {offsets = [0, 1], sizes = [32, 120], strides = [1, 1]} : vector<32x121xbf16> to vector<32x120xbf16>
    %108 = tpu.concatenate %100, %101, %102, %103, %104 in 0 : vector<32x120xbf16>, vector<32x120xbf16>, vector<32x120xbf16>, vector<32x120xbf16>, vector<32x120xbf16> -> vector<160x120xbf16>
    %c0_75 = arith.constant 0 : index
    %c0_76 = arith.constant 0 : index
    %109 = vector.load %arg4[%c0_75, %c0_76] : memref<32x160xbf16, #tpu.memory_space<vmem>>, vector<32x160xbf16>
    %cst_77 = arith.constant dense<0.000000e+00> : vector<32x120xf32>
    %110 = tpu.matmul %109, %108, %cst_77 {dimension_numbers = #tpu.dot_dimension_numbers<[1], [0], [0], [1], [0, 0, 1, 1], [], []>} : vector<32x160xbf16>, vector<160x120xbf16>, vector<32x120xf32> -> vector<32x120xf32>
    %111 = tpu.concatenate %101, %102, %103, %104, %105 in 0 : vector<32x120xbf16>, vector<32x120xbf16>, vector<32x120xbf16>, vector<32x120xbf16>, vector<32x120xbf16> -> vector<160x120xbf16>
    %c0_78 = arith.constant 0 : index
    %c0_79 = arith.constant 0 : index
    %112 = vector.load %arg4[%c0_78, %c0_79] : memref<32x160xbf16, #tpu.memory_space<vmem>>, vector<32x160xbf16>
    %cst_80 = arith.constant dense<0.000000e+00> : vector<32x120xf32>
    %113 = tpu.matmul %112, %111, %cst_80 {dimension_numbers = #tpu.dot_dimension_numbers<[1], [0], [0], [1], [0, 0, 1, 1], [], []>} : vector<32x160xbf16>, vector<160x120xbf16>, vector<32x120xf32> -> vector<32x120xf32>
    %114 = arith.maximumf %110, %113 : vector<32x120xf32>
    %c0_81 = arith.constant 0 : index
    %c0_82 = arith.constant 0 : index
    %115 = vector.load %arg5[%c0_81, %c0_82] : memref<32x1xf32, #tpu.memory_space<vmem>>, vector<32x1xf32>
    %116 = vector.broadcast %115 : vector<32x1xf32> to vector<32x120xf32>
    %117 = arith.addf %114, %116 : vector<32x120xf32>
    %cst_83 = arith.constant 0.000000e+00 : f32
    %118 = vector.broadcast %cst_83 : f32 to vector<32x120xf32>
    %119 = arith.maximumf %117, %118 : vector<32x120xf32>
    %120 = arith.truncf %119 : vector<32x120xf32> to vector<32x120xbf16>
    %121 = tpu.concatenate %102, %103, %104, %105, %106 in 0 : vector<32x120xbf16>, vector<32x120xbf16>, vector<32x120xbf16>, vector<32x120xbf16>, vector<32x120xbf16> -> vector<160x120xbf16>
    %c0_84 = arith.constant 0 : index
    %c0_85 = arith.constant 0 : index
    %122 = vector.load %arg4[%c0_84, %c0_85] : memref<32x160xbf16, #tpu.memory_space<vmem>>, vector<32x160xbf16>
    %cst_86 = arith.constant dense<0.000000e+00> : vector<32x120xf32>
    %123 = tpu.matmul %122, %121, %cst_86 {dimension_numbers = #tpu.dot_dimension_numbers<[1], [0], [0], [1], [0, 0, 1, 1], [], []>} : vector<32x160xbf16>, vector<160x120xbf16>, vector<32x120xf32> -> vector<32x120xf32>
    %124 = tpu.concatenate %103, %104, %105, %106, %107 in 0 : vector<32x120xbf16>, vector<32x120xbf16>, vector<32x120xbf16>, vector<32x120xbf16>, vector<32x120xbf16> -> vector<160x120xbf16>
    %c0_87 = arith.constant 0 : index
    %c0_88 = arith.constant 0 : index
    %125 = vector.load %arg4[%c0_87, %c0_88] : memref<32x160xbf16, #tpu.memory_space<vmem>>, vector<32x160xbf16>
    %cst_89 = arith.constant dense<0.000000e+00> : vector<32x120xf32>
    %126 = tpu.matmul %125, %124, %cst_89 {dimension_numbers = #tpu.dot_dimension_numbers<[1], [0], [0], [1], [0, 0, 1, 1], [], []>} : vector<32x160xbf16>, vector<160x120xbf16>, vector<32x120xf32> -> vector<32x120xf32>
    %127 = arith.maximumf %123, %126 : vector<32x120xf32>
    %c0_90 = arith.constant 0 : index
    %c0_91 = arith.constant 0 : index
    %128 = vector.load %arg5[%c0_90, %c0_91] : memref<32x1xf32, #tpu.memory_space<vmem>>, vector<32x1xf32>
    %129 = vector.broadcast %128 : vector<32x1xf32> to vector<32x120xf32>
    %130 = arith.addf %127, %129 : vector<32x120xf32>
    %cst_92 = arith.constant 0.000000e+00 : f32
    %131 = vector.broadcast %cst_92 : f32 to vector<32x120xf32>
    %132 = arith.maximumf %130, %131 : vector<32x120xf32>
    %133 = arith.truncf %132 : vector<32x120xf32> to vector<32x120xbf16>
    %134 = vector.extract_strided_slice %120 {offsets = [0, 0], sizes = [32, 118], strides = [1, 1]} : vector<32x120xbf16> to vector<32x118xbf16>
    %135 = vector.extract_strided_slice %133 {offsets = [0, 0], sizes = [32, 118], strides = [1, 1]} : vector<32x120xbf16> to vector<32x118xbf16>
    %136 = vector.extract_strided_slice %120 {offsets = [0, 1], sizes = [32, 118], strides = [1, 1]} : vector<32x120xbf16> to vector<32x118xbf16>
    %137 = vector.extract_strided_slice %133 {offsets = [0, 1], sizes = [32, 118], strides = [1, 1]} : vector<32x120xbf16> to vector<32x118xbf16>
    %138 = vector.extract_strided_slice %120 {offsets = [0, 2], sizes = [32, 118], strides = [1, 1]} : vector<32x120xbf16> to vector<32x118xbf16>
    %139 = vector.extract_strided_slice %133 {offsets = [0, 2], sizes = [32, 118], strides = [1, 1]} : vector<32x120xbf16> to vector<32x118xbf16>
    %140 = tpu.concatenate %134, %135, %136, %137, %138 in 0 : vector<32x118xbf16>, vector<32x118xbf16>, vector<32x118xbf16>, vector<32x118xbf16>, vector<32x118xbf16> -> vector<160x118xbf16>
    %c0_93 = arith.constant 0 : index
    %c0_94 = arith.constant 0 : index
    %141 = vector.load %arg6[%c0_93, %c0_94] : memref<64x160xbf16, #tpu.memory_space<vmem>>, vector<64x160xbf16>
    %cst_95 = arith.constant dense<0.000000e+00> : vector<64x118xf32>
    %142 = tpu.matmul %141, %140, %cst_95 {dimension_numbers = #tpu.dot_dimension_numbers<[1], [0], [0], [1], [0, 0, 1, 1], [], []>} : vector<64x160xbf16>, vector<160x118xbf16>, vector<64x118xf32> -> vector<64x118xf32>
    %143 = tpu.concatenate %135, %136, %137, %138, %139 in 0 : vector<32x118xbf16>, vector<32x118xbf16>, vector<32x118xbf16>, vector<32x118xbf16>, vector<32x118xbf16> -> vector<160x118xbf16>
    %c0_96 = arith.constant 0 : index
    %c0_97 = arith.constant 0 : index
    %144 = vector.load %arg6[%c0_96, %c0_97] : memref<64x160xbf16, #tpu.memory_space<vmem>>, vector<64x160xbf16>
    %cst_98 = arith.constant dense<0.000000e+00> : vector<64x118xf32>
    %145 = tpu.matmul %144, %143, %cst_98 {dimension_numbers = #tpu.dot_dimension_numbers<[1], [0], [0], [1], [0, 0, 1, 1], [], []>} : vector<64x160xbf16>, vector<160x118xbf16>, vector<64x118xf32> -> vector<64x118xf32>
    %146 = arith.maximumf %142, %145 : vector<64x118xf32>
    %c0_99 = arith.constant 0 : index
    %c0_100 = arith.constant 0 : index
    %147 = vector.load %arg7[%c0_99, %c0_100] : memref<64x1xf32, #tpu.memory_space<vmem>>, vector<64x1xf32>
    %148 = vector.broadcast %147 : vector<64x1xf32> to vector<64x118xf32>
    %149 = arith.addf %146, %148 : vector<64x118xf32>
    %cst_101 = arith.constant 0.000000e+00 : f32
    %150 = vector.broadcast %cst_101 : f32 to vector<64x118xf32>
    %151 = arith.maximumf %149, %150 : vector<64x118xf32>
    %c1_102 = arith.constant 1 : index
    %c0_103 = arith.constant 0 : index
    %c0_104 = arith.constant 0 : index
    %c0_105 = arith.constant 0 : index
    %152 = vector.load %arg1[%c1_102, %c0_103, %c0_104, %c0_105] : memref<2x8x32x122xbf16, #tpu.memory_space<vmem>>, vector<1x1x32x121xbf16>
    %153 = vector.shape_cast %152 : vector<1x1x32x121xbf16> to vector<32x121xbf16>
    %c1_106 = arith.constant 1 : index
    %c1_107 = arith.constant 1 : index
    %c0_108 = arith.constant 0 : index
    %c0_109 = arith.constant 0 : index
    %154 = vector.load %arg1[%c1_106, %c1_107, %c0_108, %c0_109] : memref<2x8x32x122xbf16, #tpu.memory_space<vmem>>, vector<1x1x32x121xbf16>
    %155 = vector.shape_cast %154 : vector<1x1x32x121xbf16> to vector<32x121xbf16>
    %c1_110 = arith.constant 1 : index
    %c2_111 = arith.constant 2 : index
    %c0_112 = arith.constant 0 : index
    %c0_113 = arith.constant 0 : index
    %156 = vector.load %arg1[%c1_110, %c2_111, %c0_112, %c0_113] : memref<2x8x32x122xbf16, #tpu.memory_space<vmem>>, vector<1x1x32x121xbf16>
    %157 = vector.shape_cast %156 : vector<1x1x32x121xbf16> to vector<32x121xbf16>
    %c1_114 = arith.constant 1 : index
    %c3_115 = arith.constant 3 : index
    %c0_116 = arith.constant 0 : index
    %c0_117 = arith.constant 0 : index
    %158 = vector.load %arg1[%c1_114, %c3_115, %c0_116, %c0_117] : memref<2x8x32x122xbf16, #tpu.memory_space<vmem>>, vector<1x1x32x121xbf16>
    %159 = vector.shape_cast %158 : vector<1x1x32x121xbf16> to vector<32x121xbf16>
    %c1_118 = arith.constant 1 : index
    %c4_119 = arith.constant 4 : index
    %c0_120 = arith.constant 0 : index
    %c0_121 = arith.constant 0 : index
    %160 = vector.load %arg1[%c1_118, %c4_119, %c0_120, %c0_121] : memref<2x8x32x122xbf16, #tpu.memory_space<vmem>>, vector<1x1x32x121xbf16>
    %161 = vector.shape_cast %160 : vector<1x1x32x121xbf16> to vector<32x121xbf16>
    %c1_122 = arith.constant 1 : index
    %c5_123 = arith.constant 5 : index
    %c0_124 = arith.constant 0 : index
    %c0_125 = arith.constant 0 : index
    %162 = vector.load %arg1[%c1_122, %c5_123, %c0_124, %c0_125] : memref<2x8x32x122xbf16, #tpu.memory_space<vmem>>, vector<1x1x32x121xbf16>
    %163 = vector.shape_cast %162 : vector<1x1x32x121xbf16> to vector<32x121xbf16>
    %c1_126 = arith.constant 1 : index
    %c6_127 = arith.constant 6 : index
    %c0_128 = arith.constant 0 : index
    %c0_129 = arith.constant 0 : index
    %164 = vector.load %arg1[%c1_126, %c6_127, %c0_128, %c0_129] : memref<2x8x32x122xbf16, #tpu.memory_space<vmem>>, vector<1x1x32x121xbf16>
    %165 = vector.shape_cast %164 : vector<1x1x32x121xbf16> to vector<32x121xbf16>
    %c1_130 = arith.constant 1 : index
    %c7_131 = arith.constant 7 : index
    %c0_132 = arith.constant 0 : index
    %c0_133 = arith.constant 0 : index
    %166 = vector.load %arg1[%c1_130, %c7_131, %c0_132, %c0_133] : memref<2x8x32x122xbf16, #tpu.memory_space<vmem>>, vector<1x1x32x121xbf16>
    %167 = vector.shape_cast %166 : vector<1x1x32x121xbf16> to vector<32x121xbf16>
    %c1_134 = arith.constant 1 : index
    %c0_135 = arith.constant 0 : index
    %c0_136 = arith.constant 0 : index
    %c1_137 = arith.constant 1 : index
    %168 = vector.load %arg1[%c1_134, %c0_135, %c0_136, %c1_137] : memref<2x8x32x122xbf16, #tpu.memory_space<vmem>>, vector<1x1x32x121xbf16>
    %169 = vector.shape_cast %168 : vector<1x1x32x121xbf16> to vector<32x121xbf16>
    %c1_138 = arith.constant 1 : index
    %c1_139 = arith.constant 1 : index
    %c0_140 = arith.constant 0 : index
    %c1_141 = arith.constant 1 : index
    %170 = vector.load %arg1[%c1_138, %c1_139, %c0_140, %c1_141] : memref<2x8x32x122xbf16, #tpu.memory_space<vmem>>, vector<1x1x32x121xbf16>
    %171 = vector.shape_cast %170 : vector<1x1x32x121xbf16> to vector<32x121xbf16>
    %c1_142 = arith.constant 1 : index
    %c2_143 = arith.constant 2 : index
    %c0_144 = arith.constant 0 : index
    %c1_145 = arith.constant 1 : index
    %172 = vector.load %arg1[%c1_142, %c2_143, %c0_144, %c1_145] : memref<2x8x32x122xbf16, #tpu.memory_space<vmem>>, vector<1x1x32x121xbf16>
    %173 = vector.shape_cast %172 : vector<1x1x32x121xbf16> to vector<32x121xbf16>
    %c1_146 = arith.constant 1 : index
    %c3_147 = arith.constant 3 : index
    %c0_148 = arith.constant 0 : index
    %c1_149 = arith.constant 1 : index
    %174 = vector.load %arg1[%c1_146, %c3_147, %c0_148, %c1_149] : memref<2x8x32x122xbf16, #tpu.memory_space<vmem>>, vector<1x1x32x121xbf16>
    %175 = vector.shape_cast %174 : vector<1x1x32x121xbf16> to vector<32x121xbf16>
    %176 = tpu.concatenate %153, %155, %157, %159, %161 in 0 : vector<32x121xbf16>, vector<32x121xbf16>, vector<32x121xbf16>, vector<32x121xbf16>, vector<32x121xbf16> -> vector<160x121xbf16>
    %c0_150 = arith.constant 0 : index
    %c0_151 = arith.constant 0 : index
    %177 = vector.load %arg2[%c0_150, %c0_151] : memref<64x160xbf16, #tpu.memory_space<vmem>>, vector<64x160xbf16>
    %cst_152 = arith.constant dense<0.000000e+00> : vector<64x121xf32>
    %178 = tpu.matmul %177, %176, %cst_152 {dimension_numbers = #tpu.dot_dimension_numbers<[1], [0], [0], [1], [0, 0, 1, 1], [], []>} : vector<64x160xbf16>, vector<160x121xbf16>, vector<64x121xf32> -> vector<64x121xf32>
    %179 = tpu.concatenate %155, %157, %159, %161, %163 in 0 : vector<32x121xbf16>, vector<32x121xbf16>, vector<32x121xbf16>, vector<32x121xbf16>, vector<32x121xbf16> -> vector<160x121xbf16>
    %c0_153 = arith.constant 0 : index
    %c0_154 = arith.constant 0 : index
    %180 = vector.load %arg2[%c0_153, %c0_154] : memref<64x160xbf16, #tpu.memory_space<vmem>>, vector<64x160xbf16>
    %cst_155 = arith.constant dense<0.000000e+00> : vector<64x121xf32>
    %181 = tpu.matmul %180, %179, %cst_155 {dimension_numbers = #tpu.dot_dimension_numbers<[1], [0], [0], [1], [0, 0, 1, 1], [], []>} : vector<64x160xbf16>, vector<160x121xbf16>, vector<64x121xf32> -> vector<64x121xf32>
    %182 = vector.extract_strided_slice %178 {offsets = [0, 0], sizes = [32, 121], strides = [1, 1]} : vector<64x121xf32> to vector<32x121xf32>
    %183 = vector.extract_strided_slice %178 {offsets = [32, 0], sizes = [32, 121], strides = [1, 1]} : vector<64x121xf32> to vector<32x121xf32>
    %184 = arith.maximumf %182, %183 : vector<32x121xf32>
    %185 = vector.extract_strided_slice %181 {offsets = [0, 0], sizes = [32, 121], strides = [1, 1]} : vector<64x121xf32> to vector<32x121xf32>
    %186 = vector.extract_strided_slice %181 {offsets = [32, 0], sizes = [32, 121], strides = [1, 1]} : vector<64x121xf32> to vector<32x121xf32>
    %187 = arith.maximumf %185, %186 : vector<32x121xf32>
    %188 = arith.maximumf %184, %187 : vector<32x121xf32>
    %c0_156 = arith.constant 0 : index
    %c0_157 = arith.constant 0 : index
    %189 = vector.load %arg3[%c0_156, %c0_157] : memref<32x1xf32, #tpu.memory_space<vmem>>, vector<32x1xf32>
    %190 = vector.broadcast %189 : vector<32x1xf32> to vector<32x121xf32>
    %191 = arith.addf %188, %190 : vector<32x121xf32>
    %cst_158 = arith.constant 0.000000e+00 : f32
    %192 = vector.broadcast %cst_158 : f32 to vector<32x121xf32>
    %193 = arith.maximumf %191, %192 : vector<32x121xf32>
    %194 = arith.truncf %193 : vector<32x121xf32> to vector<32x121xbf16>
    %195 = tpu.concatenate %157, %159, %161, %163, %165 in 0 : vector<32x121xbf16>, vector<32x121xbf16>, vector<32x121xbf16>, vector<32x121xbf16>, vector<32x121xbf16> -> vector<160x121xbf16>
    %c0_159 = arith.constant 0 : index
    %c0_160 = arith.constant 0 : index
    %196 = vector.load %arg2[%c0_159, %c0_160] : memref<64x160xbf16, #tpu.memory_space<vmem>>, vector<64x160xbf16>
    %cst_161 = arith.constant dense<0.000000e+00> : vector<64x121xf32>
    %197 = tpu.matmul %196, %195, %cst_161 {dimension_numbers = #tpu.dot_dimension_numbers<[1], [0], [0], [1], [0, 0, 1, 1], [], []>} : vector<64x160xbf16>, vector<160x121xbf16>, vector<64x121xf32> -> vector<64x121xf32>
    %198 = tpu.concatenate %159, %161, %163, %165, %167 in 0 : vector<32x121xbf16>, vector<32x121xbf16>, vector<32x121xbf16>, vector<32x121xbf16>, vector<32x121xbf16> -> vector<160x121xbf16>
    %c0_162 = arith.constant 0 : index
    %c0_163 = arith.constant 0 : index
    %199 = vector.load %arg2[%c0_162, %c0_163] : memref<64x160xbf16, #tpu.memory_space<vmem>>, vector<64x160xbf16>
    %cst_164 = arith.constant dense<0.000000e+00> : vector<64x121xf32>
    %200 = tpu.matmul %199, %198, %cst_164 {dimension_numbers = #tpu.dot_dimension_numbers<[1], [0], [0], [1], [0, 0, 1, 1], [], []>} : vector<64x160xbf16>, vector<160x121xbf16>, vector<64x121xf32> -> vector<64x121xf32>
    %201 = vector.extract_strided_slice %197 {offsets = [0, 0], sizes = [32, 121], strides = [1, 1]} : vector<64x121xf32> to vector<32x121xf32>
    %202 = vector.extract_strided_slice %197 {offsets = [32, 0], sizes = [32, 121], strides = [1, 1]} : vector<64x121xf32> to vector<32x121xf32>
    %203 = arith.maximumf %201, %202 : vector<32x121xf32>
    %204 = vector.extract_strided_slice %200 {offsets = [0, 0], sizes = [32, 121], strides = [1, 1]} : vector<64x121xf32> to vector<32x121xf32>
    %205 = vector.extract_strided_slice %200 {offsets = [32, 0], sizes = [32, 121], strides = [1, 1]} : vector<64x121xf32> to vector<32x121xf32>
    %206 = arith.maximumf %204, %205 : vector<32x121xf32>
    %207 = arith.maximumf %203, %206 : vector<32x121xf32>
    %c0_165 = arith.constant 0 : index
    %c0_166 = arith.constant 0 : index
    %208 = vector.load %arg3[%c0_165, %c0_166] : memref<32x1xf32, #tpu.memory_space<vmem>>, vector<32x1xf32>
    %209 = vector.broadcast %208 : vector<32x1xf32> to vector<32x121xf32>
    %210 = arith.addf %207, %209 : vector<32x121xf32>
    %cst_167 = arith.constant 0.000000e+00 : f32
    %211 = vector.broadcast %cst_167 : f32 to vector<32x121xf32>
    %212 = arith.maximumf %210, %211 : vector<32x121xf32>
    %213 = arith.truncf %212 : vector<32x121xf32> to vector<32x121xbf16>
    %214 = tpu.concatenate %161, %163, %165, %167, %169 in 0 : vector<32x121xbf16>, vector<32x121xbf16>, vector<32x121xbf16>, vector<32x121xbf16>, vector<32x121xbf16> -> vector<160x121xbf16>
    %c0_168 = arith.constant 0 : index
    %c0_169 = arith.constant 0 : index
    %215 = vector.load %arg2[%c0_168, %c0_169] : memref<64x160xbf16, #tpu.memory_space<vmem>>, vector<64x160xbf16>
    %cst_170 = arith.constant dense<0.000000e+00> : vector<64x121xf32>
    %216 = tpu.matmul %215, %214, %cst_170 {dimension_numbers = #tpu.dot_dimension_numbers<[1], [0], [0], [1], [0, 0, 1, 1], [], []>} : vector<64x160xbf16>, vector<160x121xbf16>, vector<64x121xf32> -> vector<64x121xf32>
    %217 = tpu.concatenate %163, %165, %167, %169, %171 in 0 : vector<32x121xbf16>, vector<32x121xbf16>, vector<32x121xbf16>, vector<32x121xbf16>, vector<32x121xbf16> -> vector<160x121xbf16>
    %c0_171 = arith.constant 0 : index
    %c0_172 = arith.constant 0 : index
    %218 = vector.load %arg2[%c0_171, %c0_172] : memref<64x160xbf16, #tpu.memory_space<vmem>>, vector<64x160xbf16>
    %cst_173 = arith.constant dense<0.000000e+00> : vector<64x121xf32>
    %219 = tpu.matmul %218, %217, %cst_173 {dimension_numbers = #tpu.dot_dimension_numbers<[1], [0], [0], [1], [0, 0, 1, 1], [], []>} : vector<64x160xbf16>, vector<160x121xbf16>, vector<64x121xf32> -> vector<64x121xf32>
    %220 = vector.extract_strided_slice %216 {offsets = [0, 0], sizes = [32, 121], strides = [1, 1]} : vector<64x121xf32> to vector<32x121xf32>
    %221 = vector.extract_strided_slice %216 {offsets = [32, 0], sizes = [32, 121], strides = [1, 1]} : vector<64x121xf32> to vector<32x121xf32>
    %222 = arith.maximumf %220, %221 : vector<32x121xf32>
    %223 = vector.extract_strided_slice %219 {offsets = [0, 0], sizes = [32, 121], strides = [1, 1]} : vector<64x121xf32> to vector<32x121xf32>
    %224 = vector.extract_strided_slice %219 {offsets = [32, 0], sizes = [32, 121], strides = [1, 1]} : vector<64x121xf32> to vector<32x121xf32>
    %225 = arith.maximumf %223, %224 : vector<32x121xf32>
    %226 = arith.maximumf %222, %225 : vector<32x121xf32>
    %c0_174 = arith.constant 0 : index
    %c0_175 = arith.constant 0 : index
    %227 = vector.load %arg3[%c0_174, %c0_175] : memref<32x1xf32, #tpu.memory_space<vmem>>, vector<32x1xf32>
    %228 = vector.broadcast %227 : vector<32x1xf32> to vector<32x121xf32>
    %229 = arith.addf %226, %228 : vector<32x121xf32>
    %cst_176 = arith.constant 0.000000e+00 : f32
    %230 = vector.broadcast %cst_176 : f32 to vector<32x121xf32>
    %231 = arith.maximumf %229, %230 : vector<32x121xf32>
    %232 = arith.truncf %231 : vector<32x121xf32> to vector<32x121xbf16>
    %233 = tpu.concatenate %165, %167, %169, %171, %173 in 0 : vector<32x121xbf16>, vector<32x121xbf16>, vector<32x121xbf16>, vector<32x121xbf16>, vector<32x121xbf16> -> vector<160x121xbf16>
    %c0_177 = arith.constant 0 : index
    %c0_178 = arith.constant 0 : index
    %234 = vector.load %arg2[%c0_177, %c0_178] : memref<64x160xbf16, #tpu.memory_space<vmem>>, vector<64x160xbf16>
    %cst_179 = arith.constant dense<0.000000e+00> : vector<64x121xf32>
    %235 = tpu.matmul %234, %233, %cst_179 {dimension_numbers = #tpu.dot_dimension_numbers<[1], [0], [0], [1], [0, 0, 1, 1], [], []>} : vector<64x160xbf16>, vector<160x121xbf16>, vector<64x121xf32> -> vector<64x121xf32>
    %236 = tpu.concatenate %167, %169, %171, %173, %175 in 0 : vector<32x121xbf16>, vector<32x121xbf16>, vector<32x121xbf16>, vector<32x121xbf16>, vector<32x121xbf16> -> vector<160x121xbf16>
    %c0_180 = arith.constant 0 : index
    %c0_181 = arith.constant 0 : index
    %237 = vector.load %arg2[%c0_180, %c0_181] : memref<64x160xbf16, #tpu.memory_space<vmem>>, vector<64x160xbf16>
    %cst_182 = arith.constant dense<0.000000e+00> : vector<64x121xf32>
    %238 = tpu.matmul %237, %236, %cst_182 {dimension_numbers = #tpu.dot_dimension_numbers<[1], [0], [0], [1], [0, 0, 1, 1], [], []>} : vector<64x160xbf16>, vector<160x121xbf16>, vector<64x121xf32> -> vector<64x121xf32>
    %239 = vector.extract_strided_slice %235 {offsets = [0, 0], sizes = [32, 121], strides = [1, 1]} : vector<64x121xf32> to vector<32x121xf32>
    %240 = vector.extract_strided_slice %235 {offsets = [32, 0], sizes = [32, 121], strides = [1, 1]} : vector<64x121xf32> to vector<32x121xf32>
    %241 = arith.maximumf %239, %240 : vector<32x121xf32>
    %242 = vector.extract_strided_slice %238 {offsets = [0, 0], sizes = [32, 121], strides = [1, 1]} : vector<64x121xf32> to vector<32x121xf32>
    %243 = vector.extract_strided_slice %238 {offsets = [32, 0], sizes = [32, 121], strides = [1, 1]} : vector<64x121xf32> to vector<32x121xf32>
    %244 = arith.maximumf %242, %243 : vector<32x121xf32>
    %245 = arith.maximumf %241, %244 : vector<32x121xf32>
    %c0_183 = arith.constant 0 : index
    %c0_184 = arith.constant 0 : index
    %246 = vector.load %arg3[%c0_183, %c0_184] : memref<32x1xf32, #tpu.memory_space<vmem>>, vector<32x1xf32>
    %247 = vector.broadcast %246 : vector<32x1xf32> to vector<32x121xf32>
    %248 = arith.addf %245, %247 : vector<32x121xf32>
    %cst_185 = arith.constant 0.000000e+00 : f32
    %249 = vector.broadcast %cst_185 : f32 to vector<32x121xf32>
    %250 = arith.maximumf %248, %249 : vector<32x121xf32>
    %251 = arith.truncf %250 : vector<32x121xf32> to vector<32x121xbf16>
    %252 = vector.extract_strided_slice %194 {offsets = [0, 0], sizes = [32, 120], strides = [1, 1]} : vector<32x121xbf16> to vector<32x120xbf16>
    %253 = vector.extract_strided_slice %213 {offsets = [0, 0], sizes = [32, 120], strides = [1, 1]} : vector<32x121xbf16> to vector<32x120xbf16>
    %254 = vector.extract_strided_slice %232 {offsets = [0, 0], sizes = [32, 120], strides = [1, 1]} : vector<32x121xbf16> to vector<32x120xbf16>
    %255 = vector.extract_strided_slice %251 {offsets = [0, 0], sizes = [32, 120], strides = [1, 1]} : vector<32x121xbf16> to vector<32x120xbf16>
    %256 = vector.extract_strided_slice %194 {offsets = [0, 1], sizes = [32, 120], strides = [1, 1]} : vector<32x121xbf16> to vector<32x120xbf16>
    %257 = vector.extract_strided_slice %213 {offsets = [0, 1], sizes = [32, 120], strides = [1, 1]} : vector<32x121xbf16> to vector<32x120xbf16>
    %258 = vector.extract_strided_slice %232 {offsets = [0, 1], sizes = [32, 120], strides = [1, 1]} : vector<32x121xbf16> to vector<32x120xbf16>
    %259 = vector.extract_strided_slice %251 {offsets = [0, 1], sizes = [32, 120], strides = [1, 1]} : vector<32x121xbf16> to vector<32x120xbf16>
    %260 = tpu.concatenate %252, %253, %254, %255, %256 in 0 : vector<32x120xbf16>, vector<32x120xbf16>, vector<32x120xbf16>, vector<32x120xbf16>, vector<32x120xbf16> -> vector<160x120xbf16>
    %c0_186 = arith.constant 0 : index
    %c0_187 = arith.constant 0 : index
    %261 = vector.load %arg4[%c0_186, %c0_187] : memref<32x160xbf16, #tpu.memory_space<vmem>>, vector<32x160xbf16>
    %cst_188 = arith.constant dense<0.000000e+00> : vector<32x120xf32>
    %262 = tpu.matmul %261, %260, %cst_188 {dimension_numbers = #tpu.dot_dimension_numbers<[1], [0], [0], [1], [0, 0, 1, 1], [], []>} : vector<32x160xbf16>, vector<160x120xbf16>, vector<32x120xf32> -> vector<32x120xf32>
    %263 = tpu.concatenate %253, %254, %255, %256, %257 in 0 : vector<32x120xbf16>, vector<32x120xbf16>, vector<32x120xbf16>, vector<32x120xbf16>, vector<32x120xbf16> -> vector<160x120xbf16>
    %c0_189 = arith.constant 0 : index
    %c0_190 = arith.constant 0 : index
    %264 = vector.load %arg4[%c0_189, %c0_190] : memref<32x160xbf16, #tpu.memory_space<vmem>>, vector<32x160xbf16>
    %cst_191 = arith.constant dense<0.000000e+00> : vector<32x120xf32>
    %265 = tpu.matmul %264, %263, %cst_191 {dimension_numbers = #tpu.dot_dimension_numbers<[1], [0], [0], [1], [0, 0, 1, 1], [], []>} : vector<32x160xbf16>, vector<160x120xbf16>, vector<32x120xf32> -> vector<32x120xf32>
    %266 = arith.maximumf %262, %265 : vector<32x120xf32>
    %c0_192 = arith.constant 0 : index
    %c0_193 = arith.constant 0 : index
    %267 = vector.load %arg5[%c0_192, %c0_193] : memref<32x1xf32, #tpu.memory_space<vmem>>, vector<32x1xf32>
    %268 = vector.broadcast %267 : vector<32x1xf32> to vector<32x120xf32>
    %269 = arith.addf %266, %268 : vector<32x120xf32>
    %cst_194 = arith.constant 0.000000e+00 : f32
    %270 = vector.broadcast %cst_194 : f32 to vector<32x120xf32>
    %271 = arith.maximumf %269, %270 : vector<32x120xf32>
    %272 = arith.truncf %271 : vector<32x120xf32> to vector<32x120xbf16>
    %273 = tpu.concatenate %254, %255, %256, %257, %258 in 0 : vector<32x120xbf16>, vector<32x120xbf16>, vector<32x120xbf16>, vector<32x120xbf16>, vector<32x120xbf16> -> vector<160x120xbf16>
    %c0_195 = arith.constant 0 : index
    %c0_196 = arith.constant 0 : index
    %274 = vector.load %arg4[%c0_195, %c0_196] : memref<32x160xbf16, #tpu.memory_space<vmem>>, vector<32x160xbf16>
    %cst_197 = arith.constant dense<0.000000e+00> : vector<32x120xf32>
    %275 = tpu.matmul %274, %273, %cst_197 {dimension_numbers = #tpu.dot_dimension_numbers<[1], [0], [0], [1], [0, 0, 1, 1], [], []>} : vector<32x160xbf16>, vector<160x120xbf16>, vector<32x120xf32> -> vector<32x120xf32>
    %276 = tpu.concatenate %255, %256, %257, %258, %259 in 0 : vector<32x120xbf16>, vector<32x120xbf16>, vector<32x120xbf16>, vector<32x120xbf16>, vector<32x120xbf16> -> vector<160x120xbf16>
    %c0_198 = arith.constant 0 : index
    %c0_199 = arith.constant 0 : index
    %277 = vector.load %arg4[%c0_198, %c0_199] : memref<32x160xbf16, #tpu.memory_space<vmem>>, vector<32x160xbf16>
    %cst_200 = arith.constant dense<0.000000e+00> : vector<32x120xf32>
    %278 = tpu.matmul %277, %276, %cst_200 {dimension_numbers = #tpu.dot_dimension_numbers<[1], [0], [0], [1], [0, 0, 1, 1], [], []>} : vector<32x160xbf16>, vector<160x120xbf16>, vector<32x120xf32> -> vector<32x120xf32>
    %279 = arith.maximumf %275, %278 : vector<32x120xf32>
    %c0_201 = arith.constant 0 : index
    %c0_202 = arith.constant 0 : index
    %280 = vector.load %arg5[%c0_201, %c0_202] : memref<32x1xf32, #tpu.memory_space<vmem>>, vector<32x1xf32>
    %281 = vector.broadcast %280 : vector<32x1xf32> to vector<32x120xf32>
    %282 = arith.addf %279, %281 : vector<32x120xf32>
    %cst_203 = arith.constant 0.000000e+00 : f32
    %283 = vector.broadcast %cst_203 : f32 to vector<32x120xf32>
    %284 = arith.maximumf %282, %283 : vector<32x120xf32>
    %285 = arith.truncf %284 : vector<32x120xf32> to vector<32x120xbf16>
    %286 = vector.extract_strided_slice %272 {offsets = [0, 0], sizes = [32, 118], strides = [1, 1]} : vector<32x120xbf16> to vector<32x118xbf16>
    %287 = vector.extract_strided_slice %285 {offsets = [0, 0], sizes = [32, 118], strides = [1, 1]} : vector<32x120xbf16> to vector<32x118xbf16>
    %288 = vector.extract_strided_slice %272 {offsets = [0, 1], sizes = [32, 118], strides = [1, 1]} : vector<32x120xbf16> to vector<32x118xbf16>
    %289 = vector.extract_strided_slice %285 {offsets = [0, 1], sizes = [32, 118], strides = [1, 1]} : vector<32x120xbf16> to vector<32x118xbf16>
    %290 = vector.extract_strided_slice %272 {offsets = [0, 2], sizes = [32, 118], strides = [1, 1]} : vector<32x120xbf16> to vector<32x118xbf16>
    %291 = vector.extract_strided_slice %285 {offsets = [0, 2], sizes = [32, 118], strides = [1, 1]} : vector<32x120xbf16> to vector<32x118xbf16>
    %292 = tpu.concatenate %286, %287, %288, %289, %290 in 0 : vector<32x118xbf16>, vector<32x118xbf16>, vector<32x118xbf16>, vector<32x118xbf16>, vector<32x118xbf16> -> vector<160x118xbf16>
    %c0_204 = arith.constant 0 : index
    %c0_205 = arith.constant 0 : index
    %293 = vector.load %arg6[%c0_204, %c0_205] : memref<64x160xbf16, #tpu.memory_space<vmem>>, vector<64x160xbf16>
    %cst_206 = arith.constant dense<0.000000e+00> : vector<64x118xf32>
    %294 = tpu.matmul %293, %292, %cst_206 {dimension_numbers = #tpu.dot_dimension_numbers<[1], [0], [0], [1], [0, 0, 1, 1], [], []>} : vector<64x160xbf16>, vector<160x118xbf16>, vector<64x118xf32> -> vector<64x118xf32>
    %295 = tpu.concatenate %287, %288, %289, %290, %291 in 0 : vector<32x118xbf16>, vector<32x118xbf16>, vector<32x118xbf16>, vector<32x118xbf16>, vector<32x118xbf16> -> vector<160x118xbf16>
    %c0_207 = arith.constant 0 : index
    %c0_208 = arith.constant 0 : index
    %296 = vector.load %arg6[%c0_207, %c0_208] : memref<64x160xbf16, #tpu.memory_space<vmem>>, vector<64x160xbf16>
    %cst_209 = arith.constant dense<0.000000e+00> : vector<64x118xf32>
    %297 = tpu.matmul %296, %295, %cst_209 {dimension_numbers = #tpu.dot_dimension_numbers<[1], [0], [0], [1], [0, 0, 1, 1], [], []>} : vector<64x160xbf16>, vector<160x118xbf16>, vector<64x118xf32> -> vector<64x118xf32>
    %298 = arith.maximumf %294, %297 : vector<64x118xf32>
    %c0_210 = arith.constant 0 : index
    %c0_211 = arith.constant 0 : index
    %299 = vector.load %arg7[%c0_210, %c0_211] : memref<64x1xf32, #tpu.memory_space<vmem>>, vector<64x1xf32>
    %300 = vector.broadcast %299 : vector<64x1xf32> to vector<64x118xf32>
    %301 = arith.addf %298, %300 : vector<64x118xf32>
    %cst_212 = arith.constant 0.000000e+00 : f32
    %302 = vector.broadcast %cst_212 : f32 to vector<64x118xf32>
    %303 = arith.maximumf %301, %302 : vector<64x118xf32>
    tpu.wait_dma2 semaphore(%arg16 : memref<!tpu.dma_semaphore, #tpu.memory_space<semaphore_mem>>) src(%arg8 : memref<8x118x1024xbf16, #tpu.memory_space<any>>) dst(%arg15 : memref<8x118x1024xbf16, #tpu.memory_space<vmem>>)
    %304 = vector.extract_strided_slice %151 {offsets = [0, 0], sizes = [8, 118], strides = [1, 1]} : vector<64x118xf32> to vector<8x118xf32>
    %305 = vector.extract_strided_slice %303 {offsets = [0, 0], sizes = [8, 118], strides = [1, 1]} : vector<64x118xf32> to vector<8x118xf32>
    %306 = tpu.concatenate %304, %305 in 0 : vector<8x118xf32>, vector<8x118xf32> -> vector<16x118xf32>
    %307 = arith.truncf %306 : vector<16x118xf32> to vector<16x118xbf16>
    %c0_213 = arith.constant 0 : index
    %c0_214 = arith.constant 0 : index
    %c0_215 = arith.constant 0 : index
    %308 = vector.load %arg15[%c0_213, %c0_214, %c0_215] : memref<8x118x1024xbf16, #tpu.memory_space<vmem>>, vector<1x118x1024xbf16>
    %309 = vector.shape_cast %308 : vector<1x118x1024xbf16> to vector<118x1024xbf16>
    %cst_216 = arith.constant dense<0.000000e+00> : vector<16x1024xf32>
    %310 = tpu.matmul %307, %309, %cst_216 {dimension_numbers = #tpu.dot_dimension_numbers<[1], [0], [0], [1], [0, 0, 1, 1], [], []>} : vector<16x118xbf16>, vector<118x1024xbf16>, vector<16x1024xf32> -> vector<16x1024xf32>
    %311 = vector.extract_strided_slice %151 {offsets = [8, 0], sizes = [8, 118], strides = [1, 1]} : vector<64x118xf32> to vector<8x118xf32>
    %312 = vector.extract_strided_slice %303 {offsets = [8, 0], sizes = [8, 118], strides = [1, 1]} : vector<64x118xf32> to vector<8x118xf32>
    %313 = tpu.concatenate %311, %312 in 0 : vector<8x118xf32>, vector<8x118xf32> -> vector<16x118xf32>
    %314 = arith.truncf %313 : vector<16x118xf32> to vector<16x118xbf16>
    %c1_217 = arith.constant 1 : index
    %c0_218 = arith.constant 0 : index
    %c0_219 = arith.constant 0 : index
    %315 = vector.load %arg15[%c1_217, %c0_218, %c0_219] : memref<8x118x1024xbf16, #tpu.memory_space<vmem>>, vector<1x118x1024xbf16>
    %316 = vector.shape_cast %315 : vector<1x118x1024xbf16> to vector<118x1024xbf16>
    %cst_220 = arith.constant dense<0.000000e+00> : vector<16x1024xf32>
    %317 = tpu.matmul %314, %316, %cst_220 {dimension_numbers = #tpu.dot_dimension_numbers<[1], [0], [0], [1], [0, 0, 1, 1], [], []>} : vector<16x118xbf16>, vector<118x1024xbf16>, vector<16x1024xf32> -> vector<16x1024xf32>
    %318 = arith.addf %310, %317 : vector<16x1024xf32>
    %319 = vector.extract_strided_slice %151 {offsets = [16, 0], sizes = [8, 118], strides = [1, 1]} : vector<64x118xf32> to vector<8x118xf32>
    %320 = vector.extract_strided_slice %303 {offsets = [16, 0], sizes = [8, 118], strides = [1, 1]} : vector<64x118xf32> to vector<8x118xf32>
    %321 = tpu.concatenate %319, %320 in 0 : vector<8x118xf32>, vector<8x118xf32> -> vector<16x118xf32>
    %322 = arith.truncf %321 : vector<16x118xf32> to vector<16x118xbf16>
    %c2_221 = arith.constant 2 : index
    %c0_222 = arith.constant 0 : index
    %c0_223 = arith.constant 0 : index
    %323 = vector.load %arg15[%c2_221, %c0_222, %c0_223] : memref<8x118x1024xbf16, #tpu.memory_space<vmem>>, vector<1x118x1024xbf16>
    %324 = vector.shape_cast %323 : vector<1x118x1024xbf16> to vector<118x1024xbf16>
    %cst_224 = arith.constant dense<0.000000e+00> : vector<16x1024xf32>
    %325 = tpu.matmul %322, %324, %cst_224 {dimension_numbers = #tpu.dot_dimension_numbers<[1], [0], [0], [1], [0, 0, 1, 1], [], []>} : vector<16x118xbf16>, vector<118x1024xbf16>, vector<16x1024xf32> -> vector<16x1024xf32>
    %326 = arith.addf %318, %325 : vector<16x1024xf32>
    %327 = vector.extract_strided_slice %151 {offsets = [24, 0], sizes = [8, 118], strides = [1, 1]} : vector<64x118xf32> to vector<8x118xf32>
    %328 = vector.extract_strided_slice %303 {offsets = [24, 0], sizes = [8, 118], strides = [1, 1]} : vector<64x118xf32> to vector<8x118xf32>
    %329 = tpu.concatenate %327, %328 in 0 : vector<8x118xf32>, vector<8x118xf32> -> vector<16x118xf32>
    %330 = arith.truncf %329 : vector<16x118xf32> to vector<16x118xbf16>
    %c3_225 = arith.constant 3 : index
    %c0_226 = arith.constant 0 : index
    %c0_227 = arith.constant 0 : index
    %331 = vector.load %arg15[%c3_225, %c0_226, %c0_227] : memref<8x118x1024xbf16, #tpu.memory_space<vmem>>, vector<1x118x1024xbf16>
    %332 = vector.shape_cast %331 : vector<1x118x1024xbf16> to vector<118x1024xbf16>
    %cst_228 = arith.constant dense<0.000000e+00> : vector<16x1024xf32>
    %333 = tpu.matmul %330, %332, %cst_228 {dimension_numbers = #tpu.dot_dimension_numbers<[1], [0], [0], [1], [0, 0, 1, 1], [], []>} : vector<16x118xbf16>, vector<118x1024xbf16>, vector<16x1024xf32> -> vector<16x1024xf32>
    %334 = arith.addf %326, %333 : vector<16x1024xf32>
    %335 = vector.extract_strided_slice %151 {offsets = [32, 0], sizes = [8, 118], strides = [1, 1]} : vector<64x118xf32> to vector<8x118xf32>
    %336 = vector.extract_strided_slice %303 {offsets = [32, 0], sizes = [8, 118], strides = [1, 1]} : vector<64x118xf32> to vector<8x118xf32>
    %337 = tpu.concatenate %335, %336 in 0 : vector<8x118xf32>, vector<8x118xf32> -> vector<16x118xf32>
    %338 = arith.truncf %337 : vector<16x118xf32> to vector<16x118xbf16>
    %c4_229 = arith.constant 4 : index
    %c0_230 = arith.constant 0 : index
    %c0_231 = arith.constant 0 : index
    %339 = vector.load %arg15[%c4_229, %c0_230, %c0_231] : memref<8x118x1024xbf16, #tpu.memory_space<vmem>>, vector<1x118x1024xbf16>
    %340 = vector.shape_cast %339 : vector<1x118x1024xbf16> to vector<118x1024xbf16>
    %cst_232 = arith.constant dense<0.000000e+00> : vector<16x1024xf32>
    %341 = tpu.matmul %338, %340, %cst_232 {dimension_numbers = #tpu.dot_dimension_numbers<[1], [0], [0], [1], [0, 0, 1, 1], [], []>} : vector<16x118xbf16>, vector<118x1024xbf16>, vector<16x1024xf32> -> vector<16x1024xf32>
    %342 = arith.addf %334, %341 : vector<16x1024xf32>
    %343 = vector.extract_strided_slice %151 {offsets = [40, 0], sizes = [8, 118], strides = [1, 1]} : vector<64x118xf32> to vector<8x118xf32>
    %344 = vector.extract_strided_slice %303 {offsets = [40, 0], sizes = [8, 118], strides = [1, 1]} : vector<64x118xf32> to vector<8x118xf32>
    %345 = tpu.concatenate %343, %344 in 0 : vector<8x118xf32>, vector<8x118xf32> -> vector<16x118xf32>
    %346 = arith.truncf %345 : vector<16x118xf32> to vector<16x118xbf16>
    %c5_233 = arith.constant 5 : index
    %c0_234 = arith.constant 0 : index
    %c0_235 = arith.constant 0 : index
    %347 = vector.load %arg15[%c5_233, %c0_234, %c0_235] : memref<8x118x1024xbf16, #tpu.memory_space<vmem>>, vector<1x118x1024xbf16>
    %348 = vector.shape_cast %347 : vector<1x118x1024xbf16> to vector<118x1024xbf16>
    %cst_236 = arith.constant dense<0.000000e+00> : vector<16x1024xf32>
    %349 = tpu.matmul %346, %348, %cst_236 {dimension_numbers = #tpu.dot_dimension_numbers<[1], [0], [0], [1], [0, 0, 1, 1], [], []>} : vector<16x118xbf16>, vector<118x1024xbf16>, vector<16x1024xf32> -> vector<16x1024xf32>
    %350 = arith.addf %342, %349 : vector<16x1024xf32>
    %351 = vector.extract_strided_slice %151 {offsets = [48, 0], sizes = [8, 118], strides = [1, 1]} : vector<64x118xf32> to vector<8x118xf32>
    %352 = vector.extract_strided_slice %303 {offsets = [48, 0], sizes = [8, 118], strides = [1, 1]} : vector<64x118xf32> to vector<8x118xf32>
    %353 = tpu.concatenate %351, %352 in 0 : vector<8x118xf32>, vector<8x118xf32> -> vector<16x118xf32>
    %354 = arith.truncf %353 : vector<16x118xf32> to vector<16x118xbf16>
    %c6_237 = arith.constant 6 : index
    %c0_238 = arith.constant 0 : index
    %c0_239 = arith.constant 0 : index
    %355 = vector.load %arg15[%c6_237, %c0_238, %c0_239] : memref<8x118x1024xbf16, #tpu.memory_space<vmem>>, vector<1x118x1024xbf16>
    %356 = vector.shape_cast %355 : vector<1x118x1024xbf16> to vector<118x1024xbf16>
    %cst_240 = arith.constant dense<0.000000e+00> : vector<16x1024xf32>
    %357 = tpu.matmul %354, %356, %cst_240 {dimension_numbers = #tpu.dot_dimension_numbers<[1], [0], [0], [1], [0, 0, 1, 1], [], []>} : vector<16x118xbf16>, vector<118x1024xbf16>, vector<16x1024xf32> -> vector<16x1024xf32>
    %358 = arith.addf %350, %357 : vector<16x1024xf32>
    %359 = vector.extract_strided_slice %151 {offsets = [56, 0], sizes = [8, 118], strides = [1, 1]} : vector<64x118xf32> to vector<8x118xf32>
    %360 = vector.extract_strided_slice %303 {offsets = [56, 0], sizes = [8, 118], strides = [1, 1]} : vector<64x118xf32> to vector<8x118xf32>
    %361 = tpu.concatenate %359, %360 in 0 : vector<8x118xf32>, vector<8x118xf32> -> vector<16x118xf32>
    %362 = arith.truncf %361 : vector<16x118xf32> to vector<16x118xbf16>
    %c7_241 = arith.constant 7 : index
    %c0_242 = arith.constant 0 : index
    %c0_243 = arith.constant 0 : index
    %363 = vector.load %arg15[%c7_241, %c0_242, %c0_243] : memref<8x118x1024xbf16, #tpu.memory_space<vmem>>, vector<1x118x1024xbf16>
    %364 = vector.shape_cast %363 : vector<1x118x1024xbf16> to vector<118x1024xbf16>
    %cst_244 = arith.constant dense<0.000000e+00> : vector<16x1024xf32>
    %365 = tpu.matmul %362, %364, %cst_244 {dimension_numbers = #tpu.dot_dimension_numbers<[1], [0], [0], [1], [0, 0, 1, 1], [], []>} : vector<16x118xbf16>, vector<118x1024xbf16>, vector<16x1024xf32> -> vector<16x1024xf32>
    %366 = arith.addf %358, %365 : vector<16x1024xf32>
    %c0_245 = arith.constant 0 : index
    %c0_246 = arith.constant 0 : index
    %367 = vector.load %arg9[%c0_245, %c0_246] : memref<1x128xf32, #tpu.memory_space<vmem>>, vector<1x128xf32>
    %368 = vector.extract_strided_slice %366 {offsets = [0, 0], sizes = [1, 128], strides = [1, 1]} : vector<16x1024xf32> to vector<1x128xf32>
    %369 = arith.addf %367, %368 : vector<1x128xf32>
    %370 = vector.extract_strided_slice %366 {offsets = [1, 128], sizes = [1, 128], strides = [1, 1]} : vector<16x1024xf32> to vector<1x128xf32>
    %371 = arith.addf %369, %370 : vector<1x128xf32>
    %372 = vector.extract_strided_slice %366 {offsets = [2, 256], sizes = [1, 128], strides = [1, 1]} : vector<16x1024xf32> to vector<1x128xf32>
    %373 = arith.addf %371, %372 : vector<1x128xf32>
    %374 = vector.extract_strided_slice %366 {offsets = [3, 384], sizes = [1, 128], strides = [1, 1]} : vector<16x1024xf32> to vector<1x128xf32>
    %375 = arith.addf %373, %374 : vector<1x128xf32>
    %376 = vector.extract_strided_slice %366 {offsets = [4, 512], sizes = [1, 128], strides = [1, 1]} : vector<16x1024xf32> to vector<1x128xf32>
    %377 = arith.addf %375, %376 : vector<1x128xf32>
    %378 = vector.extract_strided_slice %366 {offsets = [5, 640], sizes = [1, 128], strides = [1, 1]} : vector<16x1024xf32> to vector<1x128xf32>
    %379 = arith.addf %377, %378 : vector<1x128xf32>
    %380 = vector.extract_strided_slice %366 {offsets = [6, 768], sizes = [1, 128], strides = [1, 1]} : vector<16x1024xf32> to vector<1x128xf32>
    %381 = arith.addf %379, %380 : vector<1x128xf32>
    %382 = vector.extract_strided_slice %366 {offsets = [7, 896], sizes = [1, 128], strides = [1, 1]} : vector<16x1024xf32> to vector<1x128xf32>
    %383 = arith.addf %381, %382 : vector<1x128xf32>
    %c0_247 = arith.constant 0 : index
    %c0_248 = arith.constant 0 : index
    %384 = vector.load %arg9[%c0_247, %c0_248] : memref<1x128xf32, #tpu.memory_space<vmem>>, vector<1x128xf32>
    %385 = vector.extract_strided_slice %366 {offsets = [8, 0], sizes = [1, 128], strides = [1, 1]} : vector<16x1024xf32> to vector<1x128xf32>
    %386 = arith.addf %384, %385 : vector<1x128xf32>
    %387 = vector.extract_strided_slice %366 {offsets = [9, 128], sizes = [1, 128], strides = [1, 1]} : vector<16x1024xf32> to vector<1x128xf32>
    %388 = arith.addf %386, %387 : vector<1x128xf32>
    %389 = vector.extract_strided_slice %366 {offsets = [10, 256], sizes = [1, 128], strides = [1, 1]} : vector<16x1024xf32> to vector<1x128xf32>
    %390 = arith.addf %388, %389 : vector<1x128xf32>
    %391 = vector.extract_strided_slice %366 {offsets = [11, 384], sizes = [1, 128], strides = [1, 1]} : vector<16x1024xf32> to vector<1x128xf32>
    %392 = arith.addf %390, %391 : vector<1x128xf32>
    %393 = vector.extract_strided_slice %366 {offsets = [12, 512], sizes = [1, 128], strides = [1, 1]} : vector<16x1024xf32> to vector<1x128xf32>
    %394 = arith.addf %392, %393 : vector<1x128xf32>
    %395 = vector.extract_strided_slice %366 {offsets = [13, 640], sizes = [1, 128], strides = [1, 1]} : vector<16x1024xf32> to vector<1x128xf32>
    %396 = arith.addf %394, %395 : vector<1x128xf32>
    %397 = vector.extract_strided_slice %366 {offsets = [14, 768], sizes = [1, 128], strides = [1, 1]} : vector<16x1024xf32> to vector<1x128xf32>
    %398 = arith.addf %396, %397 : vector<1x128xf32>
    %399 = vector.extract_strided_slice %366 {offsets = [15, 896], sizes = [1, 128], strides = [1, 1]} : vector<16x1024xf32> to vector<1x128xf32>
    %400 = arith.addf %398, %399 : vector<1x128xf32>
    %401 = tpu.concatenate %383, %400 in 0 : vector<1x128xf32>, vector<1x128xf32> -> vector<2x128xf32>
    %cst_249 = arith.constant 0.000000e+00 : f32
    %402 = vector.broadcast %cst_249 : f32 to vector<2x128xf32>
    %403 = arith.maximumf %401, %402 : vector<2x128xf32>
    %c0_250 = arith.constant 0 : index
    %c0_251 = arith.constant 0 : index
    %404 = vector.load %arg10[%c0_250, %c0_251] : memref<128x32xf32, #tpu.memory_space<vmem>>, vector<128x32xf32>
    %cst_252 = arith.constant dense<0.000000e+00> : vector<2x32xf32>
    %405 = tpu.matmul %403, %404, %cst_252 {dimension_numbers = #tpu.dot_dimension_numbers<[1], [0], [0], [1], [0, 0, 1, 1], [], []>} : vector<2x128xf32>, vector<128x32xf32>, vector<2x32xf32> -> vector<2x32xf32>
    %c0_253 = arith.constant 0 : index
    %c0_254 = arith.constant 0 : index
    %406 = vector.load %arg11[%c0_253, %c0_254] : memref<1x32xf32, #tpu.memory_space<vmem>>, vector<1x32xf32>
    %407 = vector.broadcast %406 : vector<1x32xf32> to vector<2x32xf32>
    %408 = arith.addf %405, %407 : vector<2x32xf32>
    %c0_255 = arith.constant 0 : index
    %c0_256 = arith.constant 0 : index
    %409 = vector.load %arg12[%c0_255, %c0_256] : memref<32x8xf32, #tpu.memory_space<vmem>>, vector<32x8xf32>
    %cst_257 = arith.constant dense<0.000000e+00> : vector<2x8xf32>
    %410 = tpu.matmul %408, %409, %cst_257 {dimension_numbers = #tpu.dot_dimension_numbers<[1], [0], [0], [1], [0, 0, 1, 1], [], []>} : vector<2x32xf32>, vector<32x8xf32>, vector<2x8xf32> -> vector<2x8xf32>
    %c0_258 = arith.constant 0 : index
    %c0_259 = arith.constant 0 : index
    %411 = vector.load %arg13[%c0_258, %c0_259] : memref<1x8xf32, #tpu.memory_space<vmem>>, vector<1x8xf32>
    %412 = vector.broadcast %411 : vector<1x8xf32> to vector<2x8xf32>
    %413 = arith.addf %410, %412 : vector<2x8xf32>
    %414 = arith.mulf %413, %413 : vector<2x8xf32>
    %cst_260 = arith.constant dense<0.000000e+00> : vector<2xf32>
    %415 = vector.multi_reduction <add>, %414, %cst_260 [1] : vector<2x8xf32> to vector<2xf32>
    %416 = vector.shape_cast %415 : vector<2xf32> to vector<2x1xf32>
    %cst_261 = arith.constant 1.000000e-24 : f32
    %417 = vector.broadcast %cst_261 : f32 to vector<2x1xf32>
    %418 = arith.maximumf %416, %417 : vector<2x1xf32>
    %419 = math.rsqrt %418 : vector<2x1xf32>
    %420 = vector.broadcast %419 : vector<2x1xf32> to vector<2x8xf32>
    %421 = arith.mulf %413, %420 : vector<2x8xf32>
    %c0_262 = arith.constant 0 : index
    %c0_263 = arith.constant 0 : index
    %422 = vector.load %arg14[%c0_262, %c0_263] : memref<2x8xf32, #tpu.memory_space<vmem>>, vector<2x8xf32>
    tpu.vector_store %arg14[%c0_262, %c0_263], %421 {strides = array<i32>} : memref<2x8xf32, #tpu.memory_space<vmem>>, vector<2x8xf32>,
    return
  }
  func.func @transform_0(%arg0: i32) -> (i32, i32, i32, i32) {
    %c0_i32 = arith.constant 0 : i32
    %c0_i32_0 = arith.constant 0 : i32
    %c0_i32_1 = arith.constant 0 : i32
    %c0_i32_2 = arith.constant 0 : i32
    %c0_i32_3 = arith.constant 0 : i32
    return %c0_i32, %c0_i32_0, %c0_i32_1, %c0_i32_2 : i32, i32, i32, i32
  }
  func.func @transform_1(%arg0: i32) -> (i32, i32) {
    %c0_i32 = arith.constant 0 : i32
    %c0_i32_0 = arith.constant 0 : i32
    %c0_i32_1 = arith.constant 0 : i32
    return %c0_i32, %c0_i32_0 : i32, i32
  }
  func.func @transform_2(%arg0: i32) -> (i32, i32) {
    %c0_i32 = arith.constant 0 : i32
    %c0_i32_0 = arith.constant 0 : i32
    %c0_i32_1 = arith.constant 0 : i32
    return %c0_i32, %c0_i32_0 : i32, i32
  }
  func.func @transform_3(%arg0: i32) -> (i32, i32) {
    %c0_i32 = arith.constant 0 : i32
    %c0_i32_0 = arith.constant 0 : i32
    %c0_i32_1 = arith.constant 0 : i32
    return %c0_i32, %c0_i32_0 : i32, i32
  }
  func.func @transform_4(%arg0: i32) -> (i32, i32) {
    %c0_i32 = arith.constant 0 : i32
    %c0_i32_0 = arith.constant 0 : i32
    %c0_i32_1 = arith.constant 0 : i32
    return %c0_i32, %c0_i32_0 : i32, i32
  }
  func.func @transform_5(%arg0: i32) -> (i32, i32) {
    %c0_i32 = arith.constant 0 : i32
    %c0_i32_0 = arith.constant 0 : i32
    %c0_i32_1 = arith.constant 0 : i32
    return %c0_i32, %c0_i32_0 : i32, i32
  }
  func.func @transform_6(%arg0: i32) -> (i32, i32) {
    %c0_i32 = arith.constant 0 : i32
    %c0_i32_0 = arith.constant 0 : i32
    %c0_i32_1 = arith.constant 0 : i32
    return %c0_i32, %c0_i32_0 : i32, i32
  }
  func.func @transform_8(%arg0: i32) -> (i32, i32) {
    %c0_i32 = arith.constant 0 : i32
    %c0_i32_0 = arith.constant 0 : i32
    %c0_i32_1 = arith.constant 0 : i32
    return %c0_i32, %c0_i32_0 : i32, i32
  }
  func.func @transform_9(%arg0: i32) -> (i32, i32) {
    %c0_i32 = arith.constant 0 : i32
    %c0_i32_0 = arith.constant 0 : i32
    %c0_i32_1 = arith.constant 0 : i32
    return %c0_i32, %c0_i32_0 : i32, i32
  }
  func.func @transform_10(%arg0: i32) -> (i32, i32) {
    %c0_i32 = arith.constant 0 : i32
    %c0_i32_0 = arith.constant 0 : i32
    %c0_i32_1 = arith.constant 0 : i32
    return %c0_i32, %c0_i32_0 : i32, i32
  }
  func.func @transform_11(%arg0: i32) -> (i32, i32) {
    %c0_i32 = arith.constant 0 : i32
    %c0_i32_0 = arith.constant 0 : i32
    %c0_i32_1 = arith.constant 0 : i32
    return %c0_i32, %c0_i32_0 : i32, i32
  }
  func.func @transform_12(%arg0: i32) -> (i32, i32) {
    %c0_i32 = arith.constant 0 : i32
    %c0_i32_0 = arith.constant 0 : i32
    %c0_i32_1 = arith.constant 0 : i32
    return %c0_i32, %c0_i32_0 : i32, i32
  }
  func.func @transform_13(%arg0: i32) -> (i32, i32) {
    %c0_i32 = arith.constant 0 : i32
    %c0_i32_0 = arith.constant 0 : i32
    %c0_i32_1 = arith.constant 0 : i32
    return %c0_i32, %c0_i32_0 : i32, i32
  }
}

</mosaic_0001>

<bundles_post_ra>
// kernel: kspacenet_forward.1
= control target key start
LH: loop header
LB: loop body
LE: loop exit
PB: predicated region body
PF: predicated region fallthrough
CT: control target
= control target key end

     0   :  { %18 = vsyncpa [#allocation5], 0  ;;  %s13070_s0 = inlined_call_operand.vmem [shape: bf16[2,8,32,122], index: 0, kind: input, shape index: {}]   ;;  %s13071_s1 = inlined_call_operand.vmem [shape: bf16[64,160], index: 1, kind: input, shape index: {}]   ;;  %s13072_s2 = inlined_call_operand.vmem [shape: f32[32,1], index: 2, kind: input, shape index: {}]   ;;  %s13073_s3 = inlined_call_operand.vmem [shape: bf16[32,160], index: 3, kind: input, shape index: {}]   ;;  %s13074_s4 = inlined_call_operand.vmem [shape: f32[32,1], index: 4, kind: input, shape index: {}]   ;;  %s13075_s5 = inlined_call_operand.vmem [shape: bf16[64,160], index: 5, kind: input, shape index: {}]   ;;  %s13076_s6 = inlined_call_operand.vmem [shape: f32[64,1], index: 6, kind: input, shape index: {}]   ;;  %s13077_s7 = inlined_call_operand.vmem [shape: bf16[8,118,1024], index: 7, kind: input, shape index: {}]   ;;  %s13078_s8 = inlined_call_operand.vmem [shape: f32[1,128], index: 8, kind: input, shape index: {}]   ;;  %s13079_s9 = inlined_call_operand.vmem [shape: f32[128,32], index: 9, kind: input, shape index: {}]   ;;  %s13080_s10 = inlined_call_operand.vmem [shape: f32[1,32], index: 10, kind: input, shape index: {}]   ;;  %s13081_s11 = inlined_call_operand.vmem [shape: f32[32,8], index: 11, kind: input, shape index: {}]   ;;  %s13082_s12 = inlined_call_operand.vmem [shape: f32[1,8], index: 12, kind: input, shape index: {}]   ;;  %s13083_s13 = inlined_call_operand.hbm [shape: f32[2,8], index: 13, kind: output, shape index: {}]  }
   0x1   :  { %v76_v0 = vld [vmem:[%s13077_s7] sm:$0xff]  ;;  %v78_v1 = vld [vmem:[%s13077_s7 + $0x8] sm:$0xff]  ;;  %v80_v2 = vld [vmem:[%s13077_s7 + $0x10] sm:$0xff] }
   0x2   :  { %77 = vst [vmem:[#allocation2] sm:$0xff] %v76_v0  ;;  %79 = vst [vmem:[#allocation2 + $0x8] sm:$0xff] %v78_v1  ;;  %v82_v3 = vld [vmem:[%s13077_s7 + $0x18] sm:$0xff]  ;;  %v84_v4 = vld [vmem:[%s13077_s7 + $0x20] sm:$0xff] }
   0x3   :  { %81 = vst [vmem:[#allocation2 + $0x10] sm:$0xff] %v80_v2  ;;  %83 = vst [vmem:[#allocation2 + $0x18] sm:$0xff] %v82_v3  ;;  %v86_v5 = vld [vmem:[%s13077_s7 + $0x28] sm:$0xff]  ;;  %v88_v6 = vld [vmem:[%s13077_s7 + $0x30] sm:$0xff] }
   0x4   :  { %85 = vst [vmem:[#allocation2 + $0x20] sm:$0xff] %v84_v4  ;;  %v90_v7 = vld [vmem:[%s13077_s7 + $0x38] sm:$0xff]  ;;  %87 = vst [vmem:[#allocation2 + $0x28] sm:$0xff] %v86_v5  ;;  %v92_v8 = vld [vmem:[%s13077_s7 + $0x40] sm:$0xff] }
   0x5   :  { %89 = vst [vmem:[#allocation2 + $0x30] sm:$0xff] %v88_v6  ;;  %91 = vst [vmem:[#allocation2 + $0x38] sm:$0xff] %v90_v7  ;;  %v94_v9 = vld [vmem:[%s13077_s7 + $0x48] sm:$0xff]  ;;  %v96_v10 = vld [vmem:[%s13077_s7 + $0x50] sm:$0xff] }
   0x6   :  { %93 = vst [vmem:[#allocation2 + $0x40] sm:$0xff] %v92_v8  ;;  %95 = vst [vmem:[#allocation2 + $0x48] sm:$0xff] %v94_v9  ;;  %v98_v11 = vld [vmem:[%s13077_s7 + $0x58] sm:$0xff]  ;;  %v100_v12 = vld [vmem:[%s13077_s7 + $0x60] sm:$0xff] }
   0x7   :  { %97 = vst [vmem:[#allocation2 + $0x50] sm:$0xff] %v96_v10  ;;  %v102_v13 = vld [vmem:[%s13077_s7 + $0x68] sm:$0xff]  ;;  %99 = vst [vmem:[#allocation2 + $0x58] sm:$0xff] %v98_v11  ;;  %v104_v14 = vld [vmem:[%s13077_s7 + $0x70] sm:$0xff] }
   0x8   :  { %101 = vst [vmem:[#allocation2 + $0x60] sm:$0xff] %v100_v12  ;;  %103 = vst [vmem:[#allocation2 + $0x68] sm:$0xff] %v102_v13  ;;  %v106_v15 = vld [vmem:[%s13077_s7 + $0x78] sm:$0xff]  ;;  %v108_v16 = vld [vmem:[%s13077_s7 + $0x80] sm:$0xff] }
   0x9   :  { %105 = vst [vmem:[#allocation2 + $0x70] sm:$0xff] %v104_v14  ;;  %107 = vst [vmem:[#allocation2 + $0x78] sm:$0xff] %v106_v15  ;;  %v110_v17 = vld [vmem:[%s13077_s7 + $0x88] sm:$0xff]  ;;  %v112_v18 = vld [vmem:[%s13077_s7 + $0x90] sm:$0xff] }
   0xa   :  { %109 = vst [vmem:[#allocation2 + $0x80] sm:$0xff] %v108_v16  ;;  %v114_v19 = vld [vmem:[%s13077_s7 + $0x98] sm:$0xff]  ;;  %111 = vst [vmem:[#allocation2 + $0x88] sm:$0xff] %v110_v17  ;;  %v116_v20 = vld [vmem:[%s13077_s7 + $0xa0] sm:$0xff] }
   0xb   :  { %113 = vst [vmem:[#allocation2 + $0x90] sm:$0xff] %v112_v18  ;;  %115 = vst [vmem:[#allocation2 + $0x98] sm:$0xff] %v114_v19  ;;  %v118_v21 = vld [vmem:[%s13077_s7 + $0xa8] sm:$0xff]  ;;  %v120_v22 = vld [vmem:[%s13077_s7 + $0xb0] sm:$0xff] }
   0xc   :  { %117 = vst [vmem:[#allocation2 + $0xa0] sm:$0xff] %v116_v20  ;;  %119 = vst [vmem:[#allocation2 + $0xa8] sm:$0xff] %v118_v21  ;;  %v122_v23 = vld [vmem:[%s13077_s7 + $0xb8] sm:$0xff]  ;;  %v124_v24 = vld [vmem:[%s13077_s7 + $0xc0] sm:$0xff] }
   0xd   :  { %121 = vst [vmem:[#allocation2 + $0xb0] sm:$0xff] %v120_v22  ;;  %v126_v25 = vld [vmem:[%s13077_s7 + $0xc8] sm:$0xff]  ;;  %123 = vst [vmem:[#allocation2 + $0xb8] sm:$0xff] %v122_v23  ;;  %v128_v26 = vld [vmem:[%s13077_s7 + $0xd0] sm:$0xff] }
   0xe   :  { %125 = vst [vmem:[#allocation2 + $0xc0] sm:$0xff] %v124_v24  ;;  %127 = vst [vmem:[#allocation2 + $0xc8] sm:$0xff] %v126_v25  ;;  %v130_v27 = vld [vmem:[%s13077_s7 + $0xd8] sm:$0xff]  ;;  %v132_v28 = vld [vmem:[%s13077_s7 + $0xe0] sm:$0xff] }
   0xf   :  { %129 = vst [vmem:[#allocation2 + $0xd0] sm:$0xff] %v128_v26  ;;  %131 = vst [vmem:[#allocation2 + $0xd8] sm:$0xff] %v130_v27  ;;  %v134_v29 = vld [vmem:[%s13077_s7 + $0xe8] sm:$0xff]  ;;  %v136_v30 = vld [vmem:[%s13077_s7 + $0xf0] sm:$0xff] }
  0x10   :  { %133 = vst [vmem:[#allocation2 + $0xe0] sm:$0xff] %v132_v28  ;;  %v138_v31 = vld [vmem:[%s13077_s7 + $0xf8] sm:$0xff]  ;;  %135 = vst [vmem:[#allocation2 + $0xe8] sm:$0xff] %v134_v29  ;;  %v140_v32 = vld [vmem:[%s13077_s7 + $0x100] sm:$0xff] }
  0x11   :  { %137 = vst [vmem:[#allocation2 + $0xf0] sm:$0xff] %v136_v30  ;;  %139 = vst [vmem:[#allocation2 + $0xf8] sm:$0xff] %v138_v31  ;;  %v142_v33 = vld [vmem:[%s13077_s7 + $0x108] sm:$0xff]  ;;  %v144_v34 = vld [vmem:[%s13077_s7 + $0x110] sm:$0xff] }
  0x12   :  { %141 = vst [vmem:[#allocation2 + $0x100] sm:$0xff] %v140_v32  ;;  %143 = vst [vmem:[#allocation2 + $0x108] sm:$0xff] %v142_v33  ;;  %v146_v35 = vld [vmem:[%s13077_s7 + $0x118] sm:$0xff]  ;;  %v148_v36 = vld [vmem:[%s13077_s7 + $0x120] sm:$0xff] }
  0x13   :  { %145 = vst [vmem:[#allocation2 + $0x110] sm:$0xff] %v144_v34  ;;  %v150_v37 = vld [vmem:[%s13077_s7 + $0x128] sm:$0xff]  ;;  %147 = vst [vmem:[#allocation2 + $0x118] sm:$0xff] %v146_v35  ;;  %v152_v38 = vld [vmem:[%s13077_s7 + $0x130] sm:$0xff] }
  0x14   :  { %149 = vst [vmem:[#allocation2 + $0x120] sm:$0xff] %v148_v36  ;;  %151 = vst [vmem:[#allocation2 + $0x128] sm:$0xff] %v150_v37  ;;  %v154_v39 = vld [vmem:[%s13077_s7 + $0x138] sm:$0xff]  ;;  %v156_v40 = vld [vmem:[%s13077_s7 + $0x140] sm:$0xff] }
  0x15   :  { %153 = vst [vmem:[#allocation2 + $0x130] sm:$0xff] %v152_v38  ;;  %155 = vst [vmem:[#allocation2 + $0x138] sm:$0xff] %v154_v39  ;;  %v158_v41 = vld [vmem:[%s13077_s7 + $0x148] sm:$0xff]  ;;  %v160_v42 = vld [vmem:[%s13077_s7 + $0x150] sm:$0xff] }
  0x16   :  { %157 = vst [vmem:[#allocation2 + $0x140] sm:$0xff] %v156_v40  ;;  %v162_v43 = vld [vmem:[%s13077_s7 + $0x158] sm:$0xff]  ;;  %159 = vst [vmem:[#allocation2 + $0x148] sm:$0xff] %v158_v41  ;;  %v164_v44 = vld [vmem:[%s13077_s7 + $0x160] sm:$0xff] }
  0x17   :  { %161 = vst [vmem:[#allocation2 + $0x150] sm:$0xff] %v160_v42  ;;  %163 = vst [vmem:[#allocation2 + $0x158] sm:$0xff] %v162_v43  ;;  %v166_v45 = vld [vmem:[%s13077_s7 + $0x168] sm:$0xff]  ;;  %v168_v46 = vld [vmem:[%s13077_s7 + $0x170] sm:$0xff] }
  0x18   :  { %165 = vst [vmem:[#allocation2 + $0x160] sm:$0xff] %v164_v44  ;;  %167 = vst [vmem:[#allocation2 + $0x168] sm:$0xff] %v166_v45  ;;  %v170_v47 = vld [vmem:[%s13077_s7 + $0x178] sm:$0xff]  ;;  %v172_v48 = vld [vmem:[%s13077_s7 + $0x180] sm:$0xff] }
  0x19   :  { %169 = vst [vmem:[#allocation2 + $0x170] sm:$0xff] %v168_v46  ;;  %v174_v49 = vld [vmem:[%s13077_s7 + $0x188] sm:$0xff]  ;;  %171 = vst [vmem:[#allocation2 + $0x178] sm:$0xff] %v170_v47  ;;  %v176_v50 = vld [vmem:[%s13077_s7 + $0x190] sm:$0xff] }
  0x1a   :  { %173 = vst [vmem:[#allocation2 + $0x180] sm:$0xff] %v172_v48  ;;  %175 = vst [vmem:[#allocation2 + $0x188] sm:$0xff] %v174_v49  ;;  %v178_v51 = vld [vmem:[%s13077_s7 + $0x198] sm:$0xff]  ;;  %v180_v52 = vld [vmem:[%s13077_s7 + $0x1a0] sm:$0xff] }
  0x1b   :  { %177 = vst [vmem:[#allocation2 + $0x190] sm:$0xff] %v176_v50  ;;  %179 = vst [vmem:[#allocation2 + $0x198] sm:$0xff] %v178_v51  ;;  %v182_v53 = vld [vmem:[%s13077_s7 + $0x1a8] sm:$0xff]  ;;  %v184_v54 = vld [vmem:[%s13077_s7 + $0x1b0] sm:$0xff] }
  0x1c   :  { %181 = vst [vmem:[#allocation2 + $0x1a0] sm:$0xff] %v180_v52  ;;  %v186_v55 = vld [vmem:[%s13077_s7 + $0x1b8] sm:$0xff]  ;;  %183 = vst [vmem:[#allocation2 + $0x1a8] sm:$0xff] %v182_v53  ;;  %v188_v56 = vld [vmem:[%s13077_s7 + $0x1c0] sm:$0xff] }
  0x1d   :  { %185 = vst [vmem:[#allocation2 + $0x1b0] sm:$0xff] %v184_v54  ;;  %187 = vst [vmem:[#allocation2 + $0x1b8] sm:$0xff] %v186_v55  ;;  %v190_v57 = vld [vmem:[%s13077_s7 + $0x1c8] sm:$0xff]  ;;  %v192_v58 = vld [vmem:[%s13077_s7 + $0x1d0] sm:$0xff] }
  0x1e   :  { %189 = vst [vmem:[#allocation2 + $0x1c0] sm:$0xff] %v188_v56  ;;  %191 = vst [vmem:[#allocation2 + $0x1c8] sm:$0xff] %v190_v57  ;;  %v194_v59 = vld [vmem:[%s13077_s7 + $0x1d8] sm:$0xff]  ;;  %v196_v60 = vld [vmem:[%s13077_s7 + $0x1e0] sm:$0xff] }
  0x1f   :  { %193 = vst [vmem:[#allocation2 + $0x1d0] sm:$0xff] %v192_v58  ;;  %v198_v61 = vld [vmem:[%s13077_s7 + $0x1e8] sm:$0xff]  ;;  %195 = vst [vmem:[#allocation2 + $0x1d8] sm:$0xff] %v194_v59  ;;  %v200_v62 = vld [vmem:[%s13077_s7 + $0x1f0] sm:$0xff] }
  0x20   :  { %197 = vst [vmem:[#allocation2 + $0x1e0] sm:$0xff] %v196_v60  ;;  %199 = vst [vmem:[#allocation2 + $0x1e8] sm:$0xff] %v198_v61  ;;  %v202_v63 = vld [vmem:[%s13077_s7 + $0x1f8] sm:$0xff]  ;;  %v204_v0 = vld [vmem:[%s13077_s7 + $0x200] sm:$0xff] }
  0x21   :  { %201 = vst [vmem:[#allocation2 + $0x1f0] sm:$0xff] %v200_v62  ;;  %203 = vst [vmem:[#allocation2 + $0x1f8] sm:$0xff] %v202_v63  ;;  %v206_v1 = vld [vmem:[%s13077_s7 + $0x208] sm:$0xff]  ;;  %v208_v2 = vld [vmem:[%s13077_s7 + $0x210] sm:$0xff] }
  0x22   :  { %205 = vst [vmem:[#allocation2 + $0x200] sm:$0xff] %v204_v0  ;;  %v210_v3 = vld [vmem:[%s13077_s7 + $0x218] sm:$0xff]  ;;  %207 = vst [vmem:[#allocation2 + $0x208] sm:$0xff] %v206_v1  ;;  %v212_v4 = vld [vmem:[%s13077_s7 + $0x220] sm:$0xff] }
  0x23   :  { %209 = vst [vmem:[#allocation2 + $0x210] sm:$0xff] %v208_v2  ;;  %211 = vst [vmem:[#allocation2 + $0x218] sm:$0xff] %v210_v3  ;;  %v214_v5 = vld [vmem:[%s13077_s7 + $0x228] sm:$0xff]  ;;  %v216_v6 = vld [vmem:[%s13077_s7 + $0x230] sm:$0xff] }
  0x24   :  { %213 = vst [vmem:[#allocation2 + $0x220] sm:$0xff] %v212_v4  ;;  %215 = vst [vmem:[#allocation2 + $0x228] sm:$0xff] %v214_v5  ;;  %v218_v7 = vld [vmem:[%s13077_s7 + $0x238] sm:$0xff]  ;;  %v220_v8 = vld [vmem:[%s13077_s7 + $0x240] sm:$0xff] }
  0x25   :  { %217 = vst [vmem:[#allocation2 + $0x230] sm:$0xff] %v216_v6  ;;  %v222_v9 = vld [vmem:[%s13077_s7 + $0x248] sm:$0xff]  ;;  %219 = vst [vmem:[#allocation2 + $0x238] sm:$0xff] %v218_v7  ;;  %v224_v10 = vld [vmem:[%s13077_s7 + $0x250] sm:$0xff] }
  0x26   :  { %221 = vst [vmem:[#allocation2 + $0x240] sm:$0xff] %v220_v8  ;;  %223 = vst [vmem:[#allocation2 + $0x248] sm:$0xff] %v222_v9  ;;  %v226_v11 = vld [vmem:[%s13077_s7 + $0x258] sm:$0xff]  ;;  %v228_v12 = vld [vmem:[%s13077_s7 + $0x260] sm:$0xff] }
  0x27   :  { %225 = vst [vmem:[#allocation2 + $0x250] sm:$0xff] %v224_v10  ;;  %227 = vst [vmem:[#allocation2 + $0x258] sm:$0xff] %v226_v11  ;;  %v230_v13 = vld [vmem:[%s13077_s7 + $0x268] sm:$0xff]  ;;  %v232_v14 = vld [vmem:[%s13077_s7 + $0x270] sm:$0xff] }
  0x28   :  { %229 = vst [vmem:[#allocation2 + $0x260] sm:$0xff] %v228_v12  ;;  %v234_v15 = vld [vmem:[%s13077_s7 + $0x278] sm:$0xff]  ;;  %231 = vst [vmem:[#allocation2 + $0x268] sm:$0xff] %v230_v13  ;;  %v236_v16 = vld [vmem:[%s13077_s7 + $0x280] sm:$0xff] }
  0x29   :  { %233 = vst [vmem:[#allocation2 + $0x270] sm:$0xff] %v232_v14  ;;  %235 = vst [vmem:[#allocation2 + $0x278] sm:$0xff] %v234_v15  ;;  %v238_v17 = vld [vmem:[%s13077_s7 + $0x288] sm:$0xff]  ;;  %v240_v18 = vld [vmem:[%s13077_s7 + $0x290] sm:$0xff] }
  0x2a   :  { %237 = vst [vmem:[#allocation2 + $0x280] sm:$0xff] %v236_v16  ;;  %239 = vst [vmem:[#allocation2 + $0x288] sm:$0xff] %v238_v17  ;;  %v242_v19 = vld [vmem:[%s13077_s7 + $0x298] sm:$0xff]  ;;  %v244_v20 = vld [vmem:[%s13077_s7 + $0x2a0] sm:$0xff] }
  0x2b   :  { %241 = vst [vmem:[#allocation2 + $0x290] sm:$0xff] %v240_v18  ;;  %v246_v21 = vld [vmem:[%s13077_s7 + $0x2a8] sm:$0xff]  ;;  %243 = vst [vmem:[#allocation2 + $0x298] sm:$0xff] %v242_v19  ;;  %v248_v22 = vld [vmem:[%s13077_s7 + $0x2b0] sm:$0xff] }
  0x2c   :  { %245 = vst [vmem:[#allocation2 + $0x2a0] sm:$0xff] %v244_v20  ;;  %247 = vst [vmem:[#allocation2 + $0x2a8] sm:$0xff] %v246_v21  ;;  %v250_v23 = vld [vmem:[%s13077_s7 + $0x2b8] sm:$0xff]  ;;  %v252_v24 = vld [vmem:[%s13077_s7 + $0x2c0] sm:$0xff] }
  0x2d   :  { %249 = vst [vmem:[#allocation2 + $0x2b0] sm:$0xff] %v248_v22  ;;  %251 = vst [vmem:[#allocation2 + $0x2b8] sm:$0xff] %v250_v23  ;;  %v254_v25 = vld [vmem:[%s13077_s7 + $0x2c8] sm:$0xff]  ;;  %v256_v26 = vld [vmem:[%s13077_s7 + $0x2d0] sm:$0xff] }
  0x2e   :  { %253 = vst [vmem:[#allocation2 + $0x2c0] sm:$0xff] %v252_v24  ;;  %v258_v27 = vld [vmem:[%s13077_s7 + $0x2d8] sm:$0xff]  ;;  %255 = vst [vmem:[#allocation2 + $0x2c8] sm:$0xff] %v254_v25  ;;  %v260_v28 = vld [vmem:[%s13077_s7 + $0x2e0] sm:$0xff] }
  0x2f   :  { %257 = vst [vmem:[#allocation2 + $0x2d0] sm:$0xff] %v256_v26  ;;  %259 = vst [vmem:[#allocation2 + $0x2d8] sm:$0xff] %v258_v27  ;;  %v262_v29 = vld [vmem:[%s13077_s7 + $0x2e8] sm:$0xff]  ;;  %v264_v30 = vld [vmem:[%s13077_s7 + $0x2f0] sm:$0xff] }
  0x30   :  { %261 = vst [vmem:[#allocation2 + $0x2e0] sm:$0xff] %v260_v28  ;;  %263 = vst [vmem:[#allocation2 + $0x2e8] sm:$0xff] %v262_v29  ;;  %v266_v31 = vld [vmem:[%s13077_s7 + $0x2f8] sm:$0xff]  ;;  %v268_v32 = vld [vmem:[%s13077_s7 + $0x300] sm:$0xff] }
  0x31   :  { %265 = vst [vmem:[#allocation2 + $0x2f0] sm:$0xff] %v264_v30  ;;  %v270_v33 = vld [vmem:[%s13077_s7 + $0x308] sm:$0xff]  ;;  %267 = vst [vmem:[#allocation2 + $0x2f8] sm:$0xff] %v266_v31  ;;  %v272_v34 = vld [vmem:[%s13077_s7 + $0x310] sm:$0xff] }
  0x32   :  { %269 = vst [vmem:[#allocation2 + $0x300] sm:$0xff] %v268_v32  ;;  %271 = vst [vmem:[#allocation2 + $0x308] sm:$0xff] %v270_v33  ;;  %v274_v35 = vld [vmem:[%s13077_s7 + $0x318] sm:$0xff]  ;;  %v276_v36 = vld [vmem:[%s13077_s7 + $0x320] sm:$0xff] }
  0x33   :  { %273 = vst [vmem:[#allocation2 + $0x310] sm:$0xff] %v272_v34  ;;  %275 = vst [vmem:[#allocation2 + $0x318] sm:$0xff] %v274_v35  ;;  %v278_v37 = vld [vmem:[%s13077_s7 + $0x328] sm:$0xff]  ;;  %v280_v38 = vld [vmem:[%s13077_s7 + $0x330] sm:$0xff] }
  0x34   :  { %277 = vst [vmem:[#allocation2 + $0x320] sm:$0xff] %v276_v36  ;;  %v282_v39 = vld [vmem:[%s13077_s7 + $0x338] sm:$0xff]  ;;  %279 = vst [vmem:[#allocation2 + $0x328] sm:$0xff] %v278_v37  ;;  %v284_v40 = vld [vmem:[%s13077_s7 + $0x340] sm:$0xff] }
  0x35   :  { %281 = vst [vmem:[#allocation2 + $0x330] sm:$0xff] %v280_v38  ;;  %283 = vst [vmem:[#allocation2 + $0x338] sm:$0xff] %v282_v39  ;;  %v286_v41 = vld [vmem:[%s13077_s7 + $0x348] sm:$0xff]  ;;  %v288_v42 = vld [vmem:[%s13077_s7 + $0x350] sm:$0xff] }
  0x36   :  { %285 = vst [vmem:[#allocation2 + $0x340] sm:$0xff] %v284_v40  ;;  %287 = vst [vmem:[#allocation2 + $0x348] sm:$0xff] %v286_v41  ;;  %v290_v43 = vld [vmem:[%s13077_s7 + $0x358] sm:$0xff]  ;;  %v292_v44 = vld [vmem:[%s13077_s7 + $0x360] sm:$0xff] }
  0x37   :  { %289 = vst [vmem:[#allocation2 + $0x350] sm:$0xff] %v288_v42  ;;  %v294_v45 = vld [vmem:[%s13077_s7 + $0x368] sm:$0xff]  ;;  %291 = vst [vmem:[#allocation2 + $0x358] sm:$0xff] %v290_v43  ;;  %v296_v46 = vld [vmem:[%s13077_s7 + $0x370] sm:$0xff] }
  0x38   :  { %293 = vst [vmem:[#allocation2 + $0x360] sm:$0xff] %v292_v44  ;;  %295 = vst [vmem:[#allocation2 + $0x368] sm:$0xff] %v294_v45  ;;  %v298_v47 = vld [vmem:[%s13077_s7 + $0x378] sm:$0xff]  ;;  %v300_v48 = vld [vmem:[%s13077_s7 + $0x380] sm:$0xff] }
  0x39   :  { %297 = vst [vmem:[#allocation2 + $0x370] sm:$0xff] %v296_v46  ;;  %299 = vst [vmem:[#allocation2 + $0x378] sm:$0xff] %v298_v47  ;;  %v302_v49 = vld [vmem:[%s13077_s7 + $0x388] sm:$0xff]  ;;  %v304_v50 = vld [vmem:[%s13077_s7 + $0x390] sm:$0xff] }
  0x3a   :  { %301 = vst [vmem:[#allocation2 + $0x380] sm:$0xff] %v300_v48  ;;  %v306_v51 = vld [vmem:[%s13077_s7 + $0x398] sm:$0xff]  ;;  %303 = vst [vmem:[#allocation2 + $0x388] sm:$0xff] %v302_v49  ;;  %v308_v52 = vld [vmem:[%s13077_s7 + $0x3a0] sm:$0xff] }
  0x3b   :  { %305 = vst [vmem:[#allocation2 + $0x390] sm:$0xff] %v304_v50  ;;  %307 = vst [vmem:[#allocation2 + $0x398] sm:$0xff] %v306_v51  ;;  %v310_v53 = vld [vmem:[%s13077_s7 + $0x3a8] sm:$0xff]  ;;  %v312_v54 = vld [vmem:[%s13077_s7 + $0x3b0] sm:$0xff] }
  0x3c   :  { %309 = vst [vmem:[#allocation2 + $0x3a0] sm:$0xff] %v308_v52  ;;  %311 = vst [vmem:[#allocation2 + $0x3a8] sm:$0xff] %v310_v53  ;;  %v314_v55 = vld [vmem:[%s13077_s7 + $0x3b8] sm:$0xff]  ;;  %v316_v56 = vld [vmem:[%s13077_s7 + $0x3c0] sm:$0xff] }
  0x3d   :  { %313 = vst [vmem:[#allocation2 + $0x3b0] sm:$0xff] %v312_v54  ;;  %v318_v57 = vld [vmem:[%s13077_s7 + $0x3c8] sm:$0xff]  ;;  %315 = vst [vmem:[#allocation2 + $0x3b8] sm:$0xff] %v314_v55  ;;  %v320_v58 = vld [vmem:[%s13077_s7 + $0x3d0] sm:$0xff] }
  0x3e   :  { %317 = vst [vmem:[#allocation2 + $0x3c0] sm:$0xff] %v316_v56  ;;  %319 = vst [vmem:[#allocation2 + $0x3c8] sm:$0xff] %v318_v57  ;;  %v322_v59 = vld [vmem:[%s13077_s7 + $0x3d8] sm:$0xff]  ;;  %v324_v60 = vld [vmem:[%s13077_s7 + $0x3e0] sm:$0xff] }
  0x3f   :  { %321 = vst [vmem:[#allocation2 + $0x3d0] sm:$0xff] %v320_v58  ;;  %323 = vst [vmem:[#allocation2 + $0x3d8] sm:$0xff] %v322_v59  ;;  %v326_v61 = vld [vmem:[%s13077_s7 + $0x3e8] sm:$0xff]  ;;  %v328_v62 = vld [vmem:[%s13077_s7 + $0x3f0] sm:$0xff] }
  0x40   :  { %325 = vst [vmem:[#allocation2 + $0x3e0] sm:$0xff] %v324_v60  ;;  %v330_v63 = vld [vmem:[%s13077_s7 + $0x3f8] sm:$0xff]  ;;  %327 = vst [vmem:[#allocation2 + $0x3e8] sm:$0xff] %v326_v61  ;;  %v332_v0 = vld [vmem:[%s13077_s7 + $0x400] sm:$0xff] }
  0x41   :  { %329 = vst [vmem:[#allocation2 + $0x3f0] sm:$0xff] %v328_v62  ;;  %331 = vst [vmem:[#allocation2 + $0x3f8] sm:$0xff] %v330_v63  ;;  %v334_v1 = vld [vmem:[%s13077_s7 + $0x408] sm:$0xff]  ;;  %v336_v2 = vld [vmem:[%s13077_s7 + $0x410] sm:$0xff] }
  0x42   :  { %333 = vst [vmem:[#allocation2 + $0x400] sm:$0xff] %v332_v0  ;;  %335 = vst [vmem:[#allocation2 + $0x408] sm:$0xff] %v334_v1  ;;  %v338_v3 = vld [vmem:[%s13077_s7 + $0x418] sm:$0xff]  ;;  %v340_v4 = vld [vmem:[%s13077_s7 + $0x420] sm:$0xff] }
  0x43   :  { %337 = vst [vmem:[#allocation2 + $0x410] sm:$0xff] %v336_v2  ;;  %v342_v5 = vld [vmem:[%s13077_s7 + $0x428] sm:$0xff]  ;;  %339 = vst [vmem:[#allocation2 + $0x418] sm:$0xff] %v338_v3  ;;  %v344_v6 = vld [vmem:[%s13077_s7 + $0x430] sm:$0xff] }
  0x44   :  { %341 = vst [vmem:[#allocation2 + $0x420] sm:$0xff] %v340_v4  ;;  %343 = vst [vmem:[#allocation2 + $0x428] sm:$0xff] %v342_v5  ;;  %v346_v7 = vld [vmem:[%s13077_s7 + $0x438] sm:$0xff]  ;;  %v348_v8 = vld [vmem:[%s13077_s7 + $0x440] sm:$0xff] }
  0x45   :  { %345 = vst [vmem:[#allocation2 + $0x430] sm:$0xff] %v344_v6  ;;  %347 = vst [vmem:[#allocation2 + $0x438] sm:$0xff] %v346_v7  ;;  %v350_v9 = vld [vmem:[%s13077_s7 + $0x448] sm:$0xff]  ;;  %v352_v10 = vld [vmem:[%s13077_s7 + $0x450] sm:$0xff] }
  0x46   :  { %349 = vst [vmem:[#allocation2 + $0x440] sm:$0xff] %v348_v8  ;;  %v354_v11 = vld [vmem:[%s13077_s7 + $0x458] sm:$0xff]  ;;  %351 = vst [vmem:[#allocation2 + $0x448] sm:$0xff] %v350_v9  ;;  %v356_v12 = vld [vmem:[%s13077_s7 + $0x460] sm:$0xff] }
  0x47   :  { %353 = vst [vmem:[#allocation2 + $0x450] sm:$0xff] %v352_v10  ;;  %355 = vst [vmem:[#allocation2 + $0x458] sm:$0xff] %v354_v11  ;;  %v358_v13 = vld [vmem:[%s13077_s7 + $0x468] sm:$0xff]  ;;  %v360_v14 = vld [vmem:[%s13077_s7 + $0x470] sm:$0xff] }
  0x48   :  { %357 = vst [vmem:[#allocation2 + $0x460] sm:$0xff] %v356_v12  ;;  %359 = vst [vmem:[#allocation2 + $0x468] sm:$0xff] %v358_v13  ;;  %v362_v15 = vld [vmem:[%s13077_s7 + $0x478] sm:$0xff]  ;;  %v364_v16 = vld [vmem:[%s13077_s7 + $0x480] sm:$0xff] }
  0x49   :  { %361 = vst [vmem:[#allocation2 + $0x470] sm:$0xff] %v360_v14  ;;  %v366_v17 = vld [vmem:[%s13077_s7 + $0x488] sm:$0xff]  ;;  %363 = vst [vmem:[#allocation2 + $0x478] sm:$0xff] %v362_v15  ;;  %v368_v18 = vld [vmem:[%s13077_s7 + $0x490] sm:$0xff] }
  0x4a   :  { %365 = vst [vmem:[#allocation2 + $0x480] sm:$0xff] %v364_v16  ;;  %367 = vst [vmem:[#allocation2 + $0x488] sm:$0xff] %v366_v17  ;;  %v370_v19 = vld [vmem:[%s13077_s7 + $0x498] sm:$0xff]  ;;  %v372_v20 = vld [vmem:[%s13077_s7 + $0x4a0] sm:$0xff] }
  0x4b   :  { %369 = vst [vmem:[#allocation2 + $0x490] sm:$0xff] %v368_v18  ;;  %371 = vst [vmem:[#allocation2 + $0x498] sm:$0xff] %v370_v19  ;;  %v374_v21 = vld [vmem:[%s13077_s7 + $0x4a8] sm:$0xff]  ;;  %v376_v22 = vld [vmem:[%s13077_s7 + $0x4b0] sm:$0xff] }
  0x4c   :  { %373 = vst [vmem:[#allocation2 + $0x4a0] sm:$0xff] %v372_v20  ;;  %v378_v23 = vld [vmem:[%s13077_s7 + $0x4b8] sm:$0xff]  ;;  %375 = vst [vmem:[#allocation2 + $0x4a8] sm:$0xff] %v374_v21  ;;  %v380_v24 = vld [vmem:[%s13077_s7 + $0x4c0] sm:$0xff] }
  0x4d   :  { %377 = vst [vmem:[#allocation2 + $0x4b0] sm:$0xff] %v376_v22  ;;  %379 = vst [vmem:[#allocation2 + $0x4b8] sm:$0xff] %v378_v23  ;;  %v382_v25 = vld [vmem:[%s13077_s7 + $0x4c8] sm:$0xff]  ;;  %v384_v26 = vld [vmem:[%s13077_s7 + $0x4d0] sm:$0xff] }
  0x4e   :  { %381 = vst [vmem:[#allocation2 + $0x4c0] sm:$0xff] %v380_v24  ;;  %383 = vst [vmem:[#allocation2 + $0x4c8] sm:$0xff] %v382_v25  ;;  %v386_v27 = vld [vmem:[%s13077_s7 + $0x4d8] sm:$0xff]  ;;  %v388_v28 = vld [vmem:[%s13077_s7 + $0x4e0] sm:$0xff] }
  0x4f   :  { %385 = vst [vmem:[#allocation2 + $0x4d0] sm:$0xff] %v384_v26  ;;  %v390_v29 = vld [vmem:[%s13077_s7 + $0x4e8] sm:$0xff]  ;;  %387 = vst [vmem:[#allocation2 + $0x4d8] sm:$0xff] %v386_v27  ;;  %v392_v30 = vld [vmem:[%s13077_s7 + $0x4f0] sm:$0xff] }
  0x50   :  { %389 = vst [vmem:[#allocation2 + $0x4e0] sm:$0xff] %v388_v28  ;;  %391 = vst [vmem:[#allocation2 + $0x4e8] sm:$0xff] %v390_v29  ;;  %v394_v31 = vld [vmem:[%s13077_s7 + $0x4f8] sm:$0xff]  ;;  %v396_v32 = vld [vmem:[%s13077_s7 + $0x500] sm:$0xff] }
  0x51   :  { %393 = vst [vmem:[#allocation2 + $0x4f0] sm:$0xff] %v392_v30  ;;  %395 = vst [vmem:[#allocation2 + $0x4f8] sm:$0xff] %v394_v31  ;;  %v398_v33 = vld [vmem:[%s13077_s7 + $0x508] sm:$0xff]  ;;  %v400_v34 = vld [vmem:[%s13077_s7 + $0x510] sm:$0xff] }
  0x52   :  { %397 = vst [vmem:[#allocation2 + $0x500] sm:$0xff] %v396_v32  ;;  %v402_v35 = vld [vmem:[%s13077_s7 + $0x518] sm:$0xff]  ;;  %399 = vst [vmem:[#allocation2 + $0x508] sm:$0xff] %v398_v33  ;;  %v404_v36 = vld [vmem:[%s13077_s7 + $0x520] sm:$0xff] }
  0x53   :  { %401 = vst [vmem:[#allocation2 + $0x510] sm:$0xff] %v400_v34  ;;  %403 = vst [vmem:[#allocation2 + $0x518] sm:$0xff] %v402_v35  ;;  %v406_v37 = vld [vmem:[%s13077_s7 + $0x528] sm:$0xff]  ;;  %v408_v38 = vld [vmem:[%s13077_s7 + $0x530] sm:$0xff] }
  0x54   :  { %405 = vst [vmem:[#allocation2 + $0x520] sm:$0xff] %v404_v36  ;;  %407 = vst [vmem:[#allocation2 + $0x528] sm:$0xff] %v406_v37  ;;  %v410_v39 = vld [vmem:[%s13077_s7 + $0x538] sm:$0xff]  ;;  %v412_v40 = vld [vmem:[%s13077_s7 + $0x540] sm:$0xff] }
  0x55   :  { %409 = vst [vmem:[#allocation2 + $0x530] sm:$0xff] %v408_v38  ;;  %v414_v41 = vld [vmem:[%s13077_s7 + $0x548] sm:$0xff]  ;;  %411 = vst [vmem:[#allocation2 + $0x538] sm:$0xff] %v410_v39  ;;  %v416_v42 = vld [vmem:[%s13077_s7 + $0x550] sm:$0xff] }
  0x56   :  { %413 = vst [vmem:[#allocation2 + $0x540] sm:$0xff] %v412_v40  ;;  %415 = vst [vmem:[#allocation2 + $0x548] sm:$0xff] %v414_v41  ;;  %v418_v43 = vld [vmem:[%s13077_s7 + $0x558] sm:$0xff]  ;;  %v420_v44 = vld [vmem:[%s13077_s7 + $0x560] sm:$0xff] }
  0x57   :  { %417 = vst [vmem:[#allocation2 + $0x550] sm:$0xff] %v416_v42  ;;  %419 = vst [vmem:[#allocation2 + $0x558] sm:$0xff] %v418_v43  ;;  %v422_v45 = vld [vmem:[%s13077_s7 + $0x568] sm:$0xff]  ;;  %v424_v46 = vld [vmem:[%s13077_s7 + $0x570] sm:$0xff] }
  0x58   :  { %421 = vst [vmem:[#allocation2 + $0x560] sm:$0xff] %v420_v44  ;;  %v426_v47 = vld [vmem:[%s13077_s7 + $0x578] sm:$0xff]  ;;  %423 = vst [vmem:[#allocation2 + $0x568] sm:$0xff] %v422_v45  ;;  %v428_v48 = vld [vmem:[%s13077_s7 + $0x580] sm:$0xff] }
  0x59   :  { %425 = vst [vmem:[#allocation2 + $0x570] sm:$0xff] %v424_v46  ;;  %427 = vst [vmem:[#allocation2 + $0x578] sm:$0xff] %v426_v47  ;;  %v430_v49 = vld [vmem:[%s13077_s7 + $0x588] sm:$0xff]  ;;  %v432_v50 = vld [vmem:[%s13077_s7 + $0x590] sm:$0xff] }
  0x5a   :  { %429 = vst [vmem:[#allocation2 + $0x580] sm:$0xff] %v428_v48  ;;  %431 = vst [vmem:[#allocation2 + $0x588] sm:$0xff] %v430_v49  ;;  %v434_v51 = vld [vmem:[%s13077_s7 + $0x598] sm:$0xff]  ;;  %v436_v52 = vld [vmem:[%s13077_s7 + $0x5a0] sm:$0xff] }
  0x5b   :  { %433 = vst [vmem:[#allocation2 + $0x590] sm:$0xff] %v432_v50  ;;  %v438_v53 = vld [vmem:[%s13077_s7 + $0x5a8] sm:$0xff]  ;;  %435 = vst [vmem:[#allocation2 + $0x598] sm:$0xff] %v434_v51  ;;  %v440_v54 = vld [vmem:[%s13077_s7 + $0x5b0] sm:$0xff] }
  0x5c   :  { %437 = vst [vmem:[#allocation2 + $0x5a0] sm:$0xff] %v436_v52  ;;  %439 = vst [vmem:[#allocation2 + $0x5a8] sm:$0xff] %v438_v53  ;;  %v442_v55 = vld [vmem:[%s13077_s7 + $0x5b8] sm:$0xff]  ;;  %v444_v56 = vld [vmem:[%s13077_s7 + $0x5c0] sm:$0xff] }
  0x5d   :  { %441 = vst [vmem:[#allocation2 + $0x5b0] sm:$0xff] %v440_v54  ;;  %443 = vst [vmem:[#allocation2 + $0x5b8] sm:$0xff] %v442_v55  ;;  %v446_v57 = vld [vmem:[%s13077_s7 + $0x5c8] sm:$0xff]  ;;  %v448_v58 = vld [vmem:[%s13077_s7 + $0x5d0] sm:$0xff] }
  0x5e   :  { %445 = vst [vmem:[#allocation2 + $0x5c0] sm:$0xff] %v444_v56  ;;  %v450_v59 = vld [vmem:[%s13077_s7 + $0x5d8] sm:$0xff]  ;;  %447 = vst [vmem:[#allocation2 + $0x5c8] sm:$0xff] %v446_v57  ;;  %v452_v60 = vld [vmem:[%s13077_s7 + $0x5e0] sm:$0xff] }
  0x5f   :  { %449 = vst [vmem:[#allocation2 + $0x5d0] sm:$0xff] %v448_v58  ;;  %451 = vst [vmem:[#allocation2 + $0x5d8] sm:$0xff] %v450_v59  ;;  %v454_v61 = vld [vmem:[%s13077_s7 + $0x5e8] sm:$0xff]  ;;  %v456_v62 = vld [vmem:[%s13077_s7 + $0x5f0] sm:$0xff] }
  0x60   :  { %453 = vst [vmem:[#allocation2 + $0x5e0] sm:$0xff] %v452_v60  ;;  %455 = vst [vmem:[#allocation2 + $0x5e8] sm:$0xff] %v454_v61  ;;  %v458_v63 = vld [vmem:[%s13077_s7 + $0x5f8] sm:$0xff]  ;;  %v460_v0 = vld [vmem:[%s13077_s7 + $0x600] sm:$0xff] }
  0x61   :  { %457 = vst [vmem:[#allocation2 + $0x5f0] sm:$0xff] %v456_v62  ;;  %v462_v1 = vld [vmem:[%s13077_s7 + $0x608] sm:$0xff]  ;;  %459 = vst [vmem:[#allocation2 + $0x5f8] sm:$0xff] %v458_v63  ;;  %v464_v2 = vld [vmem:[%s13077_s7 + $0x610] sm:$0xff] }
  0x62   :  { %461 = vst [vmem:[#allocation2 + $0x600] sm:$0xff] %v460_v0  ;;  %463 = vst [vmem:[#allocation2 + $0x608] sm:$0xff] %v462_v1  ;;  %v466_v3 = vld [vmem:[%s13077_s7 + $0x618] sm:$0xff]  ;;  %v468_v4 = vld [vmem:[%s13077_s7 + $0x620] sm:$0xff] }
  0x63   :  { %465 = vst [vmem:[#allocation2 + $0x610] sm:$0xff] %v464_v2  ;;  %467 = vst [vmem:[#allocation2 + $0x618] sm:$0xff] %v466_v3  ;;  %v470_v5 = vld [vmem:[%s13077_s7 + $0x628] sm:$0xff]  ;;  %v472_v6 = vld [vmem:[%s13077_s7 + $0x630] sm:$0xff] }
  0x64   :  { %469 = vst [vmem:[#allocation2 + $0x620] sm:$0xff] %v468_v4  ;;  %v474_v7 = vld [vmem:[%s13077_s7 + $0x638] sm:$0xff]  ;;  %471 = vst [vmem:[#allocation2 + $0x628] sm:$0xff] %v470_v5  ;;  %v476_v8 = vld [vmem:[%s13077_s7 + $0x640] sm:$0xff] }
  0x65   :  { %473 = vst [vmem:[#allocation2 + $0x630] sm:$0xff] %v472_v6  ;;  %475 = vst [vmem:[#allocation2 + $0x638] sm:$0xff] %v474_v7  ;;  %v478_v9 = vld [vmem:[%s13077_s7 + $0x648] sm:$0xff]  ;;  %v480_v10 = vld [vmem:[%s13077_s7 + $0x650] sm:$0xff] }
  0x66   :  { %477 = vst [vmem:[#allocation2 + $0x640] sm:$0xff] %v476_v8  ;;  %479 = vst [vmem:[#allocation2 + $0x648] sm:$0xff] %v478_v9  ;;  %v482_v11 = vld [vmem:[%s13077_s7 + $0x658] sm:$0xff]  ;;  %v484_v12 = vld [vmem:[%s13077_s7 + $0x660] sm:$0xff] }
  0x67   :  { %481 = vst [vmem:[#allocation2 + $0x650] sm:$0xff] %v480_v10  ;;  %v486_v13 = vld [vmem:[%s13077_s7 + $0x668] sm:$0xff]  ;;  %483 = vst [vmem:[#allocation2 + $0x658] sm:$0xff] %v482_v11  ;;  %v488_v14 = vld [vmem:[%s13077_s7 + $0x670] sm:$0xff] }
  0x68   :  { %485 = vst [vmem:[#allocation2 + $0x660] sm:$0xff] %v484_v12  ;;  %487 = vst [vmem:[#allocation2 + $0x668] sm:$0xff] %v486_v13  ;;  %v490_v15 = vld [vmem:[%s13077_s7 + $0x678] sm:$0xff]  ;;  %v492_v16 = vld [vmem:[%s13077_s7 + $0x680] sm:$0xff] }
  0x69   :  { %489 = vst [vmem:[#allocation2 + $0x670] sm:$0xff] %v488_v14  ;;  %491 = vst [vmem:[#allocation2 + $0x678] sm:$0xff] %v490_v15  ;;  %v494_v17 = vld [vmem:[%s13077_s7 + $0x688] sm:$0xff]  ;;  %v496_v18 = vld [vmem:[%s13077_s7 + $0x690] sm:$0xff] }
  0x6a   :  { %493 = vst [vmem:[#allocation2 + $0x680] sm:$0xff] %v492_v16  ;;  %v498_v19 = vld [vmem:[%s13077_s7 + $0x698] sm:$0xff]  ;;  %495 = vst [vmem:[#allocation2 + $0x688] sm:$0xff] %v494_v17  ;;  %v500_v20 = vld [vmem:[%s13077_s7 + $0x6a0] sm:$0xff] }
  0x6b   :  { %497 = vst [vmem:[#allocation2 + $0x690] sm:$0xff] %v496_v18  ;;  %499 = vst [vmem:[#allocation2 + $0x698] sm:$0xff] %v498_v19  ;;  %v502_v21 = vld [vmem:[%s13077_s7 + $0x6a8] sm:$0xff]  ;;  %v504_v22 = vld [vmem:[%s13077_s7 + $0x6b0] sm:$0xff] }
  0x6c   :  { %501 = vst [vmem:[#allocation2 + $0x6a0] sm:$0xff] %v500_v20  ;;  %503 = vst [vmem:[#allocation2 + $0x6a8] sm:$0xff] %v502_v21  ;;  %v506_v23 = vld [vmem:[%s13077_s7 + $0x6b8] sm:$0xff]  ;;  %v508_v24 = vld [vmem:[%s13077_s7 + $0x6c0] sm:$0xff] }
  0x6d   :  { %505 = vst [vmem:[#allocation2 + $0x6b0] sm:$0xff] %v504_v22  ;;  %v510_v25 = vld [vmem:[%s13077_s7 + $0x6c8] sm:$0xff]  ;;  %507 = vst [vmem:[#allocation2 + $0x6b8] sm:$0xff] %v506_v23  ;;  %v512_v26 = vld [vmem:[%s13077_s7 + $0x6d0] sm:$0xff] }
  0x6e   :  { %509 = vst [vmem:[#allocation2 + $0x6c0] sm:$0xff] %v508_v24  ;;  %511 = vst [vmem:[#allocation2 + $0x6c8] sm:$0xff] %v510_v25  ;;  %v514_v27 = vld [vmem:[%s13077_s7 + $0x6d8] sm:$0xff]  ;;  %v516_v28 = vld [vmem:[%s13077_s7 + $0x6e0] sm:$0xff] }
  0x6f   :  { %513 = vst [vmem:[#allocation2 + $0x6d0] sm:$0xff] %v512_v26  ;;  %515 = vst [vmem:[#allocation2 + $0x6d8] sm:$0xff] %v514_v27  ;;  %v518_v29 = vld [vmem:[%s13077_s7 + $0x6e8] sm:$0xff]  ;;  %v520_v30 = vld [vmem:[%s13077_s7 + $0x6f0] sm:$0xff] }
  0x70   :  { %517 = vst [vmem:[#allocation2 + $0x6e0] sm:$0xff] %v516_v28  ;;  %v522_v31 = vld [vmem:[%s13077_s7 + $0x6f8] sm:$0xff]  ;;  %519 = vst [vmem:[#allocation2 + $0x6e8] sm:$0xff] %v518_v29  ;;  %v524_v32 = vld [vmem:[%s13077_s7 + $0x700] sm:$0xff] }
  0x71   :  { %521 = vst [vmem:[#allocation2 + $0x6f0] sm:$0xff] %v520_v30  ;;  %523 = vst [vmem:[#allocation2 + $0x6f8] sm:$0xff] %v522_v31  ;;  %v526_v33 = vld [vmem:[%s13077_s7 + $0x708] sm:$0xff]  ;;  %v528_v34 = vld [vmem:[%s13077_s7 + $0x710] sm:$0xff] }
  0x72   :  { %525 = vst [vmem:[#allocation2 + $0x700] sm:$0xff] %v524_v32  ;;  %527 = vst [vmem:[#allocation2 + $0x708] sm:$0xff] %v526_v33  ;;  %v530_v35 = vld [vmem:[%s13077_s7 + $0x718] sm:$0xff]  ;;  %v532_v36 = vld [vmem:[%s13077_s7 + $0x720] sm:$0xff] }
  0x73   :  { %529 = vst [vmem:[#allocation2 + $0x710] sm:$0xff] %v528_v34  ;;  %v534_v37 = vld [vmem:[%s13077_s7 + $0x728] sm:$0xff]  ;;  %531 = vst [vmem:[#allocation2 + $0x718] sm:$0xff] %v530_v35  ;;  %v536_v38 = vld [vmem:[%s13077_s7 + $0x730] sm:$0xff] }
  0x74   :  { %533 = vst [vmem:[#allocation2 + $0x720] sm:$0xff] %v532_v36  ;;  %535 = vst [vmem:[#allocation2 + $0x728] sm:$0xff] %v534_v37  ;;  %v538_v39 = vld [vmem:[%s13077_s7 + $0x738] sm:$0xff]  ;;  %v540_v40 = vld [vmem:[%s13077_s7 + $0x740] sm:$0xff] }
  0x75   :  { %537 = vst [vmem:[#allocation2 + $0x730] sm:$0xff] %v536_v38  ;;  %539 = vst [vmem:[#allocation2 + $0x738] sm:$0xff] %v538_v39  ;;  %v542_v41 = vld [vmem:[%s13077_s7 + $0x748] sm:$0xff]  ;;  %v544_v42 = vld [vmem:[%s13077_s7 + $0x750] sm:$0xff] }
  0x76   :  { %541 = vst [vmem:[#allocation2 + $0x740] sm:$0xff] %v540_v40  ;;  %v546_v43 = vld [vmem:[%s13077_s7 + $0x758] sm:$0xff]  ;;  %543 = vst [vmem:[#allocation2 + $0x748] sm:$0xff] %v542_v41  ;;  %v548_v44 = vld [vmem:[%s13077_s7 + $0x760] sm:$0xff] }
  0x77   :  { %545 = vst [vmem:[#allocation2 + $0x750] sm:$0xff] %v544_v42  ;;  %547 = vst [vmem:[#allocation2 + $0x758] sm:$0xff] %v546_v43  ;;  %v550_v45 = vld [vmem:[%s13077_s7 + $0x768] sm:$0xff]  ;;  %v552_v46 = vld [vmem:[%s13077_s7 + $0x770] sm:$0xff] }
  0x78   :  { %549 = vst [vmem:[#allocation2 + $0x760] sm:$0xff] %v548_v44  ;;  %551 = vst [vmem:[#allocation2 + $0x768] sm:$0xff] %v550_v45  ;;  %v554_v47 = vld [vmem:[%s13077_s7 + $0x778] sm:$0xff]  ;;  %v556_v48 = vld [vmem:[%s13077_s7 + $0x780] sm:$0xff] }
  0x79   :  { %553 = vst [vmem:[#allocation2 + $0x770] sm:$0xff] %v552_v46  ;;  %v558_v49 = vld [vmem:[%s13077_s7 + $0x788] sm:$0xff]  ;;  %555 = vst [vmem:[#allocation2 + $0x778] sm:$0xff] %v554_v47  ;;  %v560_v50 = vld [vmem:[%s13077_s7 + $0x790] sm:$0xff] }
  0x7a   :  { %557 = vst [vmem:[#allocation2 + $0x780] sm:$0xff] %v556_v48  ;;  %559 = vst [vmem:[#allocation2 + $0x788] sm:$0xff] %v558_v49  ;;  %v562_v51 = vld [vmem:[%s13077_s7 + $0x798] sm:$0xff]  ;;  %v564_v52 = vld [vmem:[%s13077_s7 + $0x7a0] sm:$0xff] }
  0x7b   :  { %561 = vst [vmem:[#allocation2 + $0x790] sm:$0xff] %v560_v50  ;;  %563 = vst [vmem:[#allocation2 + $0x798] sm:$0xff] %v562_v51  ;;  %v566_v53 = vld [vmem:[%s13077_s7 + $0x7a8] sm:$0xff]  ;;  %v568_v54 = vld [vmem:[%s13077_s7 + $0x7b0] sm:$0xff] }
  0x7c   :  { %565 = vst [vmem:[#allocation2 + $0x7a0] sm:$0xff] %v564_v52  ;;  %v570_v55 = vld [vmem:[%s13077_s7 + $0x7b8] sm:$0xff]  ;;  %567 = vst [vmem:[#allocation2 + $0x7a8] sm:$0xff] %v566_v53  ;;  %v572_v56 = vld [vmem:[%s13077_s7 + $0x7c0] sm:$0xff] }
  0x7d   :  { %569 = vst [vmem:[#allocation2 + $0x7b0] sm:$0xff] %v568_v54  ;;  %571 = vst [vmem:[#allocation2 + $0x7b8] sm:$0xff] %v570_v55  ;;  %v574_v57 = vld [vmem:[%s13077_s7 + $0x7c8] sm:$0xff]  ;;  %v576_v58 = vld [vmem:[%s13077_s7 + $0x7d0] sm:$0xff] }
  0x7e   :  { %573 = vst [vmem:[#allocation2 + $0x7c0] sm:$0xff] %v572_v56  ;;  %575 = vst [vmem:[#allocation2 + $0x7c8] sm:$0xff] %v574_v57  ;;  %v578_v59 = vld [vmem:[%s13077_s7 + $0x7d8] sm:$0xff]  ;;  %v580_v60 = vld [vmem:[%s13077_s7 + $0x7e0] sm:$0xff] }
  0x7f   :  { %577 = vst [vmem:[#allocation2 + $0x7d0] sm:$0xff] %v576_v58  ;;  %v582_v61 = vld [vmem:[%s13077_s7 + $0x7e8] sm:$0xff]  ;;  %579 = vst [vmem:[#allocation2 + $0x7d8] sm:$0xff] %v578_v59  ;;  %v584_v62 = vld [vmem:[%s13077_s7 + $0x7f0] sm:$0xff] }
  0x80   :  { %581 = vst [vmem:[#allocation2 + $0x7e0] sm:$0xff] %v580_v60  ;;  %583 = vst [vmem:[#allocation2 + $0x7e8] sm:$0xff] %v582_v61  ;;  %v586_v63 = vld [vmem:[%s13077_s7 + $0x7f8] sm:$0xff]  ;;  %v588_v0 = vld [vmem:[%s13077_s7 + $0x800] sm:$0xff] }
  0x81   :  { %585 = vst [vmem:[#allocation2 + $0x7f0] sm:$0xff] %v584_v62  ;;  %587 = vst [vmem:[#allocation2 + $0x7f8] sm:$0xff] %v586_v63  ;;  %v590_v1 = vld [vmem:[%s13077_s7 + $0x808] sm:$0xff]  ;;  %v592_v2 = vld [vmem:[%s13077_s7 + $0x810] sm:$0xff] }
  0x82   :  { %589 = vst [vmem:[#allocation2 + $0x800] sm:$0xff] %v588_v0  ;;  %v594_v3 = vld [vmem:[%s13077_s7 + $0x818] sm:$0xff]  ;;  %591 = vst [vmem:[#allocation2 + $0x808] sm:$0xff] %v590_v1  ;;  %v596_v4 = vld [vmem:[%s13077_s7 + $0x820] sm:$0xff] }
  0x83   :  { %593 = vst [vmem:[#allocation2 + $0x810] sm:$0xff] %v592_v2  ;;  %595 = vst [vmem:[#allocation2 + $0x818] sm:$0xff] %v594_v3  ;;  %v598_v5 = vld [vmem:[%s13077_s7 + $0x828] sm:$0xff]  ;;  %v600_v6 = vld [vmem:[%s13077_s7 + $0x830] sm:$0xff] }
  0x84   :  { %597 = vst [vmem:[#allocation2 + $0x820] sm:$0xff] %v596_v4  ;;  %599 = vst [vmem:[#allocation2 + $0x828] sm:$0xff] %v598_v5  ;;  %v602_v7 = vld [vmem:[%s13077_s7 + $0x838] sm:$0xff]  ;;  %v604_v8 = vld [vmem:[%s13077_s7 + $0x840] sm:$0xff] }
  0x85   :  { %601 = vst [vmem:[#allocation2 + $0x830] sm:$0xff] %v600_v6  ;;  %v606_v9 = vld [vmem:[%s13077_s7 + $0x848] sm:$0xff]  ;;  %603 = vst [vmem:[#allocation2 + $0x838] sm:$0xff] %v602_v7  ;;  %v608_v10 = vld [vmem:[%s13077_s7 + $0x850] sm:$0xff] }
  0x86   :  { %605 = vst [vmem:[#allocation2 + $0x840] sm:$0xff] %v604_v8  ;;  %607 = vst [vmem:[#allocation2 + $0x848] sm:$0xff] %v606_v9  ;;  %v610_v11 = vld [vmem:[%s13077_s7 + $0x858] sm:$0xff]  ;;  %v612_v12 = vld [vmem:[%s13077_s7 + $0x860] sm:$0xff] }
  0x87   :  { %609 = vst [vmem:[#allocation2 + $0x850] sm:$0xff] %v608_v10  ;;  %611 = vst [vmem:[#allocation2 + $0x858] sm:$0xff] %v610_v11  ;;  %v614_v13 = vld [vmem:[%s13077_s7 + $0x868] sm:$0xff]  ;;  %v616_v14 = vld [vmem:[%s13077_s7 + $0x870] sm:$0xff] }
  0x88   :  { %613 = vst [vmem:[#allocation2 + $0x860] sm:$0xff] %v612_v12  ;;  %v618_v15 = vld [vmem:[%s13077_s7 + $0x878] sm:$0xff]  ;;  %615 = vst [vmem:[#allocation2 + $0x868] sm:$0xff] %v614_v13  ;;  %v620_v16 = vld [vmem:[%s13077_s7 + $0x880] sm:$0xff] }
  0x89   :  { %617 = vst [vmem:[#allocation2 + $0x870] sm:$0xff] %v616_v14  ;;  %619 = vst [vmem:[#allocation2 + $0x878] sm:$0xff] %v618_v15  ;;  %v622_v17 = vld [vmem:[%s13077_s7 + $0x888] sm:$0xff]  ;;  %v624_v18 = vld [vmem:[%s13077_s7 + $0x890] sm:$0xff] }
  0x8a   :  { %621 = vst [vmem:[#allocation2 + $0x880] sm:$0xff] %v620_v16  ;;  %623 = vst [vmem:[#allocation2 + $0x888] sm:$0xff] %v622_v17  ;;  %v626_v19 = vld [vmem:[%s13077_s7 + $0x898] sm:$0xff]  ;;  %v628_v20 = vld [vmem:[%s13077_s7 + $0x8a0] sm:$0xff] }
  0x8b   :  { %625 = vst [vmem:[#allocation2 + $0x890] sm:$0xff] %v624_v18  ;;  %v630_v21 = vld [vmem:[%s13077_s7 + $0x8a8] sm:$0xff]  ;;  %627 = vst [vmem:[#allocation2 + $0x898] sm:$0xff] %v626_v19  ;;  %v632_v22 = vld [vmem:[%s13077_s7 + $0x8b0] sm:$0xff] }
  0x8c   :  { %629 = vst [vmem:[#allocation2 + $0x8a0] sm:$0xff] %v628_v20  ;;  %631 = vst [vmem:[#allocation2 + $0x8a8] sm:$0xff] %v630_v21  ;;  %v634_v23 = vld [vmem:[%s13077_s7 + $0x8b8] sm:$0xff]  ;;  %v636_v24 = vld [vmem:[%s13077_s7 + $0x8c0] sm:$0xff] }
  0x8d   :  { %633 = vst [vmem:[#allocation2 + $0x8b0] sm:$0xff] %v632_v22  ;;  %635 = vst [vmem:[#allocation2 + $0x8b8] sm:$0xff] %v634_v23  ;;  %v638_v25 = vld [vmem:[%s13077_s7 + $0x8c8] sm:$0xff]  ;;  %v640_v26 = vld [vmem:[%s13077_s7 + $0x8d0] sm:$0xff] }
  0x8e   :  { %637 = vst [vmem:[#allocation2 + $0x8c0] sm:$0xff] %v636_v24  ;;  %v642_v27 = vld [vmem:[%s13077_s7 + $0x8d8] sm:$0xff]  ;;  %639 = vst [vmem:[#allocation2 + $0x8c8] sm:$0xff] %v638_v25  ;;  %v644_v28 = vld [vmem:[%s13077_s7 + $0x8e0] sm:$0xff] }
  0x8f   :  { %641 = vst [vmem:[#allocation2 + $0x8d0] sm:$0xff] %v640_v26  ;;  %643 = vst [vmem:[#allocation2 + $0x8d8] sm:$0xff] %v642_v27  ;;  %v646_v29 = vld [vmem:[%s13077_s7 + $0x8e8] sm:$0xff]  ;;  %v648_v30 = vld [vmem:[%s13077_s7 + $0x8f0] sm:$0xff] }
  0x90   :  { %645 = vst [vmem:[#allocation2 + $0x8e0] sm:$0xff] %v644_v28  ;;  %647 = vst [vmem:[#allocation2 + $0x8e8] sm:$0xff] %v646_v29  ;;  %v650_v31 = vld [vmem:[%s13077_s7 + $0x8f8] sm:$0xff]  ;;  %v652_v32 = vld [vmem:[%s13077_s7 + $0x900] sm:$0xff] }
  0x91   :  { %649 = vst [vmem:[#allocation2 + $0x8f0] sm:$0xff] %v648_v30  ;;  %v654_v33 = vld [vmem:[%s13077_s7 + $0x908] sm:$0xff]  ;;  %651 = vst [vmem:[#allocation2 + $0x8f8] sm:$0xff] %v650_v31  ;;  %v656_v34 = vld [vmem:[%s13077_s7 + $0x910] sm:$0xff] }
  0x92   :  { %653 = vst [vmem:[#allocation2 + $0x900] sm:$0xff] %v652_v32  ;;  %655 = vst [vmem:[#allocation2 + $0x908] sm:$0xff] %v654_v33  ;;  %v658_v35 = vld [vmem:[%s13077_s7 + $0x918] sm:$0xff]  ;;  %v660_v36 = vld [vmem:[%s13077_s7 + $0x920] sm:$0xff] }
  0x93   :  { %657 = vst [vmem:[#allocation2 + $0x910] sm:$0xff] %v656_v34  ;;  %659 = vst [vmem:[#allocation2 + $0x918] sm:$0xff] %v658_v35  ;;  %v662_v37 = vld [vmem:[%s13077_s7 + $0x928] sm:$0xff]  ;;  %v664_v38 = vld [vmem:[%s13077_s7 + $0x930] sm:$0xff] }
  0x94   :  { %661 = vst [vmem:[#allocation2 + $0x920] sm:$0xff] %v660_v36  ;;  %v666_v39 = vld [vmem:[%s13077_s7 + $0x938] sm:$0xff]  ;;  %663 = vst [vmem:[#allocation2 + $0x928] sm:$0xff] %v662_v37  ;;  %v668_v40 = vld [vmem:[%s13077_s7 + $0x940] sm:$0xff] }
  0x95   :  { %665 = vst [vmem:[#allocation2 + $0x930] sm:$0xff] %v664_v38  ;;  %667 = vst [vmem:[#allocation2 + $0x938] sm:$0xff] %v666_v39  ;;  %v670_v41 = vld [vmem:[%s13077_s7 + $0x948] sm:$0xff]  ;;  %v672_v42 = vld [vmem:[%s13077_s7 + $0x950] sm:$0xff] }
  0x96   :  { %669 = vst [vmem:[#allocation2 + $0x940] sm:$0xff] %v668_v40  ;;  %671 = vst [vmem:[#allocation2 + $0x948] sm:$0xff] %v670_v41  ;;  %v674_v43 = vld [vmem:[%s13077_s7 + $0x958] sm:$0xff]  ;;  %v676_v44 = vld [vmem:[%s13077_s7 + $0x960] sm:$0xff] }
  0x97   :  { %673 = vst [vmem:[#allocation2 + $0x950] sm:$0xff] %v672_v42  ;;  %v678_v45 = vld [vmem:[%s13077_s7 + $0x968] sm:$0xff]  ;;  %675 = vst [vmem:[#allocation2 + $0x958] sm:$0xff] %v674_v43  ;;  %v680_v46 = vld [vmem:[%s13077_s7 + $0x970] sm:$0xff] }
  0x98   :  { %677 = vst [vmem:[#allocation2 + $0x960] sm:$0xff] %v676_v44  ;;  %679 = vst [vmem:[#allocation2 + $0x968] sm:$0xff] %v678_v45  ;;  %v682_v47 = vld [vmem:[%s13077_s7 + $0x978] sm:$0xff]  ;;  %v684_v48 = vld [vmem:[%s13077_s7 + $0x980] sm:$0xff] }
  0x99   :  { %681 = vst [vmem:[#allocation2 + $0x970] sm:$0xff] %v680_v46  ;;  %683 = vst [vmem:[#allocation2 + $0x978] sm:$0xff] %v682_v47  ;;  %v686_v49 = vld [vmem:[%s13077_s7 + $0x988] sm:$0xff]  ;;  %v688_v50 = vld [vmem:[%s13077_s7 + $0x990] sm:$0xff] }
  0x9a   :  { %685 = vst [vmem:[#allocation2 + $0x980] sm:$0xff] %v684_v48  ;;  %v690_v51 = vld [vmem:[%s13077_s7 + $0x998] sm:$0xff]  ;;  %687 = vst [vmem:[#allocation2 + $0x988] sm:$0xff] %v686_v49  ;;  %v692_v52 = vld [vmem:[%s13077_s7 + $0x9a0] sm:$0xff] }
  0x9b   :  { %689 = vst [vmem:[#allocation2 + $0x990] sm:$0xff] %v688_v50  ;;  %691 = vst [vmem:[#allocation2 + $0x998] sm:$0xff] %v690_v51  ;;  %v694_v53 = vld [vmem:[%s13077_s7 + $0x9a8] sm:$0xff]  ;;  %v696_v54 = vld [vmem:[%s13077_s7 + $0x9b0] sm:$0xff] }
  0x9c   :  { %693 = vst [vmem:[#allocation2 + $0x9a0] sm:$0xff] %v692_v52  ;;  %695 = vst [vmem:[#allocation2 + $0x9a8] sm:$0xff] %v694_v53  ;;  %v698_v55 = vld [vmem:[%s13077_s7 + $0x9b8] sm:$0xff]  ;;  %v700_v56 = vld [vmem:[%s13077_s7 + $0x9c0] sm:$0xff] }
  0x9d   :  { %697 = vst [vmem:[#allocation2 + $0x9b0] sm:$0xff] %v696_v54  ;;  %v702_v57 = vld [vmem:[%s13077_s7 + $0x9c8] sm:$0xff]  ;;  %699 = vst [vmem:[#allocation2 + $0x9b8] sm:$0xff] %v698_v55  ;;  %v704_v58 = vld [vmem:[%s13077_s7 + $0x9d0] sm:$0xff] }
  0x9e   :  { %701 = vst [vmem:[#allocation2 + $0x9c0] sm:$0xff] %v700_v56  ;;  %703 = vst [vmem:[#allocation2 + $0x9c8] sm:$0xff] %v702_v57  ;;  %v706_v59 = vld [vmem:[%s13077_s7 + $0x9d8] sm:$0xff]  ;;  %v708_v60 = vld [vmem:[%s13077_s7 + $0x9e0] sm:$0xff] }
  0x9f   :  { %705 = vst [vmem:[#allocation2 + $0x9d0] sm:$0xff] %v704_v58  ;;  %707 = vst [vmem:[#allocation2 + $0x9d8] sm:$0xff] %v706_v59  ;;  %v710_v61 = vld [vmem:[%s13077_s7 + $0x9e8] sm:$0xff]  ;;  %v712_v62 = vld [vmem:[%s13077_s7 + $0x9f0] sm:$0xff] }
  0xa0   :  { %709 = vst [vmem:[#allocation2 + $0x9e0] sm:$0xff] %v708_v60  ;;  %v714_v63 = vld [vmem:[%s13077_s7 + $0x9f8] sm:$0xff]  ;;  %711 = vst [vmem:[#allocation2 + $0x9e8] sm:$0xff] %v710_v61  ;;  %v716_v0 = vld [vmem:[%s13077_s7 + $0xa00] sm:$0xff] }
  0xa1   :  { %713 = vst [vmem:[#allocation2 + $0x9f0] sm:$0xff] %v712_v62  ;;  %715 = vst [vmem:[#allocation2 + $0x9f8] sm:$0xff] %v714_v63  ;;  %v718_v1 = vld [vmem:[%s13077_s7 + $0xa08] sm:$0xff]  ;;  %v720_v2 = vld [vmem:[%s13077_s7 + $0xa10] sm:$0xff] }
  0xa2   :  { %717 = vst [vmem:[#allocation2 + $0xa00] sm:$0xff] %v716_v0  ;;  %719 = vst [vmem:[#allocation2 + $0xa08] sm:$0xff] %v718_v1  ;;  %v722_v3 = vld [vmem:[%s13077_s7 + $0xa18] sm:$0xff]  ;;  %v724_v4 = vld [vmem:[%s13077_s7 + $0xa20] sm:$0xff] }
  0xa3   :  { %721 = vst [vmem:[#allocation2 + $0xa10] sm:$0xff] %v720_v2  ;;  %v726_v5 = vld [vmem:[%s13077_s7 + $0xa28] sm:$0xff]  ;;  %723 = vst [vmem:[#allocation2 + $0xa18] sm:$0xff] %v722_v3  ;;  %v728_v6 = vld [vmem:[%s13077_s7 + $0xa30] sm:$0xff] }
  0xa4   :  { %725 = vst [vmem:[#allocation2 + $0xa20] sm:$0xff] %v724_v4  ;;  %727 = vst [vmem:[#allocation2 + $0xa28] sm:$0xff] %v726_v5  ;;  %v730_v7 = vld [vmem:[%s13077_s7 + $0xa38] sm:$0xff]  ;;  %v732_v8 = vld [vmem:[%s13077_s7 + $0xa40] sm:$0xff] }
  0xa5   :  { %729 = vst [vmem:[#allocation2 + $0xa30] sm:$0xff] %v728_v6  ;;  %731 = vst [vmem:[#allocation2 + $0xa38] sm:$0xff] %v730_v7  ;;  %v734_v9 = vld [vmem:[%s13077_s7 + $0xa48] sm:$0xff]  ;;  %v736_v10 = vld [vmem:[%s13077_s7 + $0xa50] sm:$0xff] }
  0xa6   :  { %733 = vst [vmem:[#allocation2 + $0xa40] sm:$0xff] %v732_v8  ;;  %v738_v11 = vld [vmem:[%s13077_s7 + $0xa58] sm:$0xff]  ;;  %735 = vst [vmem:[#allocation2 + $0xa48] sm:$0xff] %v734_v9  ;;  %v740_v12 = vld [vmem:[%s13077_s7 + $0xa60] sm:$0xff] }
  0xa7   :  { %737 = vst [vmem:[#allocation2 + $0xa50] sm:$0xff] %v736_v10  ;;  %739 = vst [vmem:[#allocation2 + $0xa58] sm:$0xff] %v738_v11  ;;  %v742_v13 = vld [vmem:[%s13077_s7 + $0xa68] sm:$0xff]  ;;  %v744_v14 = vld [vmem:[%s13077_s7 + $0xa70] sm:$0xff] }
  0xa8   :  { %741 = vst [vmem:[#allocation2 + $0xa60] sm:$0xff] %v740_v12  ;;  %743 = vst [vmem:[#allocation2 + $0xa68] sm:$0xff] %v742_v13  ;;  %v746_v15 = vld [vmem:[%s13077_s7 + $0xa78] sm:$0xff]  ;;  %v748_v16 = vld [vmem:[%s13077_s7 + $0xa80] sm:$0xff] }
  0xa9   :  { %745 = vst [vmem:[#allocation2 + $0xa70] sm:$0xff] %v744_v14  ;;  %v750_v17 = vld [vmem:[%s13077_s7 + $0xa88] sm:$0xff]  ;;  %747 = vst [vmem:[#allocation2 + $0xa78] sm:$0xff] %v746_v15  ;;  %v752_v18 = vld [vmem:[%s13077_s7 + $0xa90] sm:$0xff] }
  0xaa   :  { %749 = vst [vmem:[#allocation2 + $0xa80] sm:$0xff] %v748_v16  ;;  %751 = vst [vmem:[#allocation2 + $0xa88] sm:$0xff] %v750_v17  ;;  %v754_v19 = vld [vmem:[%s13077_s7 + $0xa98] sm:$0xff]  ;;  %v756_v20 = vld [vmem:[%s13077_s7 + $0xaa0] sm:$0xff] }
  0xab   :  { %753 = vst [vmem:[#allocation2 + $0xa90] sm:$0xff] %v752_v18  ;;  %755 = vst [vmem:[#allocation2 + $0xa98] sm:$0xff] %v754_v19  ;;  %v758_v21 = vld [vmem:[%s13077_s7 + $0xaa8] sm:$0xff]  ;;  %v760_v22 = vld [vmem:[%s13077_s7 + $0xab0] sm:$0xff] }
  0xac   :  { %757 = vst [vmem:[#allocation2 + $0xaa0] sm:$0xff] %v756_v20  ;;  %v762_v23 = vld [vmem:[%s13077_s7 + $0xab8] sm:$0xff]  ;;  %759 = vst [vmem:[#allocation2 + $0xaa8] sm:$0xff] %v758_v21  ;;  %v764_v24 = vld [vmem:[%s13077_s7 + $0xac0] sm:$0xff] }
  0xad   :  { %761 = vst [vmem:[#allocation2 + $0xab0] sm:$0xff] %v760_v22  ;;  %763 = vst [vmem:[#allocation2 + $0xab8] sm:$0xff] %v762_v23  ;;  %v766_v25 = vld [vmem:[%s13077_s7 + $0xac8] sm:$0xff]  ;;  %v768_v26 = vld [vmem:[%s13077_s7 + $0xad0] sm:$0xff] }
  0xae   :  { %765 = vst [vmem:[#allocation2 + $0xac0] sm:$0xff] %v764_v24  ;;  %767 = vst [vmem:[#allocation2 + $0xac8] sm:$0xff] %v766_v25  ;;  %v770_v27 = vld [vmem:[%s13077_s7 + $0xad8] sm:$0xff]  ;;  %v772_v28 = vld [vmem:[%s13077_s7 + $0xae0] sm:$0xff] }
  0xaf   :  { %769 = vst [vmem:[#allocation2 + $0xad0] sm:$0xff] %v768_v26  ;;  %v774_v29 = vld [vmem:[%s13077_s7 + $0xae8] sm:$0xff]  ;;  %771 = vst [vmem:[#allocation2 + $0xad8] sm:$0xff] %v770_v27  ;;  %v776_v30 = vld [vmem:[%s13077_s7 + $0xaf0] sm:$0xff] }
  0xb0   :  { %773 = vst [vmem:[#allocation2 + $0xae0] sm:$0xff] %v772_v28  ;;  %775 = vst [vmem:[#allocation2 + $0xae8] sm:$0xff] %v774_v29  ;;  %v778_v31 = vld [vmem:[%s13077_s7 + $0xaf8] sm:$0xff]  ;;  %v780_v32 = vld [vmem:[%s13077_s7 + $0xb00] sm:$0xff] }
  0xb1   :  { %777 = vst [vmem:[#allocation2 + $0xaf0] sm:$0xff] %v776_v30  ;;  %779 = vst [vmem:[#allocation2 + $0xaf8] sm:$0xff] %v778_v31  ;;  %v782_v33 = vld [vmem:[%s13077_s7 + $0xb08] sm:$0xff]  ;;  %v784_v34 = vld [vmem:[%s13077_s7 + $0xb10] sm:$0xff] }
  0xb2   :  { %781 = vst [vmem:[#allocation2 + $0xb00] sm:$0xff] %v780_v32  ;;  %v786_v35 = vld [vmem:[%s13077_s7 + $0xb18] sm:$0xff]  ;;  %783 = vst [vmem:[#allocation2 + $0xb08] sm:$0xff] %v782_v33  ;;  %v788_v36 = vld [vmem:[%s13077_s7 + $0xb20] sm:$0xff] }
  0xb3   :  { %785 = vst [vmem:[#allocation2 + $0xb10] sm:$0xff] %v784_v34  ;;  %787 = vst [vmem:[#allocation2 + $0xb18] sm:$0xff] %v786_v35  ;;  %v790_v37 = vld [vmem:[%s13077_s7 + $0xb28] sm:$0xff]  ;;  %v792_v38 = vld [vmem:[%s13077_s7 + $0xb30] sm:$0xff] }
  0xb4   :  { %789 = vst [vmem:[#allocation2 + $0xb20] sm:$0xff] %v788_v36  ;;  %791 = vst [vmem:[#allocation2 + $0xb28] sm:$0xff] %v790_v37  ;;  %v794_v39 = vld [vmem:[%s13077_s7 + $0xb38] sm:$0xff]  ;;  %v796_v40 = vld [vmem:[%s13077_s7 + $0xb40] sm:$0xff] }
  0xb5   :  { %793 = vst [vmem:[#allocation2 + $0xb30] sm:$0xff] %v792_v38  ;;  %v798_v41 = vld [vmem:[%s13077_s7 + $0xb48] sm:$0xff]  ;;  %795 = vst [vmem:[#allocation2 + $0xb38] sm:$0xff] %v794_v39  ;;  %v800_v42 = vld [vmem:[%s13077_s7 + $0xb50] sm:$0xff] }
  0xb6   :  { %797 = vst [vmem:[#allocation2 + $0xb40] sm:$0xff] %v796_v40  ;;  %799 = vst [vmem:[#allocation2 + $0xb48] sm:$0xff] %v798_v41  ;;  %v802_v43 = vld [vmem:[%s13077_s7 + $0xb58] sm:$0xff]  ;;  %v804_v44 = vld [vmem:[%s13077_s7 + $0xb60] sm:$0xff] }
  0xb7   :  { %801 = vst [vmem:[#allocation2 + $0xb50] sm:$0xff] %v800_v42  ;;  %803 = vst [vmem:[#allocation2 + $0xb58] sm:$0xff] %v802_v43  ;;  %v806_v45 = vld [vmem:[%s13077_s7 + $0xb68] sm:$0xff]  ;;  %v808_v46 = vld [vmem:[%s13077_s7 + $0xb70] sm:$0xff] }
  0xb8   :  { %805 = vst [vmem:[#allocation2 + $0xb60] sm:$0xff] %v804_v44  ;;  %v810_v47 = vld [vmem:[%s13077_s7 + $0xb78] sm:$0xff]  ;;  %807 = vst [vmem:[#allocation2 + $0xb68] sm:$0xff] %v806_v45  ;;  %v812_v48 = vld [vmem:[%s13077_s7 + $0xb80] sm:$0xff] }
  0xb9   :  { %809 = vst [vmem:[#allocation2 + $0xb70] sm:$0xff] %v808_v46  ;;  %811 = vst [vmem:[#allocation2 + $0xb78] sm:$0xff] %v810_v47  ;;  %v814_v49 = vld [vmem:[%s13077_s7 + $0xb88] sm:$0xff]  ;;  %v816_v50 = vld [vmem:[%s13077_s7 + $0xb90] sm:$0xff] }
  0xba   :  { %813 = vst [vmem:[#allocation2 + $0xb80] sm:$0xff] %v812_v48  ;;  %815 = vst [vmem:[#allocation2 + $0xb88] sm:$0xff] %v814_v49  ;;  %v818_v51 = vld [vmem:[%s13077_s7 + $0xb98] sm:$0xff]  ;;  %v820_v52 = vld [vmem:[%s13077_s7 + $0xba0] sm:$0xff] }
  0xbb   :  { %817 = vst [vmem:[#allocation2 + $0xb90] sm:$0xff] %v816_v50  ;;  %v822_v53 = vld [vmem:[%s13077_s7 + $0xba8] sm:$0xff]  ;;  %819 = vst [vmem:[#allocation2 + $0xb98] sm:$0xff] %v818_v51  ;;  %v824_v54 = vld [vmem:[%s13077_s7 + $0xbb0] sm:$0xff] }
  0xbc   :  { %821 = vst [vmem:[#allocation2 + $0xba0] sm:$0xff] %v820_v52  ;;  %823 = vst [vmem:[#allocation2 + $0xba8] sm:$0xff] %v822_v53  ;;  %v826_v55 = vld [vmem:[%s13077_s7 + $0xbb8] sm:$0xff]  ;;  %v828_v56 = vld [vmem:[%s13077_s7 + $0xbc0] sm:$0xff] }
  0xbd   :  { %825 = vst [vmem:[#allocation2 + $0xbb0] sm:$0xff] %v824_v54  ;;  %827 = vst [vmem:[#allocation2 + $0xbb8] sm:$0xff] %v826_v55  ;;  %v830_v57 = vld [vmem:[%s13077_s7 + $0xbc8] sm:$0xff]  ;;  %v832_v58 = vld [vmem:[%s13077_s7 + $0xbd0] sm:$0xff] }
  0xbe   :  { %829 = vst [vmem:[#allocation2 + $0xbc0] sm:$0xff] %v828_v56  ;;  %v834_v59 = vld [vmem:[%s13077_s7 + $0xbd8] sm:$0xff]  ;;  %831 = vst [vmem:[#allocation2 + $0xbc8] sm:$0xff] %v830_v57  ;;  %v836_v60 = vld [vmem:[%s13077_s7 + $0xbe0] sm:$0xff] }
  0xbf   :  { %833 = vst [vmem:[#allocation2 + $0xbd0] sm:$0xff] %v832_v58  ;;  %835 = vst [vmem:[#allocation2 + $0xbd8] sm:$0xff] %v834_v59  ;;  %v838_v61 = vld [vmem:[%s13077_s7 + $0xbe8] sm:$0xff]  ;;  %v840_v62 = vld [vmem:[%s13077_s7 + $0xbf0] sm:$0xff] }
  0xc0   :  { %837 = vst [vmem:[#allocation2 + $0xbe0] sm:$0xff] %v836_v60  ;;  %839 = vst [vmem:[#allocation2 + $0xbe8] sm:$0xff] %v838_v61  ;;  %v842_v63 = vld [vmem:[%s13077_s7 + $0xbf8] sm:$0xff]  ;;  %v844_v0 = vld [vmem:[%s13077_s7 + $0xc00] sm:$0xff] }
  0xc1   :  { %841 = vst [vmem:[#allocation2 + $0xbf0] sm:$0xff] %v840_v62  ;;  %v846_v1 = vld [vmem:[%s13077_s7 + $0xc08] sm:$0xff]  ;;  %843 = vst [vmem:[#allocation2 + $0xbf8] sm:$0xff] %v842_v63  ;;  %v848_v2 = vld [vmem:[%s13077_s7 + $0xc10] sm:$0xff] }
  0xc2   :  { %845 = vst [vmem:[#allocation2 + $0xc00] sm:$0xff] %v844_v0  ;;  %847 = vst [vmem:[#allocation2 + $0xc08] sm:$0xff] %v846_v1  ;;  %v850_v3 = vld [vmem:[%s13077_s7 + $0xc18] sm:$0xff]  ;;  %v852_v4 = vld [vmem:[%s13077_s7 + $0xc20] sm:$0xff] }
  0xc3   :  { %849 = vst [vmem:[#allocation2 + $0xc10] sm:$0xff] %v848_v2  ;;  %851 = vst [vmem:[#allocation2 + $0xc18] sm:$0xff] %v850_v3  ;;  %v854_v5 = vld [vmem:[%s13077_s7 + $0xc28] sm:$0xff]  ;;  %v856_v6 = vld [vmem:[%s13077_s7 + $0xc30] sm:$0xff] }
  0xc4   :  { %853 = vst [vmem:[#allocation2 + $0xc20] sm:$0xff] %v852_v4  ;;  %v858_v7 = vld [vmem:[%s13077_s7 + $0xc38] sm:$0xff]  ;;  %855 = vst [vmem:[#allocation2 + $0xc28] sm:$0xff] %v854_v5  ;;  %v860_v8 = vld [vmem:[%s13077_s7 + $0xc40] sm:$0xff] }
  0xc5   :  { %857 = vst [vmem:[#allocation2 + $0xc30] sm:$0xff] %v856_v6  ;;  %859 = vst [vmem:[#allocation2 + $0xc38] sm:$0xff] %v858_v7  ;;  %v862_v9 = vld [vmem:[%s13077_s7 + $0xc48] sm:$0xff]  ;;  %v864_v10 = vld [vmem:[%s13077_s7 + $0xc50] sm:$0xff] }
  0xc6   :  { %861 = vst [vmem:[#allocation2 + $0xc40] sm:$0xff] %v860_v8  ;;  %863 = vst [vmem:[#allocation2 + $0xc48] sm:$0xff] %v862_v9  ;;  %v866_v11 = vld [vmem:[%s13077_s7 + $0xc58] sm:$0xff]  ;;  %v868_v12 = vld [vmem:[%s13077_s7 + $0xc60] sm:$0xff] }
  0xc7   :  { %865 = vst [vmem:[#allocation2 + $0xc50] sm:$0xff] %v864_v10  ;;  %v870_v13 = vld [vmem:[%s13077_s7 + $0xc68] sm:$0xff]  ;;  %867 = vst [vmem:[#allocation2 + $0xc58] sm:$0xff] %v866_v11  ;;  %v872_v14 = vld [vmem:[%s13077_s7 + $0xc70] sm:$0xff] }
  0xc8   :  { %869 = vst [vmem:[#allocation2 + $0xc60] sm:$0xff] %v868_v12  ;;  %871 = vst [vmem:[#allocation2 + $0xc68] sm:$0xff] %v870_v13  ;;  %v874_v15 = vld [vmem:[%s13077_s7 + $0xc78] sm:$0xff]  ;;  %v876_v16 = vld [vmem:[%s13077_s7 + $0xc80] sm:$0xff] }
  0xc9   :  { %873 = vst [vmem:[#allocation2 + $0xc70] sm:$0xff] %v872_v14  ;;  %875 = vst [vmem:[#allocation2 + $0xc78] sm:$0xff] %v874_v15  ;;  %v878_v17 = vld [vmem:[%s13077_s7 + $0xc88] sm:$0xff]  ;;  %v880_v18 = vld [vmem:[%s13077_s7 + $0xc90] sm:$0xff] }
  0xca   :  { %877 = vst [vmem:[#allocation2 + $0xc80] sm:$0xff] %v876_v16  ;;  %v882_v19 = vld [vmem:[%s13077_s7 + $0xc98] sm:$0xff]  ;;  %879 = vst [vmem:[#allocation2 + $0xc88] sm:$0xff] %v878_v17  ;;  %v884_v20 = vld [vmem:[%s13077_s7 + $0xca0] sm:$0xff] }
  0xcb   :  { %881 = vst [vmem:[#allocation2 + $0xc90] sm:$0xff] %v880_v18  ;;  %883 = vst [vmem:[#allocation2 + $0xc98] sm:$0xff] %v882_v19  ;;  %v886_v21 = vld [vmem:[%s13077_s7 + $0xca8] sm:$0xff]  ;;  %v888_v22 = vld [vmem:[%s13077_s7 + $0xcb0] sm:$0xff] }
  0xcc   :  { %885 = vst [vmem:[#allocation2 + $0xca0] sm:$0xff] %v884_v20  ;;  %887 = vst [vmem:[#allocation2 + $0xca8] sm:$0xff] %v886_v21  ;;  %v890_v23 = vld [vmem:[%s13077_s7 + $0xcb8] sm:$0xff]  ;;  %v892_v24 = vld [vmem:[%s13077_s7 + $0xcc0] sm:$0xff] }
  0xcd   :  { %889 = vst [vmem:[#allocation2 + $0xcb0] sm:$0xff] %v888_v22  ;;  %v894_v25 = vld [vmem:[%s13077_s7 + $0xcc8] sm:$0xff]  ;;  %891 = vst [vmem:[#allocation2 + $0xcb8] sm:$0xff] %v890_v23  ;;  %v896_v26 = vld [vmem:[%s13077_s7 + $0xcd0] sm:$0xff] }
  0xce   :  { %893 = vst [vmem:[#allocation2 + $0xcc0] sm:$0xff] %v892_v24  ;;  %895 = vst [vmem:[#allocation2 + $0xcc8] sm:$0xff] %v894_v25  ;;  %v898_v27 = vld [vmem:[%s13077_s7 + $0xcd8] sm:$0xff]  ;;  %v900_v28 = vld [vmem:[%s13077_s7 + $0xce0] sm:$0xff] }
  0xcf   :  { %897 = vst [vmem:[#allocation2 + $0xcd0] sm:$0xff] %v896_v26  ;;  %899 = vst [vmem:[#allocation2 + $0xcd8] sm:$0xff] %v898_v27  ;;  %v902_v29 = vld [vmem:[%s13077_s7 + $0xce8] sm:$0xff]  ;;  %v904_v30 = vld [vmem:[%s13077_s7 + $0xcf0] sm:$0xff] }
  0xd0   :  { %901 = vst [vmem:[#allocation2 + $0xce0] sm:$0xff] %v900_v28  ;;  %v906_v31 = vld [vmem:[%s13077_s7 + $0xcf8] sm:$0xff]  ;;  %903 = vst [vmem:[#allocation2 + $0xce8] sm:$0xff] %v902_v29  ;;  %v908_v32 = vld [vmem:[%s13077_s7 + $0xd00] sm:$0xff] }
  0xd1   :  { %905 = vst [vmem:[#allocation2 + $0xcf0] sm:$0xff] %v904_v30  ;;  %907 = vst [vmem:[#allocation2 + $0xcf8] sm:$0xff] %v906_v31  ;;  %v910_v33 = vld [vmem:[%s13077_s7 + $0xd08] sm:$0xff]  ;;  %v912_v34 = vld [vmem:[%s13077_s7 + $0xd10] sm:$0xff] }
  0xd2   :  { %909 = vst [vmem:[#allocation2 + $0xd00] sm:$0xff] %v908_v32  ;;  %911 = vst [vmem:[#allocation2 + $0xd08] sm:$0xff] %v910_v33  ;;  %v914_v35 = vld [vmem:[%s13077_s7 + $0xd18] sm:$0xff]  ;;  %v916_v36 = vld [vmem:[%s13077_s7 + $0xd20] sm:$0xff] }
  0xd3   :  { %913 = vst [vmem:[#allocation2 + $0xd10] sm:$0xff] %v912_v34  ;;  %v918_v37 = vld [vmem:[%s13077_s7 + $0xd28] sm:$0xff]  ;;  %915 = vst [vmem:[#allocation2 + $0xd18] sm:$0xff] %v914_v35  ;;  %v920_v38 = vld [vmem:[%s13077_s7 + $0xd30] sm:$0xff] }
  0xd4   :  { %917 = vst [vmem:[#allocation2 + $0xd20] sm:$0xff] %v916_v36  ;;  %919 = vst [vmem:[#allocation2 + $0xd28] sm:$0xff] %v918_v37  ;;  %v922_v39 = vld [vmem:[%s13077_s7 + $0xd38] sm:$0xff]  ;;  %v924_v40 = vld [vmem:[%s13077_s7 + $0xd40] sm:$0xff] }
  0xd5   :  { %921 = vst [vmem:[#allocation2 + $0xd30] sm:$0xff] %v920_v38  ;;  %923 = vst [vmem:[#allocation2 + $0xd38] sm:$0xff] %v922_v39  ;;  %v926_v41 = vld [vmem:[%s13077_s7 + $0xd48] sm:$0xff]  ;;  %v928_v42 = vld [vmem:[%s13077_s7 + $0xd50] sm:$0xff] }
  0xd6   :  { %925 = vst [vmem:[#allocation2 + $0xd40] sm:$0xff] %v924_v40  ;;  %v930_v43 = vld [vmem:[%s13077_s7 + $0xd58] sm:$0xff]  ;;  %927 = vst [vmem:[#allocation2 + $0xd48] sm:$0xff] %v926_v41  ;;  %v932_v44 = vld [vmem:[%s13077_s7 + $0xd60] sm:$0xff] }
  0xd7   :  { %929 = vst [vmem:[#allocation2 + $0xd50] sm:$0xff] %v928_v42  ;;  %931 = vst [vmem:[#allocation2 + $0xd58] sm:$0xff] %v930_v43  ;;  %v934_v45 = vld [vmem:[%s13077_s7 + $0xd68] sm:$0xff]  ;;  %v936_v46 = vld [vmem:[%s13077_s7 + $0xd70] sm:$0xff] }
  0xd8   :  { %933 = vst [vmem:[#allocation2 + $0xd60] sm:$0xff] %v932_v44  ;;  %935 = vst [vmem:[#allocation2 + $0xd68] sm:$0xff] %v934_v45  ;;  %v938_v47 = vld [vmem:[%s13077_s7 + $0xd78] sm:$0xff]  ;;  %v940_v48 = vld [vmem:[%s13077_s7 + $0xd80] sm:$0xff] }
  0xd9   :  { %937 = vst [vmem:[#allocation2 + $0xd70] sm:$0xff] %v936_v46  ;;  %v942_v49 = vld [vmem:[%s13077_s7 + $0xd88] sm:$0xff]  ;;  %939 = vst [vmem:[#allocation2 + $0xd78] sm:$0xff] %v938_v47  ;;  %v944_v50 = vld [vmem:[%s13077_s7 + $0xd90] sm:$0xff] }
  0xda   :  { %941 = vst [vmem:[#allocation2 + $0xd80] sm:$0xff] %v940_v48  ;;  %943 = vst [vmem:[#allocation2 + $0xd88] sm:$0xff] %v942_v49  ;;  %v946_v51 = vld [vmem:[%s13077_s7 + $0xd98] sm:$0xff]  ;;  %v948_v52 = vld [vmem:[%s13077_s7 + $0xda0] sm:$0xff] }
  0xdb   :  { %945 = vst [vmem:[#allocation2 + $0xd90] sm:$0xff] %v944_v50  ;;  %947 = vst [vmem:[#allocation2 + $0xd98] sm:$0xff] %v946_v51  ;;  %v950_v53 = vld [vmem:[%s13077_s7 + $0xda8] sm:$0xff]  ;;  %v952_v54 = vld [vmem:[%s13077_s7 + $0xdb0] sm:$0xff] }
  0xdc   :  { %949 = vst [vmem:[#allocation2 + $0xda0] sm:$0xff] %v948_v52  ;;  %v954_v55 = vld [vmem:[%s13077_s7 + $0xdb8] sm:$0xff]  ;;  %951 = vst [vmem:[#allocation2 + $0xda8] sm:$0xff] %v950_v53  ;;  %v956_v56 = vld [vmem:[%s13077_s7 + $0xdc0] sm:$0xff] }
  0xdd   :  { %953 = vst [vmem:[#allocation2 + $0xdb0] sm:$0xff] %v952_v54  ;;  %955 = vst [vmem:[#allocation2 + $0xdb8] sm:$0xff] %v954_v55  ;;  %v958_v57 = vld [vmem:[%s13077_s7 + $0xdc8] sm:$0xff]  ;;  %v960_v58 = vld [vmem:[%s13077_s7 + $0xdd0] sm:$0xff] }
  0xde   :  { %957 = vst [vmem:[#allocation2 + $0xdc0] sm:$0xff] %v956_v56  ;;  %959 = vst [vmem:[#allocation2 + $0xdc8] sm:$0xff] %v958_v57  ;;  %v962_v59 = vld [vmem:[%s13077_s7 + $0xdd8] sm:$0xff]  ;;  %v964_v60 = vld [vmem:[%s13077_s7 + $0xde0] sm:$0xff] }
  0xdf   :  { %961 = vst [vmem:[#allocation2 + $0xdd0] sm:$0xff] %v960_v58  ;;  %v966_v61 = vld [vmem:[%s13077_s7 + $0xde8] sm:$0xff]  ;;  %963 = vst [vmem:[#allocation2 + $0xdd8] sm:$0xff] %v962_v59  ;;  %v968_v62 = vld [vmem:[%s13077_s7 + $0xdf0] sm:$0xff] }
  0xe0   :  { %965 = vst [vmem:[#allocation2 + $0xde0] sm:$0xff] %v964_v60  ;;  %967 = vst [vmem:[#allocation2 + $0xde8] sm:$0xff] %v966_v61  ;;  %v970_v63 = vld [vmem:[%s13077_s7 + $0xdf8] sm:$0xff]  ;;  %v972_v0 = vld [vmem:[%s13077_s7 + $0xe00] sm:$0xff] }
  0xe1   :  { %969 = vst [vmem:[#allocation2 + $0xdf0] sm:$0xff] %v968_v62  ;;  %971 = vst [vmem:[#allocation2 + $0xdf8] sm:$0xff] %v970_v63  ;;  %v974_v1 = vld [vmem:[%s13077_s7 + $0xe08] sm:$0xff]  ;;  %v976_v2 = vld [vmem:[%s13077_s7 + $0xe10] sm:$0xff] }
  0xe2   :  { %973 = vst [vmem:[#allocation2 + $0xe00] sm:$0xff] %v972_v0  ;;  %v978_v3 = vld [vmem:[%s13077_s7 + $0xe18] sm:$0xff]  ;;  %975 = vst [vmem:[#allocation2 + $0xe08] sm:$0xff] %v974_v1  ;;  %v980_v4 = vld [vmem:[%s13077_s7 + $0xe20] sm:$0xff] }
  0xe3   :  { %977 = vst [vmem:[#allocation2 + $0xe10] sm:$0xff] %v976_v2  ;;  %979 = vst [vmem:[#allocation2 + $0xe18] sm:$0xff] %v978_v3  ;;  %v982_v5 = vld [vmem:[%s13077_s7 + $0xe28] sm:$0xff]  ;;  %v984_v6 = vld [vmem:[%s13077_s7 + $0xe30] sm:$0xff] }
  0xe4   :  { %981 = vst [vmem:[#allocation2 + $0xe20] sm:$0xff] %v980_v4  ;;  %983 = vst [vmem:[#allocation2 + $0xe28] sm:$0xff] %v982_v5  ;;  %v986_v7 = vld [vmem:[%s13077_s7 + $0xe38] sm:$0xff]  ;;  %v988_v8 = vld [vmem:[%s13077_s7 + $0xe40] sm:$0xff] }
  0xe5   :  { %985 = vst [vmem:[#allocation2 + $0xe30] sm:$0xff] %v984_v6  ;;  %v990_v9 = vld [vmem:[%s13077_s7 + $0xe48] sm:$0xff]  ;;  %987 = vst [vmem:[#allocation2 + $0xe38] sm:$0xff] %v986_v7  ;;  %v992_v10 = vld [vmem:[%s13077_s7 + $0xe50] sm:$0xff] }
  0xe6   :  { %989 = vst [vmem:[#allocation2 + $0xe40] sm:$0xff] %v988_v8  ;;  %991 = vst [vmem:[#allocation2 + $0xe48] sm:$0xff] %v990_v9  ;;  %v994_v11 = vld [vmem:[%s13077_s7 + $0xe58] sm:$0xff]  ;;  %v996_v12 = vld [vmem:[%s13077_s7 + $0xe60] sm:$0xff] }
  0xe7   :  { %993 = vst [vmem:[#allocation2 + $0xe50] sm:$0xff] %v992_v10  ;;  %995 = vst [vmem:[#allocation2 + $0xe58] sm:$0xff] %v994_v11  ;;  %v998_v13 = vld [vmem:[%s13077_s7 + $0xe68] sm:$0xff]  ;;  %v1000_v14 = vld [vmem:[%s13077_s7 + $0xe70] sm:$0xff] }
  0xe8   :  { %997 = vst [vmem:[#allocation2 + $0xe60] sm:$0xff] %v996_v12  ;;  %v1002_v15 = vld [vmem:[%s13077_s7 + $0xe78] sm:$0xff]  ;;  %999 = vst [vmem:[#allocation2 + $0xe68] sm:$0xff] %v998_v13  ;;  %v1004_v16 = vld [vmem:[%s13077_s7 + $0xe80] sm:$0xff] }
  0xe9   :  { %1001 = vst [vmem:[#allocation2 + $0xe70] sm:$0xff] %v1000_v14  ;;  %1003 = vst [vmem:[#allocation2 + $0xe78] sm:$0xff] %v1002_v15  ;;  %v1006_v17 = vld [vmem:[%s13077_s7 + $0xe88] sm:$0xff]  ;;  %v1008_v18 = vld [vmem:[%s13077_s7 + $0xe90] sm:$0xff] }
  0xea   :  { %1005 = vst [vmem:[#allocation2 + $0xe80] sm:$0xff] %v1004_v16  ;;  %1007 = vst [vmem:[#allocation2 + $0xe88] sm:$0xff] %v1006_v17  ;;  %v1010_v19 = vld [vmem:[%s13077_s7 + $0xe98] sm:$0xff]  ;;  %v1012_v20 = vld [vmem:[%s13077_s7 + $0xea0] sm:$0xff] }
  0xeb   :  { %1009 = vst [vmem:[#allocation2 + $0xe90] sm:$0xff] %v1008_v18  ;;  %v1014_v21 = vld [vmem:[%s13077_s7 + $0xea8] sm:$0xff]  ;;  %1011 = vst [vmem:[#allocation2 + $0xe98] sm:$0xff] %v1010_v19  ;;  %v1016_v22 = vld [vmem:[%s13077_s7 + $0xeb0] sm:$0xff] }
  0xec   :  { %1013 = vst [vmem:[#allocation2 + $0xea0] sm:$0xff] %v1012_v20  ;;  %1015 = vst [vmem:[#allocation2 + $0xea8] sm:$0xff] %v1014_v21  ;;  %v1018_v23 = vld [vmem:[%s13077_s7 + $0xeb8] sm:$0xff]  ;;  %v1020_v24 = vld [vmem:[%s13077_s7 + $0xec0] sm:$0xff] }
  0xed   :  { %1017 = vst [vmem:[#allocation2 + $0xeb0] sm:$0xff] %v1016_v22  ;;  %1019 = vst [vmem:[#allocation2 + $0xeb8] sm:$0xff] %v1018_v23  ;;  %v1022_v25 = vld [vmem:[%s13077_s7 + $0xec8] sm:$0xff]  ;;  %v1024_v26 = vld [vmem:[%s13077_s7 + $0xed0] sm:$0xff] }
  0xee   :  { %1021 = vst [vmem:[#allocation2 + $0xec0] sm:$0xff] %v1020_v24  ;;  %v1026_v27 = vld [vmem:[%s13077_s7 + $0xed8] sm:$0xff]  ;;  %1023 = vst [vmem:[#allocation2 + $0xec8] sm:$0xff] %v1022_v25  ;;  %v1028_v28 = vld [vmem:[%s13077_s7 + $0xee0] sm:$0xff] }
  0xef   :  { %1025 = vst [vmem:[#allocation2 + $0xed0] sm:$0xff] %v1024_v26  ;;  %1027 = vst [vmem:[#allocation2 + $0xed8] sm:$0xff] %v1026_v27  ;;  %v1030_v29 = vld [vmem:[%s13077_s7 + $0xee8] sm:$0xff]  ;;  %v1032_v30 = vld [vmem:[%s13077_s7 + $0xef0] sm:$0xff] }
  0xf0   :  { %1029 = vst [vmem:[#allocation2 + $0xee0] sm:$0xff] %v1028_v28  ;;  %1031 = vst [vmem:[#allocation2 + $0xee8] sm:$0xff] %v1030_v29  ;;  %v1034_v31 = vld [vmem:[%s13077_s7 + $0xef8] sm:$0xff] }
  0xf1   :  { %1033 = vst [vmem:[#allocation2 + $0xef0] sm:$0xff] %v1032_v30  ;;  %1035 = vst [vmem:[#allocation2 + $0xef8] sm:$0xff] %v1034_v31 }
  0xf2   :  { %1043 = vsyncadd [#allocation3], 61440  ;;  %v9778_v32 = vld [vmem:[%s13070_s0 + $0x10] sm:$0xff]   ;;  %v9952_v33 = vmov 0   ;;  %v9779_v34 = vld [vmem:[%s13070_s0] sm:$0xff]   ;;  %s9953_s21 = smov 127  }
  0xf3   :  { %1200 = vmatprep.subr.bf16.mxu0 %v9952_v33  ;;  %1277 = vmatprep.subr.bf16.mxu1 %v9952_v33  ;;  %v9780_v35 = vld [vmem:[%s13070_s0 + $0x18] sm:$0xff]   ;;  %v9781_v36 = vld [vmem:[%s13070_s0 + $0x8] sm:$0xff]   ;;  %v11493_v37 = vld [vmem:[%s13070_s0 + $0x20] sm:$0xff]   ;;  %vm1187_vm0 = vcmask 261120   ;;  %s9954_s18 = smov 126  }
  0xf4   :  { %1278 = vmatpush1.bf16.msra.mxu1 %v9778_v32  ;;  %9776 = vset.pattern.permute.xlu0 %v9952_v33  ;;  %v11502_v38 = vld [vmem:[%s13070_s0 + $0x28] sm:$0xff]   ;;  %v11520_v40 = vld [vmem:[%s13070_s0 + $0x30] sm:$0xff]   ;;  %v11528_v41 = vld [vmem:[%s13070_s0 + $0x38] sm:$0xff]  }
  0xf5   :  { %1279 = vmatprep.subr.bf16.mxu1 %v9952_v33  ;;  %1635 = vrot.lane.b32.xlu1 %v9778_v32, %s9953_s21  ;;  %v11514_v39 = vld [vmem:[%s13071_s1 + $0x4] ss:$8 sps:$4 sm:$0xff]   ;;  %v11567_v46 = vld [vmem:[%s13070_s0 + $0x50] sm:$0xff]   ;;  %v1357_v48 = vld [vmem:[%s13072_s2 + $0x18] sm:$0xff] }
  0xf6   :  { %1564 = vrot.lane.b32.xlu0 %v9779_v34, %s9953_s21  ;;  %1201 = vmatpush1.bf16.msra.mxu0 %v9779_v34  ;;  %v11544_v42 = vld [vmem:[%s13070_s0 + $0x40] sm:$0xff]   ;;  %v1355_v44 = vld [vmem:[%s13072_s2 + $0x8] sm:$0xff]  ;;  %v1356_v47 = vld [vmem:[%s13072_s2 + $0x10] sm:$0xff] }
  0xf7   :  { %1202 = vmatprep.subr.bf16.mxu0 %v9952_v33  ;;  %9777 = vset.pattern.permute.xlu1 %v9952_v33  ;;  %v1354_v43 = vld [vmem:[%s13072_s2] sm:$0xff]  ;;  %v11558_v45 = vld [vmem:[%s13070_s0 + $0x48] sm:$0xff]   ;;  %v11582_v49 = vld [vmem:[%s13070_s0 + $0x58] sm:$0xff]  }
  0xf8   :  { %1280 = vmatpush1.bf16.msra.mxu1 %v9780_v35  ;;  %8816 = vmatprep.mubr.msk.bf16.mxu0 %vm1187_vm0, %v11514_v39  ;;  %v11592_v50 = vld [vmem:[%s13071_s1] ss:$8 sps:$4 sm:$0xff]   ;;  %v11598_v51 = vld [vmem:[%s13071_s1 + $0x14] ss:$8 sps:$4 sm:$0xff]   ;;  %v11616_v52 = vld [vmem:[%s13071_s1 + $0x10] ss:$8 sps:$4 sm:$0xff]  }
  0xf9   :  { %1281 = vmatprep.subr.bf16.mxu1 %v9952_v33  ;;  %1637 = vrot.lane.b32.xlu1 %v9780_v35, %s9953_s21  ;;  %v11622_v53 = vld [vmem:[%s13071_s1 + $0x24] ss:$8 sps:$4 sm:$0xff]   ;;  %v11640_v54 = vld [vmem:[%s13071_s1 + $0x20] ss:$8 sps:$4 sm:$0xff]   ;;  %v11646_v55 = vld [vmem:[%s13071_s1 + $0x34] ss:$8 sps:$4 sm:$0xff]  }
  0xfa   :  { %1566 = vrot.lane.b32.xlu0 %v9781_v36, %s9953_s21  ;;  %1203 = vmatpush1.bf16.msra.mxu0 %v9781_v36  ;;  %v11664_v56 = vld [vmem:[%s13071_s1 + $0x30] ss:$8 sps:$4 sm:$0xff]   ;;  %v11670_v57 = vld [vmem:[%s13070_s0 + $0x60] sm:$0xff]   ;;  %v11680_v58 = vld [vmem:[%s13070_s0 + $0x68] sm:$0xff]  }
  0xfb   :  { %1204 = vmatprep.subr.bf16.mxu0 %v9952_v33  ;;  %8822 = vmatprep.mubr.msk.bf16.mxu1 %vm1187_vm0, %v11514_v39  ;;  %v11694_v59 = vld [vmem:[%s13070_s0 + $0x70] sm:$0xff]   ;;  %v11703_v60 = vld [vmem:[%s13070_s0 + $0x78] sm:$0xff]  }
  0xfc   :  { %1282 = vmatpush1.bf16.msra.mxu1 %v11493_v37 }
  0xfd   :  { %1283 = vmatprep.subr.bf16.mxu1 %v9952_v33  ;;  %1730 = vrot.lane.b32.xlu1 %v11502_v38, %s9953_s21 }
  0xfe   :  { %1205 = vmatpush1.bf16.msra.mxu0 %v9778_v32  ;;  %1728 = vrot.lane.b32.xlu0 %v11493_v37, %s9953_s21 }
  0xff   :  { %1206 = vmatprep.subr.bf16.mxu0 %v9952_v33 }
 0x100   :  { %1284 = vmatpush1.bf16.msra.mxu1 %v11502_v38 }
 0x101   :  { %1285 = vmatprep.subr.bf16.mxu1 %v9952_v33  ;;  %1801 = vrot.lane.b32.xlu1 %v11528_v41, %s9953_s21 }
 0x102   :  { %1207 = vmatpush1.bf16.msra.mxu0 %v9780_v35  ;;  %1799 = vrot.lane.b32.xlu0 %v11520_v40, %s9953_s21 }
 0x103   :  { %1208 = vmatprep.subr.bf16.mxu0 %v9952_v33 }
 0x104   :  { %1286 = vmatpush1.bf16.msra.mxu1 %v11520_v40 }
 0x105   :  { %1287 = vmatprep.subr.bf16.mxu1 %v9952_v33  ;;  %1365 = vperm.xlu1 %9777, %v1355_v44  }
 0x106   :  { %1209 = vmatpush1.bf16.msra.mxu0 %v11493_v37  ;;  %1360 = vperm.xlu0 %9776, %v1354_v43  }
 0x107   :  { %1210 = vmatprep.subr.bf16.mxu0 %v9952_v33 }
 0x108   :  { %1288 = vmatpush1.bf16.msra.mxu1 %v11528_v41 }
 0x109   :  { %1289 = vmatprep.subr.bf16.mxu1 %v9952_v33  ;;  %1370 = vperm.xlu1 %9777, %v1356_v47  }
 0x10a   :  { %1211 = vmatpush1.bf16.msra.mxu0 %v11502_v38  ;;  %1375 = vperm.xlu0 %9776, %v1357_v48  }
 0x10b   :  { %1212 = vmatprep.subr.bf16.mxu0 %v9952_v33 }
 0x10c   :  { %1290 = vmatpush1.bf16.msra.mxu1 %v11544_v42 }
 0x10d   :  { %1291 = vmatprep.subr.bf16.mxu1 %v9952_v33 }
 0x10e   :  { %1213 = vmatpush1.bf16.msra.mxu0 %v11520_v40 }
 0x10f   :  { %1214 = vmatprep.subr.bf16.mxu0 %v9952_v33 }
 0x110   :  { %1292 = vmatpush1.bf16.msra.mxu1 %v11558_v45 }
 0x111   :  { %1293 = vmatprep.subr.bf16.mxu1 %v9952_v33 }
 0x112   :  { %1215 = vmatpush1.bf16.msra.mxu0 %v11528_v41 }
 0x113   :  { %1216 = vmatprep.subr.bf16.mxu0 %v9952_v33 }
 0x114   :  { %1294 = vmatpush1.bf16.msra.mxu1 %v11567_v46 }
 0x115   :  { %1295 = vmatprep.subr.bf16.mxu1 %v9952_v33 }
 0x116   :  { %1217 = vmatpush1.bf16.msra.mxu0 %v11544_v42 }
 0x117   :  { %1218 = vmatprep.subr.bf16.mxu0 %v9952_v33 }
 0x118   :  { %1296 = vmatpush1.bf16.msra.mxu1 %v11582_v49 }
 0x119   :  { %1477 = vmatprep.subr.bf16.mxu1 %v9952_v33 }
 0x11a   :  { %1219 = vmatpush1.bf16.msra.mxu0 %v11558_v45 }
 0x11b   :  { %1310 = vmatmul.mubr.bf16.vlgmr.msra.gmra.mrb[0].mxu1 %v11592_v50  ;;  %1400 = vmatprep.subr.bf16.mxu0 %v9952_v33 }
 0x11c   :  { %1478 = vmatpush1.bf16.msra.mxu1 %v11520_v40  ;;  %8823 = vmatprep.mubr.msk.bf16.mxu1 %vm1187_vm0, %v11598_v51 }
 0x11d   :  { %1233 = vmatmul.mubr.bf16.vlgmr.msra.gmra.mrb[0].mxu0 %v11592_v50  ;;  %1479 = vmatprep.subr.bf16.mxu1 %v9952_v33 }
 0x11e   :  { %1401 = vmatpush1.bf16.msra.mxu0 %v11493_v37  ;;  %8817 = vmatprep.mubr.msk.bf16.mxu0 %vm1187_vm0, %v11598_v51 }
 0x11f   :  { %1402 = vmatprep.subr.bf16.mxu0 %v9952_v33 }
 0x120   :  { %1480 = vmatpush1.bf16.msra.mxu1 %v11528_v41 }
 0x121   :  { %1481 = vmatprep.subr.bf16.mxu1 %v9952_v33 }
 0x122   :  { %1403 = vmatpush1.bf16.msra.mxu0 %v11502_v38 }
 0x123   :  { %1318 = vmatmul.mubr.bf16.gmra.mrb[4].mxu1 %v11616_v52  ;;  %1404 = vmatprep.subr.bf16.mxu0 %v9952_v33 }
 0x124   :  { %1482 = vmatpush1.bf16.msra.mxu1 %v11544_v42  ;;  %8824 = vmatprep.mubr.msk.bf16.mxu1 %vm1187_vm0, %v11622_v53 }
 0x125   :  { %1241 = vmatmul.mubr.bf16.gmra.mrb[4].mxu0 %v11616_v52  ;;  %1483 = vmatprep.subr.bf16.mxu1 %v9952_v33 }
 0x126   :  { %1405 = vmatpush1.bf16.msra.mxu0 %v11520_v40  ;;  %8818 = vmatprep.mubr.msk.bf16.mxu0 %vm1187_vm0, %v11622_v53 }
 0x127   :  { %1406 = vmatprep.subr.bf16.mxu0 %v9952_v33 }
 0x128   :  { %1484 = vmatpush1.bf16.msra.mxu1 %v11558_v45 }
 0x129   :  { %1485 = vmatprep.subr.bf16.mxu1 %v9952_v33 }
 0x12a   :  { %1407 = vmatpush1.bf16.msra.mxu0 %v11528_v41 }
 0x12b   :  { %1326 = vmatmul.mubr.bf16.gmra.mrb[8].mxu1 %v11640_v54  ;;  %1408 = vmatprep.subr.bf16.mxu0 %v9952_v33 }
 0x12c   :  { %1486 = vmatpush1.bf16.msra.mxu1 %v11567_v46  ;;  %8825 = vmatprep.mubr.msk.bf16.mxu1 %vm1187_vm0, %v11646_v55 }
 0x12d   :  { %1249 = vmatmul.mubr.bf16.gmra.mrb[8].mxu0 %v11640_v54  ;;  %1487 = vmatprep.subr.bf16.mxu1 %v9952_v33 }
 0x12e   :  { %1409 = vmatpush1.bf16.msra.mxu0 %v11544_v42  ;;  %8819 = vmatprep.mubr.msk.bf16.mxu0 %vm1187_vm0, %v11646_v55 }
 0x12f   :  { %1410 = vmatprep.subr.bf16.mxu0 %v9952_v33 }
 0x130   :  { %1488 = vmatpush1.bf16.msra.mxu1 %v11582_v49 }
 0x131   :  { %1489 = vmatprep.subr.bf16.mxu1 %v9952_v33 }
 0x132   :  { %1411 = vmatpush1.bf16.msra.mxu0 %v11558_v45 }
 0x133   :  { %1412 = vmatprep.subr.bf16.mxu0 %v9952_v33  ;;  %1334 = vmatmul.mubr.bf16.gmra.mrb[12].mxu1 %v11664_v56 }
 0x134   :  { %1490 = vmatpush1.bf16.msra.mxu1 %v11670_v57  ;;  %8834 = vmatprep.mubr.msk.bf16.mxu1 %vm1187_vm0, %v11514_v39 }
 0x135   :  { %1257 = vmatmul.mubr.bf16.gmra.mrb[12].mxu0 %v11664_v56  ;;  %1491 = vmatprep.subr.bf16.mxu1 %v9952_v33 }
 0x136   :  { %1413 = vmatpush1.bf16.msra.mxu0 %v11567_v46  ;;  %8828 = vmatprep.mubr.msk.bf16.mxu0 %vm1187_vm0, %v11514_v39 }
 0x137   :  { %1414 = vmatprep.subr.bf16.mxu0 %v9952_v33 }
 0x138   :  { %1492 = vmatpush1.bf16.msra.mxu1 %v11680_v58 }
 0x139   :  { %1493 = vmatprep.subr.bf16.mxu1 %v9952_v33 }
 0x13a   :  { %1415 = vmatpush1.bf16.msra.mxu0 %v11582_v49 }
 0x13b   :  { %1416 = vmatprep.subr.bf16.mxu0 %v9952_v33 }
 0x13c   :  { %1494 = vmatpush1.bf16.msra.mxu1 %v11694_v59 }
 0x13d   :  { %1495 = vmatprep.subr.bf16.mxu1 %v9952_v33 }
 0x13e   :  { %1417 = vmatpush1.bf16.msra.mxu0 %v11670_v57 }
 0x13f   :  { %1418 = vmatprep.subr.bf16.mxu0 %v9952_v33 }
 0x140   :  { %1496 = vmatpush1.bf16.msra.mxu1 %v11703_v60 }
 0x141   :  { %1641 = vmatprep.subr.bf16.mxu1 %v9952_v33 }
 0x142   :  { %1419 = vmatpush1.bf16.msra.mxu0 %v11680_v58 }
 0x143   :  { %1510 = vmatmul.mubr.bf16.vlgmr.msra.gmra.mrb[16].mxu1 %v11592_v50  ;;  %1570 = vmatprep.subr.bf16.mxu0 %v9952_v33 }
 0x144   :  { %8835 = vmatprep.mubr.msk.bf16.mxu1 %vm1187_vm0, %v11598_v51  ;;  %1642 = vmatpush1.bf16.msra.mxu1 %v11567_v46 }
 0x145   :  { %1433 = vmatmul.mubr.bf16.vlgmr.msra.gmra.mrb[16].mxu0 %v11592_v50  ;;  %1643 = vmatprep.subr.bf16.mxu1 %v9952_v33 }
 0x146   :  { %1571 = vmatpush1.bf16.msra.mxu0 %v11544_v42  ;;  %8829 = vmatprep.mubr.msk.bf16.mxu0 %vm1187_vm0, %v11598_v51 }
 0x147   :  { %1572 = vmatprep.subr.bf16.mxu0 %v9952_v33 }
 0x148   :  { %1644 = vmatpush1.bf16.msra.mxu1 %v11582_v49 }
 0x149   :  { %1645 = vmatprep.subr.bf16.mxu1 %v9952_v33 }
 0x14a   :  { %1573 = vmatpush1.bf16.msra.mxu0 %v11558_v45 }
 0x14b   :  { %1518 = vmatmul.mubr.bf16.gmra.mrb[20].mxu1 %v11616_v52  ;;  %1574 = vmatprep.subr.bf16.mxu0 %v9952_v33 }
 0x14c   :  { %8836 = vmatprep.mubr.msk.bf16.mxu1 %vm1187_vm0, %v11622_v53  ;;  %1646 = vmatpush1.bf16.msra.mxu1 %v11670_v57 }
 0x14d   :  { %1441 = vmatmul.mubr.bf16.gmra.mrb[20].mxu0 %v11616_v52  ;;  %1647 = vmatprep.subr.bf16.mxu1 %v9952_v33 }
 0x14e   :  { %1575 = vmatpush1.bf16.msra.mxu0 %v11567_v46  ;;  %8830 = vmatprep.mubr.msk.bf16.mxu0 %vm1187_vm0, %v11622_v53 }
 0x14f   :  { %1576 = vmatprep.subr.bf16.mxu0 %v9952_v33 }
 0x150   :  { %1648 = vmatpush1.bf16.msra.mxu1 %v11680_v58 }
 0x151   :  { %1649 = vmatprep.subr.bf16.mxu1 %v9952_v33 }
 0x152   :  { %1577 = vmatpush1.bf16.msra.mxu0 %v11582_v49 }
 0x153   :  { %1526 = vmatmul.mubr.bf16.gmra.mrb[24].mxu1 %v11640_v54  ;;  %1578 = vmatprep.subr.bf16.mxu0 %v9952_v33 }
 0x154   :  { %8837 = vmatprep.mubr.msk.bf16.mxu1 %vm1187_vm0, %v11646_v55  ;;  %1650 = vmatpush1.bf16.msra.mxu1 %v11694_v59 }
 0x155   :  { %1449 = vmatmul.mubr.bf16.gmra.mrb[24].mxu0 %v11640_v54  ;;  %1651 = vmatprep.subr.bf16.mxu1 %v9952_v33 }
 0x156   :  { %1579 = vmatpush1.bf16.msra.mxu0 %v11670_v57  ;;  %8831 = vmatprep.mubr.msk.bf16.mxu0 %vm1187_vm0, %v11646_v55 }
 0x157   :  { %1580 = vmatprep.subr.bf16.mxu0 %v9952_v33 }
 0x158   :  { %1652 = vmatpush1.bf16.msra.mxu1 %v11703_v60 }
 0x159   :  { %1653 = vmatprep.subr.bf16.mxu1 %v9952_v33 }
 0x15a   :  { %1581 = vmatpush1.bf16.msra.mxu0 %v11680_v58 }
 0x15b   :  { %1534 = vmatmul.mubr.bf16.gmra.mrb[28].mxu1 %v11664_v56  ;;  %1582 = vmatprep.subr.bf16.mxu0 %v9952_v33 }
 0x15c   :  { %8842 = vmatprep.mubr.msk.bf16.mxu1 %vm1187_vm0, %v11514_v39 }
 0x15d   :  { %1457 = vmatmul.mubr.bf16.gmra.mrb[28].mxu0 %v11664_v56 }
 0x15e   :  { %1583 = vmatpush1.bf16.msra.mxu0 %v11694_v59  ;;  %8838 = vmatprep.mubr.msk.bf16.mxu0 %vm1187_vm0, %v11514_v39 }
 0x15f   :  { %1584 = vmatprep.subr.bf16.mxu0 %v9952_v33 }
 0x162   :  { %1585 = vmatpush1.bf16.msra.mxu0 %v11703_v60 }
 0x163   :  { %1586 = vmatprep.subr.bf16.mxu0 %v9952_v33 }
 0x167   :  { %v1636_v63 = vpop.permute.xlu1 %1635 }
 0x168   :  { %v1565_v61 = vpop.permute.xlu0 %1564 }
 0x169   :  { %1587 = vmatpush1.bf16.msra.mxu0 %v1565_v61  ;;  %1654 = vmatpush1.bf16.msra.mxu1 %v1565_v61 }
 0x16a   :  { %1655 = vmatprep.subr.bf16.mxu1 %v9952_v33  ;;  %1588 = vmatprep.subr.bf16.mxu0 %v9952_v33 }
 0x16b   :  { %v1638_v0 = vpop.permute.xlu1 %1637 }
 0x16c   :  { %v1567_v62 = vpop.permute.xlu0 %1566 }
 0x16d   :  { %1589 = vmatpush1.bf16.msra.mxu0 %v1567_v62  ;;  %1656 = vmatpush1.bf16.msra.mxu1 %v1567_v62 }
 0x16e   :  { %1657 = vmatprep.subr.bf16.mxu1 %v9952_v33  ;;  %1734 = vmatprep.subr.bf16.mxu0 %v9952_v33 }
 0x16f   :  { %v1731_v2 = vpop.permute.xlu1 %1730 }
 0x170   :  { %1603 = vmatmul.mubr.bf16.vlgmr.msra.gmra.mrb[32].mxu0 %v11592_v50  ;;  %v1729_v1 = vpop.permute.xlu0 %1728 }
 0x171   :  { %1658 = vmatpush1.bf16.msra.mxu1 %v1636_v63  ;;  %1735 = vmatpush1.bf16.msra.mxu0 %v11670_v57 }
 0x172   :  { %1659 = vmatprep.subr.bf16.mxu1 %v9952_v33  ;;  %1736 = vmatprep.subr.bf16.mxu0 %v9952_v33 }
 0x173   :  { %8839 = vmatprep.mubr.msk.bf16.mxu0 %vm1187_vm0, %v11598_v51  ;;  %v1802_v4 = vpop.permute.xlu1 %1801 }
 0x174   :  { %v1800_v3 = vpop.permute.xlu0 %1799 }
 0x175   :  { %1660 = vmatpush1.bf16.msra.mxu1 %v1638_v0  ;;  %1737 = vmatpush1.bf16.msra.mxu0 %v11680_v58 }
 0x176   :  { %1738 = vmatprep.subr.bf16.mxu0 %v9952_v33  ;;  %1805 = vmatprep.subr.bf16.mxu1 %v9952_v33 }
 0x178   :  { %1611 = vmatmul.mubr.bf16.gmra.mrb[36].mxu0 %v11616_v52  ;;  %1674 = vmatmul.mubr.bf16.vlgmr.msra.gmra.mrb[32].mxu1 %v11592_v50 }
 0x179   :  { %1739 = vmatpush1.bf16.msra.mxu0 %v11694_v59  ;;  %1806 = vmatpush1.bf16.msra.mxu1 %v11694_v59 }
 0x17a   :  { %1740 = vmatprep.subr.bf16.mxu0 %v9952_v33  ;;  %1807 = vmatprep.subr.bf16.mxu1 %v9952_v33 }
 0x17b   :  { %8840 = vmatprep.mubr.msk.bf16.mxu0 %vm1187_vm0, %v11622_v53  ;;  %8843 = vmatprep.mubr.msk.bf16.mxu1 %vm1187_vm0, %v11598_v51 }
 0x17d   :  { %1741 = vmatpush1.bf16.msra.mxu0 %v11703_v60  ;;  %1808 = vmatpush1.bf16.msra.mxu1 %v11703_v60 }
 0x17e   :  { %1742 = vmatprep.subr.bf16.mxu0 %v9952_v33  ;;  %1809 = vmatprep.subr.bf16.mxu1 %v9952_v33 }
 0x180   :  { %1619 = vmatmul.mubr.bf16.gmra.mrb[40].mxu0 %v11640_v54  ;;  %1682 = vmatmul.mubr.bf16.gmra.mrb[36].mxu1 %v11616_v52 }
 0x181   :  { %1743 = vmatpush1.bf16.msra.mxu0 %v1565_v61  ;;  %1810 = vmatpush1.bf16.msra.mxu1 %v1565_v61 }
 0x182   :  { %1744 = vmatprep.subr.bf16.mxu0 %v9952_v33  ;;  %1811 = vmatprep.subr.bf16.mxu1 %v9952_v33 }
 0x183   :  { %8841 = vmatprep.mubr.msk.bf16.mxu0 %vm1187_vm0, %v11646_v55  ;;  %8844 = vmatprep.mubr.msk.bf16.mxu1 %vm1187_vm0, %v11622_v53 }
 0x184   :  { %v11842_v36 = vpop.permute.xlu1 %1365 }
 0x185   :  { %1745 = vmatpush1.bf16.msra.mxu0 %v1567_v62  ;;  %1812 = vmatpush1.bf16.msra.mxu1 %v1567_v62  ;;  %v11840_v31 = vpop.permute.xlu0 %1360 }
 0x186   :  { %1746 = vmatprep.subr.bf16.mxu0 %v9952_v33  ;;  %1813 = vmatprep.subr.bf16.mxu1 %v9952_v33 }
 0x188   :  { %1627 = vmatmul.mubr.bf16.gmra.mrb[44].mxu0 %v11664_v56  ;;  %1690 = vmatmul.mubr.bf16.gmra.mrb[40].mxu1 %v11640_v54 }
 0x189   :  { %1747 = vmatpush1.bf16.msra.mxu0 %v1636_v63  ;;  %1814 = vmatpush1.bf16.msra.mxu1 %v1636_v63  ;;  %v11848_v57 = vpop.permute.xlu0 %1375 }
 0x18a   :  { %1748 = vmatprep.subr.bf16.mxu0 %v9952_v33  ;;  %1815 = vmatprep.subr.bf16.mxu1 %v9952_v33 }
 0x18b   :  { %8845 = vmatprep.mubr.msk.bf16.mxu1 %vm1187_vm0, %v11646_v55  ;;  %8846 = vmatprep.mubr.msk.bf16.mxu0 %vm1187_vm0, %v11514_v39 }
 0x18d   :  { %1749 = vmatpush1.bf16.msra.mxu0 %v1638_v0  ;;  %1816 = vmatpush1.bf16.msra.mxu1 %v1638_v0 }
 0x18e   :  { %1817 = vmatprep.subr.bf16.mxu1 %v9952_v33  ;;  %1750 = vmatprep.subr.bf16.mxu0 %v9952_v33 }
 0x190   :  { %1698 = vmatmul.mubr.bf16.gmra.mrb[44].mxu1 %v11664_v56 }
 0x191   :  { %1751 = vmatpush1.bf16.msra.mxu0 %v1729_v1  ;;  %1818 = vmatpush1.bf16.msra.mxu1 %v1729_v1 }
 0x192   :  { %1752 = vmatprep.subr.bf16.mxu0 %v9952_v33  ;;  %1819 = vmatprep.subr.bf16.mxu1 %v9952_v33 }
 0x193   :  { %8850 = vmatprep.mubr.msk.bf16.mxu1 %vm1187_vm0, %v11514_v39 }
 0x195   :  { %1753 = vmatpush1.bf16.msra.mxu0 %v1731_v2  ;;  %1820 = vmatpush1.bf16.msra.mxu1 %v1731_v2 }
 0x196   :  { %1821 = vmatprep.subr.bf16.mxu1 %v9952_v33  ;;  %1928 = vmatprep.subr.bf16.mxu0 %v9952_v33 }
 0x198   :  { %1767 = vmatmul.mubr.bf16.vlgmr.msra.gmra.mrb[48].mxu0 %v11592_v50 }
 0x199   :  { %1822 = vmatpush1.bf16.msra.mxu1 %v1800_v3  ;;  %8847 = vmatprep.mubr.msk.bf16.mxu0 %vm1187_vm0, %v11598_v51 }
 0x19a   :  { %1823 = vmatprep.subr.bf16.mxu1 %v9952_v33 }
 0x19d   :  { %1824 = vmatpush1.bf16.msra.mxu1 %v1802_v4 }
 0x19e   :  { %1985 = vmatprep.subr.bf16.mxu1 %v9952_v33 }
 0x1a0   :  { %1775 = vmatmul.mubr.bf16.gmra.mrb[52].mxu0 %v11616_v52  ;;  %1838 = vmatmul.mubr.bf16.vlgmr.msra.gmra.mrb[48].mxu1 %v11592_v50 }
 0x1a1   :  { %8848 = vmatprep.mubr.msk.bf16.mxu0 %vm1187_vm0, %v11622_v53  ;;  %8851 = vmatprep.mubr.msk.bf16.mxu1 %vm1187_vm0, %v11598_v51 }
 0x1a8   :  { %1783 = vmatmul.mubr.bf16.gmra.mrb[56].mxu0 %v11640_v54  ;;  %1846 = vmatmul.mubr.bf16.gmra.mrb[52].mxu1 %v11616_v52  ;;  %v11846_v52 = vpop.permute.xlu1 %1370 }
 0x1a9   :  { %8849 = vmatprep.mubr.msk.bf16.mxu0 %vm1187_vm0, %v11646_v55  ;;  %8852 = vmatprep.mubr.msk.bf16.mxu1 %vm1187_vm0, %v11622_v53 }
 0x1b0   :  { %1791 = vmatmul.mubr.bf16.gmra.mrb[60].mxu0 %v11664_v56  ;;  %1854 = vmatmul.mubr.bf16.gmra.mrb[56].mxu1 %v11640_v54 }
 0x1b1   :  { %8853 = vmatprep.mubr.msk.bf16.mxu1 %vm1187_vm0, %v11646_v55 }
 0x1b8   :  { %1862 = vmatmul.mubr.bf16.gmra.mrb[60].mxu1 %v11664_v56 }
 0x1ee   :  { %v1311_v5 = vpop.f32.mrb[0].mxu1 }
 0x1ef   :  { %v1313_v6 = vpop.f32.mrb[1].mxu1 }
 0x1f0   :  { %v1234_v7 = vpop.f32.mrb[0].mxu0  ;;  %v1314_v8 = vpop.f32.mrb[2].mxu1 }
 0x1f1   :  { %v1236_v9 = vpop.f32.mrb[1].mxu0  ;;  %v1316_v10 = vpop.f32.mrb[3].mxu1 }
 0x1f2   :  { %v1237_v11 = vpop.f32.mrb[2].mxu0 }
 0x1f3   :  { %v1239_v12 = vpop.f32.mrb[3].mxu0 }
 0x1f6   :  { %v1319_v13 = vpop.f32.mrb[4].mxu1 }
 0x1f7   :  { %v1321_v14 = vpop.f32.mrb[5].mxu1 }
 0x1f8   :  { %v1242_v15 = vpop.f32.mrb[4].mxu0  ;;  %v1322_v16 = vpop.f32.mrb[6].mxu1  ;;  %v11859_v14 = vld [vmem:[%s13073_s3 + $0x4] ss:$8 sps:$4 sm:$0xff]  }
 0x1f9   :  { %v1244_v17 = vpop.f32.mrb[5].mxu0  ;;  %v1324_v18 = vpop.f32.mrb[7].mxu1  ;;  %8858 = vmatprep.mubr.msk.bf16.mxu0 %vm1187_vm0, %v11859_v14  ;;  %8860 = vmatprep.mubr.msk.bf16.mxu1 %vm1187_vm0, %v11859_v14 }
 0x1fa   :  { %v1245_v19 = vpop.f32.mrb[6].mxu0 }
 0x1fb   :  { %v1247_v20 = vpop.f32.mrb[7].mxu0 }
 0x1fe   :  { %v1327_v21 = vpop.f32.mrb[8].mxu1 }
 0x1ff   :  { %v1346_v22 = vmax.f32 %v1311_v5, %v1327_v21  ;;  %v1329_v23 = vpop.f32.mrb[9].mxu1 }
 0x200   :  { %v1250_v24 = vpop.f32.mrb[8].mxu0  ;;  %v1330_v25 = vpop.f32.mrb[10].mxu1 }
 0x201   :  { %v1342_v26 = vmax.f32 %v1234_v7, %v1250_v24  ;;  %v1252_v27 = vpop.f32.mrb[9].mxu0  ;;  %v1347_v28 = vmax.f32 %v1314_v8, %v1330_v25  ;;  %v1332_v29 = vpop.f32.mrb[11].mxu1 }
 0x202   :  { %v1253_v30 = vpop.f32.mrb[10].mxu0 }
 0x203   :  { %v1350_v32 = vmax.f32 %v1342_v26, %v1346_v22  ;;  %v1343_v34 = vmax.f32 %v1237_v11, %v1253_v30  ;;  %v1255_v35 = vpop.f32.mrb[11].mxu0 }
 0x205   :  { %v1351_v37 = vmax.f32 %v1343_v34, %v1347_v28  ;;  %v1378_v38 = vadd.f32 %v11840_v31, %v1350_v32 }
 0x206   :  { %v1335_v39 = vpop.f32.mrb[12].mxu1 }
 0x207   :  { %v1348_v40 = vmax.f32 %v1319_v13, %v1335_v39  ;;  %v1337_v41 = vpop.f32.mrb[13].mxu1  ;;  %v1379_v42 = vadd.f32 %v11842_v36, %v1351_v37  ;;  %v1382_v48 = vmax.f32 %v1378_v38, 0.0 }
 0x208   :  { %v1258_v43 = vpop.f32.mrb[12].mxu0  ;;  %v1338_v44 = vpop.f32.mrb[14].mxu1 }
 0x209   :  { %v1344_v45 = vmax.f32 %v1242_v15, %v1258_v43  ;;  %v1260_v46 = vpop.f32.mrb[13].mxu0  ;;  %v1349_v47 = vmax.f32 %v1322_v16, %v1338_v44  ;;  %v1383_v49 = vmax.f32 %v1379_v42, 0.0  ;;  %v1340_v50 = vpop.f32.mrb[15].mxu1 }
 0x20a   :  { %v1261_v51 = vpop.f32.mrb[14].mxu0 }
 0x20b   :  { %v1352_v53 = vmax.f32 %v1344_v45, %v1348_v40  ;;  %v1345_v54 = vmax.f32 %v1245_v19, %v1261_v51  ;;  %v1386_v55 = vpack.c.bf16 %v1383_v49, %v1382_v48  ;;  %v1263_v56 = vpop.f32.mrb[15].mxu0 }
 0x20d   :  { %v1353_v58 = vmax.f32 %v1345_v54, %v1349_v47  ;;  %1894 = vrot.lane.b32.xlu1 %v1386_v55, %s9953_s21  ;;  %1929 = vmatpush1.bf16.msra.mxu0 %v1386_v55  ;;  %v1380_v59 = vadd.f32 %v11846_v52, %v1352_v53 }
 0x20e   :  { %1930 = vmatprep.subr.bf16.mxu0 %v9952_v33 }
 0x20f   :  { %v1381_v60 = vadd.f32 %v11848_v57, %v1353_v58  ;;  %v1384_v61 = vmax.f32 %v1380_v59, 0.0 }
 0x211   :  { %v1385_v62 = vmax.f32 %v1381_v60, 0.0 }
 0x213   :  { %v1387_v63 = vpack.c.bf16 %v1385_v62, %v1384_v61 }
 0x215   :  { %1896 = vrot.lane.b32.xlu0 %v1387_v63, %s9953_s21  ;;  %1931 = vmatpush1.bf16.msra.mxu0 %v1387_v63 }
 0x216   :  { %v1511_v0 = vpop.f32.mrb[16].mxu1  ;;  %1932 = vmatprep.subr.bf16.mxu0 %v9952_v33 }
 0x217   :  { %v1513_v1 = vpop.f32.mrb[17].mxu1 }
 0x218   :  { %v1434_v2 = vpop.f32.mrb[16].mxu0  ;;  %v1514_v3 = vpop.f32.mrb[18].mxu1 }
 0x219   :  { %v1436_v4 = vpop.f32.mrb[17].mxu0  ;;  %v1516_v5 = vpop.f32.mrb[19].mxu1 }
 0x21a   :  { %v1437_v6 = vpop.f32.mrb[18].mxu0 }
 0x21b   :  { %v1439_v7 = vpop.f32.mrb[19].mxu0 }
 0x21e   :  { %v1519_v8 = vpop.f32.mrb[20].mxu1 }
 0x21f   :  { %v1521_v9 = vpop.f32.mrb[21].mxu1 }
 0x220   :  { %v1442_v10 = vpop.f32.mrb[20].mxu0  ;;  %v1522_v11 = vpop.f32.mrb[22].mxu1 }
 0x221   :  { %v1444_v12 = vpop.f32.mrb[21].mxu0  ;;  %v1524_v13 = vpop.f32.mrb[23].mxu1 }
 0x222   :  { %v1445_v15 = vpop.f32.mrb[22].mxu0 }
 0x223   :  { %v1447_v16 = vpop.f32.mrb[23].mxu0 }
 0x226   :  { %v1527_v17 = vpop.f32.mrb[24].mxu1 }
 0x227   :  { %v1546_v18 = vmax.f32 %v1511_v0, %v1527_v17  ;;  %v1529_v19 = vpop.f32.mrb[25].mxu1 }
 0x228   :  { %v1450_v20 = vpop.f32.mrb[24].mxu0  ;;  %v1530_v21 = vpop.f32.mrb[26].mxu1 }
 0x229   :  { %v1542_v22 = vmax.f32 %v1434_v2, %v1450_v20  ;;  %v1452_v23 = vpop.f32.mrb[25].mxu0  ;;  %v1547_v24 = vmax.f32 %v1514_v3, %v1530_v21  ;;  %v1532_v25 = vpop.f32.mrb[27].mxu1 }
 0x22a   :  { %v1453_v26 = vpop.f32.mrb[26].mxu0 }
 0x22b   :  { %v1550_v27 = vmax.f32 %v1542_v22, %v1546_v18  ;;  %v1543_v28 = vmax.f32 %v1437_v6, %v1453_v26  ;;  %v1455_v29 = vpop.f32.mrb[27].mxu0 }
 0x22d   :  { %v1554_v30 = vadd.f32 %v1550_v27, %v11840_v31  ;;  %v1551_v32 = vmax.f32 %v1543_v28, %v1547_v24 }
 0x22e   :  { %v1535_v34 = vpop.f32.mrb[28].mxu1 }
 0x22f   :  { %v1555_v35 = vadd.f32 %v1551_v32, %v11842_v36  ;;  %v1548_v37 = vmax.f32 %v1519_v8, %v1535_v34  ;;  %v1537_v38 = vpop.f32.mrb[29].mxu1  ;;  %v1558_v41 = vmax.f32 %v1554_v30, 0.0 }
 0x230   :  { %v1458_v39 = vpop.f32.mrb[28].mxu0  ;;  %v1538_v40 = vpop.f32.mrb[30].mxu1 }
 0x231   :  { %v1559_v42 = vmax.f32 %v1555_v35, 0.0  ;;  %v1544_v43 = vmax.f32 %v1442_v10, %v1458_v39  ;;  %v1460_v44 = vpop.f32.mrb[29].mxu0  ;;  %v1549_v45 = vmax.f32 %v1522_v11, %v1538_v40  ;;  %v1540_v46 = vpop.f32.mrb[31].mxu1 }
 0x232   :  { %v1461_v47 = vpop.f32.mrb[30].mxu0 }
 0x233   :  { %v1552_v48 = vmax.f32 %v1544_v43, %v1548_v37  ;;  %v1545_v49 = vmax.f32 %v1445_v15, %v1461_v47  ;;  %v1562_v50 = vpack.c.bf16 %v1559_v42, %v1558_v41  ;;  %v1463_v51 = vpop.f32.mrb[31].mxu0 }
 0x235   :  { %v1556_v53 = vadd.f32 %v1552_v48, %v11846_v52  ;;  %v1553_v54 = vmax.f32 %v1545_v49, %v1549_v45  ;;  %1979 = vrot.lane.b32.xlu1 %v1562_v50, %s9953_s21  ;;  %1933 = vmatpush1.bf16.msra.mxu0 %v1562_v50 }
 0x236   :  { %1986 = vmatpush1.bf16.msra.mxu1 %v1562_v50  ;;  %1934 = vmatprep.subr.bf16.mxu0 %v9952_v33 }
 0x237   :  { %v1560_v55 = vmax.f32 %v1556_v53, 0.0  ;;  %v1557_v56 = vadd.f32 %v1553_v54, %v11848_v57  ;;  %1987 = vmatprep.subr.bf16.mxu1 %v9952_v33 }
 0x239   :  { %v1561_v58 = vmax.f32 %v1557_v56, 0.0 }
 0x23b   :  { %v1563_v59 = vpack.c.bf16 %v1561_v58, %v1560_v55 }
 0x23d   :  { %1981 = vrot.lane.b32.xlu0 %v1563_v59, %s9953_s21  ;;  %1935 = vmatpush1.bf16.msra.mxu0 %v1563_v59 }
 0x23e   :  { %1988 = vmatpush1.bf16.msra.mxu1 %v1563_v59  ;;  %1936 = vmatprep.subr.bf16.mxu0 %v9952_v33 }
 0x23f   :  { %1989 = vmatprep.subr.bf16.mxu1 %v9952_v33 }
 0x243   :  { %v1604_v60 = vpop.f32.mrb[32].mxu0 }
 0x244   :  { %v1606_v61 = vpop.f32.mrb[33].mxu0 }
 0x245   :  { %v1607_v62 = vpop.f32.mrb[34].mxu0 }
 0x246   :  { %v1609_v63 = vpop.f32.mrb[35].mxu0 }
 0x24b   :  { %v1675_v0 = vpop.f32.mrb[32].mxu1  ;;  %v1612_v1 = vpop.f32.mrb[36].mxu0 }
 0x24c   :  { %v1677_v2 = vpop.f32.mrb[33].mxu1  ;;  %v1614_v3 = vpop.f32.mrb[37].mxu0 }
 0x24d   :  { %v1678_v4 = vpop.f32.mrb[34].mxu1  ;;  %v1615_v5 = vpop.f32.mrb[38].mxu0 }
 0x24e   :  { %v1680_v6 = vpop.f32.mrb[35].mxu1  ;;  %v1617_v7 = vpop.f32.mrb[39].mxu0 }
 0x253   :  { %v1620_v8 = vpop.f32.mrb[40].mxu0  ;;  %v1683_v9 = vpop.f32.mrb[36].mxu1 }
 0x254   :  { %v1706_v10 = vmax.f32 %v1604_v60, %v1620_v8  ;;  %v1622_v11 = vpop.f32.mrb[41].mxu0  ;;  %v1685_v12 = vpop.f32.mrb[37].mxu1 }
 0x255   :  { %v1623_v13 = vpop.f32.mrb[42].mxu0  ;;  %v1686_v15 = vpop.f32.mrb[38].mxu1 }
 0x256   :  { %v1707_v16 = vmax.f32 %v1607_v62, %v1623_v13  ;;  %v1625_v17 = vpop.f32.mrb[43].mxu0  ;;  %v1688_v18 = vpop.f32.mrb[39].mxu1 }
 0x25b   :  { %v1628_v19 = vpop.f32.mrb[44].mxu0  ;;  %v1691_v20 = vpop.f32.mrb[40].mxu1 }
 0x25c   :  { %v1708_v21 = vmax.f32 %v1612_v1, %v1628_v19  ;;  %v1710_v22 = vmax.f32 %v1675_v0, %v1691_v20  ;;  %v1630_v23 = vpop.f32.mrb[45].mxu0  ;;  %v1693_v24 = vpop.f32.mrb[41].mxu1 }
 0x25d   :  { %v1631_v25 = vpop.f32.mrb[46].mxu0  ;;  %v1694_v26 = vpop.f32.mrb[42].mxu1 }
 0x25e   :  { %v1714_v27 = vmax.f32 %v1706_v10, %v1710_v22  ;;  %v1709_v28 = vmax.f32 %v1615_v5, %v1631_v25  ;;  %v1711_v29 = vmax.f32 %v1678_v4, %v1694_v26  ;;  %v1696_v30 = vpop.f32.mrb[43].mxu1  ;;  %v1633_v32 = vpop.f32.mrb[47].mxu0 }
 0x260   :  { %v1718_v34 = vadd.f32 %v1714_v27, %v11840_v31  ;;  %v1715_v35 = vmax.f32 %v1707_v16, %v1711_v29 }
 0x262   :  { %v1719_v37 = vadd.f32 %v1715_v35, %v11842_v36  ;;  %v1722_v39 = vmax.f32 %v1718_v34, 0.0 }
 0x263   :  { %v1699_v38 = vpop.f32.mrb[44].mxu1 }
 0x264   :  { %v1723_v40 = vmax.f32 %v1719_v37, 0.0  ;;  %v1712_v41 = vmax.f32 %v1683_v9, %v1699_v38  ;;  %v1701_v42 = vpop.f32.mrb[45].mxu1 }
 0x265   :  { %v1702_v43 = vpop.f32.mrb[46].mxu1 }
 0x266   :  { %v11877_v44 = vpack.c.bf16 %v1723_v40, %v1722_v39  ;;  %v1716_v45 = vmax.f32 %v1708_v21, %v1712_v41  ;;  %v1713_v46 = vmax.f32 %v1686_v15, %v1702_v43  ;;  %v1704_v47 = vpop.f32.mrb[47].mxu1 }
 0x267   :  { %v2038_v47 = vld [vmem:[%s13074_s4] sm:$0xff] }
 0x268   :  { %v1720_v48 = vadd.f32 %v1716_v45, %v11846_v52  ;;  %v1717_v49 = vmax.f32 %v1709_v28, %v1713_v46  ;;  %2074 = vrot.lane.b32.xlu1 %v11877_v44, %s9953_s21  ;;  %1937 = vmatpush1.bf16.msra.mxu0 %v11877_v44 }
 0x269   :  { %1990 = vmatpush1.bf16.msra.mxu1 %v11877_v44  ;;  %1938 = vmatprep.subr.bf16.mxu0 %v9952_v33 }
 0x26a   :  { %v1721_v50 = vadd.f32 %v1717_v49, %v11848_v57  ;;  %1991 = vmatprep.subr.bf16.mxu1 %v9952_v33  ;;  %v1724_v53 = vmax.f32 %v1720_v48, 0.0 }
 0x26b   :  { %v1768_v51 = vpop.f32.mrb[48].mxu0 }
 0x26c   :  { %v1725_v54 = vmax.f32 %v1721_v50, 0.0  ;;  %v1770_v55 = vpop.f32.mrb[49].mxu0 }
 0x26d   :  { %v1771_v56 = vpop.f32.mrb[50].mxu0 }
 0x26e   :  { %v11887_v58 = vpack.c.bf16 %v1725_v54, %v1724_v53  ;;  %v1773_v59 = vpop.f32.mrb[51].mxu0  ;;  %v2039_v54 = vld [vmem:[%s13074_s4 + $0x8] sm:$0xff] }
 0x270   :  { %2076 = vrot.lane.b32.xlu0 %v11887_v58, %s9953_s21  ;;  %1939 = vmatpush1.bf16.msra.mxu0 %v11887_v58 }
 0x271   :  { %1992 = vmatpush1.bf16.msra.mxu1 %v11887_v58  ;;  %1940 = vmatprep.subr.bf16.mxu0 %v9952_v33 }
 0x272   :  { %1993 = vmatprep.subr.bf16.mxu1 %v9952_v33 }
 0x273   :  { %v1839_v60 = vpop.f32.mrb[48].mxu1  ;;  %v1776_v61 = vpop.f32.mrb[52].mxu0 }
 0x274   :  { %v1841_v62 = vpop.f32.mrb[49].mxu1  ;;  %v1778_v63 = vpop.f32.mrb[53].mxu0 }
 0x275   :  { %v1842_v0 = vpop.f32.mrb[50].mxu1  ;;  %v1779_v1 = vpop.f32.mrb[54].mxu0  ;;  %v9811_v63 = vld [vmem:[%s13073_s3 + $0x10] ss:$8 sps:$4 sm:$0xff]  }
 0x276   :  { %v1844_v2 = vpop.f32.mrb[51].mxu1  ;;  %v1781_v3 = vpop.f32.mrb[55].mxu0 }
 0x27b   :  { %v1784_v4 = vpop.f32.mrb[56].mxu0  ;;  %v1847_v5 = vpop.f32.mrb[52].mxu1 }
 0x27c   :  { %v1870_v6 = vmax.f32 %v1768_v51, %v1784_v4  ;;  %v1786_v7 = vpop.f32.mrb[57].mxu0  ;;  %v1849_v8 = vpop.f32.mrb[53].mxu1  ;;  %v2040_v51 = vld [vmem:[%s13074_s4 + $0x10] sm:$0xff] }
 0x27d   :  { %v1787_v9 = vpop.f32.mrb[58].mxu0  ;;  %v1850_v10 = vpop.f32.mrb[54].mxu1 }
 0x27e   :  { %v1871_v11 = vmax.f32 %v1771_v56, %v1787_v9  ;;  %v1852_v12 = vpop.f32.mrb[55].mxu1  ;;  %v1789_v13 = vpop.f32.mrb[59].mxu0  ;;  %v2041_v56 = vld [vmem:[%s13074_s4 + $0x18] sm:$0xff] }
 0x27f   :  { %v1895_v55 = vpop.permute.xlu1 %1894 }
 0x283   :  { %v1792_v15 = vpop.f32.mrb[60].mxu0  ;;  %v1855_v16 = vpop.f32.mrb[56].mxu1 }
 0x284   :  { %v1872_v17 = vmax.f32 %v1776_v61, %v1792_v15  ;;  %v1874_v18 = vmax.f32 %v1839_v60, %v1855_v16  ;;  %v1794_v19 = vpop.f32.mrb[61].mxu0  ;;  %v1857_v20 = vpop.f32.mrb[57].mxu1  ;;  %v11922_v60 = vld [vmem:[%s13073_s3] ss:$8 sps:$4 sm:$0xff]   ;;  %v11927_v61 = vld [vmem:[%s13073_s3 + $0x14] ss:$8 sps:$4 sm:$0xff]  }
 0x285   :  { %v1795_v21 = vpop.f32.mrb[62].mxu0  ;;  %v1858_v22 = vpop.f32.mrb[58].mxu1 }
 0x286   :  { %v1878_v23 = vmax.f32 %v1870_v6, %v1874_v18  ;;  %v1873_v24 = vmax.f32 %v1779_v1, %v1795_v21  ;;  %v1875_v25 = vmax.f32 %v1842_v0, %v1858_v22  ;;  %v1860_v26 = vpop.f32.mrb[59].mxu1  ;;  %v1797_v27 = vpop.f32.mrb[63].mxu0 }
 0x287   :  { %v1897_v59 = vpop.permute.xlu0 %1896 }
 0x288   :  { %v1882_v28 = vadd.f32 %v1878_v23, %v11840_v31  ;;  %v1879_v29 = vmax.f32 %v1871_v11, %v1875_v25 }
 0x28a   :  { %v1883_v30 = vadd.f32 %v1879_v29, %v11842_v36  ;;  %v1886_v34 = vmax.f32 %v1882_v28, 0.0 }
 0x28b   :  { %v1863_v32 = vpop.f32.mrb[60].mxu1 }
 0x28c   :  { %v1887_v35 = vmax.f32 %v1883_v30, 0.0  ;;  %v1876_v37 = vmax.f32 %v1847_v5, %v1863_v32  ;;  %v1865_v38 = vpop.f32.mrb[61].mxu1 }
 0x28d   :  { %v1866_v39 = vpop.f32.mrb[62].mxu1 }
 0x28e   :  { %v1890_v40 = vpack.c.bf16 %v1887_v35, %v1886_v34  ;;  %v1880_v41 = vmax.f32 %v1872_v17, %v1876_v37  ;;  %v1877_v42 = vmax.f32 %v1850_v10, %v1866_v39  ;;  %v1868_v43 = vpop.f32.mrb[63].mxu1 }
 0x290   :  { %v1884_v45 = vadd.f32 %v1880_v41, %v11846_v52  ;;  %v1881_v46 = vmax.f32 %v1873_v24, %v1877_v42  ;;  %2131 = vrot.lane.b32.xlu1 %v1890_v40, %s9953_s21  ;;  %1941 = vmatpush1.bf16.msra.mxu0 %v1890_v40 }
 0x291   :  { %1994 = vmatpush1.bf16.msra.mxu1 %v1890_v40  ;;  %1942 = vmatprep.subr.bf16.mxu0 %v9952_v33 }
 0x292   :  { %v1885_v48 = vadd.f32 %v1881_v46, %v11848_v57  ;;  %1995 = vmatprep.subr.bf16.mxu1 %v9952_v33  ;;  %v1888_v49 = vmax.f32 %v1884_v45, 0.0 }
 0x294   :  { %v1889_v50 = vmax.f32 %v1885_v48, 0.0  ;;  %2044 = vperm.xlu1 %9777, %v2038_v47  }
 0x296   :  { %v1891_v53 = vpack.c.bf16 %v1889_v50, %v1888_v49 }
 0x298   :  { %2054 = vperm.xlu1 %9777, %v2040_v51   ;;  %2133 = vrot.lane.b32.xlu0 %v1891_v53, %s9953_s21 }
 0x299   :  { %1943 = vmatpush1.bf16.msra.mxu0 %v1891_v53  ;;  %1996 = vmatpush1.bf16.msra.mxu1 %v1891_v53 }
 0x29a   :  { %1944 = vmatprep.subr.bf16.mxu0 %v9952_v33  ;;  %1997 = vmatprep.subr.bf16.mxu1 %v9952_v33 }
 0x29c   :  { %2049 = vperm.xlu0 %9776, %v2039_v54  }
 0x29d   :  { %1945 = vmatpush1.bf16.msra.mxu0 %v1895_v55  ;;  %1998 = vmatpush1.bf16.msra.mxu1 %v1895_v55 }
 0x29e   :  { %1946 = vmatprep.subr.bf16.mxu0 %v9952_v33  ;;  %1999 = vmatprep.subr.bf16.mxu1 %v9952_v33 }
 0x2a0   :  { %2059 = vperm.xlu0 %9776, %v2041_v56  }
 0x2a1   :  { %1947 = vmatpush1.bf16.msra.mxu0 %v1897_v59  ;;  %2000 = vmatpush1.bf16.msra.mxu1 %v1897_v59 }
 0x2a2   :  { %2080 = vmatprep.subr.bf16.mxu0 %v9952_v33  ;;  %2001 = vmatprep.subr.bf16.mxu1 %v9952_v33 }
 0x2a4   :  { %1961 = vmatmul.mubr.bf16.vlgmr.msra.gmra.mrb[64].mxu0 %v11922_v60 }
 0x2a5   :  { %2081 = vmatpush1.bf16.msra.mxu0 %v11877_v44  ;;  %8859 = vmatprep.mubr.msk.bf16.mxu0 %vm1187_vm0, %v11927_v61 }
 0x2a6   :  { %2082 = vmatprep.subr.bf16.mxu0 %v9952_v33 }
 0x2a7   :  { %v1980_v62 = vpop.permute.xlu1 %1979 }
 0x2a8   :  { %2002 = vmatpush1.bf16.msra.mxu1 %v1980_v62 }
 0x2a9   :  { %2083 = vmatpush1.bf16.msra.mxu0 %v11887_v58  ;;  %2003 = vmatprep.subr.bf16.mxu1 %v9952_v33 }
 0x2aa   :  { %2084 = vmatprep.subr.bf16.mxu0 %v9952_v33 }
 0x2ac   :  { %1969 = vmatmul.mubr.bf16.gmra.mrb[68].mxu0 %v9811_v63 }
 0x2ad   :  { %2085 = vmatpush1.bf16.msra.mxu0 %v1890_v40  ;;  %8862 = vmatprep.mubr.msk.bf16.mxu0 %vm1187_vm0, %v11859_v14 }
 0x2ae   :  { %2086 = vmatprep.subr.bf16.mxu0 %v9952_v33 }
 0x2af   :  { %v1982_v44 = vpop.permute.xlu0 %1981 }
 0x2b0   :  { %2004 = vmatpush1.bf16.msra.mxu1 %v1982_v44 }
 0x2b1   :  { %2087 = vmatpush1.bf16.msra.mxu0 %v1891_v53  ;;  %2137 = vmatprep.subr.bf16.mxu1 %v9952_v33 }
 0x2b2   :  { %2088 = vmatprep.subr.bf16.mxu0 %v9952_v33 }
 0x2b3   :  { %2018 = vmatmul.mubr.bf16.vlgmr.msra.gmra.mrb[64].mxu1 %v11922_v60 }
 0x2b4   :  { %2138 = vmatpush1.bf16.msra.mxu1 %v1890_v40  ;;  %8861 = vmatprep.mubr.msk.bf16.mxu1 %vm1187_vm0, %v11927_v61 }
 0x2b5   :  { %2089 = vmatpush1.bf16.msra.mxu0 %v1895_v55  ;;  %2139 = vmatprep.subr.bf16.mxu1 %v9952_v33 }
 0x2b6   :  { %2090 = vmatprep.subr.bf16.mxu0 %v9952_v33 }
 0x2b8   :  { %2140 = vmatpush1.bf16.msra.mxu1 %v1891_v53 }
 0x2b9   :  { %2091 = vmatpush1.bf16.msra.mxu0 %v1897_v59  ;;  %2141 = vmatprep.subr.bf16.mxu1 %v9952_v33 }
 0x2ba   :  { %2092 = vmatprep.subr.bf16.mxu0 %v9952_v33 }
 0x2bb   :  { %2026 = vmatmul.mubr.bf16.gmra.mrb[68].mxu1 %v9811_v63 }
 0x2bc   :  { %2142 = vmatpush1.bf16.msra.mxu1 %v1895_v55  ;;  %8864 = vmatprep.mubr.msk.bf16.mxu1 %vm1187_vm0, %v11859_v14 }
 0x2bd   :  { %2093 = vmatpush1.bf16.msra.mxu0 %v1980_v62  ;;  %2143 = vmatprep.subr.bf16.mxu1 %v9952_v33 }
 0x2be   :  { %2094 = vmatprep.subr.bf16.mxu0 %v9952_v33 }
 0x2c0   :  { %2144 = vmatpush1.bf16.msra.mxu1 %v1897_v59 }
 0x2c1   :  { %2095 = vmatpush1.bf16.msra.mxu0 %v1982_v44  ;;  %2145 = vmatprep.subr.bf16.mxu1 %v9952_v33 }
 0x2c2   :  { %2096 = vmatprep.subr.bf16.mxu0 %v9952_v33 }
 0x2c4   :  { %2146 = vmatpush1.bf16.msra.mxu1 %v1980_v62 }
 0x2c5   :  { %2147 = vmatprep.subr.bf16.mxu1 %v9952_v33 }
 0x2c8   :  { %2148 = vmatpush1.bf16.msra.mxu1 %v1982_v44 }
 0x2c9   :  { %2149 = vmatprep.subr.bf16.mxu1 %v9952_v33 }
 0x2da   :  { %v2075_v58 = vpop.permute.xlu1 %2074 }
 0x2db   :  { %2097 = vmatpush1.bf16.msra.mxu0 %v2075_v58  ;;  %2150 = vmatpush1.bf16.msra.mxu1 %v2075_v58 }
 0x2dc   :  { %2098 = vmatprep.subr.bf16.mxu0 %v9952_v33  ;;  %2151 = vmatprep.subr.bf16.mxu1 %v9952_v33 }
 0x2e2   :  { %v2077_v14 = vpop.permute.xlu0 %2076 }
 0x2e3   :  { %2099 = vmatpush1.bf16.msra.mxu0 %v2077_v14  ;;  %2152 = vmatpush1.bf16.msra.mxu1 %v2077_v14 }
 0x2e4   :  { %2153 = vmatprep.subr.bf16.mxu1 %v9952_v33  ;;  %2278 = vmatprep.subr.bf16.mxu0 %v9952_v33 }
 0x2e6   :  { %2113 = vmatmul.mubr.bf16.vlgmr.msra.gmra.mrb[72].mxu0 %v11922_v60 }
 0x2e7   :  { %8863 = vmatprep.mubr.msk.bf16.mxu0 %vm1187_vm0, %v11927_v61 }
 0x2ee   :  { %2121 = vmatmul.mubr.bf16.gmra.mrb[76].mxu0 %v9811_v63 }
 0x302   :  { %v2132_v0 = vpop.permute.xlu1 %2131 }
 0x303   :  { %2154 = vmatpush1.bf16.msra.mxu1 %v2132_v0 }
 0x304   :  { %2155 = vmatprep.subr.bf16.mxu1 %v9952_v33 }
 0x30a   :  { %v2134_v1 = vpop.permute.xlu0 %2133 }
 0x30b   :  { %2156 = vmatpush1.bf16.msra.mxu1 %v2134_v1 }
 0x30c   :  { %2349 = vmatprep.subr.bf16.mxu1 %v9952_v33 }
 0x30e   :  { %2170 = vmatmul.mubr.bf16.vlgmr.msra.gmra.mrb[72].mxu1 %v11922_v60 }
 0x30f   :  { %8865 = vmatprep.mubr.msk.bf16.mxu1 %vm1187_vm0, %v11927_v61 }
 0x313   :  { %v11974_v13 = vpop.permute.xlu1 %2044 }
 0x316   :  { %2178 = vmatmul.mubr.bf16.gmra.mrb[76].mxu1 %v9811_v63 }
 0x317   :  { %v11980_v27 = vpop.permute.xlu1 %2054 }
 0x31b   :  { %v11977_v19 = vpop.permute.xlu0 %2049 }
 0x31f   :  { %v11984_v34 = vpop.permute.xlu0 %2059 }
 0x377   :  { %v1962_v2 = vpop.f32.mrb[64].mxu0 }
 0x378   :  { %v1964_v3 = vpop.f32.mrb[65].mxu0 }
 0x379   :  { %v1965_v4 = vpop.f32.mrb[66].mxu0 }
 0x37a   :  { %v1967_v5 = vpop.f32.mrb[67].mxu0 }
 0x37f   :  { %v1970_v6 = vpop.f32.mrb[68].mxu0 }
 0x380   :  { %v1972_v7 = vpop.f32.mrb[69].mxu0 }
 0x381   :  { %v1973_v8 = vpop.f32.mrb[70].mxu0 }
 0x382   :  { %v1975_v9 = vpop.f32.mrb[71].mxu0 }
 0x383   :  { %v12015_v9 = vld [vmem:[%s13070_s0 + $0x90] sm:$0xff]  }
 0x386   :  { %v2019_v10 = vpop.f32.mrb[64].mxu1 }
 0x387   :  { %v2034_v11 = vmax.f32 %v1962_v2, %v2019_v10  ;;  %v2021_v12 = vpop.f32.mrb[65].mxu1  ;;  %v9816_v10 = vld [vmem:[%s13070_s0 + $0x88] sm:$0xff]  }
 0x388   :  { %v2022_v15 = vpop.f32.mrb[66].mxu1  ;;  %v12032_v12 = vld [vmem:[%s13070_s0 + $0x98] sm:$0xff]  }
 0x389   :  { %v2062_v16 = vadd.f32 %v11974_v13, %v2034_v11  ;;  %v2035_v17 = vmax.f32 %v1965_v4, %v2022_v15  ;;  %v2024_v18 = vpop.f32.mrb[67].mxu1  ;;  %v9815_v4 = vld [vmem:[%s13075_s5 + $0x4] ss:$8 sps:$4 sm:$0xff]  }
 0x38a   :  { %8874 = vmatprep.mubr.msk.bf16.mxu0 %vm1187_vm0, %v9815_v4  ;;  %8878 = vmatprep.mubr.msk.bf16.mxu1 %vm1187_vm0, %v9815_v4  ;;  %v12027_v11 = vld [vmem:[%s13070_s0 + $0xa0] sm:$0xff]  }
 0x38b   :  { %v2063_v20 = vadd.f32 %v11977_v19, %v2035_v17  ;;  %v2066_v21 = vmax.f32 %v2062_v16, 0.0  ;;  %v12043_v16 = vld [vmem:[%s13070_s0 + $0xa8] sm:$0xff]   ;;  %v12048_v17 = vld [vmem:[%s13070_s0 + $0xb0] sm:$0xff]  }
 0x38d   :  { %v2067_v22 = vmax.f32 %v2063_v20, 0.0  ;;  %v12057_v20 = vld [vmem:[%s13070_s0 + $0xb8] sm:$0xff]  }
 0x38e   :  { %v2027_v23 = vpop.f32.mrb[68].mxu1 }
 0x38f   :  { %v2036_v24 = vmax.f32 %v1970_v6, %v2027_v23  ;;  %v2029_v25 = vpop.f32.mrb[69].mxu1  ;;  %v2070_v26 = vpack.c.bf16 %v2067_v22, %v2066_v21 }
 0x390   :  { %v2030_v28 = vpop.f32.mrb[70].mxu1  ;;  %v9813_v25 = vld [vmem:[%s13075_s5] ss:$8 sps:$4 sm:$0xff]  }
 0x391   :  { %v2064_v29 = vadd.f32 %v11980_v27, %v2036_v24  ;;  %v2037_v30 = vmax.f32 %v1973_v8, %v2030_v28  ;;  %2202 = vrot.lane.b32.xlu1 %v2070_v26, %s9953_s21  ;;  %2279 = vmatpush1.bf16.msra.mxu0 %v2070_v26  ;;  %v2032_v32 = vpop.f32.mrb[71].mxu1  ;;  %v9812_v8 = vld [vmem:[%s13070_s0 + $0x80] sm:$0xff]  }
 0x392   :  { %2280 = vmatprep.subr.bf16.mxu0 %v9952_v33  ;;  %v9824_v32 = vld [vmem:[%s13075_s5 + $0x24] ss:$8 sps:$4 sm:$0xff]  }
 0x393   :  { %v2065_v35 = vadd.f32 %v11984_v34, %v2037_v30  ;;  %v2068_v37 = vmax.f32 %v2064_v29, 0.0  ;;  %v9821_v30 = vld [vmem:[%s13075_s5 + $0x10] ss:$8 sps:$4 sm:$0xff]  }
 0x395   :  { %v2069_v38 = vmax.f32 %v2065_v35, 0.0  ;;  %v9826_v35 = vld [vmem:[%s13075_s5 + $0x20] ss:$8 sps:$4 sm:$0xff]  }
 0x397   :  { %v2071_v39 = vpack.c.bf16 %v2069_v38, %v2068_v37  ;;  %v9829_v37 = vld [vmem:[%s13075_s5 + $0x34] ss:$8 sps:$4 sm:$0xff]   ;;  %v9831_v38 = vld [vmem:[%s13075_s5 + $0x30] ss:$8 sps:$4 sm:$0xff]  }
 0x399   :  { %2204 = vrot.lane.b32.xlu0 %v2071_v39, %s9953_s21  ;;  %2281 = vmatpush1.bf16.msra.mxu0 %v2071_v39 }
 0x39a   :  { %2282 = vmatprep.subr.bf16.mxu0 %v9952_v33 }
 0x3b9   :  { %v2114_v40 = vpop.f32.mrb[72].mxu0 }
 0x3ba   :  { %v2116_v41 = vpop.f32.mrb[73].mxu0 }
 0x3bb   :  { %v2117_v42 = vpop.f32.mrb[74].mxu0  ;;  %v12143_v41 = vld [vmem:[%s13070_s0 + $0xc8] sm:$0xff]  }
 0x3bc   :  { %v2119_v43 = vpop.f32.mrb[75].mxu0 }
 0x3bd   :  { %v12161_v43 = vld [vmem:[%s13071_s1] ss:$8 sps:$4 sm:$0xff]  }
 0x3c1   :  { %v2122_v45 = vpop.f32.mrb[76].mxu0 }
 0x3c2   :  { %v2124_v46 = vpop.f32.mrb[77].mxu0 }
 0x3c3   :  { %v2125_v47 = vpop.f32.mrb[78].mxu0  ;;  %v12176_v46 = vld [vmem:[%s13071_s1 + $0x14] ss:$8 sps:$4 sm:$0xff]  }
 0x3c4   :  { %v2127_v48 = vpop.f32.mrb[79].mxu0 }
 0x3c5   :  { %v12198_v48 = vld [vmem:[%s13071_s1 + $0x24] ss:$8 sps:$4 sm:$0xff]  }
 0x3e1   :  { %v2171_v49 = vpop.f32.mrb[72].mxu1 }
 0x3e2   :  { %v2186_v50 = vmax.f32 %v2114_v40, %v2171_v49  ;;  %v2173_v51 = vpop.f32.mrb[73].mxu1  ;;  %v12134_v40 = vld [vmem:[%s13070_s0 + $0xc0] sm:$0xff]  }
 0x3e3   :  { %v2174_v53 = vpop.f32.mrb[74].mxu1  ;;  %v12211_v49 = vld [vmem:[%s13071_s1 + $0x20] ss:$8 sps:$4 sm:$0xff]   ;;  %v12235_v51 = vld [vmem:[%s13071_s1 + $0x30] ss:$8 sps:$4 sm:$0xff]  }
 0x3e4   :  { %v2190_v54 = vadd.f32 %v2186_v50, %v11974_v13  ;;  %v2187_v55 = vmax.f32 %v2117_v42, %v2174_v53  ;;  %v2176_v56 = vpop.f32.mrb[75].mxu1  ;;  %v12154_v42 = vld [vmem:[%s13070_s0 + $0xd0] sm:$0xff]   ;;  %v12252_v53 = vld [vmem:[%s13070_s0 + $0xe0] sm:$0xff]  }
 0x3e5   :  { %v12222_v50 = vld [vmem:[%s13071_s1 + $0x34] ss:$8 sps:$4 sm:$0xff]  }
 0x3e6   :  { %v2191_v59 = vadd.f32 %v2187_v55, %v11977_v19  ;;  %v2194_v60 = vmax.f32 %v2190_v54, 0.0  ;;  %v12262_v54 = vld [vmem:[%s13070_s0 + $0xe8] sm:$0xff]   ;;  %v12273_v55 = vld [vmem:[%s13070_s0 + $0xf0] sm:$0xff]   ;;  %v12283_v56 = vld [vmem:[%s13070_s0 + $0xf8] sm:$0xff]  }
 0x3e8   :  { %v2195_v61 = vmax.f32 %v2191_v59, 0.0 }
 0x3e9   :  { %v2179_v62 = vpop.f32.mrb[76].mxu1 }
 0x3ea   :  { %v2198_v63 = vpack.c.bf16 %v2195_v61, %v2194_v60  ;;  %v2188_v44 = vmax.f32 %v2122_v45, %v2179_v62  ;;  %v2181_v58 = vpop.f32.mrb[77].mxu1  ;;  %v12169_v45 = vld [vmem:[%s13070_s0 + $0xd8] sm:$0xff]  }
 0x3eb   :  { %v2182_v14 = vpop.f32.mrb[78].mxu1 }
 0x3ec   :  { %v2192_v0 = vadd.f32 %v2188_v44, %v11980_v27  ;;  %v2189_v1 = vmax.f32 %v2125_v47, %v2182_v14  ;;  %v2184_v2 = vpop.f32.mrb[79].mxu1  ;;  %2210 = vrot.lane.b32.xlu1 %v2198_v63, %s9953_s21  ;;  %2283 = vmatpush1.bf16.msra.mxu0 %v2198_v63  ;;  %v12187_v47 = vld [vmem:[%s13071_s1 + $0x10] ss:$8 sps:$4 sm:$0xff]  }
 0x3ed   :  { %2350 = vmatpush1.bf16.msra.mxu1 %v2198_v63  ;;  %2284 = vmatprep.subr.bf16.mxu0 %v9952_v33 }
 0x3ee   :  { %v2193_v3 = vadd.f32 %v2189_v1, %v11984_v34  ;;  %2351 = vmatprep.subr.bf16.mxu1 %v9952_v33  ;;  %v2196_v5 = vmax.f32 %v2192_v0, 0.0  ;;  %v12416_v0 = vld [vmem:[%s13073_s3 + $0x4] ss:$8 sps:$4 sm:$0xff]  }
 0x3f0   :  { %v2197_v6 = vmax.f32 %v2193_v3, 0.0  ;;  %2216 = vrot.lane.b32.xlu1 %v2070_v26, %s9954_s18  ;;  %v9819_v26 = vld [vmem:[%s13075_s5 + $0x14] ss:$8 sps:$4 sm:$0xff]  }
 0x3f2   :  { %v2199_v7 = vpack.c.bf16 %v2197_v6, %v2196_v5 }
 0x3f4   :  { %2343 = vrot.lane.b32.xlu1 %v2198_v63, %s9954_s18  ;;  %2212 = vrot.lane.b32.xlu0 %v2199_v7, %s9953_s21 }
 0x3f5   :  { %2285 = vmatpush1.bf16.msra.mxu0 %v2199_v7  ;;  %2352 = vmatpush1.bf16.msra.mxu1 %v2199_v7 }
 0x3f6   :  { %2286 = vmatprep.subr.bf16.mxu0 %v9952_v33  ;;  %2353 = vmatprep.subr.bf16.mxu1 %v9952_v33 }
 0x3f8   :  { %2218 = vrot.lane.b32.xlu0 %v2071_v39, %s9954_s18  ;;  %2926 = vrot.lane.b32.xlu1 %v9812_v8, %s9953_s21  ;;  %v12125_v39 = vld [vmem:[%s13071_s1 + $0x4] ss:$8 sps:$4 sm:$0xff]  }
 0x3fc   :  { %2345 = vrot.lane.b32.xlu0 %v2199_v7, %s9954_s18  ;;  %2997 = vrot.lane.b32.xlu1 %v12015_v9, %s9953_s21 }
 0x400   :  { %2928 = vrot.lane.b32.xlu0 %v9816_v10, %s9953_s21  ;;  %3090 = vrot.lane.b32.xlu1 %v12027_v11, %s9953_s21 }
 0x403   :  { %v2203_v15 = vpop.permute.xlu1 %2202 }
 0x404   :  { %2287 = vmatpush1.bf16.msra.mxu0 %v2203_v15  ;;  %2354 = vmatpush1.bf16.msra.mxu1 %v2203_v15 }
 0x405   :  { %2288 = vmatprep.subr.bf16.mxu0 %v9952_v33  ;;  %2355 = vmatprep.subr.bf16.mxu1 %v9952_v33 }
 0x406   :  { %2999 = vrot.lane.b32.xlu0 %v12032_v12, %s9953_s21  ;;  %3161 = vrot.lane.b32.xlu1 %v12048_v17, %s9953_s21 }
 0x40a   :  { %3092 = vrot.lane.b32.xlu0 %v12043_v16, %s9953_s21 }
 0x40b   :  { %v2205_v18 = vpop.permute.xlu0 %2204 }
 0x40c   :  { %2289 = vmatpush1.bf16.msra.mxu0 %v2205_v18  ;;  %2356 = vmatpush1.bf16.msra.mxu1 %v2205_v18 }
 0x40d   :  { %2290 = vmatprep.subr.bf16.mxu0 %v9952_v33  ;;  %2357 = vmatprep.subr.bf16.mxu1 %v9952_v33 }
 0x40e   :  { %3163 = vrot.lane.b32.xlu0 %v12057_v20, %s9953_s21 }
 0x45e   :  { %v2211_v21 = vpop.permute.xlu1 %2210 }
 0x45f   :  { %2291 = vmatpush1.bf16.msra.mxu0 %v2211_v21  ;;  %2358 = vmatpush1.bf16.msra.mxu1 %v2211_v21 }
 0x460   :  { %2292 = vmatprep.subr.bf16.mxu0 %v9952_v33  ;;  %2359 = vmatprep.subr.bf16.mxu1 %v9952_v33 }
 0x462   :  { %v2217_v23 = vpop.permute.xlu1 %2216 }
 0x466   :  { %v2213_v22 = vpop.permute.xlu0 %2212  ;;  %v2344_v28 = vpop.permute.xlu1 %2343 }
 0x467   :  { %2293 = vmatpush1.bf16.msra.mxu0 %v2213_v22  ;;  %2360 = vmatpush1.bf16.msra.mxu1 %v2213_v22 }
 0x468   :  { %2294 = vmatprep.subr.bf16.mxu0 %v9952_v33  ;;  %2361 = vmatprep.subr.bf16.mxu1 %v9952_v33 }
 0x46a   :  { %v2219_v24 = vpop.permute.xlu0 %2218  ;;  %v2927_v59 = vpop.permute.xlu1 %2926 }
 0x46b   :  { %2295 = vmatpush1.bf16.msra.mxu0 %v2217_v23  ;;  %2362 = vmatpush1.bf16.msra.mxu1 %v2217_v23 }
 0x46c   :  { %2296 = vmatprep.subr.bf16.mxu0 %v9952_v33  ;;  %2363 = vmatprep.subr.bf16.mxu1 %v9952_v33 }
 0x46e   :  { %v2346_v29 = vpop.permute.xlu0 %2345  ;;  %v2998_v61 = vpop.permute.xlu1 %2997 }
 0x46f   :  { %2297 = vmatpush1.bf16.msra.mxu0 %v2219_v24  ;;  %2364 = vmatpush1.bf16.msra.mxu1 %v2219_v24 }
 0x470   :  { %2365 = vmatprep.subr.bf16.mxu1 %v9952_v33  ;;  %2586 = vmatprep.subr.bf16.mxu0 %v9952_v33 }
 0x472   :  { %2311 = vmatmul.mubr.bf16.vlgmr.msra.gmra.mrb[80].mxu0 %v9813_v25  ;;  %v2929_v60 = vpop.permute.xlu0 %2928  ;;  %v3091_v63 = vpop.permute.xlu1 %3090 }
 0x473   :  { %2366 = vmatpush1.bf16.msra.mxu1 %v2344_v28  ;;  %2587 = vmatpush1.bf16.msra.mxu0 %v9812_v8 }
 0x474   :  { %2367 = vmatprep.subr.bf16.mxu1 %v9952_v33  ;;  %2588 = vmatprep.subr.bf16.mxu0 %v9952_v33 }
 0x475   :  { %8875 = vmatprep.mubr.msk.bf16.mxu0 %vm1187_vm0, %v9819_v26 }
 0x477   :  { %2368 = vmatpush1.bf16.msra.mxu1 %v2346_v29  ;;  %2589 = vmatpush1.bf16.msra.mxu0 %v9816_v10 }
 0x478   :  { %2590 = vmatprep.subr.bf16.mxu0 %v9952_v33  ;;  %2663 = vmatprep.subr.bf16.mxu1 %v9952_v33  ;;  %v3000_v62 = vpop.permute.xlu0 %2999  ;;  %v3162_v58 = vpop.permute.xlu1 %3161 }
 0x47a   :  { %2382 = vmatmul.mubr.bf16.vlgmr.msra.gmra.mrb[80].mxu1 %v9813_v25  ;;  %2319 = vmatmul.mubr.bf16.gmra.mrb[84].mxu0 %v9821_v30 }
 0x47b   :  { %2591 = vmatpush1.bf16.msra.mxu0 %v12015_v9  ;;  %2664 = vmatpush1.bf16.msra.mxu1 %v12015_v9 }
 0x47c   :  { %2592 = vmatprep.subr.bf16.mxu0 %v9952_v33  ;;  %2665 = vmatprep.subr.bf16.mxu1 %v9952_v33  ;;  %v3093_v44 = vpop.permute.xlu0 %3092 }
 0x47d   :  { %8879 = vmatprep.mubr.msk.bf16.mxu1 %vm1187_vm0, %v9819_v26  ;;  %8876 = vmatprep.mubr.msk.bf16.mxu0 %vm1187_vm0, %v9824_v32 }
 0x47f   :  { %2593 = vmatpush1.bf16.msra.mxu0 %v12032_v12  ;;  %2666 = vmatpush1.bf16.msra.mxu1 %v12032_v12 }
 0x480   :  { %2594 = vmatprep.subr.bf16.mxu0 %v9952_v33  ;;  %2667 = vmatprep.subr.bf16.mxu1 %v9952_v33  ;;  %v3164_v14 = vpop.permute.xlu0 %3163 }
 0x482   :  { %2390 = vmatmul.mubr.bf16.gmra.mrb[84].mxu1 %v9821_v30  ;;  %2327 = vmatmul.mubr.bf16.gmra.mrb[88].mxu0 %v9826_v35 }
 0x483   :  { %2595 = vmatpush1.bf16.msra.mxu0 %v12027_v11  ;;  %2668 = vmatpush1.bf16.msra.mxu1 %v12027_v11 }
 0x484   :  { %2596 = vmatprep.subr.bf16.mxu0 %v9952_v33  ;;  %2669 = vmatprep.subr.bf16.mxu1 %v9952_v33 }
 0x485   :  { %8880 = vmatprep.mubr.msk.bf16.mxu1 %vm1187_vm0, %v9824_v32  ;;  %8877 = vmatprep.mubr.msk.bf16.mxu0 %vm1187_vm0, %v9829_v37 }
 0x487   :  { %2597 = vmatpush1.bf16.msra.mxu0 %v12043_v16  ;;  %2670 = vmatpush1.bf16.msra.mxu1 %v12043_v16 }
 0x488   :  { %2598 = vmatprep.subr.bf16.mxu0 %v9952_v33  ;;  %2671 = vmatprep.subr.bf16.mxu1 %v9952_v33 }
 0x48a   :  { %2398 = vmatmul.mubr.bf16.gmra.mrb[88].mxu1 %v9826_v35  ;;  %2335 = vmatmul.mubr.bf16.gmra.mrb[92].mxu0 %v9831_v38 }
 0x48b   :  { %2599 = vmatpush1.bf16.msra.mxu0 %v12048_v17  ;;  %2672 = vmatpush1.bf16.msra.mxu1 %v12048_v17 }
 0x48c   :  { %2600 = vmatprep.subr.bf16.mxu0 %v9952_v33  ;;  %2673 = vmatprep.subr.bf16.mxu1 %v9952_v33 }
 0x48d   :  { %8881 = vmatprep.mubr.msk.bf16.mxu1 %vm1187_vm0, %v9829_v37  ;;  %8924 = vmatprep.mubr.msk.bf16.mxu0 %vm1187_vm0, %v12125_v39 }
 0x48f   :  { %2601 = vmatpush1.bf16.msra.mxu0 %v12057_v20  ;;  %2674 = vmatpush1.bf16.msra.mxu1 %v12057_v20 }
 0x490   :  { %2602 = vmatprep.subr.bf16.mxu0 %v9952_v33  ;;  %2675 = vmatprep.subr.bf16.mxu1 %v9952_v33 }
 0x492   :  { %2406 = vmatmul.mubr.bf16.gmra.mrb[92].mxu1 %v9831_v38 }
 0x493   :  { %2603 = vmatpush1.bf16.msra.mxu0 %v12134_v40  ;;  %2676 = vmatpush1.bf16.msra.mxu1 %v12134_v40 }
 0x494   :  { %2604 = vmatprep.subr.bf16.mxu0 %v9952_v33  ;;  %2677 = vmatprep.subr.bf16.mxu1 %v9952_v33 }
 0x495   :  { %8930 = vmatprep.mubr.msk.bf16.mxu1 %vm1187_vm0, %v12125_v39 }
 0x497   :  { %2605 = vmatpush1.bf16.msra.mxu0 %v12143_v41  ;;  %2678 = vmatpush1.bf16.msra.mxu1 %v12143_v41 }
 0x498   :  { %2679 = vmatprep.subr.bf16.mxu1 %v9952_v33  ;;  %2762 = vmatprep.subr.bf16.mxu0 %v9952_v33 }
 0x49a   :  { %2619 = vmatmul.mubr.bf16.vlgmr.msra.gmra.mrb[96].mxu0 %v12161_v43 }
 0x49b   :  { %2680 = vmatpush1.bf16.msra.mxu1 %v12154_v42  ;;  %2763 = vmatpush1.bf16.msra.mxu0 %v12027_v11 }
 0x49c   :  { %2681 = vmatprep.subr.bf16.mxu1 %v9952_v33  ;;  %2764 = vmatprep.subr.bf16.mxu0 %v9952_v33 }
 0x49d   :  { %8925 = vmatprep.mubr.msk.bf16.mxu0 %vm1187_vm0, %v12176_v46 }
 0x49f   :  { %2682 = vmatpush1.bf16.msra.mxu1 %v12169_v45  ;;  %2765 = vmatpush1.bf16.msra.mxu0 %v12043_v16 }
 0x4a0   :  { %2766 = vmatprep.subr.bf16.mxu0 %v9952_v33  ;;  %2839 = vmatprep.subr.bf16.mxu1 %v9952_v33 }
 0x4a2   :  { %2627 = vmatmul.mubr.bf16.gmra.mrb[100].mxu0 %v12187_v47  ;;  %2696 = vmatmul.mubr.bf16.vlgmr.msra.gmra.mrb[96].mxu1 %v12161_v43 }
 0x4a3   :  { %2767 = vmatpush1.bf16.msra.mxu0 %v12048_v17  ;;  %2840 = vmatpush1.bf16.msra.mxu1 %v12048_v17 }
 0x4a4   :  { %2768 = vmatprep.subr.bf16.mxu0 %v9952_v33  ;;  %2841 = vmatprep.subr.bf16.mxu1 %v9952_v33 }
 0x4a5   :  { %8926 = vmatprep.mubr.msk.bf16.mxu0 %vm1187_vm0, %v12198_v48  ;;  %8931 = vmatprep.mubr.msk.bf16.mxu1 %vm1187_vm0, %v12176_v46 }
 0x4a7   :  { %2769 = vmatpush1.bf16.msra.mxu0 %v12057_v20  ;;  %2842 = vmatpush1.bf16.msra.mxu1 %v12057_v20 }
 0x4a8   :  { %2770 = vmatprep.subr.bf16.mxu0 %v9952_v33  ;;  %2843 = vmatprep.subr.bf16.mxu1 %v9952_v33 }
 0x4aa   :  { %2635 = vmatmul.mubr.bf16.gmra.mrb[104].mxu0 %v12211_v49  ;;  %2704 = vmatmul.mubr.bf16.gmra.mrb[100].mxu1 %v12187_v47 }
 0x4ab   :  { %2771 = vmatpush1.bf16.msra.mxu0 %v12134_v40  ;;  %2844 = vmatpush1.bf16.msra.mxu1 %v12134_v40 }
 0x4ac   :  { %2772 = vmatprep.subr.bf16.mxu0 %v9952_v33  ;;  %2845 = vmatprep.subr.bf16.mxu1 %v9952_v33 }
 0x4ad   :  { %8927 = vmatprep.mubr.msk.bf16.mxu0 %vm1187_vm0, %v12222_v50  ;;  %8932 = vmatprep.mubr.msk.bf16.mxu1 %vm1187_vm0, %v12198_v48 }
 0x4af   :  { %2773 = vmatpush1.bf16.msra.mxu0 %v12143_v41  ;;  %2846 = vmatpush1.bf16.msra.mxu1 %v12143_v41 }
 0x4b0   :  { %2774 = vmatprep.subr.bf16.mxu0 %v9952_v33  ;;  %2847 = vmatprep.subr.bf16.mxu1 %v9952_v33 }
 0x4b2   :  { %2643 = vmatmul.mubr.bf16.gmra.mrb[108].mxu0 %v12235_v51  ;;  %2712 = vmatmul.mubr.bf16.gmra.mrb[104].mxu1 %v12211_v49 }
 0x4b3   :  { %2775 = vmatpush1.bf16.msra.mxu0 %v12154_v42  ;;  %2848 = vmatpush1.bf16.msra.mxu1 %v12154_v42 }
 0x4b4   :  { %2776 = vmatprep.subr.bf16.mxu0 %v9952_v33  ;;  %2849 = vmatprep.subr.bf16.mxu1 %v9952_v33 }
 0x4b5   :  { %8933 = vmatprep.mubr.msk.bf16.mxu1 %vm1187_vm0, %v12222_v50  ;;  %8936 = vmatprep.mubr.msk.bf16.mxu0 %vm1187_vm0, %v12125_v39 }
 0x4b7   :  { %2777 = vmatpush1.bf16.msra.mxu0 %v12169_v45  ;;  %2850 = vmatpush1.bf16.msra.mxu1 %v12169_v45 }
 0x4b8   :  { %2778 = vmatprep.subr.bf16.mxu0 %v9952_v33  ;;  %2851 = vmatprep.subr.bf16.mxu1 %v9952_v33 }
 0x4ba   :  { %2720 = vmatmul.mubr.bf16.gmra.mrb[108].mxu1 %v12235_v51 }
 0x4bb   :  { %2779 = vmatpush1.bf16.msra.mxu0 %v12252_v53  ;;  %2852 = vmatpush1.bf16.msra.mxu1 %v12252_v53 }
 0x4bc   :  { %2780 = vmatprep.subr.bf16.mxu0 %v9952_v33  ;;  %2853 = vmatprep.subr.bf16.mxu1 %v9952_v33 }
 0x4bd   :  { %8942 = vmatprep.mubr.msk.bf16.mxu1 %vm1187_vm0, %v12125_v39 }
 0x4bf   :  { %2781 = vmatpush1.bf16.msra.mxu0 %v12262_v54  ;;  %2854 = vmatpush1.bf16.msra.mxu1 %v12262_v54 }
 0x4c0   :  { %2855 = vmatprep.subr.bf16.mxu1 %v9952_v33  ;;  %2932 = vmatprep.subr.bf16.mxu0 %v9952_v33 }
 0x4c2   :  { %2795 = vmatmul.mubr.bf16.vlgmr.msra.gmra.mrb[112].mxu0 %v12161_v43 }
 0x4c3   :  { %2856 = vmatpush1.bf16.msra.mxu1 %v12273_v55  ;;  %2933 = vmatpush1.bf16.msra.mxu0 %v12134_v40 }
 0x4c4   :  { %2857 = vmatprep.subr.bf16.mxu1 %v9952_v33  ;;  %2934 = vmatprep.subr.bf16.mxu0 %v9952_v33 }
 0x4c5   :  { %8937 = vmatprep.mubr.msk.bf16.mxu0 %vm1187_vm0, %v12176_v46 }
 0x4c7   :  { %2858 = vmatpush1.bf16.msra.mxu1 %v12283_v56  ;;  %2935 = vmatpush1.bf16.msra.mxu0 %v12143_v41 }
 0x4c8   :  { %2936 = vmatprep.subr.bf16.mxu0 %v9952_v33  ;;  %3003 = vmatprep.subr.bf16.mxu1 %v9952_v33 }
 0x4ca   :  { %2803 = vmatmul.mubr.bf16.gmra.mrb[116].mxu0 %v12187_v47  ;;  %2872 = vmatmul.mubr.bf16.vlgmr.msra.gmra.mrb[112].mxu1 %v12161_v43 }
 0x4cb   :  { %2937 = vmatpush1.bf16.msra.mxu0 %v12154_v42  ;;  %3004 = vmatpush1.bf16.msra.mxu1 %v12154_v42 }
 0x4cc   :  { %2938 = vmatprep.subr.bf16.mxu0 %v9952_v33  ;;  %3005 = vmatprep.subr.bf16.mxu1 %v9952_v33 }
 0x4cd   :  { %8938 = vmatprep.mubr.msk.bf16.mxu0 %vm1187_vm0, %v12198_v48  ;;  %8943 = vmatprep.mubr.msk.bf16.mxu1 %vm1187_vm0, %v12176_v46 }
 0x4cf   :  { %2939 = vmatpush1.bf16.msra.mxu0 %v12169_v45  ;;  %3006 = vmatpush1.bf16.msra.mxu1 %v12169_v45 }
 0x4d0   :  { %2940 = vmatprep.subr.bf16.mxu0 %v9952_v33  ;;  %3007 = vmatprep.subr.bf16.mxu1 %v9952_v33 }
 0x4d2   :  { %2811 = vmatmul.mubr.bf16.gmra.mrb[120].mxu0 %v12211_v49  ;;  %2880 = vmatmul.mubr.bf16.gmra.mrb[116].mxu1 %v12187_v47 }
 0x4d3   :  { %2941 = vmatpush1.bf16.msra.mxu0 %v12252_v53  ;;  %3008 = vmatpush1.bf16.msra.mxu1 %v12252_v53 }
 0x4d4   :  { %2942 = vmatprep.subr.bf16.mxu0 %v9952_v33  ;;  %3009 = vmatprep.subr.bf16.mxu1 %v9952_v33 }
 0x4d5   :  { %8939 = vmatprep.mubr.msk.bf16.mxu0 %vm1187_vm0, %v12222_v50  ;;  %8944 = vmatprep.mubr.msk.bf16.mxu1 %vm1187_vm0, %v12198_v48 }
 0x4d7   :  { %2943 = vmatpush1.bf16.msra.mxu0 %v12262_v54  ;;  %3010 = vmatpush1.bf16.msra.mxu1 %v12262_v54 }
 0x4d8   :  { %2944 = vmatprep.subr.bf16.mxu0 %v9952_v33  ;;  %3011 = vmatprep.subr.bf16.mxu1 %v9952_v33 }
 0x4da   :  { %2819 = vmatmul.mubr.bf16.gmra.mrb[124].mxu0 %v12235_v51  ;;  %2888 = vmatmul.mubr.bf16.gmra.mrb[120].mxu1 %v12211_v49 }
 0x4db   :  { %2945 = vmatpush1.bf16.msra.mxu0 %v12273_v55  ;;  %3012 = vmatpush1.bf16.msra.mxu1 %v12273_v55 }
 0x4dc   :  { %2946 = vmatprep.subr.bf16.mxu0 %v9952_v33  ;;  %3013 = vmatprep.subr.bf16.mxu1 %v9952_v33 }
 0x4dd   :  { %8945 = vmatprep.mubr.msk.bf16.mxu1 %vm1187_vm0, %v12222_v50  ;;  %8946 = vmatprep.mubr.msk.bf16.mxu0 %vm1187_vm0, %v12125_v39 }
 0x4df   :  { %2947 = vmatpush1.bf16.msra.mxu0 %v12283_v56  ;;  %3014 = vmatpush1.bf16.msra.mxu1 %v12283_v56 }
 0x4e0   :  { %2948 = vmatprep.subr.bf16.mxu0 %v9952_v33  ;;  %3015 = vmatprep.subr.bf16.mxu1 %v9952_v33 }
 0x4e2   :  { %2896 = vmatmul.mubr.bf16.gmra.mrb[124].mxu1 %v12235_v51 }
 0x4e3   :  { %2949 = vmatpush1.bf16.msra.mxu0 %v2927_v59  ;;  %3016 = vmatpush1.bf16.msra.mxu1 %v2927_v59 }
 0x4e4   :  { %2950 = vmatprep.subr.bf16.mxu0 %v9952_v33  ;;  %3017 = vmatprep.subr.bf16.mxu1 %v9952_v33 }
 0x4e5   :  { %8950 = vmatprep.mubr.msk.bf16.mxu1 %vm1187_vm0, %v12125_v39 }
 0x4e7   :  { %2951 = vmatpush1.bf16.msra.mxu0 %v2929_v60  ;;  %3018 = vmatpush1.bf16.msra.mxu1 %v2929_v60 }
 0x4e8   :  { %3019 = vmatprep.subr.bf16.mxu1 %v9952_v33  ;;  %3096 = vmatprep.subr.bf16.mxu0 %v9952_v33 }
 0x4ea   :  { %2965 = vmatmul.mubr.bf16.vlgmr.msra.gmra.mrb[128].mxu0 %v12161_v43 }
 0x4eb   :  { %3020 = vmatpush1.bf16.msra.mxu1 %v2998_v61  ;;  %3097 = vmatpush1.bf16.msra.mxu0 %v12252_v53 }
 0x4ec   :  { %3021 = vmatprep.subr.bf16.mxu1 %v9952_v33  ;;  %3098 = vmatprep.subr.bf16.mxu0 %v9952_v33 }
 0x4ed   :  { %8947 = vmatprep.mubr.msk.bf16.mxu0 %vm1187_vm0, %v12176_v46 }
 0x4ef   :  { %3022 = vmatpush1.bf16.msra.mxu1 %v3000_v62  ;;  %3099 = vmatpush1.bf16.msra.mxu0 %v12262_v54 }
 0x4f0   :  { %3100 = vmatprep.subr.bf16.mxu0 %v9952_v33  ;;  %3167 = vmatprep.subr.bf16.mxu1 %v9952_v33 }
 0x4f2   :  { %2973 = vmatmul.mubr.bf16.gmra.mrb[132].mxu0 %v12187_v47  ;;  %3036 = vmatmul.mubr.bf16.vlgmr.msra.gmra.mrb[128].mxu1 %v12161_v43 }
 0x4f3   :  { %3101 = vmatpush1.bf16.msra.mxu0 %v12273_v55  ;;  %3168 = vmatpush1.bf16.msra.mxu1 %v12273_v55 }
 0x4f4   :  { %3102 = vmatprep.subr.bf16.mxu0 %v9952_v33  ;;  %3169 = vmatprep.subr.bf16.mxu1 %v9952_v33 }
 0x4f5   :  { %8948 = vmatprep.mubr.msk.bf16.mxu0 %vm1187_vm0, %v12198_v48  ;;  %8951 = vmatprep.mubr.msk.bf16.mxu1 %vm1187_vm0, %v12176_v46 }
 0x4f7   :  { %3103 = vmatpush1.bf16.msra.mxu0 %v12283_v56  ;;  %3170 = vmatpush1.bf16.msra.mxu1 %v12283_v56 }
 0x4f8   :  { %3104 = vmatprep.subr.bf16.mxu0 %v9952_v33  ;;  %3171 = vmatprep.subr.bf16.mxu1 %v9952_v33 }
 0x4fa   :  { %2981 = vmatmul.mubr.bf16.gmra.mrb[136].mxu0 %v12211_v49  ;;  %3044 = vmatmul.mubr.bf16.gmra.mrb[132].mxu1 %v12187_v47 }
 0x4fb   :  { %3105 = vmatpush1.bf16.msra.mxu0 %v2927_v59  ;;  %3172 = vmatpush1.bf16.msra.mxu1 %v2927_v59 }
 0x4fc   :  { %3106 = vmatprep.subr.bf16.mxu0 %v9952_v33  ;;  %3173 = vmatprep.subr.bf16.mxu1 %v9952_v33 }
 0x4fd   :  { %8949 = vmatprep.mubr.msk.bf16.mxu0 %vm1187_vm0, %v12222_v50  ;;  %8952 = vmatprep.mubr.msk.bf16.mxu1 %vm1187_vm0, %v12198_v48 }
 0x4ff   :  { %3107 = vmatpush1.bf16.msra.mxu0 %v2929_v60  ;;  %3174 = vmatpush1.bf16.msra.mxu1 %v2929_v60 }
 0x500   :  { %3108 = vmatprep.subr.bf16.mxu0 %v9952_v33  ;;  %3175 = vmatprep.subr.bf16.mxu1 %v9952_v33 }
 0x502   :  { %2989 = vmatmul.mubr.bf16.gmra.mrb[140].mxu0 %v12235_v51  ;;  %3052 = vmatmul.mubr.bf16.gmra.mrb[136].mxu1 %v12211_v49 }
 0x503   :  { %3109 = vmatpush1.bf16.msra.mxu0 %v2998_v61  ;;  %3176 = vmatpush1.bf16.msra.mxu1 %v2998_v61 }
 0x504   :  { %3110 = vmatprep.subr.bf16.mxu0 %v9952_v33  ;;  %3177 = vmatprep.subr.bf16.mxu1 %v9952_v33 }
 0x505   :  { %8953 = vmatprep.mubr.msk.bf16.mxu1 %vm1187_vm0, %v12222_v50  ;;  %8954 = vmatprep.mubr.msk.bf16.mxu0 %vm1187_vm0, %v12125_v39 }
 0x507   :  { %3111 = vmatpush1.bf16.msra.mxu0 %v3000_v62  ;;  %3178 = vmatpush1.bf16.msra.mxu1 %v3000_v62 }
 0x508   :  { %3112 = vmatprep.subr.bf16.mxu0 %v9952_v33  ;;  %3179 = vmatprep.subr.bf16.mxu1 %v9952_v33 }
 0x50a   :  { %3060 = vmatmul.mubr.bf16.gmra.mrb[140].mxu1 %v12235_v51 }
 0x50b   :  { %3113 = vmatpush1.bf16.msra.mxu0 %v3091_v63  ;;  %3180 = vmatpush1.bf16.msra.mxu1 %v3091_v63 }
 0x50c   :  { %3114 = vmatprep.subr.bf16.mxu0 %v9952_v33  ;;  %3181 = vmatprep.subr.bf16.mxu1 %v9952_v33 }
 0x50d   :  { %8958 = vmatprep.mubr.msk.bf16.mxu1 %vm1187_vm0, %v12125_v39 }
 0x50f   :  { %3115 = vmatpush1.bf16.msra.mxu0 %v3093_v44  ;;  %3182 = vmatpush1.bf16.msra.mxu1 %v3093_v44 }
 0x510   :  { %3183 = vmatprep.subr.bf16.mxu1 %v9952_v33  ;;  %3262 = vmatprep.subr.bf16.mxu0 %v9952_v33 }
 0x512   :  { %3129 = vmatmul.mubr.bf16.vlgmr.msra.gmra.mrb[144].mxu0 %v12161_v43 }
 0x513   :  { %3184 = vmatpush1.bf16.msra.mxu1 %v3162_v58  ;;  %8955 = vmatprep.mubr.msk.bf16.mxu0 %vm1187_vm0, %v12176_v46 }
 0x514   :  { %3185 = vmatprep.subr.bf16.mxu1 %v9952_v33 }
 0x517   :  { %3186 = vmatpush1.bf16.msra.mxu1 %v3164_v14 }
 0x518   :  { %3319 = vmatprep.subr.bf16.mxu1 %v9952_v33 }
 0x51a   :  { %3137 = vmatmul.mubr.bf16.gmra.mrb[148].mxu0 %v12187_v47  ;;  %3200 = vmatmul.mubr.bf16.vlgmr.msra.gmra.mrb[144].mxu1 %v12161_v43 }
 0x51b   :  { %8956 = vmatprep.mubr.msk.bf16.mxu0 %vm1187_vm0, %v12198_v48  ;;  %8959 = vmatprep.mubr.msk.bf16.mxu1 %vm1187_vm0, %v12176_v46 }
 0x522   :  { %3145 = vmatmul.mubr.bf16.gmra.mrb[152].mxu0 %v12211_v49  ;;  %3208 = vmatmul.mubr.bf16.gmra.mrb[148].mxu1 %v12187_v47 }
 0x523   :  { %8957 = vmatprep.mubr.msk.bf16.mxu0 %vm1187_vm0, %v12222_v50  ;;  %8960 = vmatprep.mubr.msk.bf16.mxu1 %vm1187_vm0, %v12198_v48 }
 0x52a   :  { %3153 = vmatmul.mubr.bf16.gmra.mrb[156].mxu0 %v12235_v51  ;;  %3216 = vmatmul.mubr.bf16.gmra.mrb[152].mxu1 %v12211_v49 }
 0x52b   :  { %8961 = vmatprep.mubr.msk.bf16.mxu1 %vm1187_vm0, %v12222_v50  ;;  %8962 = vmatprep.mubr.msk.bf16.mxu0 %vm1187_vm0, %v12416_v0 }
 0x532   :  { %3224 = vmatmul.mubr.bf16.gmra.mrb[156].mxu1 %v12235_v51 }
 0x533   :  { %8964 = vmatprep.mubr.msk.bf16.mxu1 %vm1187_vm0, %v12416_v0 }
 0x545   :  { %v12423_v1 = vpop.f32.mrb[80].mxu0 }
 0x546   :  { %v2314_v2 = vpop.f32.mrb[81].mxu0 }
 0x547   :  { %v12425_v3 = vpop.f32.mrb[82].mxu0 }
 0x548   :  { %v2317_v4 = vpop.f32.mrb[83].mxu0 }
 0x54d   :  { %v12427_v5 = vpop.f32.mrb[80].mxu1  ;;  %v12429_v6 = vpop.f32.mrb[84].mxu0 }
 0x54e   :  { %v2414_v7 = vmax.f32 %v12423_v1, %v12427_v5  ;;  %v2385_v8 = vpop.f32.mrb[81].mxu1  ;;  %v2322_v9 = vpop.f32.mrb[85].mxu0 }
 0x54f   :  { %v12433_v10 = vpop.f32.mrb[82].mxu1  ;;  %v12435_v11 = vpop.f32.mrb[86].mxu0 }
 0x550   :  { %v2415_v12 = vmax.f32 %v12425_v3, %v12433_v10  ;;  %v2388_v15 = vpop.f32.mrb[83].mxu1  ;;  %v2325_v16 = vpop.f32.mrb[87].mxu0  ;;  %v9858_v3 = vld [vmem:[%s13075_s5 + $0x34] ss:$8 sps:$4 sm:$0xff]  }
 0x555   :  { %v12439_v17 = vpop.f32.mrb[84].mxu1  ;;  %v12441_v18 = vpop.f32.mrb[88].mxu0 }
 0x556   :  { %v2416_v20 = vmax.f32 %v12429_v6, %v12439_v17  ;;  %v2393_v21 = vpop.f32.mrb[85].mxu1  ;;  %v2330_v22 = vpop.f32.mrb[89].mxu0 }
 0x557   :  { %v12445_v23 = vpop.f32.mrb[86].mxu1  ;;  %v12447_v24 = vpop.f32.mrb[90].mxu0 }
 0x558   :  { %v2417_v25 = vmax.f32 %v12435_v11, %v12445_v23  ;;  %v2396_v26 = vpop.f32.mrb[87].mxu1  ;;  %v2333_v28 = vpop.f32.mrb[91].mxu0 }
 0x55d   :  { %v12451_v29 = vpop.f32.mrb[88].mxu1  ;;  %v12453_v30 = vpop.f32.mrb[92].mxu0 }
 0x55e   :  { %v2418_v32 = vmax.f32 %v12441_v18, %v12451_v29  ;;  %v2401_v35 = vpop.f32.mrb[89].mxu1  ;;  %v2338_v37 = vpop.f32.mrb[93].mxu0 }
 0x55f   :  { %v12457_v38 = vpop.f32.mrb[90].mxu1  ;;  %v12459_v39 = vpop.f32.mrb[94].mxu0 }
 0x560   :  { %v2419_v40 = vmax.f32 %v12447_v24, %v12457_v38  ;;  %v2404_v41 = vpop.f32.mrb[91].mxu1  ;;  %v2341_v42 = vpop.f32.mrb[95].mxu0 }
 0x565   :  { %v12463_v43 = vpop.f32.mrb[92].mxu1 }
 0x566   :  { %v2420_v45 = vmax.f32 %v12453_v30, %v12463_v43  ;;  %v2409_v46 = vpop.f32.mrb[93].mxu1  ;;  %v9859_v43 = vld [vmem:[%s13075_s5 + $0x30] ss:$8 sps:$4 sm:$0xff]  }
 0x567   :  { %v12467_v47 = vpop.f32.mrb[94].mxu1 }
 0x568   :  { %v2421_v48 = vmax.f32 %v12459_v39, %v12467_v47  ;;  %v2412_v49 = vpop.f32.mrb[95].mxu1 }
 0x56d   :  { %v2620_v50 = vpop.f32.mrb[96].mxu0 }
 0x56e   :  { %v2622_v51 = vpop.f32.mrb[97].mxu0 }
 0x56f   :  { %v2623_v53 = vpop.f32.mrb[98].mxu0 }
 0x570   :  { %v2625_v54 = vpop.f32.mrb[99].mxu0 }
 0x575   :  { %v2697_v55 = vpop.f32.mrb[96].mxu1  ;;  %v2628_v56 = vpop.f32.mrb[100].mxu0 }
 0x576   :  { %v2699_v59 = vpop.f32.mrb[97].mxu1  ;;  %v2630_v60 = vpop.f32.mrb[101].mxu0 }
 0x577   :  { %v2700_v61 = vpop.f32.mrb[98].mxu1  ;;  %v2631_v62 = vpop.f32.mrb[102].mxu0 }
 0x578   :  { %v2702_v63 = vpop.f32.mrb[99].mxu1  ;;  %v2633_v44 = vpop.f32.mrb[103].mxu0 }
 0x57d   :  { %v2636_v58 = vpop.f32.mrb[104].mxu0  ;;  %v2705_v14 = vpop.f32.mrb[100].mxu1 }
 0x57e   :  { %v2728_v2 = vmax.f32 %v2620_v50, %v2636_v58  ;;  %v2638_v4 = vpop.f32.mrb[105].mxu0  ;;  %v2707_v8 = vpop.f32.mrb[101].mxu1 }
 0x57f   :  { %v2639_v9 = vpop.f32.mrb[106].mxu0  ;;  %v2708_v15 = vpop.f32.mrb[102].mxu1 }
 0x580   :  { %v2729_v16 = vmax.f32 %v2623_v53, %v2639_v9  ;;  %v2641_v21 = vpop.f32.mrb[107].mxu0  ;;  %v2710_v22 = vpop.f32.mrb[103].mxu1 }
 0x585   :  { %v2644_v26 = vpop.f32.mrb[108].mxu0  ;;  %v2713_v28 = vpop.f32.mrb[104].mxu1 }
 0x586   :  { %v2730_v35 = vmax.f32 %v2628_v56, %v2644_v26  ;;  %v2732_v37 = vmax.f32 %v2697_v55, %v2713_v28  ;;  %v2646_v41 = vpop.f32.mrb[109].mxu0  ;;  %v2715_v42 = vpop.f32.mrb[105].mxu1 }
 0x587   :  { %v2647_v46 = vpop.f32.mrb[110].mxu0  ;;  %v2716_v49 = vpop.f32.mrb[106].mxu1 }
 0x588   :  { %v2736_v51 = vmax.f32 %v2728_v2, %v2732_v37  ;;  %v2731_v54 = vmax.f32 %v2631_v62, %v2647_v46  ;;  %v2733_v59 = vmax.f32 %v2700_v61, %v2716_v49  ;;  %v2718_v60 = vpop.f32.mrb[107].mxu1  ;;  %v2649_v50 = vpop.f32.mrb[111].mxu0 }
 0x58a   :  { %v2740_v63 = vadd.f32 %v2736_v51, %v11840_v31  ;;  %v2737_v44 = vmax.f32 %v2729_v16, %v2733_v59 }
 0x58c   :  { %v2741_v53 = vadd.f32 %v2737_v44, %v11842_v36  ;;  %v2744_v4 = vmax.f32 %v2740_v63, 0.0 }
 0x58d   :  { %v2721_v58 = vpop.f32.mrb[108].mxu1 }
 0x58e   :  { %v2745_v8 = vmax.f32 %v2741_v53, 0.0  ;;  %v2734_v9 = vmax.f32 %v2705_v14, %v2721_v58  ;;  %v2723_v56 = vpop.f32.mrb[109].mxu1 }
 0x58f   :  { %v2724_v55 = vpop.f32.mrb[110].mxu1 }
 0x590   :  { %v2738_v21 = vmax.f32 %v2730_v35, %v2734_v9  ;;  %v2735_v22 = vmax.f32 %v2708_v15, %v2724_v55  ;;  %v2748_v26 = vpack.c.bf16 %v2745_v8, %v2744_v4  ;;  %v2726_v28 = vpop.f32.mrb[111].mxu1 }
 0x592   :  { %v2742_v62 = vadd.f32 %v2738_v21, %v11846_v52  ;;  %v2739_v61 = vmax.f32 %v2731_v54, %v2735_v22  ;;  %3256 = vrot.lane.b32.xlu1 %v2748_v26, %s9953_s21  ;;  %3263 = vmatpush1.bf16.msra.mxu0 %v2748_v26 }
 0x593   :  { %3264 = vmatprep.subr.bf16.mxu0 %v9952_v33 }
 0x594   :  { %v2743_v2 = vadd.f32 %v2739_v61, %v11848_v57  ;;  %v2746_v37 = vmax.f32 %v2742_v62, 0.0 }
 0x595   :  { %v2796_v16 = vpop.f32.mrb[112].mxu0 }
 0x596   :  { %v2747_v41 = vmax.f32 %v2743_v2, 0.0  ;;  %v2798_v14 = vpop.f32.mrb[113].mxu0 }
 0x597   :  { %v2799_v42 = vpop.f32.mrb[114].mxu0 }
 0x598   :  { %v2749_v46 = vpack.c.bf16 %v2747_v41, %v2746_v37  ;;  %v2801_v35 = vpop.f32.mrb[115].mxu0 }
 0x59a   :  { %3258 = vrot.lane.b32.xlu0 %v2749_v46, %s9953_s21  ;;  %3265 = vmatpush1.bf16.msra.mxu0 %v2749_v46 }
 0x59b   :  { %3266 = vmatprep.subr.bf16.mxu0 %v9952_v33 }
 0x59d   :  { %v2873_v15 = vpop.f32.mrb[112].mxu1  ;;  %v2804_v49 = vpop.f32.mrb[116].mxu0 }
 0x59e   :  { %v2875_v51 = vpop.f32.mrb[113].mxu1  ;;  %v2806_v54 = vpop.f32.mrb[117].mxu0 }
 0x59f   :  { %v2876_v59 = vpop.f32.mrb[114].mxu1  ;;  %v2807_v60 = vpop.f32.mrb[118].mxu0 }
 0x5a0   :  { %v2878_v50 = vpop.f32.mrb[115].mxu1  ;;  %v2809_v63 = vpop.f32.mrb[119].mxu0 }
 0x5a5   :  { %v2812_v44 = vpop.f32.mrb[120].mxu0  ;;  %v2881_v53 = vpop.f32.mrb[116].mxu1 }
 0x5a6   :  { %v2904_v58 = vmax.f32 %v2796_v16, %v2812_v44  ;;  %v2814_v4 = vpop.f32.mrb[121].mxu0  ;;  %v2883_v8 = vpop.f32.mrb[117].mxu1 }
 0x5a7   :  { %v2815_v9 = vpop.f32.mrb[122].mxu0  ;;  %v2884_v56 = vpop.f32.mrb[118].mxu1 }
 0x5a8   :  { %v2905_v55 = vmax.f32 %v2799_v42, %v2815_v9  ;;  %v2817_v21 = vpop.f32.mrb[123].mxu0  ;;  %v2886_v22 = vpop.f32.mrb[119].mxu1 }
 0x5ad   :  { %v2820_v26 = vpop.f32.mrb[124].mxu0  ;;  %v2889_v28 = vpop.f32.mrb[120].mxu1 }
 0x5ae   :  { %v2906_v62 = vmax.f32 %v2804_v49, %v2820_v26  ;;  %v2908_v61 = vmax.f32 %v2873_v15, %v2889_v28  ;;  %v2822_v2 = vpop.f32.mrb[125].mxu0  ;;  %v2891_v37 = vpop.f32.mrb[121].mxu1 }
 0x5af   :  { %v2823_v41 = vpop.f32.mrb[126].mxu0  ;;  %v2892_v14 = vpop.f32.mrb[122].mxu1 }
 0x5b0   :  { %v2912_v46 = vmax.f32 %v2904_v58, %v2908_v61  ;;  %v2907_v35 = vmax.f32 %v2807_v60, %v2823_v41  ;;  %v2909_v51 = vmax.f32 %v2876_v59, %v2892_v14  ;;  %v2894_v54 = vpop.f32.mrb[123].mxu1  ;;  %v2825_v16 = vpop.f32.mrb[127].mxu0 }
 0x5b2   :  { %v2916_v50 = vadd.f32 %v2912_v46, %v11840_v31  ;;  %v2913_v63 = vmax.f32 %v2905_v55, %v2909_v51 }
 0x5b4   :  { %v2917_v42 = vadd.f32 %v2913_v63, %v11842_v36  ;;  %v2920_v4 = vmax.f32 %v2916_v50, 0.0 }
 0x5b5   :  { %v2897_v44 = vpop.f32.mrb[124].mxu1 }
 0x5b6   :  { %v2921_v8 = vmax.f32 %v2917_v42, 0.0  ;;  %v2910_v9 = vmax.f32 %v2881_v53, %v2897_v44  ;;  %v2899_v49 = vpop.f32.mrb[125].mxu1 }
 0x5b7   :  { %v2900_v15 = vpop.f32.mrb[126].mxu1 }
 0x5b8   :  { %v2914_v21 = vmax.f32 %v2906_v62, %v2910_v9  ;;  %v2911_v22 = vmax.f32 %v2884_v56, %v2900_v15  ;;  %v2924_v26 = vpack.c.bf16 %v2921_v8, %v2920_v4  ;;  %v2902_v28 = vpop.f32.mrb[127].mxu1 }
 0x5ba   :  { %v2918_v60 = vadd.f32 %v2914_v21, %v11846_v52  ;;  %v2915_v59 = vmax.f32 %v2907_v35, %v2911_v22  ;;  %3313 = vrot.lane.b32.xlu1 %v2924_v26, %s9953_s21  ;;  %3267 = vmatpush1.bf16.msra.mxu0 %v2924_v26 }
 0x5bb   :  { %3320 = vmatpush1.bf16.msra.mxu1 %v2924_v26  ;;  %3268 = vmatprep.subr.bf16.mxu0 %v9952_v33 }
 0x5bc   :  { %v2919_v58 = vadd.f32 %v2915_v59, %v11848_v57  ;;  %3321 = vmatprep.subr.bf16.mxu1 %v9952_v33  ;;  %v2922_v55 = vmax.f32 %v2918_v60, 0.0 }
 0x5bd   :  { %v2966_v53 = vpop.f32.mrb[128].mxu0 }
 0x5be   :  { %v2923_v61 = vmax.f32 %v2919_v58, 0.0  ;;  %v2968_v62 = vpop.f32.mrb[129].mxu0 }
 0x5bf   :  { %v2969_v56 = vpop.f32.mrb[130].mxu0 }
 0x5c0   :  { %v2925_v2 = vpack.c.bf16 %v2923_v61, %v2922_v55  ;;  %v2971_v37 = vpop.f32.mrb[131].mxu0 }
 0x5c2   :  { %3315 = vrot.lane.b32.xlu0 %v2925_v2, %s9953_s21  ;;  %3269 = vmatpush1.bf16.msra.mxu0 %v2925_v2 }
 0x5c3   :  { %3322 = vmatpush1.bf16.msra.mxu1 %v2925_v2  ;;  %3270 = vmatprep.subr.bf16.mxu0 %v9952_v33 }
 0x5c4   :  { %3323 = vmatprep.subr.bf16.mxu1 %v9952_v33 }
 0x5c5   :  { %v3037_v41 = vpop.f32.mrb[128].mxu1  ;;  %v2974_v14 = vpop.f32.mrb[132].mxu0 }
 0x5c6   :  { %v3039_v46 = vpop.f32.mrb[129].mxu1  ;;  %v2976_v35 = vpop.f32.mrb[133].mxu0 }
 0x5c7   :  { %v3040_v51 = vpop.f32.mrb[130].mxu1  ;;  %v2977_v54 = vpop.f32.mrb[134].mxu0 }
 0x5c8   :  { %v3042_v16 = vpop.f32.mrb[131].mxu1  ;;  %v2979_v50 = vpop.f32.mrb[135].mxu0 }
 0x5cd   :  { %v2982_v63 = vpop.f32.mrb[136].mxu0  ;;  %v3045_v42 = vpop.f32.mrb[132].mxu1 }
 0x5ce   :  { %v3068_v44 = vmax.f32 %v2966_v53, %v2982_v63  ;;  %v2984_v4 = vpop.f32.mrb[137].mxu0  ;;  %v3047_v8 = vpop.f32.mrb[133].mxu1 }
 0x5cf   :  { %v2985_v9 = vpop.f32.mrb[138].mxu0  ;;  %v3048_v49 = vpop.f32.mrb[134].mxu1 }
 0x5d0   :  { %v3069_v15 = vmax.f32 %v2969_v56, %v2985_v9  ;;  %v2987_v21 = vpop.f32.mrb[139].mxu0  ;;  %v3050_v22 = vpop.f32.mrb[135].mxu1 }
 0x5d5   :  { %v2990_v26 = vpop.f32.mrb[140].mxu0  ;;  %v3053_v28 = vpop.f32.mrb[136].mxu1 }
 0x5d6   :  { %v3070_v60 = vmax.f32 %v2974_v14, %v2990_v26  ;;  %v3072_v59 = vmax.f32 %v3037_v41, %v3053_v28  ;;  %v2992_v58 = vpop.f32.mrb[141].mxu0  ;;  %v3055_v55 = vpop.f32.mrb[137].mxu1 }
 0x5d7   :  { %v2993_v61 = vpop.f32.mrb[142].mxu0  ;;  %v3056_v62 = vpop.f32.mrb[138].mxu1 }
 0x5d8   :  { %v3076_v2 = vmax.f32 %v3068_v44, %v3072_v59  ;;  %v3071_v37 = vmax.f32 %v2977_v54, %v2993_v61  ;;  %v3073_v46 = vmax.f32 %v3040_v51, %v3056_v62  ;;  %v3058_v35 = vpop.f32.mrb[139].mxu1  ;;  %v2995_v53 = vpop.f32.mrb[143].mxu0 }
 0x5da   :  { %v3080_v16 = vadd.f32 %v3076_v2, %v11840_v31  ;;  %v3077_v50 = vmax.f32 %v3069_v15, %v3073_v46 }
 0x5dc   :  { %v3081_v56 = vadd.f32 %v3077_v50, %v11842_v36  ;;  %v3084_v4 = vmax.f32 %v3080_v16, 0.0 }
 0x5dd   :  { %v3061_v63 = vpop.f32.mrb[140].mxu1 }
 0x5de   :  { %v3085_v8 = vmax.f32 %v3081_v56, 0.0  ;;  %v3074_v9 = vmax.f32 %v3045_v42, %v3061_v63  ;;  %v3063_v14 = vpop.f32.mrb[141].mxu1 }
 0x5df   :  { %v3064_v41 = vpop.f32.mrb[142].mxu1 }
 0x5e0   :  { %v12491_v21 = vpack.c.bf16 %v3085_v8, %v3084_v4  ;;  %v3078_v22 = vmax.f32 %v3070_v60, %v3074_v9  ;;  %v3075_v26 = vmax.f32 %v3048_v49, %v3064_v41  ;;  %v3066_v44 = vpop.f32.mrb[143].mxu1 }
 0x5e2   :  { %v3082_v51 = vadd.f32 %v3078_v22, %v11846_v52  ;;  %v3079_v54 = vmax.f32 %v3071_v37, %v3075_v26  ;;  %3384 = vrot.lane.b32.xlu1 %v12491_v21, %s9953_s21  ;;  %3271 = vmatpush1.bf16.msra.mxu0 %v12491_v21 }
 0x5e3   :  { %3324 = vmatpush1.bf16.msra.mxu1 %v12491_v21  ;;  %3272 = vmatprep.subr.bf16.mxu0 %v9952_v33 }
 0x5e4   :  { %v3083_v42 = vadd.f32 %v3079_v54, %v11848_v57  ;;  %3325 = vmatprep.subr.bf16.mxu1 %v9952_v33  ;;  %v3086_v28 = vmax.f32 %v3082_v51, 0.0 }
 0x5e5   :  { %v3130_v15 = vpop.f32.mrb[144].mxu0 }
 0x5e6   :  { %v3087_v49 = vmax.f32 %v3083_v42, 0.0  ;;  %v3132_v60 = vpop.f32.mrb[145].mxu0 }
 0x5e7   :  { %v3133_v59 = vpop.f32.mrb[146].mxu0 }
 0x5e8   :  { %v12501_v58 = vpack.c.bf16 %v3087_v49, %v3086_v28  ;;  %v3135_v55 = vpop.f32.mrb[147].mxu0 }
 0x5ea   :  { %3386 = vrot.lane.b32.xlu0 %v12501_v58, %s9953_s21  ;;  %3273 = vmatpush1.bf16.msra.mxu0 %v12501_v58 }
 0x5eb   :  { %3326 = vmatpush1.bf16.msra.mxu1 %v12501_v58  ;;  %3274 = vmatprep.subr.bf16.mxu0 %v9952_v33 }
 0x5ec   :  { %3327 = vmatprep.subr.bf16.mxu1 %v9952_v33 }
 0x5ed   :  { %v3201_v61 = vpop.f32.mrb[144].mxu1  ;;  %v3138_v62 = vpop.f32.mrb[148].mxu0 }
 0x5ee   :  { %v3203_v2 = vpop.f32.mrb[145].mxu1  ;;  %v3140_v37 = vpop.f32.mrb[149].mxu0 }
 0x5ef   :  { %v3204_v46 = vpop.f32.mrb[146].mxu1  ;;  %v3141_v35 = vpop.f32.mrb[150].mxu0 }
 0x5f0   :  { %v3206_v53 = vpop.f32.mrb[147].mxu1  ;;  %v3143_v16 = vpop.f32.mrb[151].mxu0 }
 0x5f5   :  { %v3146_v50 = vpop.f32.mrb[152].mxu0  ;;  %v3209_v56 = vpop.f32.mrb[148].mxu1 }
 0x5f6   :  { %v3232_v63 = vmax.f32 %v3130_v15, %v3146_v50  ;;  %v3148_v4 = vpop.f32.mrb[153].mxu0  ;;  %v3211_v8 = vpop.f32.mrb[149].mxu1 }
 0x5f7   :  { %v3149_v9 = vpop.f32.mrb[154].mxu0  ;;  %v3212_v14 = vpop.f32.mrb[150].mxu1 }
 0x5f8   :  { %v3233_v41 = vmax.f32 %v3133_v59, %v3149_v9  ;;  %v3214_v22 = vpop.f32.mrb[151].mxu1  ;;  %v3151_v26 = vpop.f32.mrb[155].mxu0 }
 0x5fd   :  { %v3154_v44 = vpop.f32.mrb[156].mxu0  ;;  %v3217_v51 = vpop.f32.mrb[152].mxu1 }
 0x5fe   :  { %v3234_v54 = vmax.f32 %v3138_v62, %v3154_v44  ;;  %v3236_v42 = vmax.f32 %v3201_v61, %v3217_v51  ;;  %v3156_v28 = vpop.f32.mrb[157].mxu0  ;;  %v3219_v49 = vpop.f32.mrb[153].mxu1 }
 0x5ff   :  { %v3157_v60 = vpop.f32.mrb[158].mxu0  ;;  %v3220_v55 = vpop.f32.mrb[154].mxu1 }
 0x600   :  { %v3240_v2 = vmax.f32 %v3232_v63, %v3236_v42  ;;  %v3235_v37 = vmax.f32 %v3141_v35, %v3157_v60  ;;  %v3237_v53 = vmax.f32 %v3204_v46, %v3220_v55  ;;  %v3222_v16 = vpop.f32.mrb[155].mxu1  ;;  %v3159_v15 = vpop.f32.mrb[159].mxu0 }
 0x602   :  { %v3244_v50 = vadd.f32 %v3240_v2, %v11840_v31  ;;  %v3241_v4 = vmax.f32 %v3233_v41, %v3237_v53  ;;  %v12533_v41 = vld [vmem:[%s13073_s3 + $0x14] ss:$8 sps:$4 sm:$0xff]  }
 0x604   :  { %v3245_v59 = vadd.f32 %v3241_v4, %v11842_v36  ;;  %v3248_v9 = vmax.f32 %v3244_v50, 0.0 }
 0x605   :  { %v3225_v8 = vpop.f32.mrb[156].mxu1 }
 0x606   :  { %v3249_v22 = vmax.f32 %v3245_v59, 0.0  ;;  %v3238_v26 = vmax.f32 %v3209_v56, %v3225_v8  ;;  %v3227_v62 = vpop.f32.mrb[157].mxu1 }
 0x607   :  { %v3228_v61 = vpop.f32.mrb[158].mxu1 }
 0x608   :  { %v3252_v44 = vpack.c.bf16 %v3249_v22, %v3248_v9  ;;  %v3242_v51 = vmax.f32 %v3234_v54, %v3238_v26  ;;  %v3239_v28 = vmax.f32 %v3212_v14, %v3228_v61  ;;  %v3230_v49 = vpop.f32.mrb[159].mxu1  ;;  %v12526_v14 = vld [vmem:[%s13073_s3] ss:$8 sps:$4 sm:$0xff]   ;;  %v9851_v54 = vld [vmem:[%s13073_s3 + $0x10] ss:$8 sps:$4 sm:$0xff]  }
 0x60a   :  { %v3246_v35 = vadd.f32 %v3242_v51, %v11846_v52  ;;  %v3243_v46 = vmax.f32 %v3235_v37, %v3239_v28  ;;  %3441 = vrot.lane.b32.xlu1 %v3252_v44, %s9953_s21  ;;  %3275 = vmatpush1.bf16.msra.mxu0 %v3252_v44  ;;  %v3257_v52 = vpop.permute.xlu1 %3256 }
 0x60b   :  { %3328 = vmatpush1.bf16.msra.mxu1 %v3252_v44  ;;  %3276 = vmatprep.subr.bf16.mxu0 %v9952_v33 }
 0x60c   :  { %v3247_v31 = vadd.f32 %v3243_v46, %v11848_v57  ;;  %3329 = vmatprep.subr.bf16.mxu1 %v9952_v33  ;;  %v3250_v36 = vmax.f32 %v3246_v35, 0.0  ;;  %v3259_v57 = vpop.permute.xlu0 %3258 }
 0x60e   :  { %v3251_v56 = vmax.f32 %v3247_v31, 0.0 }
 0x610   :  { %v3253_v63 = vpack.c.bf16 %v3251_v56, %v3250_v36 }
 0x612   :  { %3443 = vrot.lane.b32.xlu0 %v3253_v63, %s9953_s21  ;;  %3277 = vmatpush1.bf16.msra.mxu0 %v3253_v63 }
 0x613   :  { %3330 = vmatpush1.bf16.msra.mxu1 %v3253_v63  ;;  %3278 = vmatprep.subr.bf16.mxu0 %v9952_v33 }
 0x614   :  { %3331 = vmatprep.subr.bf16.mxu1 %v9952_v33 }
 0x616   :  { %3279 = vmatpush1.bf16.msra.mxu0 %v3257_v52 }
 0x617   :  { %3332 = vmatpush1.bf16.msra.mxu1 %v3257_v52  ;;  %3280 = vmatprep.subr.bf16.mxu0 %v9952_v33 }
 0x618   :  { %3333 = vmatprep.subr.bf16.mxu1 %v9952_v33 }
 0x61a   :  { %3281 = vmatpush1.bf16.msra.mxu0 %v3259_v57 }
 0x61b   :  { %3334 = vmatpush1.bf16.msra.mxu1 %v3259_v57  ;;  %3390 = vmatprep.subr.bf16.mxu0 %v9952_v33 }
 0x61c   :  { %3335 = vmatprep.subr.bf16.mxu1 %v9952_v33 }
 0x61d   :  { %3295 = vmatmul.mubr.bf16.vlgmr.msra.gmra.mrb[160].mxu0 %v12526_v14 }
 0x61e   :  { %3391 = vmatpush1.bf16.msra.mxu0 %v12491_v21  ;;  %8963 = vmatprep.mubr.msk.bf16.mxu0 %vm1187_vm0, %v12533_v41 }
 0x61f   :  { %3392 = vmatprep.subr.bf16.mxu0 %v9952_v33 }
 0x622   :  { %3393 = vmatpush1.bf16.msra.mxu0 %v12501_v58 }
 0x623   :  { %3394 = vmatprep.subr.bf16.mxu0 %v9952_v33 }
 0x625   :  { %3303 = vmatmul.mubr.bf16.gmra.mrb[164].mxu0 %v9851_v54 }
 0x626   :  { %3395 = vmatpush1.bf16.msra.mxu0 %v3252_v44  ;;  %8966 = vmatprep.mubr.msk.bf16.mxu0 %vm1187_vm0, %v12416_v0 }
 0x627   :  { %3396 = vmatprep.subr.bf16.mxu0 %v9952_v33 }
 0x62a   :  { %3397 = vmatpush1.bf16.msra.mxu0 %v3253_v63 }
 0x62b   :  { %3398 = vmatprep.subr.bf16.mxu0 %v9952_v33 }
 0x62c   :  { %v3314_v21 = vpop.permute.xlu1 %3313 }
 0x62d   :  { %3336 = vmatpush1.bf16.msra.mxu1 %v3314_v21 }
 0x62e   :  { %3399 = vmatpush1.bf16.msra.mxu0 %v3257_v52  ;;  %3337 = vmatprep.subr.bf16.mxu1 %v9952_v33 }
 0x62f   :  { %3400 = vmatprep.subr.bf16.mxu0 %v9952_v33 }
 0x632   :  { %3401 = vmatpush1.bf16.msra.mxu0 %v3259_v57 }
 0x633   :  { %3402 = vmatprep.subr.bf16.mxu0 %v9952_v33 }
 0x634   :  { %v3316_v58 = vpop.permute.xlu0 %3315 }
 0x635   :  { %3338 = vmatpush1.bf16.msra.mxu1 %v3316_v58 }
 0x636   :  { %3403 = vmatpush1.bf16.msra.mxu0 %v3314_v21  ;;  %3447 = vmatprep.subr.bf16.mxu1 %v9952_v33 }
 0x637   :  { %3404 = vmatprep.subr.bf16.mxu0 %v9952_v33 }
 0x638   :  { %3352 = vmatmul.mubr.bf16.vlgmr.msra.gmra.mrb[160].mxu1 %v12526_v14 }
 0x639   :  { %3448 = vmatpush1.bf16.msra.mxu1 %v3252_v44  ;;  %8965 = vmatprep.mubr.msk.bf16.mxu1 %vm1187_vm0, %v12533_v41 }
 0x63a   :  { %3405 = vmatpush1.bf16.msra.mxu0 %v3316_v58  ;;  %3449 = vmatprep.subr.bf16.mxu1 %v9952_v33 }
 0x63b   :  { %3406 = vmatprep.subr.bf16.mxu0 %v9952_v33 }
 0x63d   :  { %3450 = vmatpush1.bf16.msra.mxu1 %v3253_v63 }
 0x63e   :  { %3451 = vmatprep.subr.bf16.mxu1 %v9952_v33 }
 0x640   :  { %3360 = vmatmul.mubr.bf16.gmra.mrb[164].mxu1 %v9851_v54 }
 0x641   :  { %3452 = vmatpush1.bf16.msra.mxu1 %v3257_v52  ;;  %8968 = vmatprep.mubr.msk.bf16.mxu1 %vm1187_vm0, %v12416_v0  ;;  %v9852_v0 = vld [vmem:[%s13075_s5 + $0x4] ss:$8 sps:$4 sm:$0xff]  }
 0x642   :  { %3453 = vmatprep.subr.bf16.mxu1 %v9952_v33 }
 0x645   :  { %3454 = vmatpush1.bf16.msra.mxu1 %v3259_v57 }
 0x646   :  { %3455 = vmatprep.subr.bf16.mxu1 %v9952_v33 }
 0x649   :  { %3456 = vmatpush1.bf16.msra.mxu1 %v3314_v21 }
 0x64a   :  { %3457 = vmatprep.subr.bf16.mxu1 %v9952_v33 }
 0x64d   :  { %3458 = vmatpush1.bf16.msra.mxu1 %v3316_v58 }
 0x64e   :  { %3459 = vmatprep.subr.bf16.mxu1 %v9952_v33 }
 0x654   :  { %v3385_v42 = vpop.permute.xlu1 %3384 }
 0x655   :  { %3407 = vmatpush1.bf16.msra.mxu0 %v3385_v42  ;;  %3460 = vmatpush1.bf16.msra.mxu1 %v3385_v42 }
 0x656   :  { %3408 = vmatprep.subr.bf16.mxu0 %v9952_v33  ;;  %3461 = vmatprep.subr.bf16.mxu1 %v9952_v33 }
 0x65c   :  { %v3387_v60 = vpop.permute.xlu0 %3386 }
 0x65d   :  { %3409 = vmatpush1.bf16.msra.mxu0 %v3387_v60  ;;  %3462 = vmatpush1.bf16.msra.mxu1 %v3387_v60 }
 0x65e   :  { %3463 = vmatprep.subr.bf16.mxu1 %v9952_v33  ;;  %3532 = vmatprep.subr.bf16.mxu0 %v9952_v33 }
 0x660   :  { %3423 = vmatmul.mubr.bf16.vlgmr.msra.gmra.mrb[168].mxu0 %v12526_v14 }
 0x661   :  { %8967 = vmatprep.mubr.msk.bf16.mxu0 %vm1187_vm0, %v12533_v41 }
 0x668   :  { %3431 = vmatmul.mubr.bf16.gmra.mrb[172].mxu0 %v9851_v54 }
 0x669   :  { %8970 = vmatprep.mubr.msk.bf16.mxu0 %vm1187_vm0, %v9852_v0 }
 0x67c   :  { %v3442_v55 = vpop.permute.xlu1 %3441 }
 0x67d   :  { %3464 = vmatpush1.bf16.msra.mxu1 %v3442_v55 }
 0x67e   :  { %3465 = vmatprep.subr.bf16.mxu1 %v9952_v33 }
 0x684   :  { %v3444_v2 = vpop.permute.xlu0 %3443 }
 0x685   :  { %3466 = vmatpush1.bf16.msra.mxu1 %v3444_v2 }
 0x686   :  { %3603 = vmatprep.subr.bf16.mxu1 %v9952_v33 }
 0x688   :  { %3480 = vmatmul.mubr.bf16.vlgmr.msra.gmra.mrb[168].mxu1 %v12526_v14 }
 0x689   :  { %8969 = vmatprep.mubr.msk.bf16.mxu1 %vm1187_vm0, %v12533_v41 }
 0x690   :  { %3488 = vmatmul.mubr.bf16.gmra.mrb[172].mxu1 %v9851_v54 }
 0x691   :  { %8974 = vmatprep.mubr.msk.bf16.mxu1 %vm1187_vm0, %v9852_v0 }
 0x6f0   :  { %v3296_v37 = vpop.f32.mrb[160].mxu0 }
 0x6f1   :  { %v3298_v53 = vpop.f32.mrb[161].mxu0 }
 0x6f2   :  { %v3299_v16 = vpop.f32.mrb[162].mxu0 }
 0x6f3   :  { %v3301_v15 = vpop.f32.mrb[163].mxu0 }
 0x6f8   :  { %v3304_v50 = vpop.f32.mrb[164].mxu0 }
 0x6f9   :  { %v3306_v4 = vpop.f32.mrb[165].mxu0 }
 0x6fa   :  { %v3307_v59 = vpop.f32.mrb[166].mxu0 }
 0x6fb   :  { %v3309_v8 = vpop.f32.mrb[167].mxu0 }
 0x70b   :  { %v3353_v9 = vpop.f32.mrb[160].mxu1 }
 0x70c   :  { %v3368_v22 = vmax.f32 %v3296_v37, %v3353_v9  ;;  %v3355_v26 = vpop.f32.mrb[161].mxu1 }
 0x70d   :  { %v3356_v62 = vpop.f32.mrb[162].mxu1 }
 0x70e   :  { %v3372_v61 = vadd.f32 %v3368_v22, %v11974_v13  ;;  %v3369_v44 = vmax.f32 %v3299_v16, %v3356_v62  ;;  %v3358_v51 = vpop.f32.mrb[163].mxu1 }
 0x710   :  { %v3373_v28 = vadd.f32 %v3369_v44, %v11977_v19  ;;  %v3376_v49 = vmax.f32 %v3372_v61, 0.0 }
 0x712   :  { %v3377_v35 = vmax.f32 %v3373_v28, 0.0 }
 0x713   :  { %v3361_v46 = vpop.f32.mrb[164].mxu1 }
 0x714   :  { %v3370_v31 = vmax.f32 %v3304_v50, %v3361_v46  ;;  %v3363_v36 = vpop.f32.mrb[165].mxu1  ;;  %v3380_v56 = vpack.c.bf16 %v3377_v35, %v3376_v49 }
 0x715   :  { %v3364_v63 = vpop.f32.mrb[166].mxu1 }
 0x716   :  { %v3374_v52 = vadd.f32 %v3370_v31, %v11980_v27  ;;  %v3371_v57 = vmax.f32 %v3307_v59, %v3364_v63  ;;  %3512 = vrot.lane.b32.xlu1 %v3380_v56, %s9953_s21  ;;  %3533 = vmatpush1.bf16.msra.mxu0 %v3380_v56  ;;  %v3366_v14 = vpop.f32.mrb[167].mxu1 }
 0x717   :  { %3534 = vmatprep.subr.bf16.mxu0 %v9952_v33  ;;  %v2428_v14 = vld [vmem:[%s13076_s6 + $0x30] sm:$0xff] }
 0x718   :  { %v3375_v41 = vadd.f32 %v3371_v57, %v11984_v34  ;;  %v3378_v54 = vmax.f32 %v3374_v52, 0.0  ;;  %v2423_v57 = vld [vmem:[%s13076_s6 + $0x8] sm:$0xff] }
 0x71a   :  { %v3379_v21 = vmax.f32 %v3375_v41, 0.0  ;;  %v2425_v41 = vld [vmem:[%s13076_s6 + $0x18] sm:$0xff] }
 0x71c   :  { %v3381_v58 = vpack.c.bf16 %v3379_v21, %v3378_v54  ;;  %v2427_v54 = vld [vmem:[%s13076_s6 + $0x28] sm:$0xff]  ;;  %v2429_v21 = vld [vmem:[%s13076_s6 + $0x38] sm:$0xff] }
 0x71e   :  { %3514 = vrot.lane.b32.xlu0 %v3381_v58, %s9953_s21  ;;  %3535 = vmatpush1.bf16.msra.mxu0 %v3381_v58 }
 0x71f   :  { %3536 = vmatprep.subr.bf16.mxu0 %v9952_v33 }
 0x733   :  { %v3424_v42 = vpop.f32.mrb[168].mxu0 }
 0x734   :  { %v3426_v60 = vpop.f32.mrb[169].mxu0 }
 0x735   :  { %v3427_v0 = vpop.f32.mrb[170].mxu0 }
 0x736   :  { %v3429_v55 = vpop.f32.mrb[171].mxu0 }
 0x73b   :  { %v3432_v2 = vpop.f32.mrb[172].mxu0 }
 0x73c   :  { %v3434_v37 = vpop.f32.mrb[173].mxu0 }
 0x73d   :  { %v3435_v53 = vpop.f32.mrb[174].mxu0 }
 0x73e   :  { %v3437_v16 = vpop.f32.mrb[175].mxu0 }
 0x73f   :  { %v9854_v16 = vld [vmem:[%s13075_s5 + $0x14] ss:$8 sps:$4 sm:$0xff]  }
 0x75b   :  { %v3481_v15 = vpop.f32.mrb[168].mxu1 }
 0x75c   :  { %v3496_v50 = vmax.f32 %v3424_v42, %v3481_v15  ;;  %v3483_v4 = vpop.f32.mrb[169].mxu1 }
 0x75d   :  { %v3484_v59 = vpop.f32.mrb[170].mxu1 }
 0x75e   :  { %v3500_v8 = vadd.f32 %v3496_v50, %v11974_v13  ;;  %v3497_v9 = vmax.f32 %v3427_v0, %v3484_v59  ;;  %v3486_v22 = vpop.f32.mrb[171].mxu1 }
 0x75f   :  { %v9856_v22 = vld [vmem:[%s13075_s5 + $0x24] ss:$8 sps:$4 sm:$0xff]  }
 0x760   :  { %v3501_v26 = vadd.f32 %v3497_v9, %v11977_v19  ;;  %v3504_v62 = vmax.f32 %v3500_v8, 0.0  ;;  %v9855_v8 = vld [vmem:[%s13075_s5 + $0x10] ss:$8 sps:$4 sm:$0xff]  }
 0x762   :  { %v3505_v61 = vmax.f32 %v3501_v26, 0.0 }
 0x763   :  { %v3489_v44 = vpop.f32.mrb[172].mxu1 }
 0x764   :  { %v3508_v51 = vpack.c.bf16 %v3505_v61, %v3504_v62  ;;  %v3498_v28 = vmax.f32 %v3432_v2, %v3489_v44  ;;  %v3491_v49 = vpop.f32.mrb[173].mxu1 }
 0x765   :  { %v3492_v35 = vpop.f32.mrb[174].mxu1 }
 0x766   :  { %v3502_v46 = vadd.f32 %v3498_v28, %v11980_v27  ;;  %v3499_v31 = vmax.f32 %v3435_v53, %v3492_v35  ;;  %v3494_v36 = vpop.f32.mrb[175].mxu1  ;;  %3520 = vrot.lane.b32.xlu1 %v3508_v51, %s9953_s21  ;;  %3537 = vmatpush1.bf16.msra.mxu0 %v3508_v51  ;;  %v2422_v27 = vld [vmem:[%s13076_s6] sm:$0xff] }
 0x767   :  { %3604 = vmatpush1.bf16.msra.mxu1 %v3508_v51  ;;  %3538 = vmatprep.subr.bf16.mxu0 %v9952_v33  ;;  %v9853_v53 = vld [vmem:[%s13075_s5] ss:$8 sps:$4 sm:$0xff]  }
 0x768   :  { %v3503_v13 = vadd.f32 %v3499_v31, %v11984_v34  ;;  %3605 = vmatprep.subr.bf16.mxu1 %v9952_v33  ;;  %v3506_v19 = vmax.f32 %v3502_v46, 0.0  ;;  %v2424_v34 = vld [vmem:[%s13076_s6 + $0x10] sm:$0xff] }
 0x76a   :  { %v3507_v63 = vmax.f32 %v3503_v13, 0.0  ;;  %3526 = vrot.lane.b32.xlu1 %v3380_v56, %s9954_s18  ;;  %v2426_v56 = vld [vmem:[%s13076_s6 + $0x20] sm:$0xff] }
 0x76c   :  { %v3509_v52 = vpack.c.bf16 %v3507_v63, %v3506_v19 }
 0x76e   :  { %3597 = vrot.lane.b32.xlu1 %v3508_v51, %s9954_s18  ;;  %3522 = vrot.lane.b32.xlu0 %v3509_v52, %s9953_s21 }
 0x76f   :  { %3539 = vmatpush1.bf16.msra.mxu0 %v3509_v52  ;;  %3606 = vmatpush1.bf16.msra.mxu1 %v3509_v52 }
 0x770   :  { %3540 = vmatprep.subr.bf16.mxu0 %v9952_v33  ;;  %3607 = vmatprep.subr.bf16.mxu1 %v9952_v33 }
 0x772   :  { %2432 = vperm.xlu1 %9777, %v2422_v27   ;;  %3528 = vrot.lane.b32.xlu0 %v3381_v58, %s9954_s18 }
 0x776   :  { %2442 = vperm.xlu1 %9777, %v2424_v34   ;;  %3599 = vrot.lane.b32.xlu0 %v3509_v52, %s9954_s18 }
 0x77a   :  { %2452 = vperm.xlu1 %9777, %v2426_v56   ;;  %2437 = vperm.xlu0 %9776, %v2423_v57  }
 0x77e   :  { %2462 = vperm.xlu1 %9777, %v2428_v14   ;;  %2447 = vperm.xlu0 %9776, %v2425_v41  }
 0x782   :  { %2457 = vperm.xlu0 %9776, %v2427_v54  }
 0x786   :  { %2467 = vperm.xlu0 %9776, %v2429_v21  }
 0x788   :  { %v3513_v58 = vpop.permute.xlu1 %3512 }
 0x789   :  { %3541 = vmatpush1.bf16.msra.mxu0 %v3513_v58  ;;  %3608 = vmatpush1.bf16.msra.mxu1 %v3513_v58 }
 0x78a   :  { %3542 = vmatprep.subr.bf16.mxu0 %v9952_v33  ;;  %3609 = vmatprep.subr.bf16.mxu1 %v9952_v33 }
 0x790   :  { %v3515_v42 = vpop.permute.xlu0 %3514 }
 0x791   :  { %3543 = vmatpush1.bf16.msra.mxu0 %v3515_v42  ;;  %3610 = vmatpush1.bf16.msra.mxu1 %v3515_v42 }
 0x792   :  { %3544 = vmatprep.subr.bf16.mxu0 %v9952_v33  ;;  %3611 = vmatprep.subr.bf16.mxu1 %v9952_v33 }
 0x7d8   :  { %v3521_v60 = vpop.permute.xlu1 %3520 }
 0x7d9   :  { %3545 = vmatpush1.bf16.msra.mxu0 %v3521_v60  ;;  %3612 = vmatpush1.bf16.msra.mxu1 %v3521_v60 }
 0x7da   :  { %3546 = vmatprep.subr.bf16.mxu0 %v9952_v33  ;;  %3613 = vmatprep.subr.bf16.mxu1 %v9952_v33 }
 0x7dc   :  { %v3527_v55 = vpop.permute.xlu1 %3526 }
 0x7e0   :  { %v3523_v0 = vpop.permute.xlu0 %3522  ;;  %v3598_v37 = vpop.permute.xlu1 %3597 }
 0x7e1   :  { %3547 = vmatpush1.bf16.msra.mxu0 %v3523_v0  ;;  %3614 = vmatpush1.bf16.msra.mxu1 %v3523_v0 }
 0x7e2   :  { %3548 = vmatprep.subr.bf16.mxu0 %v9952_v33  ;;  %3615 = vmatprep.subr.bf16.mxu1 %v9952_v33 }
 0x7e4   :  { %v3529_v2 = vpop.permute.xlu0 %3528 }
 0x7e5   :  { %3549 = vmatpush1.bf16.msra.mxu0 %v3527_v55  ;;  %3616 = vmatpush1.bf16.msra.mxu1 %v3527_v55 }
 0x7e6   :  { %3550 = vmatprep.subr.bf16.mxu0 %v9952_v33  ;;  %3617 = vmatprep.subr.bf16.mxu1 %v9952_v33 }
 0x7e8   :  { %v3600_v15 = vpop.permute.xlu0 %3599 }
 0x7e9   :  { %3551 = vmatpush1.bf16.msra.mxu0 %v3529_v2  ;;  %3618 = vmatpush1.bf16.msra.mxu1 %v3529_v2 }
 0x7ea   :  { %3619 = vmatprep.subr.bf16.mxu1 %v9952_v33 }
 0x7ec   :  { %3565 = vmatmul.mubr.bf16.vlgmr.msra.gmra.mrb[176].mxu0 %v9853_v53 }
 0x7ed   :  { %3620 = vmatpush1.bf16.msra.mxu1 %v3598_v37  ;;  %8971 = vmatprep.mubr.msk.bf16.mxu0 %vm1187_vm0, %v9854_v16 }
 0x7ee   :  { %3621 = vmatprep.subr.bf16.mxu1 %v9952_v33 }
 0x7f1   :  { %v2433_v50 = vpop.permute.xlu1 %2432  ;;  %3622 = vmatpush1.bf16.msra.mxu1 %v3600_v15 }
 0x7f2   :  { %v12649_v4 = vadd.f32 %v2433_v50, %v2414_v7 }
 0x7f4   :  { %v2478_v59 = vmax.f32 %v12649_v4, 0.0  ;;  %3636 = vmatmul.mubr.bf16.vlgmr.msra.gmra.mrb[176].mxu1 %v9853_v53  ;;  %3573 = vmatmul.mubr.bf16.gmra.mrb[180].mxu0 %v9855_v8 }
 0x7f5   :  { %v2443_v9 = vpop.permute.xlu1 %2442  ;;  %8975 = vmatprep.mubr.msk.bf16.mxu1 %vm1187_vm0, %v9854_v16  ;;  %8972 = vmatprep.mubr.msk.bf16.mxu0 %vm1187_vm0, %v9856_v22 }
 0x7f6   :  { %v12663_v1 = vadd.f32 %v2443_v9, %v2416_v20  ;;  %v9857_v20 = vld [vmem:[%s13075_s5 + $0x20] ss:$8 sps:$4 sm:$0xff]  }
 0x7f8   :  { %v2480_v5 = vmax.f32 %v12663_v1, 0.0 }
 0x7f9   :  { %v12666_v7 = vpop.permute.xlu1 %2452  ;;  %v2438_v26 = vpop.permute.xlu0 %2437 }
 0x7fa   :  { %v12672_v62 = vadd.f32 %v12666_v7, %v2418_v32  ;;  %v12677_v61 = vadd.f32 %v2438_v26, %v2415_v12 }
 0x7fc   :  { %v2482_v6 = vmax.f32 %v12672_v62, 0.0  ;;  %v2479_v17 = vmax.f32 %v12677_v61, 0.0  ;;  %3644 = vmatmul.mubr.bf16.gmra.mrb[180].mxu1 %v9855_v8  ;;  %3581 = vmatmul.mubr.bf16.gmra.mrb[184].mxu0 %v9857_v20 }
 0x7fd   :  { %v12684_v44 = vpop.permute.xlu1 %2462  ;;  %v2448_v18 = vpop.permute.xlu0 %2447  ;;  %8976 = vmatprep.mubr.msk.bf16.mxu1 %vm1187_vm0, %v9856_v22  ;;  %8973 = vmatprep.mubr.msk.bf16.mxu0 %vm1187_vm0, %v9858_v3 }
 0x7fe   :  { %v12695_v10 = vadd.f32 %v12684_v44, %v2420_v45  ;;  %v12700_v12 = vadd.f32 %v2448_v18, %v2417_v25 }
 0x800   :  { %v2484_v29 = vmax.f32 %v12695_v10, 0.0  ;;  %v2481_v32 = vmax.f32 %v12700_v12, 0.0 }
 0x801   :  { %v2458_v51 = vpop.permute.xlu0 %2457 }
 0x802   :  { %v12707_v28 = vadd.f32 %v2458_v51, %v2419_v40 }
 0x804   :  { %v2483_v30 = vmax.f32 %v12707_v28, 0.0  ;;  %3652 = vmatmul.mubr.bf16.gmra.mrb[184].mxu1 %v9857_v20  ;;  %3589 = vmatmul.mubr.bf16.gmra.mrb[188].mxu0 %v9859_v43 }
 0x805   :  { %v2468_v11 = vpop.permute.xlu0 %2467  ;;  %8977 = vmatprep.mubr.msk.bf16.mxu1 %vm1187_vm0, %v9858_v3 }
 0x806   :  { %v12717_v23 = vadd.f32 %v2468_v11, %v2421_v48 }
 0x808   :  { %v2485_v24 = vmax.f32 %v12717_v23, 0.0 }
 0x80c   :  { %3660 = vmatmul.mubr.bf16.gmra.mrb[188].mxu1 %v9859_v43 }
 0x8bf   :  { %v3566_v25 = vpop.f32.mrb[176].mxu0 }
 0x8c0   :  { %v3568_v38 = vpop.f32.mrb[177].mxu0 }
 0x8c1   :  { %v3569_v40 = vpop.f32.mrb[178].mxu0 }
 0x8c2   :  { %v3571_v45 = vpop.f32.mrb[179].mxu0 }
 0x8c7   :  { %v3637_v49 = vpop.f32.mrb[176].mxu1  ;;  %v3574_v35 = vpop.f32.mrb[180].mxu0 }
 0x8c8   :  { %v3668_v46 = vmax.f32 %v3566_v25, %v3637_v49  ;;  %v3639_v31 = vpop.f32.mrb[177].mxu1  ;;  %v3576_v36 = vpop.f32.mrb[181].mxu0 }
 0x8c9   :  { %v3640_v13 = vpop.f32.mrb[178].mxu1  ;;  %v3577_v19 = vpop.f32.mrb[182].mxu0 }
 0x8ca   :  { %v12720_v63 = vadd.f32 %v3668_v46, %v2433_v50  ;;  %v3669_v52 = vmax.f32 %v3569_v40, %v3640_v13  ;;  %v3642_v39 = vpop.f32.mrb[179].mxu1  ;;  %v3579_v47 = vpop.f32.mrb[183].mxu0 }
 0x8cc   :  { %v3684_v48 = vmax.f32 %v12720_v63, 0.0  ;;  %v12723_v27 = vadd.f32 %v3669_v52, %v2438_v26 }
 0x8ce   :  { %v3685_v34 = vmax.f32 %v12723_v27, 0.0 }
 0x8cf   :  { %v3645_v56 = vpop.f32.mrb[180].mxu1  ;;  %v3582_v57 = vpop.f32.mrb[184].mxu0 }
 0x8d0   :  { %v3670_v14 = vmax.f32 %v3574_v35, %v3645_v56  ;;  %v3647_v41 = vpop.f32.mrb[181].mxu1  ;;  %v3584_v54 = vpop.f32.mrb[185].mxu0 }
 0x8d1   :  { %v3648_v21 = vpop.f32.mrb[182].mxu1  ;;  %v3585_v58 = vpop.f32.mrb[186].mxu0 }
 0x8d2   :  { %v12726_v42 = vadd.f32 %v3670_v14, %v2443_v9  ;;  %v3671_v60 = vmax.f32 %v3577_v19, %v3648_v21  ;;  %v3650_v0 = vpop.f32.mrb[183].mxu1  ;;  %v3587_v55 = vpop.f32.mrb[187].mxu0 }
 0x8d4   :  { %v3686_v2 = vmax.f32 %v12726_v42, 0.0  ;;  %v12729_v37 = vadd.f32 %v3671_v60, %v2448_v18 }
 0x8d6   :  { %v3687_v53 = vmax.f32 %v12729_v37, 0.0 }
 0x8d7   :  { %v3653_v16 = vpop.f32.mrb[184].mxu1  ;;  %v3590_v15 = vpop.f32.mrb[188].mxu0 }
 0x8d8   :  { %v3672_v50 = vmax.f32 %v3582_v57, %v3653_v16  ;;  %v3655_v8 = vpop.f32.mrb[185].mxu1  ;;  %v3592_v22 = vpop.f32.mrb[189].mxu0 }
 0x8d9   :  { %v3656_v26 = vpop.f32.mrb[186].mxu1  ;;  %v3593_v20 = vpop.f32.mrb[190].mxu0 }
 0x8da   :  { %v12733_v3 = vadd.f32 %v3672_v50, %v12666_v7  ;;  %v3673_v9 = vmax.f32 %v3585_v58, %v3656_v26  ;;  %v3658_v43 = vpop.f32.mrb[187].mxu1  ;;  %v3595_v25 = vpop.f32.mrb[191].mxu0 }
 0x8dc   :  { %v3688_v38 = vmax.f32 %v12733_v3, 0.0  ;;  %v12736_v40 = vadd.f32 %v3673_v9, %v2458_v51 }
 0x8de   :  { %v3689_v18 = vmax.f32 %v12736_v40, 0.0 }
 0x8df   :  { %v3661_v45 = vpop.f32.mrb[188].mxu1 }
 0x8e0   :  { %v3674_v49 = vmax.f32 %v3590_v15, %v3661_v45  ;;  %v3663_v35 = vpop.f32.mrb[189].mxu1 }
 0x8e1   :  { %v3664_v46 = vpop.f32.mrb[190].mxu1 }
 0x8e2   :  { %v12740_v31 = vadd.f32 %v3674_v49, %v12684_v44  ;;  %v3675_v36 = vmax.f32 %v3593_v20, %v3664_v46  ;;  %v3666_v13 = vpop.f32.mrb[191].mxu1 }
 0x8e4   :  { %v3690_v7 = vmax.f32 %v12740_v31, 0.0  ;;  %v12743_v19 = vadd.f32 %v3675_v36, %v2468_v11 }
 0x8e6   :  { %v3691_v52 = vmax.f32 %v12743_v19, 0.0 }
 0x8e7   :  { %9948 = dma.done.wait [#allocation3], 61440 }
 0x8e8   :  { %9949 = vsyncadd [#allocation3], 4294905856  ;;  %4181 = vmatprep.mubr.bf16.mxu0 %v9952_v33  ;;  %4224 = vmatprep.mubr.bf16.mxu1 %v9952_v33  ;;  %v3760_v51 = vld [vmem:[#allocation2 + $0x1e0] sm:$0xff]  ;;  %v3761_v47 = vld [vmem:[#allocation2 + $0x1e8] sm:$0xff]  ;;  %vm4124_vm1 = vcmask 1042432   ;;  %vm4120_vm2 = vcmask 965632  }
 0x8e9   :  { %v3764_v39 = vld [vmem:[#allocation2 + $0x200] sm:$0xff]  ;;  %v3765_v44 = vld [vmem:[#allocation2 + $0x208] sm:$0xff]  ;;  %v3779_v61 = vld [vmem:[#allocation2 + $0x278] sm:$0xff]  ;;  %vm9956_vm3 = vmmov 0   ;;  %vm8553_vm4 = vcmask 1040384   ;;  %vm8734_vm5 = vcmask 58368  }
 0x8ea   :  { %v8979_v56 = vcombine.high %v3760_v51, %v3764_v39  ;;  %v8978_v57 = vcombine.low %v3760_v51, %v3764_v39  ;;  %v3768_v14 = vld [vmem:[#allocation2 + $0x220] sm:$0xff]  ;;  %v8981_v54 = vcombine.high %v3761_v47, %v3765_v44  ;;  %v8980_v21 = vcombine.low %v3761_v47, %v3765_v44  ;;  %v3769_v58 = vld [vmem:[#allocation2 + $0x228] sm:$0xff]  ;;  %v3783_v27 = vld [vmem:[#allocation2 + $0x298] sm:$0xff] }
 0x8eb   :  { %v3772_v41 = vld [vmem:[#allocation2 + $0x240] sm:$0xff]  ;;  %v3773_v60 = vld [vmem:[#allocation2 + $0x248] sm:$0xff]  ;;  %v3717_v4 = vld [vmem:[#allocation2 + $0x98] sm:$0xff] }
 0x8ec   :  { %v8987_v11 = vcombine.high %v3768_v14, %v3772_v41  ;;  %v3776_v0 = vld [vmem:[#allocation2 + $0x260] sm:$0xff]  ;;  %4149 = vmatprep.subr.bf16.mxu0 %v8979_v56  ;;  %v8989_v55 = vcombine.high %v3769_v58, %v3773_v60  ;;  %v3777_v15 = vld [vmem:[#allocation2 + $0x268] sm:$0xff]  ;;  %4192 = vmatprep.subr.bf16.mxu1 %v8981_v54  ;;  %v8986_v8 = vcombine.low %v3768_v14, %v3772_v41  ;;  %v4841_v1 = vld [vmem:[#allocation2 + $0x458] sm:$0xff] }
 0x8ed   :  { %v3780_v16 = vld [vmem:[#allocation2 + $0x280] sm:$0xff]  ;;  %v3781_v50 = vld [vmem:[#allocation2 + $0x288] sm:$0xff]  ;;  %4150 = vmatpush1.bf16.msra.mxu0 %v8978_v57  ;;  %4193 = vmatpush1.bf16.msra.mxu1 %v8980_v21  ;;  %v8988_v22 = vcombine.low %v3769_v58, %v3773_v60  ;;  %v5418_v12 = vld [vmem:[#allocation2 + $0x638] sm:$0xff] }
 0x8ee   :  { %4151 = vmatprep.subr.bf16.mxu0 %v8987_v11  ;;  %v8995_v26 = vcombine.high %v3776_v0, %v3780_v16  ;;  %4194 = vmatprep.subr.bf16.mxu1 %v8989_v55  ;;  %v8997_v20 = vcombine.high %v3777_v15, %v3781_v50  ;;  %v3784_v9 = vld [vmem:[#allocation2 + $0x2a0] sm:$0xff]  ;;  %v3785_v25 = vld [vmem:[#allocation2 + $0x2a8] sm:$0xff]  ;;  %v8994_v49 = vcombine.low %v3776_v0, %v3780_v16  ;;  %v5995_v62 = vld [vmem:[#allocation2 + $0x818] sm:$0xff] }
 0x8ef   :  { %v3788_v43 = vld [vmem:[#allocation2 + $0x2c0] sm:$0xff]  ;;  %v3789_v45 = vld [vmem:[#allocation2 + $0x2c8] sm:$0xff]  ;;  %v8996_v35 = vcombine.low %v3777_v15, %v3781_v50  ;;  %v6572_v28 = vld [vmem:[#allocation2 + $0x9f8] sm:$0xff] }
 0x8f0   :  { %v9003_v46 = vcombine.high %v3784_v9, %v3788_v43  ;;  %v9005_v36 = vcombine.high %v3785_v25, %v3789_v45  ;;  %v3792_v13 = vld [vmem:[#allocation2 + $0x2e0] sm:$0xff]  ;;  %v3793_v39 = vld [vmem:[#allocation2 + $0x2e8] sm:$0xff]  ;;  %v9002_v56 = vcombine.low %v3784_v9, %v3788_v43  ;;  %v9004_v44 = vcombine.low %v3785_v25, %v3789_v45  ;;  %v7149_v10 = vld [vmem:[#allocation2 + $0xbd8] sm:$0xff] }
 0x8f1   :  { %4152 = vmatpush1.bf16.msra.mxu0 %v8986_v8  ;;  %4195 = vmatpush1.bf16.msra.mxu1 %v8988_v22  ;;  %v3796_v51 = vld [vmem:[#allocation2 + $0x300] sm:$0xff]  ;;  %v3797_v47 = vld [vmem:[#allocation2 + $0x308] sm:$0xff]  ;;  %v7726_v23 = vld [vmem:[#allocation2 + $0xdb8] sm:$0xff] }
 0x8f2   :  { %4153 = vmatprep.subr.bf16.mxu0 %v8995_v26  ;;  %4196 = vmatprep.subr.bf16.mxu1 %v8997_v20  ;;  %v9011_v57 = vcombine.high %v3792_v13, %v3796_v51  ;;  %v9013_v14 = vcombine.high %v3793_v39, %v3797_v47  ;;  %v3800_v41 = vld [vmem:[#allocation2 + $0x320] sm:$0xff]  ;;  %v3801_v21 = vld [vmem:[#allocation2 + $0x328] sm:$0xff]  ;;  %v9010_v58 = vcombine.low %v3792_v13, %v3796_v51  ;;  %v3762_v51 = vld [vmem:[#allocation2 + $0x1f0] sm:$0xff] }
 0x8f3   :  { %v3804_v54 = vld [vmem:[#allocation2 + $0x340] sm:$0xff]  ;;  %v3805_v11 = vld [vmem:[#allocation2 + $0x348] sm:$0xff]  ;;  %v9012_v60 = vcombine.low %v3793_v39, %v3797_v47  ;;  %v3766_v39 = vld [vmem:[#allocation2 + $0x210] sm:$0xff] }
 0x8f4   :  { %v9019_v0 = vcombine.high %v3800_v41, %v3804_v54  ;;  %v9021_v55 = vcombine.high %v3801_v21, %v3805_v11  ;;  %v3808_v16 = vld [vmem:[#allocation2 + $0x360] sm:$0xff]  ;;  %v3809_v50 = vld [vmem:[#allocation2 + $0x368] sm:$0xff]  ;;  %v9018_v22 = vcombine.low %v3800_v41, %v3804_v54  ;;  %v9020_v26 = vcombine.low %v3801_v21, %v3805_v11  ;;  %v3763_v47 = vld [vmem:[#allocation2 + $0x1f8] sm:$0xff] }
 0x8f5   :  { %4154 = vmatpush1.bf16.msra.mxu0 %v8994_v49  ;;  %4197 = vmatpush1.bf16.msra.mxu1 %v8996_v35  ;;  %v3812_v15 = vld [vmem:[#allocation2 + $0x380] sm:$0xff]  ;;  %v3813_v8 = vld [vmem:[#allocation2 + $0x388] sm:$0xff]  ;;  %v3770_v54 = vld [vmem:[#allocation2 + $0x230] sm:$0xff]  ;;  %v12756_v11 = vpack.c.bf16 %v3685_v34, %v2479_v17 }
 0x8f6   :  { %4155 = vmatprep.subr.bf16.mxu0 %v9003_v46  ;;  %4198 = vmatprep.subr.bf16.mxu1 %v9005_v36  ;;  %v9027_v20 = vcombine.high %v3808_v16, %v3812_v15  ;;  %v9029_v9 = vcombine.high %v3809_v50, %v3813_v8  ;;  %v3816_v43 = vld [vmem:[#allocation2 + $0x3a0] sm:$0x77]  ;;  %v3817_v25 = vld [vmem:[#allocation2 + $0x3a8] sm:$0x77]  ;;  %v9026_v45 = vcombine.low %v3808_v16, %v3812_v15  ;;  %v3774_v21 = vld [vmem:[#allocation2 + $0x250] sm:$0xff] }
 0x8f7   :  { %v9028_v49 = vcombine.low %v3809_v50, %v3813_v8  ;;  %v9035_v35 = vcombine.high %v3816_v43, %v3816_v43  ;;  %v9034_v46 = vcombine.low %v3816_v43, %v3816_v43  ;;  %v9037_v36 = vcombine.high %v3817_v25, %v3817_v25  ;;  %v3778_v50 = vld [vmem:[#allocation2 + $0x270] sm:$0xff]  ;;  %v3787_v43 = vld [vmem:[#allocation2 + $0x2b8] sm:$0xff] }
 0x8f8   :  { %v9036_v13 = vcombine.low %v3817_v25, %v3817_v25  ;;  %v8991_v16 = vcombine.high %v3770_v54, %v3774_v21  ;;  %v3782_v8 = vld [vmem:[#allocation2 + $0x290] sm:$0xff]  ;;  %v8990_v17 = vcombine.low %v3770_v54, %v3774_v21  ;;  %v3791_v25 = vld [vmem:[#allocation2 + $0x2d8] sm:$0xff] }
 0x8f9   :  { %4156 = vmatpush1.bf16.msra.mxu0 %v9002_v56  ;;  %4199 = vmatpush1.bf16.msra.mxu1 %v9004_v44  ;;  %v3767_v56 = vld [vmem:[#allocation2 + $0x218] sm:$0xff]  ;;  %v4126_v44 = vsel %vm4124_vm1, %v9034_v46, 0  ;;  %v9009_v46 = vcombine.high %v3787_v43, %v3791_v25 }
 0x8fa   :  { %4157 = vmatprep.subr.bf16.mxu0 %v9011_v57  ;;  %4200 = vmatprep.subr.bf16.mxu1 %v9013_v14  ;;  %v8983_v57 = vcombine.high %v3762_v51, %v3766_v39  ;;  %v4132_v14 = vsel %vm4124_vm1, %v9036_v13, 0  ;;  %v8985_v41 = vcombine.high %v3763_v47, %v3767_v56  ;;  %v3798_v13 = vld [vmem:[#allocation2 + $0x310] sm:$0xff]  ;;  %v3803_v54 = vld [vmem:[#allocation2 + $0x338] sm:$0xff] }
 0x8fb   :  { %v3807_v21 = vld [vmem:[#allocation2 + $0x358] sm:$0xff] }
 0x8fd   :  { %4158 = vmatpush1.bf16.msra.mxu0 %v9010_v58  ;;  %4201 = vmatpush1.bf16.msra.mxu1 %v9012_v60  ;;  %v3771_v58 = vld [vmem:[#allocation2 + $0x238] sm:$0xff] }
 0x8fe   :  { %4159 = vmatprep.subr.bf16.mxu0 %v9019_v0  ;;  %4202 = vmatprep.subr.bf16.mxu1 %v9021_v55  ;;  %v3775_v60 = vld [vmem:[#allocation2 + $0x258] sm:$0xff]  ;;  %v8982_v0 = vcombine.low %v3762_v51, %v3766_v39  ;;  %v8984_v55 = vcombine.low %v3763_v47, %v3767_v56  ;;  %v9008_v56 = vcombine.low %v3787_v43, %v3791_v25 }
 0x8ff   :  { %v8993_v15 = vcombine.high %v3771_v58, %v3775_v60  ;;  %v8992_v34 = vcombine.low %v3771_v58, %v3775_v60  ;;  %v3795_v51 = vld [vmem:[#allocation2 + $0x2f8] sm:$0xff] }
 0x900   :  { %v3799_v39 = vld [vmem:[#allocation2 + $0x318] sm:$0xff] }
 0x901   :  { %4160 = vmatpush1.bf16.msra.mxu0 %v9018_v22  ;;  %4203 = vmatpush1.bf16.msra.mxu1 %v9020_v26  ;;  %v8999_v22 = vcombine.high %v3778_v50, %v3782_v8  ;;  %v9001_v26 = vcombine.high %v3779_v61, %v3783_v27  ;;  %v9016_v60 = vcombine.low %v3795_v51, %v3799_v39 }
 0x902   :  { %4161 = vmatprep.subr.bf16.mxu0 %v9027_v20  ;;  %4204 = vmatprep.subr.bf16.mxu1 %v9029_v9  ;;  %v3786_v20 = vld [vmem:[#allocation2 + $0x2b0] sm:$0xff] }
 0x903   :  { %v3790_v9 = vld [vmem:[#allocation2 + $0x2d0] sm:$0xff] }
 0x904   :  { %v9006_v47 = vcombine.low %v3786_v20, %v3790_v9 }
 0x905   :  { %4162 = vmatpush1.bf16.msra.mxu0 %v9026_v45  ;;  %4205 = vmatpush1.bf16.msra.mxu1 %v9028_v49  ;;  %v8998_v45 = vcombine.low %v3778_v50, %v3782_v8  ;;  %v9000_v49 = vcombine.low %v3779_v61, %v3783_v27  ;;  %v3811_v50 = vld [vmem:[#allocation2 + $0x378] sm:$0xff]  ;;  %v9024_v27 = vcombine.low %v3803_v54, %v3807_v21 }
 0x906   :  { %9042 = vmatprep.subr.msk.bf16.mxu0 %vm4124_vm1, %v9035_v35  ;;  %9044 = vmatprep.subr.msk.bf16.mxu1 %vm4124_vm1, %v9037_v36  ;;  %v9007_v35 = vcombine.high %v3786_v20, %v3790_v9  ;;  %v3794_v36 = vld [vmem:[#allocation2 + $0x2f0] sm:$0xff]  ;;  %v3815_v8 = vld [vmem:[#allocation2 + $0x398] sm:$0xff] }
 0x907   :  { %v9014_v58 = vcombine.low %v3794_v36, %v3798_v13  ;;  %v9032_v9 = vcombine.low %v3811_v50, %v3815_v8 }
 0x909   :  { %4164 = vmatpush1.bf16.msra.mxu0 %v4126_v44  ;;  %4207 = vmatpush1.bf16.msra.mxu1 %v4132_v14  ;;  %v9015_v44 = vcombine.high %v3794_v36, %v3798_v13  ;;  %v3802_v14 = vld [vmem:[#allocation2 + $0x330] sm:$0xff]  ;;  %v3699_v36 = vld [vmem:[#allocation2 + $0x8] sm:$0xff] }
 0x90a   :  { %4235 = vmatprep.subr.bf16.mxu0 %v8983_v57  ;;  %4278 = vmatprep.subr.bf16.mxu1 %v8985_v41  ;;  %v9017_v57 = vcombine.high %v3795_v51, %v3799_v39  ;;  %v3806_v41 = vld [vmem:[#allocation2 + $0x350] sm:$0xff]  ;;  %v3703_v13 = vld [vmem:[#allocation2 + $0x28] sm:$0xff] }
 0x90b   :  { %v9022_v61 = vcombine.low %v3802_v14, %v3806_v41 }
 0x90c   :  { %9043 = vmatmul.mubr.msk.bf16.vlgmr.msra.gmra.mrb[192].mxu0 %vm4120_vm2, %v12756_v11  ;;  %9045 = vmatmul.mubr.msk.bf16.vlgmr.msra.gmra.mrb[192].mxu1 %vm4120_vm2, %v12756_v11 }
 0x90d   :  { %4236 = vmatpush1.bf16.msra.mxu0 %v8982_v0  ;;  %4279 = vmatpush1.bf16.msra.mxu1 %v8984_v55  ;;  %v9023_v0 = vcombine.high %v3802_v14, %v3806_v41  ;;  %v9025_v55 = vcombine.high %v3803_v54, %v3807_v21  ;;  %v3707_v14 = vld [vmem:[#allocation2 + $0x48] sm:$0xff]  ;;  %v9052_v21 = vcombine.low %v3699_v36, %v3703_v13 }
 0x90e   :  { %4237 = vmatprep.subr.bf16.mxu0 %v8991_v16  ;;  %4280 = vmatprep.subr.bf16.mxu1 %v8993_v15  ;;  %v3810_v16 = vld [vmem:[#allocation2 + $0x370] sm:$0xff]  ;;  %v3711_v41 = vld [vmem:[#allocation2 + $0x68] sm:$0xff] }
 0x90f   :  { %4267 = vmatprep.mubr.bf16.mxu0 %v9952_v33  ;;  %4310 = vmatprep.mubr.bf16.mxu1 %v9952_v33  ;;  %v3814_v15 = vld [vmem:[#allocation2 + $0x390] sm:$0xff] }
 0x910   :  { %v9030_v20 = vcombine.low %v3810_v16, %v3814_v15 }
 0x911   :  { %4238 = vmatpush1.bf16.msra.mxu0 %v8990_v17  ;;  %4281 = vmatpush1.bf16.msra.mxu1 %v8992_v34  ;;  %v9031_v17 = vcombine.high %v3810_v16, %v3814_v15  ;;  %v9033_v34 = vcombine.high %v3811_v50, %v3815_v8  ;;  %v3715_v16 = vld [vmem:[#allocation2 + $0x88] sm:$0xff]  ;;  %v9060_v8 = vcombine.low %v3707_v14, %v3711_v41 }
 0x912   :  { %4239 = vmatprep.subr.bf16.mxu0 %v8999_v22  ;;  %4282 = vmatprep.subr.bf16.mxu1 %v9001_v26  ;;  %v3818_v22 = vld [vmem:[#allocation2 + $0x3b0] sm:$0x77]  ;;  %v3819_v26 = vld [vmem:[#allocation2 + $0x3b8] sm:$0x77]  ;;  %v3719_v15 = vld [vmem:[#allocation2 + $0xa8] sm:$0xff] }
 0x913   :  { %v9039_v43 = vcombine.high %v3818_v22, %v3818_v22  ;;  %v9038_v25 = vcombine.low %v3818_v22, %v3818_v22  ;;  %v3723_v22 = vld [vmem:[#allocation2 + $0xc8] sm:$0xff] }
 0x915   :  { %4240 = vmatpush1.bf16.msra.mxu0 %v8998_v45  ;;  %4283 = vmatpush1.bf16.msra.mxu1 %v9000_v49  ;;  %v9041_v45 = vcombine.high %v3819_v26, %v3819_v26  ;;  %v9040_v49 = vcombine.low %v3819_v26, %v3819_v26  ;;  %v4138_v51 = vsel %vm4124_vm1, %v9038_v25, 0  ;;  %v3727_v26 = vld [vmem:[#allocation2 + $0xe8] sm:$0xff]  ;;  %v3730_v25 = vld [vmem:[#allocation2 + $0x100] sm:$0xff] }
 0x916   :  { %4241 = vmatprep.subr.bf16.mxu0 %v9007_v35  ;;  %4284 = vmatprep.subr.bf16.mxu1 %v9009_v46  ;;  %v3698_v35 = vld [vmem:[#allocation2] sm:$0xff] }
 0x917   :  { %v3702_v46 = vld [vmem:[#allocation2 + $0x20] sm:$0xff] }
 0x918   :  { %v9051_v39 = vcombine.high %v3698_v35, %v3702_v46  ;;  %v9050_v54 = vcombine.low %v3698_v35, %v3702_v46  ;;  %v3735_v35 = vld [vmem:[#allocation2 + $0x128] sm:$0xff] }
 0x919   :  { %4242 = vmatpush1.bf16.msra.mxu0 %v9006_v47  ;;  %4285 = vmatpush1.bf16.msra.mxu1 %v9008_v56  ;;  %v4144_v47 = vsel %vm4124_vm1, %v9040_v49, 0  ;;  %v9053_v56 = vcombine.high %v3699_v36, %v3703_v13  ;;  %v3731_v49 = vld [vmem:[#allocation2 + $0x108] sm:$0xff]  ;;  %v9076_v36 = vcombine.low %v3723_v22, %v3727_v26 }
 0x91a   :  { %4243 = vmatprep.subr.bf16.mxu0 %v9015_v44  ;;  %4286 = vmatprep.subr.bf16.mxu1 %v9017_v57  ;;  %v3706_v44 = vld [vmem:[#allocation2 + $0x40] sm:$0xff] }
 0x91b   :  { %v3710_v57 = vld [vmem:[#allocation2 + $0x60] sm:$0xff] }
 0x91c   :  { %v9058_v50 = vcombine.low %v3706_v44, %v3710_v57 }
 0x91d   :  { %4244 = vmatpush1.bf16.msra.mxu0 %v9014_v58  ;;  %4287 = vmatpush1.bf16.msra.mxu1 %v9016_v60  ;;  %v9059_v58 = vcombine.high %v3706_v44, %v3710_v57  ;;  %v9061_v60 = vcombine.high %v3707_v14, %v3711_v41  ;;  %v3743_v44 = vld [vmem:[#allocation2 + $0x168] sm:$0xff]  ;;  %v9084_v14 = vcombine.low %v3731_v49, %v3735_v35 }
 0x91e   :  { %4245 = vmatprep.subr.bf16.mxu0 %v9023_v0  ;;  %4288 = vmatprep.subr.bf16.mxu1 %v9025_v55  ;;  %v3714_v0 = vld [vmem:[#allocation2 + $0x80] sm:$0xff] }
 0x91f   :  { %v3718_v55 = vld [vmem:[#allocation2 + $0xa0] sm:$0xff] }
 0x921   :  { %4246 = vmatpush1.bf16.msra.mxu0 %v9022_v61  ;;  %4289 = vmatpush1.bf16.msra.mxu1 %v9024_v27  ;;  %v9067_v61 = vcombine.high %v3714_v0, %v3718_v55  ;;  %v9069_v27 = vcombine.high %v3715_v16, %v3719_v15 }
 0x922   :  { %4247 = vmatprep.subr.bf16.mxu0 %v9031_v17  ;;  %4290 = vmatprep.subr.bf16.mxu1 %v9033_v34  ;;  %v3722_v17 = vld [vmem:[#allocation2 + $0xc0] sm:$0xff] }
 0x923   :  { %v3726_v34 = vld [vmem:[#allocation2 + $0xe0] sm:$0xff] }
 0x924   :  { %v9074_v46 = vcombine.low %v3722_v17, %v3726_v34 }
 0x925   :  { %4248 = vmatpush1.bf16.msra.mxu0 %v9030_v20  ;;  %4291 = vmatpush1.bf16.msra.mxu1 %v9032_v9  ;;  %v9066_v20 = vcombine.low %v3714_v0, %v3718_v55  ;;  %v9075_v9 = vcombine.high %v3722_v17, %v3726_v34  ;;  %v3751_v0 = vld [vmem:[#allocation2 + $0x1a8] sm:$0xff] }
 0x926   :  { %9046 = vmatprep.subr.msk.bf16.mxu0 %vm4124_vm1, %v9039_v43  ;;  %9048 = vmatprep.subr.msk.bf16.mxu1 %vm4124_vm1, %v9041_v45  ;;  %v9077_v43 = vcombine.high %v3723_v22, %v3727_v26  ;;  %v3734_v45 = vld [vmem:[#allocation2 + $0x120] sm:$0xff] }
 0x927   :  { %v9083_v13 = vcombine.high %v3730_v25, %v3734_v45  ;;  %v9082_v57 = vcombine.low %v3730_v25, %v3734_v45  ;;  %v3705_v25 = vld [vmem:[#allocation2 + $0x38] sm:$0xff] }
 0x929   :  { %4250 = vmatpush1.bf16.msra.mxu0 %v4138_v51  ;;  %4293 = vmatpush1.bf16.msra.mxu1 %v4144_v47  ;;  %v9085_v51 = vcombine.high %v3731_v49, %v3735_v35  ;;  %v3742_v47 = vld [vmem:[#allocation2 + $0x160] sm:$0xff] }
 0x92a   :  { %4648 = vmatprep.subr.bf16.mxu0 %v9051_v39  ;;  %4691 = vmatprep.subr.bf16.mxu1 %v9053_v56  ;;  %v3738_v39 = vld [vmem:[#allocation2 + $0x140] sm:$0xff]  ;;  %v3739_v56 = vld [vmem:[#allocation2 + $0x148] sm:$0xff] }
 0x92b   :  { %v9091_v41 = vcombine.high %v3738_v39, %v3742_v47  ;;  %v9090_v55 = vcombine.low %v3738_v39, %v3742_v47  ;;  %v3709_v39 = vld [vmem:[#allocation2 + $0x58] sm:$0xff] }
 0x92c   :  { %9047 = vmatmul.mubr.msk.bf16.vlgmr.msra.gmra.mrb[196].mxu0 %vm4120_vm2, %v12756_v11  ;;  %9049 = vmatmul.mubr.msk.bf16.vlgmr.msra.gmra.mrb[196].mxu1 %vm4120_vm2, %v12756_v11  ;;  %v9068_v11 = vcombine.low %v3715_v16, %v3719_v15  ;;  %v9092_v16 = vcombine.low %v3739_v56, %v3743_v44  ;;  %v3713_v47 = vld [vmem:[#allocation2 + $0x78] sm:$0xff] }
 0x92d   :  { %4649 = vmatpush1.bf16.msra.mxu0 %v9050_v54  ;;  %4692 = vmatpush1.bf16.msra.mxu1 %v9052_v21  ;;  %v9093_v54 = vcombine.high %v3739_v56, %v3743_v44  ;;  %v3746_v21 = vld [vmem:[#allocation2 + $0x180] sm:$0xff]  ;;  %v9064_v63 = vcombine.low %v3709_v39, %v3713_v47 }
 0x92e   :  { %4650 = vmatprep.subr.bf16.mxu0 %v9059_v58  ;;  %4693 = vmatprep.subr.bf16.mxu1 %v9061_v60  ;;  %v3750_v58 = vld [vmem:[#allocation2 + $0x1a0] sm:$0xff]  ;;  %v3747_v60 = vld [vmem:[#allocation2 + $0x188] sm:$0xff] }
 0x92f   :  { %4680 = vmatprep.mubr.bf16.mxu0 %v9952_v33  ;;  %4723 = vmatprep.mubr.bf16.mxu1 %v9952_v33  ;;  %v9099_v15 = vcombine.high %v3746_v21, %v3750_v58  ;;  %v9100_v17 = vcombine.low %v3747_v60, %v3751_v0 }
 0x931   :  { %4651 = vmatpush1.bf16.msra.mxu0 %v9058_v50  ;;  %4694 = vmatpush1.bf16.msra.mxu1 %v9060_v8  ;;  %v9101_v50 = vcombine.high %v3747_v60, %v3751_v0  ;;  %v3754_v8 = vld [vmem:[#allocation2 + $0x1c0] sm:$0x77]  ;;  %v3724_v60 = vld [vmem:[#allocation2 + $0xd0] sm:$0xff] }
 0x932   :  { %4652 = vmatprep.subr.bf16.mxu0 %v9067_v61  ;;  %4695 = vmatprep.subr.bf16.mxu1 %v9069_v27  ;;  %v3755_v61 = vld [vmem:[#allocation2 + $0x1c8] sm:$0x77]  ;;  %v9098_v27 = vcombine.low %v3746_v21, %v3750_v58  ;;  %v9107_v34 = vcombine.high %v3754_v8, %v3754_v8  ;;  %v9106_v22 = vcombine.low %v3754_v8, %v3754_v8  ;;  %v3721_v21 = vld [vmem:[#allocation2 + $0xb8] sm:$0xff]  ;;  %v3728_v0 = vld [vmem:[#allocation2 + $0xf0] sm:$0xff] }
 0x933   :  { %v9109_v26 = vcombine.high %v3755_v61, %v3755_v61  ;;  %v9073_v58 = vcombine.high %v3717_v4, %v3721_v21  ;;  %v9079_v8 = vcombine.high %v3724_v60, %v3728_v0 }
 0x934   :  { %v4625_v45 = vsel %vm4124_vm1, %v9106_v22, 0  ;;  %v3737_v22 = vld [vmem:[#allocation2 + $0x138] sm:$0xff] }
 0x935   :  { %4653 = vmatpush1.bf16.msra.mxu0 %v9066_v20  ;;  %4696 = vmatpush1.bf16.msra.mxu1 %v9068_v11  ;;  %v9108_v20 = vcombine.low %v3755_v61, %v3755_v61  ;;  %v3700_v11 = vld [vmem:[#allocation2 + $0x10] sm:$0xff] }
 0x936   :  { %4654 = vmatprep.subr.bf16.mxu0 %v9075_v9  ;;  %4697 = vmatprep.subr.bf16.mxu1 %v9077_v43  ;;  %v3704_v9 = vld [vmem:[#allocation2 + $0x30] sm:$0xff]  ;;  %v3701_v43 = vld [vmem:[#allocation2 + $0x18] sm:$0xff] }
 0x937   :  { %v9055_v49 = vcombine.high %v3700_v11, %v3704_v9  ;;  %v4631_v35 = vsel %vm4124_vm1, %v9108_v20, 0  ;;  %v9054_v56 = vcombine.low %v3700_v11, %v3704_v9  ;;  %v9056_v44 = vcombine.low %v3701_v43, %v3705_v25 }
 0x939   :  { %4655 = vmatpush1.bf16.msra.mxu0 %v9074_v46  ;;  %4698 = vmatpush1.bf16.msra.mxu1 %v9076_v36  ;;  %v9057_v46 = vcombine.high %v3701_v43, %v3705_v25  ;;  %v3708_v36 = vld [vmem:[#allocation2 + $0x50] sm:$0xff] }
 0x93a   :  { %4656 = vmatprep.subr.bf16.mxu0 %v9083_v13  ;;  %4699 = vmatprep.subr.bf16.mxu1 %v9085_v51  ;;  %v3712_v13 = vld [vmem:[#allocation2 + $0x70] sm:$0xff]  ;;  %v12782_v51 = vpack.c.bf16 %v3684_v48, %v2478_v59 }
 0x93b   :  { %v9062_v59 = vcombine.low %v3708_v36, %v3712_v13  ;;  %v3740_v43 = vld [vmem:[#allocation2 + $0x150] sm:$0xff] }
 0x93c   :  { %v3744_v25 = vld [vmem:[#allocation2 + $0x170] sm:$0xff] }
 0x93d   :  { %4657 = vmatpush1.bf16.msra.mxu0 %v9082_v57  ;;  %4700 = vmatpush1.bf16.msra.mxu1 %v9084_v14  ;;  %v9063_v57 = vcombine.high %v3708_v36, %v3712_v13  ;;  %v9065_v14 = vcombine.high %v3709_v39, %v3713_v47  ;;  %v9095_v36 = vcombine.high %v3740_v43, %v3744_v25  ;;  %v3748_v39 = vld [vmem:[#allocation2 + $0x190] sm:$0xff] }
 0x93e   :  { %4658 = vmatprep.subr.bf16.mxu0 %v9091_v41  ;;  %4701 = vmatprep.subr.bf16.mxu1 %v9093_v54  ;;  %v3716_v41 = vld [vmem:[#allocation2 + $0x90] sm:$0xff] }
 0x93f   :  { %v3720_v54 = vld [vmem:[#allocation2 + $0xb0] sm:$0xff] }
 0x940   :  { %v9071_v48 = vcombine.high %v3716_v41, %v3720_v54  ;;  %v3752_v47 = vld [vmem:[#allocation2 + $0x1b0] sm:$0xff] }
 0x941   :  { %4659 = vmatpush1.bf16.msra.mxu0 %v9090_v55  ;;  %4702 = vmatpush1.bf16.msra.mxu1 %v9092_v16  ;;  %v3725_v55 = vld [vmem:[#allocation2 + $0xd8] sm:$0xff] }
 0x942   :  { %4660 = vmatprep.subr.bf16.mxu0 %v9099_v15  ;;  %4703 = vmatprep.subr.bf16.mxu1 %v9101_v50  ;;  %v3729_v16 = vld [vmem:[#allocation2 + $0xf8] sm:$0xff]  ;;  %v9070_v15 = vcombine.low %v3716_v41, %v3720_v54  ;;  %v9072_v50 = vcombine.low %v3717_v4, %v3721_v21  ;;  %v9103_v41 = vcombine.high %v3748_v39, %v3752_v47  ;;  %v3756_v4 = vld [vmem:[#allocation2 + $0x1d0] sm:$0x77] }
 0x943   :  { %v9081_v61 = vcombine.high %v3725_v55, %v3729_v16  ;;  %v9080_v20 = vcombine.low %v3725_v55, %v3729_v16  ;;  %v3757_v21 = vld [vmem:[#allocation2 + $0x1d8] sm:$0x77]  ;;  %v4822_v55 = vld [vmem:[#allocation2 + $0x3c0] sm:$0xff] }
 0x944   :  { %v4826_v16 = vld [vmem:[#allocation2 + $0x3e0] sm:$0xff] }
 0x945   :  { %4661 = vmatpush1.bf16.msra.mxu0 %v9098_v27  ;;  %4704 = vmatpush1.bf16.msra.mxu1 %v9100_v17  ;;  %v3732_v27 = vld [vmem:[#allocation2 + $0x110] sm:$0xff] }
 0x946   :  { %9114 = vmatprep.subr.msk.bf16.mxu0 %vm4124_vm1, %v9107_v34  ;;  %9116 = vmatprep.subr.msk.bf16.mxu1 %vm4124_vm1, %v9109_v26  ;;  %v3736_v17 = vld [vmem:[#allocation2 + $0x130] sm:$0xff]  ;;  %v3733_v34 = vld [vmem:[#allocation2 + $0x118] sm:$0xff]  ;;  %v9078_v26 = vcombine.low %v3724_v60, %v3728_v0  ;;  %v9113_v60 = vcombine.high %v3757_v21, %v3757_v21  ;;  %v9112_v0 = vcombine.low %v3757_v21, %v3757_v21  ;;  %v4854_v21 = vld [vmem:[#allocation2 + $0x4c0] sm:$0xff] }
 0x947   :  { %v9087_v11 = vcombine.high %v3732_v27, %v3736_v17  ;;  %v9089_v9 = vcombine.high %v3733_v34, %v3737_v22 }
 0x949   :  { %4663 = vmatpush1.bf16.msra.mxu0 %v4625_v45  ;;  %4706 = vmatpush1.bf16.msra.mxu1 %v4631_v35  ;;  %v3741_v45 = vld [vmem:[#allocation2 + $0x158] sm:$0xff]  ;;  %v9086_v35 = vcombine.low %v3732_v27, %v3736_v17  ;;  %v4643_v27 = vsel %vm4124_vm1, %v9112_v0, 0 }
 0x94a   :  { %4734 = vmatprep.subr.bf16.mxu0 %v9055_v49  ;;  %4777 = vmatprep.subr.bf16.mxu1 %v9057_v46  ;;  %v3745_v49 = vld [vmem:[#allocation2 + $0x178] sm:$0xff]  ;;  %v9088_v46 = vcombine.low %v3733_v34, %v3737_v22  ;;  %v4830_v34 = vld [vmem:[#allocation2 + $0x400] sm:$0xff] }
 0x94b   :  { %v9097_v13 = vcombine.high %v3741_v45, %v3745_v49  ;;  %v4834_v22 = vld [vmem:[#allocation2 + $0x420] sm:$0xff] }
 0x94c   :  { %9115 = vmatmul.mubr.msk.bf16.vlgmr.msra.gmra.mrb[192].mxu0 %vm4120_vm2, %v12782_v51  ;;  %9117 = vmatmul.mubr.msk.bf16.vlgmr.msra.gmra.mrb[192].mxu1 %vm4120_vm2, %v12782_v51 }
 0x94d   :  { %4735 = vmatpush1.bf16.msra.mxu0 %v9054_v56  ;;  %4778 = vmatpush1.bf16.msra.mxu1 %v9056_v44  ;;  %v3749_v56 = vld [vmem:[#allocation2 + $0x198] sm:$0xff] }
 0x94e   :  { %4736 = vmatprep.subr.bf16.mxu0 %v9063_v57  ;;  %4779 = vmatprep.subr.bf16.mxu1 %v9065_v14  ;;  %v3753_v44 = vld [vmem:[#allocation2 + $0x1b8] sm:$0xff]  ;;  %v9094_v57 = vcombine.low %v3740_v43, %v3744_v25  ;;  %v9096_v14 = vcombine.low %v3741_v45, %v3745_v49  ;;  %v9131_v43 = vcombine.high %v4830_v34, %v4834_v22  ;;  %v4838_v45 = vld [vmem:[#allocation2 + $0x440] sm:$0xff] }
 0x94f   :  { %4766 = vmatprep.mubr.bf16.mxu0 %v9952_v33  ;;  %4809 = vmatprep.mubr.bf16.mxu1 %v9952_v33  ;;  %v9105_v54 = vcombine.high %v3749_v56, %v3753_v44  ;;  %v4842_v49 = vld [vmem:[#allocation2 + $0x460] sm:$0xff] }
 0x951   :  { %4737 = vmatpush1.bf16.msra.mxu0 %v9062_v59  ;;  %4780 = vmatpush1.bf16.msra.mxu1 %v9064_v63  ;;  %v9102_v59 = vcombine.low %v3748_v39, %v3752_v47  ;;  %v9104_v63 = vcombine.low %v3749_v56, %v3753_v44  ;;  %v9139_v39 = vcombine.high %v4838_v45, %v4842_v49  ;;  %v4846_v56 = vld [vmem:[#allocation2 + $0x480] sm:$0xff] }
 0x952   :  { %4738 = vmatprep.subr.bf16.mxu0 %v9071_v48  ;;  %4781 = vmatprep.subr.bf16.mxu1 %v9073_v58  ;;  %v9111_v48 = vcombine.high %v3756_v4, %v3756_v4  ;;  %v9110_v58 = vcombine.low %v3756_v4, %v3756_v4  ;;  %v4850_v44 = vld [vmem:[#allocation2 + $0x4a0] sm:$0xff] }
 0x955   :  { %4739 = vmatpush1.bf16.msra.mxu0 %v9070_v15  ;;  %4782 = vmatpush1.bf16.msra.mxu1 %v9072_v50  ;;  %v4823_v15 = vld [vmem:[#allocation2 + $0x3c8] sm:$0xff] }
 0x956   :  { %4740 = vmatprep.subr.bf16.mxu0 %v9079_v8  ;;  %4783 = vmatprep.subr.bf16.mxu1 %v9081_v61  ;;  %v4827_v50 = vld [vmem:[#allocation2 + $0x3e8] sm:$0xff]  ;;  %v4637_v8 = vsel %vm4124_vm1, %v9110_v58, 0  ;;  %v9123_v61 = vcombine.high %v4822_v55, %v4826_v16  ;;  %v9146_v58 = vcombine.low %v4846_v56, %v4850_v44 }
 0x957   :  { %v9125_v17 = vcombine.high %v4823_v15, %v4827_v50 }
 0x959   :  { %4741 = vmatpush1.bf16.msra.mxu0 %v9078_v26  ;;  %4784 = vmatpush1.bf16.msra.mxu1 %v9080_v20  ;;  %v4831_v26 = vld [vmem:[#allocation2 + $0x408] sm:$0xff] }
 0x95a   :  { %4742 = vmatprep.subr.bf16.mxu0 %v9087_v11  ;;  %4785 = vmatprep.subr.bf16.mxu1 %v9089_v9  ;;  %v4835_v20 = vld [vmem:[#allocation2 + $0x428] sm:$0xff]  ;;  %v9122_v11 = vcombine.low %v4822_v55, %v4826_v16  ;;  %v9124_v9 = vcombine.low %v4823_v15, %v4827_v50  ;;  %v4862_v16 = vld [vmem:[#allocation2 + $0x500] sm:$0xff] }
 0x95b   :  { %v9133_v25 = vcombine.high %v4831_v26, %v4835_v20  ;;  %v4866_v15 = vld [vmem:[#allocation2 + $0x520] sm:$0xff]  ;;  %v4863_v50 = vld [vmem:[#allocation2 + $0x508] sm:$0xff] }
 0x95d   :  { %4743 = vmatpush1.bf16.msra.mxu0 %v9086_v35  ;;  %4786 = vmatpush1.bf16.msra.mxu1 %v9088_v46  ;;  %v4839_v35 = vld [vmem:[#allocation2 + $0x448] sm:$0xff] }
 0x95e   :  { %4744 = vmatprep.subr.bf16.mxu0 %v9095_v36  ;;  %4787 = vmatprep.subr.bf16.mxu1 %v9097_v13  ;;  %v4843_v46 = vld [vmem:[#allocation2 + $0x468] sm:$0xff]  ;;  %v9130_v36 = vcombine.low %v4830_v34, %v4834_v22  ;;  %v9132_v13 = vcombine.low %v4831_v26, %v4835_v20  ;;  %v4870_v22 = vld [vmem:[#allocation2 + $0x540] sm:$0xff] }
 0x95f   :  { %v9141_v47 = vcombine.high %v4839_v35, %v4843_v46  ;;  %v4874_v26 = vld [vmem:[#allocation2 + $0x560] sm:$0xff]  ;;  %v4871_v20 = vld [vmem:[#allocation2 + $0x548] sm:$0xff] }
 0x961   :  { %4745 = vmatpush1.bf16.msra.mxu0 %v9094_v57  ;;  %4788 = vmatpush1.bf16.msra.mxu1 %v9096_v14  ;;  %v4847_v57 = vld [vmem:[#allocation2 + $0x488] sm:$0xff] }
 0x962   :  { %4746 = vmatprep.subr.bf16.mxu0 %v9103_v41  ;;  %4789 = vmatprep.subr.bf16.mxu1 %v9105_v54  ;;  %v4851_v14 = vld [vmem:[#allocation2 + $0x4a8] sm:$0xff]  ;;  %v9138_v41 = vcombine.low %v4838_v45, %v4842_v49  ;;  %v9147_v54 = vcombine.high %v4846_v56, %v4850_v44  ;;  %v4878_v49 = vld [vmem:[#allocation2 + $0x580] sm:$0x77]  ;;  %v4824_v44 = vld [vmem:[#allocation2 + $0x3d0] sm:$0xff] }
 0x963   :  { %v9149_v4 = vcombine.high %v4847_v57, %v4851_v14 }
 0x965   :  { %4747 = vmatpush1.bf16.msra.mxu0 %v9102_v59  ;;  %4790 = vmatpush1.bf16.msra.mxu1 %v9104_v63  ;;  %v4858_v59 = vld [vmem:[#allocation2 + $0x4e0] sm:$0xff]  ;;  %v4855_v63 = vld [vmem:[#allocation2 + $0x4c8] sm:$0xff] }
 0x966   :  { %9118 = vmatprep.subr.msk.bf16.mxu0 %vm4124_vm1, %v9111_v48  ;;  %9120 = vmatprep.subr.msk.bf16.mxu1 %vm4124_vm1, %v9113_v60  ;;  %v4859_v48 = vld [vmem:[#allocation2 + $0x4e8] sm:$0xff]  ;;  %v9148_v60 = vcombine.low %v4847_v57, %v4851_v14  ;;  %v9155_v0 = vcombine.high %v4854_v21, %v4858_v59  ;;  %v4828_v57 = vld [vmem:[#allocation2 + $0x3f0] sm:$0xff]  ;;  %v4825_v14 = vld [vmem:[#allocation2 + $0x3d8] sm:$0xff] }
 0x967   :  { %v9157_v55 = vcombine.high %v4855_v63, %v4859_v48 }
 0x969   :  { %4749 = vmatpush1.bf16.msra.mxu0 %v4637_v8  ;;  %4792 = vmatpush1.bf16.msra.mxu1 %v4643_v27  ;;  %v4867_v8 = vld [vmem:[#allocation2 + $0x528] sm:$0xff]  ;;  %v9156_v27 = vcombine.low %v4855_v63, %v4859_v48  ;;  %v4836_v63 = vld [vmem:[#allocation2 + $0x430] sm:$0xff]  ;;  %v12808_v48 = vpack.c.bf16 %v3686_v2, %v2480_v5 }
 0x96a   :  { %5209 = vmatprep.subr.bf16.mxu0 %v9123_v61  ;;  %5252 = vmatprep.subr.bf16.mxu1 %v9125_v17  ;;  %v9154_v61 = vcombine.low %v4854_v21, %v4858_v59  ;;  %v9163_v17 = vcombine.high %v4862_v16, %v4866_v15  ;;  %v9165_v34 = vcombine.high %v4863_v50, %v4867_v8  ;;  %v4832_v59 = vld [vmem:[#allocation2 + $0x410] sm:$0xff] }
 0x96b   :  { %v9134_v5 = vcombine.low %v4832_v59, %v4836_v63 }
 0x96c   :  { %9119 = vmatmul.mubr.msk.bf16.vlgmr.msra.gmra.mrb[196].mxu0 %vm4120_vm2, %v12782_v51  ;;  %9121 = vmatmul.mubr.msk.bf16.vlgmr.msra.gmra.mrb[196].mxu1 %vm4120_vm2, %v12782_v51  ;;  %v9140_v51 = vcombine.low %v4839_v35, %v4843_v46  ;;  %v4879_v35 = vld [vmem:[#allocation2 + $0x588] sm:$0x77]  ;;  %v9170_v46 = vcombine.low %v4870_v22, %v4874_v26 }
 0x96d   :  { %5210 = vmatpush1.bf16.msra.mxu0 %v9122_v11  ;;  %5253 = vmatpush1.bf16.msra.mxu1 %v9124_v9  ;;  %v4875_v11 = vld [vmem:[#allocation2 + $0x568] sm:$0xff]  ;;  %v9162_v9 = vcombine.low %v4862_v16, %v4866_v15  ;;  %v9180_v56 = vcombine.low %v4879_v35, %v4879_v35  ;;  %v9135_v16 = vcombine.high %v4832_v59, %v4836_v63  ;;  %v4873_v59 = vld [vmem:[#allocation2 + $0x558] sm:$0xff] }
 0x96e   :  { %5211 = vmatprep.subr.bf16.mxu0 %v9131_v43  ;;  %5254 = vmatprep.subr.bf16.mxu1 %v9133_v25  ;;  %v9164_v43 = vcombine.low %v4863_v50, %v4867_v8  ;;  %v9171_v25 = vcombine.high %v4870_v22, %v4874_v26  ;;  %v9173_v45 = vcombine.high %v4871_v20, %v4875_v11  ;;  %v4840_v50 = vld [vmem:[#allocation2 + $0x450] sm:$0xff]  ;;  %v4849_v22 = vld [vmem:[#allocation2 + $0x498] sm:$0xff] }
 0x96f   :  { %5241 = vmatprep.mubr.bf16.mxu0 %v9952_v33  ;;  %5284 = vmatprep.mubr.bf16.mxu1 %v9952_v33  ;;  %v4844_v8 = vld [vmem:[#allocation2 + $0x470] sm:$0xff]  ;;  %v4853_v26 = vld [vmem:[#allocation2 + $0x4b8] sm:$0xff] }
 0x970   :  { %v9143_v2 = vcombine.high %v4840_v50, %v4844_v8  ;;  %v4877_v63 = vld [vmem:[#allocation2 + $0x578] sm:$0xff] }
 0x971   :  { %5212 = vmatpush1.bf16.msra.mxu0 %v9130_v36  ;;  %5255 = vmatpush1.bf16.msra.mxu1 %v9132_v13  ;;  %v9172_v36 = vcombine.low %v4871_v20, %v4875_v11  ;;  %v9179_v13 = vcombine.high %v4878_v49, %v4878_v49  ;;  %v9142_v20 = vcombine.low %v4840_v50, %v4844_v8 }
 0x972   :  { %5213 = vmatprep.subr.bf16.mxu0 %v9139_v39  ;;  %5256 = vmatprep.subr.bf16.mxu1 %v9141_v47  ;;  %v9178_v39 = vcombine.low %v4878_v49, %v4878_v49  ;;  %v9181_v47 = vcombine.high %v4879_v35, %v4879_v35  ;;  %v4857_v49 = vld [vmem:[#allocation2 + $0x4d8] sm:$0xff]  ;;  %v9176_v8 = vcombine.low %v4873_v59, %v4877_v63 }
 0x973   :  { %v4861_v35 = vld [vmem:[#allocation2 + $0x4f8] sm:$0xff] }
 0x975   :  { %5214 = vmatpush1.bf16.msra.mxu0 %v9138_v41  ;;  %5257 = vmatpush1.bf16.msra.mxu1 %v9140_v51  ;;  %v4829_v41 = vld [vmem:[#allocation2 + $0x3f8] sm:$0xff]  ;;  %v5186_v51 = vsel %vm4124_vm1, %v9178_v39, 0  ;;  %v9161_v39 = vcombine.high %v4857_v49, %v4861_v35 }
 0x976   :  { %5215 = vmatprep.subr.bf16.mxu0 %v9147_v54  ;;  %5258 = vmatprep.subr.bf16.mxu1 %v9149_v4  ;;  %v9127_v54 = vcombine.high %v4824_v44, %v4828_v57  ;;  %v5192_v4 = vsel %vm4124_vm1, %v9180_v56, 0  ;;  %v9129_v21 = vcombine.high %v4825_v14, %v4829_v41  ;;  %v4868_v56 = vld [vmem:[#allocation2 + $0x530] sm:$0xff] }
 0x979   :  { %5216 = vmatpush1.bf16.msra.mxu0 %v9146_v58  ;;  %5259 = vmatpush1.bf16.msra.mxu1 %v9148_v60  ;;  %v4833_v58 = vld [vmem:[#allocation2 + $0x418] sm:$0xff] }
 0x97a   :  { %5217 = vmatprep.subr.bf16.mxu0 %v9155_v0  ;;  %5260 = vmatprep.subr.bf16.mxu1 %v9157_v55  ;;  %v4837_v60 = vld [vmem:[#allocation2 + $0x438] sm:$0xff]  ;;  %v9126_v0 = vcombine.low %v4824_v44, %v4828_v57  ;;  %v9128_v55 = vcombine.low %v4825_v14, %v4829_v41  ;;  %v9160_v41 = vcombine.low %v4857_v49, %v4861_v35 }
 0x97b   :  { %v9137_v15 = vcombine.high %v4833_v58, %v4837_v60  ;;  %v9136_v42 = vcombine.low %v4833_v58, %v4837_v60  ;;  %v4865_v44 = vld [vmem:[#allocation2 + $0x518] sm:$0xff] }
 0x97c   :  { %v4869_v57 = vld [vmem:[#allocation2 + $0x538] sm:$0xff] }
 0x97d   :  { %5218 = vmatpush1.bf16.msra.mxu0 %v9154_v61  ;;  %5261 = vmatpush1.bf16.msra.mxu1 %v9156_v27  ;;  %v4845_v61 = vld [vmem:[#allocation2 + $0x478] sm:$0xff]  ;;  %v9168_v60 = vcombine.low %v4865_v44, %v4869_v57 }
 0x97e   :  { %5219 = vmatprep.subr.bf16.mxu0 %v9163_v17  ;;  %5262 = vmatprep.subr.bf16.mxu1 %v9165_v34  ;;  %v9145_v27 = vcombine.high %v4841_v1, %v4845_v61  ;;  %v4848_v17 = vld [vmem:[#allocation2 + $0x490] sm:$0xff]  ;;  %v9144_v11 = vcombine.low %v4841_v1, %v4845_v61 }
 0x97f   :  { %v4852_v34 = vld [vmem:[#allocation2 + $0x4b0] sm:$0xff] }
 0x981   :  { %5220 = vmatpush1.bf16.msra.mxu0 %v9162_v9  ;;  %5263 = vmatpush1.bf16.msra.mxu1 %v9164_v43  ;;  %v9151_v9 = vcombine.high %v4848_v17, %v4852_v34  ;;  %v9153_v43 = vcombine.high %v4849_v22, %v4853_v26 }
 0x982   :  { %5221 = vmatprep.subr.bf16.mxu0 %v9171_v25  ;;  %5264 = vmatprep.subr.bf16.mxu1 %v9173_v45  ;;  %v4856_v25 = vld [vmem:[#allocation2 + $0x4d0] sm:$0xff] }
 0x983   :  { %v4860_v45 = vld [vmem:[#allocation2 + $0x4f0] sm:$0xff] }
 0x984   :  { %v9158_v14 = vcombine.low %v4856_v25, %v4860_v45 }
 0x985   :  { %5222 = vmatpush1.bf16.msra.mxu0 %v9170_v46  ;;  %5265 = vmatpush1.bf16.msra.mxu1 %v9172_v36  ;;  %v9150_v46 = vcombine.low %v4848_v17, %v4852_v34  ;;  %v9152_v36 = vcombine.low %v4849_v22, %v4853_v26  ;;  %v5400_v17 = vld [vmem:[#allocation2 + $0x5a8] sm:$0xff] }
 0x986   :  { %9186 = vmatprep.subr.msk.bf16.mxu0 %vm4124_vm1, %v9179_v13  ;;  %9188 = vmatprep.subr.msk.bf16.mxu1 %vm4124_vm1, %v9181_v47  ;;  %v9159_v13 = vcombine.high %v4856_v25, %v4860_v45  ;;  %v4864_v47 = vld [vmem:[#allocation2 + $0x510] sm:$0xff]  ;;  %v5404_v34 = vld [vmem:[#allocation2 + $0x5c8] sm:$0xff] }
 0x987   :  { %v9166_v58 = vcombine.low %v4864_v47, %v4868_v56  ;;  %v5408_v25 = vld [vmem:[#allocation2 + $0x5e8] sm:$0xff]  ;;  %v9196_v35 = vcombine.low %v5400_v17, %v5404_v34 }
 0x988   :  { %v5412_v45 = vld [vmem:[#allocation2 + $0x608] sm:$0xff] }
 0x989   :  { %5224 = vmatpush1.bf16.msra.mxu0 %v5186_v51  ;;  %5267 = vmatpush1.bf16.msra.mxu1 %v5192_v4  ;;  %v9167_v51 = vcombine.high %v4864_v47, %v4868_v56  ;;  %v4872_v4 = vld [vmem:[#allocation2 + $0x550] sm:$0xff]  ;;  %v5416_v47 = vld [vmem:[#allocation2 + $0x628] sm:$0xff] }
 0x98a   :  { %5295 = vmatprep.subr.bf16.mxu0 %v9127_v54  ;;  %5338 = vmatprep.subr.bf16.mxu1 %v9129_v21  ;;  %v9169_v54 = vcombine.high %v4865_v44, %v4869_v57  ;;  %v4876_v21 = vld [vmem:[#allocation2 + $0x570] sm:$0xff]  ;;  %v5420_v56 = vld [vmem:[#allocation2 + $0x648] sm:$0xff]  ;;  %v9204_v57 = vcombine.low %v5408_v25, %v5412_v45 }
 0x98b   :  { %v9174_v50 = vcombine.low %v4872_v4, %v4876_v21 }
 0x98c   :  { %9187 = vmatmul.mubr.msk.bf16.vlgmr.msra.gmra.mrb[192].mxu0 %vm4120_vm2, %v12808_v48  ;;  %9189 = vmatmul.mubr.msk.bf16.vlgmr.msra.gmra.mrb[192].mxu1 %vm4120_vm2, %v12808_v48 }
 0x98d   :  { %5296 = vmatpush1.bf16.msra.mxu0 %v9126_v0  ;;  %5339 = vmatpush1.bf16.msra.mxu1 %v9128_v55  ;;  %v9175_v0 = vcombine.high %v4872_v4, %v4876_v21  ;;  %v9177_v55 = vcombine.high %v4873_v59, %v4877_v63  ;;  %v5424_v4 = vld [vmem:[#allocation2 + $0x668] sm:$0xff] }
 0x98e   :  { %5297 = vmatprep.subr.bf16.mxu0 %v9135_v16  ;;  %5340 = vmatprep.subr.bf16.mxu1 %v9137_v15  ;;  %v4880_v16 = vld [vmem:[#allocation2 + $0x590] sm:$0x77]  ;;  %v4881_v15 = vld [vmem:[#allocation2 + $0x598] sm:$0x77]  ;;  %v5428_v21 = vld [vmem:[#allocation2 + $0x688] sm:$0xff] }
 0x98f   :  { %5327 = vmatprep.mubr.bf16.mxu0 %v9952_v33  ;;  %5370 = vmatprep.mubr.bf16.mxu1 %v9952_v33  ;;  %v9183_v1 = vcombine.high %v4880_v16, %v4880_v16  ;;  %v9182_v61 = vcombine.low %v4880_v16, %v4880_v16  ;;  %v5436_v16 = vld [vmem:[#allocation2 + $0x6c8] sm:$0xff] }
 0x991   :  { %5298 = vmatpush1.bf16.msra.mxu0 %v9134_v5  ;;  %5341 = vmatpush1.bf16.msra.mxu1 %v9136_v42  ;;  %v9185_v5 = vcombine.high %v4881_v15, %v4881_v15  ;;  %v9184_v42 = vcombine.low %v4881_v15, %v4881_v15  ;;  %v5198_v22 = vsel %vm4124_vm1, %v9182_v61, 0  ;;  %v5439_v61 = vld [vmem:[#allocation2 + $0x6e0] sm:$0xff] }
 0x992   :  { %5299 = vmatprep.subr.bf16.mxu0 %v9143_v2  ;;  %5342 = vmatprep.subr.bf16.mxu1 %v9145_v27  ;;  %v5399_v2 = vld [vmem:[#allocation2 + $0x5a0] sm:$0xff] }
 0x993   :  { %v5403_v27 = vld [vmem:[#allocation2 + $0x5c0] sm:$0xff] }
 0x994   :  { %v9195_v26 = vcombine.high %v5399_v2, %v5403_v27  ;;  %v9194_v49 = vcombine.low %v5399_v2, %v5403_v27  ;;  %v5444_v2 = vld [vmem:[#allocation2 + $0x708] sm:$0xff] }
 0x995   :  { %5300 = vmatpush1.bf16.msra.mxu0 %v9142_v20  ;;  %5343 = vmatpush1.bf16.msra.mxu1 %v9144_v11  ;;  %v5204_v20 = vsel %vm4124_vm1, %v9184_v42, 0  ;;  %v9197_v11 = vcombine.high %v5400_v17, %v5404_v34  ;;  %v5440_v42 = vld [vmem:[#allocation2 + $0x6e8] sm:$0xff] }
 0x996   :  { %5301 = vmatprep.subr.bf16.mxu0 %v9151_v9  ;;  %5344 = vmatprep.subr.bf16.mxu1 %v9153_v43  ;;  %v5407_v9 = vld [vmem:[#allocation2 + $0x5e0] sm:$0xff] }
 0x997   :  { %v5411_v43 = vld [vmem:[#allocation2 + $0x600] sm:$0xff] }
 0x998   :  { %v9202_v44 = vcombine.low %v5407_v9, %v5411_v43 }
 0x999   :  { %5302 = vmatpush1.bf16.msra.mxu0 %v9150_v46  ;;  %5345 = vmatpush1.bf16.msra.mxu1 %v9152_v36  ;;  %v9203_v46 = vcombine.high %v5407_v9, %v5411_v43  ;;  %v9205_v36 = vcombine.high %v5408_v25, %v5412_v45  ;;  %v5452_v9 = vld [vmem:[#allocation2 + $0x748] sm:$0xff]  ;;  %v9236_v25 = vcombine.low %v5440_v42, %v5444_v2 }
 0x99a   :  { %5303 = vmatprep.subr.bf16.mxu0 %v9159_v13  ;;  %5346 = vmatprep.subr.bf16.mxu1 %v9161_v39  ;;  %v5415_v13 = vld [vmem:[#allocation2 + $0x620] sm:$0xff] }
 0x99b   :  { %v5419_v39 = vld [vmem:[#allocation2 + $0x640] sm:$0xff] }
 0x99c   :  { %v9210_v59 = vcombine.low %v5415_v13, %v5419_v39 }
 0x99d   :  { %5304 = vmatpush1.bf16.msra.mxu0 %v9158_v14  ;;  %5347 = vmatpush1.bf16.msra.mxu1 %v9160_v41  ;;  %v9211_v14 = vcombine.high %v5415_v13, %v5419_v39  ;;  %v9213_v41 = vcombine.high %v5416_v47, %v5420_v56 }
 0x99e   :  { %5305 = vmatprep.subr.bf16.mxu0 %v9167_v51  ;;  %5348 = vmatprep.subr.bf16.mxu1 %v9169_v54  ;;  %v5423_v51 = vld [vmem:[#allocation2 + $0x660] sm:$0xff] }
 0x99f   :  { %v5427_v54 = vld [vmem:[#allocation2 + $0x680] sm:$0xff] }
 0x9a0   :  { %v9219_v63 = vcombine.high %v5423_v51, %v5427_v54  ;;  %v9218_v15 = vcombine.low %v5423_v51, %v5427_v54  ;;  %v5406_v51 = vld [vmem:[#allocation2 + $0x5d8] sm:$0xff] }
 0x9a1   :  { %5306 = vmatpush1.bf16.msra.mxu0 %v9166_v58  ;;  %5349 = vmatpush1.bf16.msra.mxu1 %v9168_v60  ;;  %v9221_v58 = vcombine.high %v5424_v4, %v5428_v21  ;;  %v5431_v60 = vld [vmem:[#allocation2 + $0x6a0] sm:$0xff] }
 0x9a2   :  { %5307 = vmatprep.subr.bf16.mxu0 %v9175_v0  ;;  %5350 = vmatprep.subr.bf16.mxu1 %v9177_v55  ;;  %v5435_v0 = vld [vmem:[#allocation2 + $0x6c0] sm:$0xff]  ;;  %v5432_v55 = vld [vmem:[#allocation2 + $0x6a8] sm:$0xff] }
 0x9a3   :  { %v9226_v27 = vcombine.low %v5431_v60, %v5435_v0  ;;  %v9228_v17 = vcombine.low %v5432_v55, %v5436_v16 }
 0x9a5   :  { %5308 = vmatpush1.bf16.msra.mxu0 %v9174_v50  ;;  %5351 = vmatpush1.bf16.msra.mxu1 %v9176_v8  ;;  %v9220_v50 = vcombine.low %v5424_v4, %v5428_v21  ;;  %v9227_v8 = vcombine.high %v5431_v60, %v5435_v0  ;;  %v5410_v60 = vld [vmem:[#allocation2 + $0x5f8] sm:$0xff] }
 0x9a6   :  { %9190 = vmatprep.subr.msk.bf16.mxu0 %vm4124_vm1, %v9183_v1  ;;  %9192 = vmatprep.subr.msk.bf16.mxu1 %vm4124_vm1, %v9185_v5  ;;  %v9229_v1 = vcombine.high %v5432_v55, %v5436_v16  ;;  %v5443_v5 = vld [vmem:[#allocation2 + $0x700] sm:$0xff]  ;;  %v5414_v0 = vld [vmem:[#allocation2 + $0x618] sm:$0xff] }
 0x9a7   :  { %v9235_v34 = vcombine.high %v5439_v61, %v5443_v5  ;;  %v9234_v43 = vcombine.low %v5439_v61, %v5443_v5  ;;  %v5422_v61 = vld [vmem:[#allocation2 + $0x658] sm:$0xff]  ;;  %v9208_v37 = vcombine.low %v5410_v60, %v5414_v0 }
 0x9a8   :  { %v9217_v5 = vcombine.high %v5418_v12, %v5422_v61 }
 0x9a9   :  { %5310 = vmatpush1.bf16.msra.mxu0 %v5198_v22  ;;  %5353 = vmatpush1.bf16.msra.mxu1 %v5204_v20  ;;  %v9237_v22 = vcombine.high %v5440_v42, %v5444_v2  ;;  %v5451_v20 = vld [vmem:[#allocation2 + $0x740] sm:$0xff]  ;;  %v5425_v42 = vld [vmem:[#allocation2 + $0x670] sm:$0xff] }
 0x9aa   :  { %5786 = vmatprep.subr.bf16.mxu0 %v9195_v26  ;;  %5829 = vmatprep.subr.bf16.mxu1 %v9197_v11  ;;  %v5447_v26 = vld [vmem:[#allocation2 + $0x720] sm:$0xff]  ;;  %v5448_v11 = vld [vmem:[#allocation2 + $0x728] sm:$0xff]  ;;  %v5429_v2 = vld [vmem:[#allocation2 + $0x690] sm:$0xff] }
 0x9ab   :  { %v9243_v45 = vcombine.high %v5447_v26, %v5451_v20  ;;  %v9244_v13 = vcombine.low %v5448_v11, %v5452_v9 }
 0x9ac   :  { %9191 = vmatmul.mubr.msk.bf16.vlgmr.msra.gmra.mrb[196].mxu0 %vm4120_vm2, %v12808_v48  ;;  %9193 = vmatmul.mubr.msk.bf16.vlgmr.msra.gmra.mrb[196].mxu1 %vm4120_vm2, %v12808_v48  ;;  %v9212_v48 = vcombine.low %v5416_v47, %v5420_v56 }
 0x9ad   :  { %5787 = vmatpush1.bf16.msra.mxu0 %v9194_v49  ;;  %5830 = vmatpush1.bf16.msra.mxu1 %v9196_v35  ;;  %v9245_v49 = vcombine.high %v5448_v11, %v5452_v9  ;;  %v5455_v35 = vld [vmem:[#allocation2 + $0x760] sm:$0x77]  ;;  %v5433_v11 = vld [vmem:[#allocation2 + $0x6b0] sm:$0xff] }
 0x9ae   :  { %5788 = vmatprep.subr.bf16.mxu0 %v9203_v46  ;;  %5831 = vmatprep.subr.bf16.mxu1 %v9205_v36  ;;  %v5456_v46 = vld [vmem:[#allocation2 + $0x768] sm:$0x77]  ;;  %v9242_v36 = vcombine.low %v5447_v26, %v5451_v20  ;;  %v9251_v39 = vcombine.high %v5455_v35, %v5455_v35  ;;  %v9250_v47 = vcombine.low %v5455_v35, %v5455_v35  ;;  %v5437_v9 = vld [vmem:[#allocation2 + $0x6d0] sm:$0xff] }
 0x9af   :  { %5818 = vmatprep.mubr.bf16.mxu0 %v9952_v33  ;;  %5861 = vmatprep.mubr.bf16.mxu1 %v9952_v33  ;;  %v9253_v56 = vcombine.high %v5456_v46, %v5456_v46  ;;  %v9223_v26 = vcombine.high %v5425_v42, %v5429_v2  ;;  %v9231_v35 = vcombine.high %v5433_v11, %v5437_v9 }
 0x9b0   :  { %v5763_v54 = vsel %vm4124_vm1, %v9250_v47, 0  ;;  %v5446_v47 = vld [vmem:[#allocation2 + $0x718] sm:$0xff] }
 0x9b1   :  { %5789 = vmatpush1.bf16.msra.mxu0 %v9202_v44  ;;  %5832 = vmatpush1.bf16.msra.mxu1 %v9204_v57  ;;  %v9252_v44 = vcombine.low %v5456_v46, %v5456_v46  ;;  %v5401_v57 = vld [vmem:[#allocation2 + $0x5b0] sm:$0xff] }
 0x9b2   :  { %5790 = vmatprep.subr.bf16.mxu0 %v9211_v14  ;;  %5833 = vmatprep.subr.bf16.mxu1 %v9213_v41  ;;  %v5405_v14 = vld [vmem:[#allocation2 + $0x5d0] sm:$0xff]  ;;  %v5402_v41 = vld [vmem:[#allocation2 + $0x5b8] sm:$0xff] }
 0x9b3   :  { %v9199_v4 = vcombine.high %v5401_v57, %v5405_v14  ;;  %v5769_v21 = vsel %vm4124_vm1, %v9252_v44, 0  ;;  %v9198_v55 = vcombine.low %v5401_v57, %v5405_v14  ;;  %v9200_v16 = vcombine.low %v5402_v41, %v5406_v51 }
 0x9b5   :  { %5791 = vmatpush1.bf16.msra.mxu0 %v9210_v59  ;;  %5834 = vmatpush1.bf16.msra.mxu1 %v9212_v48  ;;  %v9201_v59 = vcombine.high %v5402_v41, %v5406_v51  ;;  %v5409_v48 = vld [vmem:[#allocation2 + $0x5f0] sm:$0xff] }
 0x9b6   :  { %5792 = vmatprep.subr.bf16.mxu0 %v9219_v63  ;;  %5835 = vmatprep.subr.bf16.mxu1 %v9221_v58  ;;  %v5413_v63 = vld [vmem:[#allocation2 + $0x610] sm:$0xff]  ;;  %v12834_v58 = vpack.c.bf16 %v3687_v53, %v2481_v32 }
 0x9b7   :  { %v9206_v32 = vcombine.low %v5409_v48, %v5413_v63  ;;  %v5449_v41 = vld [vmem:[#allocation2 + $0x730] sm:$0xff] }
 0x9b8   :  { %v5453_v51 = vld [vmem:[#allocation2 + $0x750] sm:$0xff] }
 0x9b9   :  { %5793 = vmatpush1.bf16.msra.mxu0 %v9218_v15  ;;  %5836 = vmatpush1.bf16.msra.mxu1 %v9220_v50  ;;  %v9207_v15 = vcombine.high %v5409_v48, %v5413_v63  ;;  %v9209_v50 = vcombine.high %v5410_v60, %v5414_v0  ;;  %v9247_v48 = vcombine.high %v5449_v41, %v5453_v51  ;;  %v5457_v60 = vld [vmem:[#allocation2 + $0x770] sm:$0x77]  ;;  %v5458_v0 = vld [vmem:[#allocation2 + $0x778] sm:$0x77] }
 0x9ba   :  { %5794 = vmatprep.subr.bf16.mxu0 %v9227_v8  ;;  %5837 = vmatprep.subr.bf16.mxu1 %v9229_v1  ;;  %v5417_v8 = vld [vmem:[#allocation2 + $0x630] sm:$0xff] }
 0x9bb   :  { %v5421_v1 = vld [vmem:[#allocation2 + $0x650] sm:$0xff] }
 0x9bc   :  { %v9215_v53 = vcombine.high %v5417_v8, %v5421_v1 }
 0x9bd   :  { %5795 = vmatpush1.bf16.msra.mxu0 %v9226_v27  ;;  %5838 = vmatpush1.bf16.msra.mxu1 %v9228_v17  ;;  %v5426_v27 = vld [vmem:[#allocation2 + $0x678] sm:$0xff] }
 0x9be   :  { %5796 = vmatprep.subr.bf16.mxu0 %v9235_v34  ;;  %5839 = vmatprep.subr.bf16.mxu1 %v9237_v22  ;;  %v5430_v17 = vld [vmem:[#allocation2 + $0x698] sm:$0xff]  ;;  %v9214_v34 = vcombine.low %v5417_v8, %v5421_v1  ;;  %v9216_v22 = vcombine.low %v5418_v12, %v5422_v61  ;;  %v9257_v8 = vcombine.high %v5458_v0, %v5458_v0  ;;  %v5976_v12 = vld [vmem:[#allocation2 + $0x780] sm:$0xff] }
 0x9bf   :  { %v9225_v20 = vcombine.high %v5426_v27, %v5430_v17  ;;  %v9256_v1 = vcombine.low %v5458_v0, %v5458_v0  ;;  %v5980_v61 = vld [vmem:[#allocation2 + $0x7a0] sm:$0xff] }
 0x9c0   :  { %v6016_v0 = vld [vmem:[#allocation2 + $0x8c0] sm:$0xff] }
 0x9c1   :  { %5797 = vmatpush1.bf16.msra.mxu0 %v9234_v43  ;;  %5840 = vmatpush1.bf16.msra.mxu1 %v9236_v25  ;;  %v5434_v43 = vld [vmem:[#allocation2 + $0x6b8] sm:$0xff] }
 0x9c2   :  { %5798 = vmatprep.subr.bf16.mxu0 %v9243_v45  ;;  %5841 = vmatprep.subr.bf16.mxu1 %v9245_v49  ;;  %v5438_v25 = vld [vmem:[#allocation2 + $0x6d8] sm:$0xff]  ;;  %v9222_v45 = vcombine.low %v5425_v42, %v5429_v2  ;;  %v9224_v49 = vcombine.low %v5426_v27, %v5430_v17  ;;  %v5781_v42 = vsel %vm4124_vm1, %v9256_v1, 0  ;;  %v5984_v27 = vld [vmem:[#allocation2 + $0x7c0] sm:$0xff] }
 0x9c3   :  { %v9233_v46 = vcombine.high %v5434_v43, %v5438_v25  ;;  %v9232_v44 = vcombine.low %v5434_v43, %v5438_v25  ;;  %v5988_v17 = vld [vmem:[#allocation2 + $0x7e0] sm:$0xff] }
 0x9c4   :  { %v5992_v43 = vld [vmem:[#allocation2 + $0x800] sm:$0xff] }
 0x9c5   :  { %5799 = vmatpush1.bf16.msra.mxu0 %v9242_v36  ;;  %5842 = vmatpush1.bf16.msra.mxu1 %v9244_v13  ;;  %v5441_v36 = vld [vmem:[#allocation2 + $0x6f0] sm:$0xff]  ;;  %v5996_v25 = vld [vmem:[#allocation2 + $0x820] sm:$0xff] }
 0x9c6   :  { %9258 = vmatprep.subr.msk.bf16.mxu0 %vm4124_vm1, %v9251_v39  ;;  %9260 = vmatprep.subr.msk.bf16.mxu1 %vm4124_vm1, %v9253_v56  ;;  %v5445_v13 = vld [vmem:[#allocation2 + $0x710] sm:$0xff]  ;;  %v5442_v39 = vld [vmem:[#allocation2 + $0x6f8] sm:$0xff]  ;;  %v9230_v56 = vcombine.low %v5433_v11, %v5437_v9  ;;  %v9275_v11 = vcombine.high %v5984_v27, %v5988_v17 }
 0x9c7   :  { %v9239_v57 = vcombine.high %v5441_v36, %v5445_v13  ;;  %v9241_v14 = vcombine.high %v5442_v39, %v5446_v47 }
 0x9c9   :  { %5801 = vmatpush1.bf16.msra.mxu0 %v5763_v54  ;;  %5844 = vmatpush1.bf16.msra.mxu1 %v5769_v21  ;;  %v5450_v54 = vld [vmem:[#allocation2 + $0x738] sm:$0xff]  ;;  %v9238_v21 = vcombine.low %v5441_v36, %v5445_v13  ;;  %v9283_v36 = vcombine.high %v5992_v43, %v5996_v25 }
 0x9ca   :  { %5872 = vmatprep.subr.bf16.mxu0 %v9199_v4  ;;  %5915 = vmatprep.subr.bf16.mxu1 %v9201_v59  ;;  %v5454_v4 = vld [vmem:[#allocation2 + $0x758] sm:$0xff]  ;;  %v9240_v59 = vcombine.low %v5442_v39, %v5446_v47  ;;  %v6000_v39 = vld [vmem:[#allocation2 + $0x840] sm:$0xff] }
 0x9cb   :  { %v9249_v63 = vcombine.high %v5450_v54, %v5454_v4  ;;  %v6004_v47 = vld [vmem:[#allocation2 + $0x860] sm:$0xff] }
 0x9cc   :  { %9259 = vmatmul.mubr.msk.bf16.vlgmr.msra.gmra.mrb[192].mxu0 %vm4120_vm2, %v12834_v58  ;;  %9261 = vmatmul.mubr.msk.bf16.vlgmr.msra.gmra.mrb[192].mxu1 %vm4120_vm2, %v12834_v58 }
 0x9cd   :  { %5873 = vmatpush1.bf16.msra.mxu0 %v9198_v55  ;;  %5916 = vmatpush1.bf16.msra.mxu1 %v9200_v16  ;;  %v9246_v55 = vcombine.low %v5449_v41, %v5453_v51  ;;  %v9248_v16 = vcombine.low %v5450_v54, %v5454_v4  ;;  %v6008_v51 = vld [vmem:[#allocation2 + $0x880] sm:$0xff]  ;;  %v6009_v4 = vld [vmem:[#allocation2 + $0x888] sm:$0xff] }
 0x9ce   :  { %5874 = vmatprep.subr.bf16.mxu0 %v9207_v15  ;;  %5917 = vmatprep.subr.bf16.mxu1 %v9209_v50  ;;  %v9255_v15 = vcombine.high %v5457_v60, %v5457_v60  ;;  %v9254_v50 = vcombine.low %v5457_v60, %v5457_v60  ;;  %v6012_v54 = vld [vmem:[#allocation2 + $0x8a0] sm:$0xff] }
 0x9cf   :  { %5904 = vmatprep.mubr.bf16.mxu0 %v9952_v33  ;;  %5947 = vmatprep.mubr.bf16.mxu1 %v9952_v33 }
 0x9d1   :  { %5875 = vmatpush1.bf16.msra.mxu0 %v9206_v32  ;;  %5918 = vmatpush1.bf16.msra.mxu1 %v9208_v37  ;;  %v5977_v32 = vld [vmem:[#allocation2 + $0x788] sm:$0xff] }
 0x9d2   :  { %5876 = vmatprep.subr.bf16.mxu0 %v9215_v53  ;;  %5919 = vmatprep.subr.bf16.mxu1 %v9217_v5  ;;  %v5981_v37 = vld [vmem:[#allocation2 + $0x7a8] sm:$0xff]  ;;  %v5775_v53 = vsel %vm4124_vm1, %v9254_v50, 0  ;;  %v9267_v5 = vcombine.high %v5976_v12, %v5980_v61  ;;  %v9298_v50 = vcombine.low %v6008_v51, %v6012_v54 }
 0x9d3   :  { %v9269_v2 = vcombine.high %v5977_v32, %v5981_v37 }
 0x9d5   :  { %5877 = vmatpush1.bf16.msra.mxu0 %v9214_v34  ;;  %5920 = vmatpush1.bf16.msra.mxu1 %v9216_v22  ;;  %v5985_v34 = vld [vmem:[#allocation2 + $0x7c8] sm:$0xff] }
 0x9d6   :  { %5878 = vmatprep.subr.bf16.mxu0 %v9223_v26  ;;  %5921 = vmatprep.subr.bf16.mxu1 %v9225_v20  ;;  %v5989_v22 = vld [vmem:[#allocation2 + $0x7e8] sm:$0xff]  ;;  %v9266_v26 = vcombine.low %v5976_v12, %v5980_v61  ;;  %v9268_v20 = vcombine.low %v5977_v32, %v5981_v37  ;;  %v6024_v61 = vld [vmem:[#allocation2 + $0x900] sm:$0xff] }
 0x9d7   :  { %v9277_v9 = vcombine.high %v5985_v34, %v5989_v22  ;;  %v6028_v32 = vld [vmem:[#allocation2 + $0x920] sm:$0xff]  ;;  %v6025_v37 = vld [vmem:[#allocation2 + $0x908] sm:$0xff] }
 0x9d9   :  { %5879 = vmatpush1.bf16.msra.mxu0 %v9222_v45  ;;  %5922 = vmatpush1.bf16.msra.mxu1 %v9224_v49  ;;  %v5993_v45 = vld [vmem:[#allocation2 + $0x808] sm:$0xff] }
 0x9da   :  { %5880 = vmatprep.subr.bf16.mxu0 %v9231_v35  ;;  %5923 = vmatprep.subr.bf16.mxu1 %v9233_v46  ;;  %v5997_v49 = vld [vmem:[#allocation2 + $0x828] sm:$0xff]  ;;  %v9274_v35 = vcombine.low %v5984_v27, %v5988_v17  ;;  %v9276_v46 = vcombine.low %v5985_v34, %v5989_v22  ;;  %v6032_v17 = vld [vmem:[#allocation2 + $0x940] sm:$0x77]  ;;  %v9314_v22 = vcombine.low %v6024_v61, %v6028_v32 }
 0x9db   :  { %v9285_v13 = vcombine.high %v5993_v45, %v5997_v49  ;;  %v6033_v34 = vld [vmem:[#allocation2 + $0x948] sm:$0x77] }
 0x9dd   :  { %5881 = vmatpush1.bf16.msra.mxu0 %v9230_v56  ;;  %5924 = vmatpush1.bf16.msra.mxu1 %v9232_v44  ;;  %v6001_v56 = vld [vmem:[#allocation2 + $0x848] sm:$0xff] }
 0x9de   :  { %5882 = vmatprep.subr.bf16.mxu0 %v9239_v57  ;;  %5925 = vmatprep.subr.bf16.mxu1 %v9241_v14  ;;  %v6005_v44 = vld [vmem:[#allocation2 + $0x868] sm:$0xff]  ;;  %v9282_v57 = vcombine.low %v5992_v43, %v5996_v25  ;;  %v9291_v14 = vcombine.high %v6000_v39, %v6004_v47  ;;  %v9324_v43 = vcombine.low %v6033_v34, %v6033_v34  ;;  %v5978_v25 = vld [vmem:[#allocation2 + $0x790] sm:$0xff] }
 0x9df   :  { %v9293_v41 = vcombine.high %v6001_v56, %v6005_v44 }
 0x9e1   :  { %5883 = vmatpush1.bf16.msra.mxu0 %v9238_v21  ;;  %5926 = vmatpush1.bf16.msra.mxu1 %v9240_v59  ;;  %v6013_v21 = vld [vmem:[#allocation2 + $0x8a8] sm:$0xff]  ;;  %v9290_v59 = vcombine.low %v6000_v39, %v6004_v47  ;;  %v5986_v47 = vld [vmem:[#allocation2 + $0x7d0] sm:$0xff] }
 0x9e2   :  { %5884 = vmatprep.subr.bf16.mxu0 %v9247_v48  ;;  %5927 = vmatprep.subr.bf16.mxu1 %v9249_v63  ;;  %v9292_v48 = vcombine.low %v6001_v56, %v6005_v44  ;;  %v9299_v63 = vcombine.high %v6008_v51, %v6012_v54  ;;  %v9301_v60 = vcombine.high %v6009_v4, %v6013_v21  ;;  %v5990_v56 = vld [vmem:[#allocation2 + $0x7f0] sm:$0xff] }
 0x9e3   :  { %v12860_v44 = vpack.c.bf16 %v3688_v38, %v2482_v6  ;;  %v9279_v51 = vcombine.high %v5986_v47, %v5990_v56  ;;  %v9278_v6 = vcombine.low %v5986_v47, %v5990_v56 }
 0x9e5   :  { %5885 = vmatpush1.bf16.msra.mxu0 %v9246_v55  ;;  %5928 = vmatpush1.bf16.msra.mxu1 %v9248_v16  ;;  %v6020_v55 = vld [vmem:[#allocation2 + $0x8e0] sm:$0xff]  ;;  %v6017_v16 = vld [vmem:[#allocation2 + $0x8c8] sm:$0xff] }
 0x9e6   :  { %9262 = vmatprep.subr.msk.bf16.mxu0 %vm4124_vm1, %v9255_v15  ;;  %9264 = vmatprep.subr.msk.bf16.mxu1 %vm4124_vm1, %v9257_v8  ;;  %v6021_v15 = vld [vmem:[#allocation2 + $0x8e8] sm:$0xff]  ;;  %v9300_v8 = vcombine.low %v6009_v4, %v6013_v21  ;;  %v9307_v1 = vcombine.high %v6016_v0, %v6020_v55  ;;  %v5994_v4 = vld [vmem:[#allocation2 + $0x810] sm:$0xff] }
 0x9e7   :  { %v9309_v12 = vcombine.high %v6017_v16, %v6021_v15  ;;  %v5998_v21 = vld [vmem:[#allocation2 + $0x830] sm:$0xff] }
 0x9e8   :  { %v9287_v38 = vcombine.high %v5994_v4, %v5998_v21 }
 0x9e9   :  { %5887 = vmatpush1.bf16.msra.mxu0 %v5775_v53  ;;  %5930 = vmatpush1.bf16.msra.mxu1 %v5781_v42  ;;  %v6029_v53 = vld [vmem:[#allocation2 + $0x928] sm:$0xff]  ;;  %v9308_v42 = vcombine.low %v6017_v16, %v6021_v15  ;;  %v9286_v16 = vcombine.low %v5994_v4, %v5998_v21 }
 0x9ea   :  { %6363 = vmatprep.subr.bf16.mxu0 %v9267_v5  ;;  %6406 = vmatprep.subr.bf16.mxu1 %v9269_v2  ;;  %v9306_v5 = vcombine.low %v6016_v0, %v6020_v55  ;;  %v9315_v2 = vcombine.high %v6024_v61, %v6028_v32  ;;  %v9317_v27 = vcombine.high %v6025_v37, %v6029_v53  ;;  %v6003_v0 = vld [vmem:[#allocation2 + $0x858] sm:$0xff]  ;;  %v6554_v4 = vld [vmem:[#allocation2 + $0x968] sm:$0xff] }
 0x9eb   :  { %v6007_v55 = vld [vmem:[#allocation2 + $0x878] sm:$0xff]  ;;  %v6558_v21 = vld [vmem:[#allocation2 + $0x988] sm:$0xff] }
 0x9ec   :  { %9263 = vmatmul.mubr.msk.bf16.vlgmr.msra.gmra.mrb[196].mxu0 %vm4120_vm2, %v12834_v58  ;;  %9265 = vmatmul.mubr.msk.bf16.vlgmr.msra.gmra.mrb[196].mxu1 %vm4120_vm2, %v12834_v58  ;;  %v9284_v58 = vcombine.low %v5993_v45, %v5997_v49  ;;  %v5982_v45 = vld [vmem:[#allocation2 + $0x7b0] sm:$0xff]  ;;  %v5979_v49 = vld [vmem:[#allocation2 + $0x798] sm:$0xff] }
 0x9ed   :  { %6364 = vmatpush1.bf16.msra.mxu0 %v9266_v26  ;;  %6407 = vmatpush1.bf16.msra.mxu1 %v9268_v20  ;;  %v9316_v26 = vcombine.low %v6025_v37, %v6029_v53  ;;  %v9323_v20 = vcombine.high %v6032_v17, %v6032_v17  ;;  %v6011_v61 = vld [vmem:[#allocation2 + $0x898] sm:$0xff]  ;;  %v9296_v53 = vcombine.low %v6003_v0, %v6007_v55 }
 0x9ee   :  { %6365 = vmatprep.subr.bf16.mxu0 %v9275_v11  ;;  %6408 = vmatprep.subr.bf16.mxu1 %v9277_v9  ;;  %v9322_v11 = vcombine.low %v6032_v17, %v6032_v17  ;;  %v9325_v9 = vcombine.high %v6033_v34, %v6033_v34  ;;  %v6015_v32 = vld [vmem:[#allocation2 + $0x8b8] sm:$0xff] }
 0x9ef   :  { %6395 = vmatprep.mubr.bf16.mxu0 %v9952_v33  ;;  %6438 = vmatprep.mubr.bf16.mxu1 %v9952_v33  ;;  %v6019_v17 = vld [vmem:[#allocation2 + $0x8d8] sm:$0xff] }
 0x9f0   :  { %v6023_v34 = vld [vmem:[#allocation2 + $0x8f8] sm:$0xff] }
 0x9f1   :  { %6366 = vmatpush1.bf16.msra.mxu0 %v9274_v35  ;;  %6409 = vmatpush1.bf16.msra.mxu1 %v9276_v46  ;;  %v5983_v35 = vld [vmem:[#allocation2 + $0x7b8] sm:$0xff]  ;;  %v6340_v46 = vsel %vm4124_vm1, %v9322_v11, 0  ;;  %v9313_v11 = vcombine.high %v6019_v17, %v6023_v34 }
 0x9f2   :  { %6367 = vmatprep.subr.bf16.mxu0 %v9283_v36  ;;  %6410 = vmatprep.subr.bf16.mxu1 %v9285_v13  ;;  %v9271_v36 = vcombine.high %v5978_v25, %v5982_v45  ;;  %v6346_v13 = vsel %vm4124_vm1, %v9324_v43, 0  ;;  %v9273_v39 = vcombine.high %v5979_v49, %v5983_v35  ;;  %v6030_v43 = vld [vmem:[#allocation2 + $0x930] sm:$0xff] }
 0x9f5   :  { %6368 = vmatpush1.bf16.msra.mxu0 %v9282_v57  ;;  %6411 = vmatpush1.bf16.msra.mxu1 %v9284_v58  ;;  %v5987_v57 = vld [vmem:[#allocation2 + $0x7d8] sm:$0xff] }
 0x9f6   :  { %6369 = vmatprep.subr.bf16.mxu0 %v9291_v14  ;;  %6412 = vmatprep.subr.bf16.mxu1 %v9293_v41  ;;  %v5991_v58 = vld [vmem:[#allocation2 + $0x7f8] sm:$0xff]  ;;  %v9270_v14 = vcombine.low %v5978_v25, %v5982_v45  ;;  %v9272_v41 = vcombine.low %v5979_v49, %v5983_v35  ;;  %v9312_v35 = vcombine.low %v6019_v17, %v6023_v34 }
 0x9f7   :  { %v9281_v54 = vcombine.high %v5987_v57, %v5991_v58  ;;  %v9280_v3 = vcombine.low %v5987_v57, %v5991_v58  ;;  %v6027_v25 = vld [vmem:[#allocation2 + $0x918] sm:$0xff] }
 0x9f8   :  { %v6031_v45 = vld [vmem:[#allocation2 + $0x938] sm:$0xff] }
 0x9f9   :  { %6370 = vmatpush1.bf16.msra.mxu0 %v9290_v59  ;;  %6413 = vmatpush1.bf16.msra.mxu1 %v9292_v48  ;;  %v5999_v59 = vld [vmem:[#allocation2 + $0x838] sm:$0xff]  ;;  %v9320_v56 = vcombine.low %v6027_v25, %v6031_v45 }
 0x9fa   :  { %6371 = vmatprep.subr.bf16.mxu0 %v9299_v63  ;;  %6414 = vmatprep.subr.bf16.mxu1 %v9301_v60  ;;  %v9289_v48 = vcombine.high %v5995_v62, %v5999_v59  ;;  %v6002_v63 = vld [vmem:[#allocation2 + $0x850] sm:$0xff]  ;;  %v9288_v15 = vcombine.low %v5995_v62, %v5999_v59 }
 0x9fb   :  { %v6006_v60 = vld [vmem:[#allocation2 + $0x870] sm:$0xff] }
 0x9fc   :  { %v9294_v37 = vcombine.low %v6002_v63, %v6006_v60 }
 0x9fd   :  { %6372 = vmatpush1.bf16.msra.mxu0 %v9298_v50  ;;  %6415 = vmatpush1.bf16.msra.mxu1 %v9300_v8  ;;  %v9295_v50 = vcombine.high %v6002_v63, %v6006_v60  ;;  %v9297_v8 = vcombine.high %v6003_v0, %v6007_v55  ;;  %v6562_v63 = vld [vmem:[#allocation2 + $0x9a8] sm:$0xff]  ;;  %v9340_v55 = vcombine.low %v6554_v4, %v6558_v21 }
 0x9fe   :  { %6373 = vmatprep.subr.bf16.mxu0 %v9307_v1  ;;  %6416 = vmatprep.subr.bf16.mxu1 %v9309_v12  ;;  %v6010_v1 = vld [vmem:[#allocation2 + $0x890] sm:$0xff]  ;;  %v6566_v60 = vld [vmem:[#allocation2 + $0x9c8] sm:$0xff] }
 0x9ff   :  { %v6014_v12 = vld [vmem:[#allocation2 + $0x8b0] sm:$0xff] }
 0xa01   :  { %6374 = vmatpush1.bf16.msra.mxu0 %v9306_v5  ;;  %6417 = vmatpush1.bf16.msra.mxu1 %v9308_v42  ;;  %v9303_v5 = vcombine.high %v6010_v1, %v6014_v12  ;;  %v9305_v42 = vcombine.high %v6011_v61, %v6015_v32 }
 0xa02   :  { %6375 = vmatprep.subr.bf16.mxu0 %v9315_v2  ;;  %6418 = vmatprep.subr.bf16.mxu1 %v9317_v27  ;;  %v6018_v2 = vld [vmem:[#allocation2 + $0x8d0] sm:$0xff] }
 0xa03   :  { %v6022_v27 = vld [vmem:[#allocation2 + $0x8f0] sm:$0xff] }
 0xa04   :  { %v9310_v49 = vcombine.low %v6018_v2, %v6022_v27 }
 0xa05   :  { %6376 = vmatpush1.bf16.msra.mxu0 %v9314_v22  ;;  %6419 = vmatpush1.bf16.msra.mxu1 %v9316_v26  ;;  %v9302_v22 = vcombine.low %v6010_v1, %v6014_v12  ;;  %v9304_v26 = vcombine.low %v6011_v61, %v6015_v32  ;;  %v6570_v1 = vld [vmem:[#allocation2 + $0x9e8] sm:$0xff]  ;;  %v9348_v32 = vcombine.low %v6562_v63, %v6566_v60 }
 0xa06   :  { %9330 = vmatprep.subr.msk.bf16.mxu0 %vm4124_vm1, %v9323_v20  ;;  %9332 = vmatprep.subr.msk.bf16.mxu1 %vm4124_vm1, %v9325_v9  ;;  %v9311_v20 = vcombine.high %v6018_v2, %v6022_v27  ;;  %v6026_v9 = vld [vmem:[#allocation2 + $0x910] sm:$0xff]  ;;  %v6574_v12 = vld [vmem:[#allocation2 + $0xa08] sm:$0xff] }
 0xa07   :  { %v9318_v47 = vcombine.low %v6026_v9, %v6030_v43  ;;  %v6578_v2 = vld [vmem:[#allocation2 + $0xa28] sm:$0xff] }
 0xa08   :  { %v6582_v27 = vld [vmem:[#allocation2 + $0xa48] sm:$0xff] }
 0xa09   :  { %6378 = vmatpush1.bf16.msra.mxu0 %v6340_v46  ;;  %6421 = vmatpush1.bf16.msra.mxu1 %v6346_v13  ;;  %v9319_v46 = vcombine.high %v6026_v9, %v6030_v43  ;;  %v6034_v13 = vld [vmem:[#allocation2 + $0x950] sm:$0x77]  ;;  %v6590_v9 = vld [vmem:[#allocation2 + $0xa88] sm:$0xff] }
 0xa0a   :  { %6449 = vmatprep.subr.bf16.mxu0 %v9271_v36  ;;  %6492 = vmatprep.subr.bf16.mxu1 %v9273_v39  ;;  %v9321_v36 = vcombine.high %v6027_v25, %v6031_v45  ;;  %v6035_v39 = vld [vmem:[#allocation2 + $0x958] sm:$0x77]  ;;  %v9327_v57 = vcombine.high %v6034_v13, %v6034_v13  ;;  %v9326_v58 = vcombine.low %v6034_v13, %v6034_v13  ;;  %v6598_v13 = vld [vmem:[#allocation2 + $0xac8] sm:$0xff] }
 0xa0b   :  { %v9364_v25 = vcombine.low %v6578_v2, %v6582_v27 }
 0xa0c   :  { %9331 = vmatmul.mubr.msk.bf16.vlgmr.msra.gmra.mrb[192].mxu0 %vm4120_vm2, %v12860_v44  ;;  %9333 = vmatmul.mubr.msk.bf16.vlgmr.msra.gmra.mrb[192].mxu1 %vm4120_vm2, %v12860_v44  ;;  %v6352_v62 = vsel %vm4124_vm1, %v9326_v58, 0  ;;  %v6601_v58 = vld [vmem:[#allocation2 + $0xae0] sm:$0xff] }
 0xa0d   :  { %6450 = vmatpush1.bf16.msra.mxu0 %v9270_v14  ;;  %6493 = vmatpush1.bf16.msra.mxu1 %v9272_v41  ;;  %v9329_v14 = vcombine.high %v6035_v39, %v6035_v39  ;;  %v9328_v41 = vcombine.low %v6035_v39, %v6035_v39 }
 0xa0e   :  { %6451 = vmatprep.subr.bf16.mxu0 %v9279_v51  ;;  %6494 = vmatprep.subr.bf16.mxu1 %v9281_v54  ;;  %v6553_v51 = vld [vmem:[#allocation2 + $0x960] sm:$0xff] }
 0xa0f   :  { %6481 = vmatprep.mubr.bf16.mxu0 %v9952_v33  ;;  %6524 = vmatprep.mubr.bf16.mxu1 %v9952_v33  ;;  %v6557_v54 = vld [vmem:[#allocation2 + $0x980] sm:$0xff] }
 0xa10   :  { %v9339_v59 = vcombine.high %v6553_v51, %v6557_v54  ;;  %v9338_v0 = vcombine.low %v6553_v51, %v6557_v54  ;;  %v6606_v51 = vld [vmem:[#allocation2 + $0xb08] sm:$0xff] }
 0xa11   :  { %6452 = vmatpush1.bf16.msra.mxu0 %v9278_v6  ;;  %6495 = vmatpush1.bf16.msra.mxu1 %v9280_v3  ;;  %v6358_v6 = vsel %vm4124_vm1, %v9328_v41, 0  ;;  %v9341_v3 = vcombine.high %v6554_v4, %v6558_v21  ;;  %v6602_v41 = vld [vmem:[#allocation2 + $0xae8] sm:$0xff] }
 0xa12   :  { %6453 = vmatprep.subr.bf16.mxu0 %v9287_v38  ;;  %6496 = vmatprep.subr.bf16.mxu1 %v9289_v48  ;;  %v6561_v38 = vld [vmem:[#allocation2 + $0x9a0] sm:$0xff] }
 0xa13   :  { %v6565_v48 = vld [vmem:[#allocation2 + $0x9c0] sm:$0xff] }
 0xa14   :  { %v9346_v61 = vcombine.low %v6561_v38, %v6565_v48 }
 0xa15   :  { %6454 = vmatpush1.bf16.msra.mxu0 %v9286_v16  ;;  %6497 = vmatpush1.bf16.msra.mxu1 %v9288_v15  ;;  %v9347_v16 = vcombine.high %v6561_v38, %v6565_v48  ;;  %v9349_v15 = vcombine.high %v6562_v63, %v6566_v60  ;;  %v9388_v38 = vcombine.low %v6602_v41, %v6606_v51 }
 0xa16   :  { %6455 = vmatprep.subr.bf16.mxu0 %v9295_v50  ;;  %6498 = vmatprep.subr.bf16.mxu1 %v9297_v8  ;;  %v6569_v50 = vld [vmem:[#allocation2 + $0x9e0] sm:$0xff] }
 0xa17   :  { %v6573_v8 = vld [vmem:[#allocation2 + $0xa00] sm:$0xff] }
 0xa18   :  { %v9354_v17 = vcombine.low %v6569_v50, %v6573_v8 }
 0xa19   :  { %6456 = vmatpush1.bf16.msra.mxu0 %v9294_v37  ;;  %6499 = vmatpush1.bf16.msra.mxu1 %v9296_v53  ;;  %v9355_v37 = vcombine.high %v6569_v50, %v6573_v8  ;;  %v9357_v53 = vcombine.high %v6570_v1, %v6574_v12  ;;  %v6560_v50 = vld [vmem:[#allocation2 + $0x998] sm:$0xff] }
 0xa1a   :  { %6457 = vmatprep.subr.bf16.mxu0 %v9303_v5  ;;  %6500 = vmatprep.subr.bf16.mxu1 %v9305_v42  ;;  %v6577_v5 = vld [vmem:[#allocation2 + $0xa20] sm:$0xff] }
 0xa1b   :  { %v6581_v42 = vld [vmem:[#allocation2 + $0xa40] sm:$0xff] }
 0xa1c   :  { %v9363_v34 = vcombine.high %v6577_v5, %v6581_v42  ;;  %v9362_v43 = vcombine.low %v6577_v5, %v6581_v42  ;;  %v6564_v5 = vld [vmem:[#allocation2 + $0x9b8] sm:$0xff] }
 0xa1d   :  { %6458 = vmatpush1.bf16.msra.mxu0 %v9302_v22  ;;  %6501 = vmatpush1.bf16.msra.mxu1 %v9304_v26  ;;  %v9365_v22 = vcombine.high %v6578_v2, %v6582_v27  ;;  %v6585_v26 = vld [vmem:[#allocation2 + $0xa60] sm:$0xff]  ;;  %v6568_v42 = vld [vmem:[#allocation2 + $0x9d8] sm:$0xff] }
 0xa1e   :  { %6459 = vmatprep.subr.bf16.mxu0 %v9311_v20  ;;  %6502 = vmatprep.subr.bf16.mxu1 %v9313_v11  ;;  %v6589_v20 = vld [vmem:[#allocation2 + $0xa80] sm:$0xff]  ;;  %v6586_v11 = vld [vmem:[#allocation2 + $0xa68] sm:$0xff]  ;;  %v9352_v40 = vcombine.low %v6564_v5, %v6568_v42 }
 0xa1f   :  { %v9371_v45 = vcombine.high %v6585_v26, %v6589_v20  ;;  %v9370_v39 = vcombine.low %v6585_v26, %v6589_v20  ;;  %v6576_v26 = vld [vmem:[#allocation2 + $0xa18] sm:$0xff] }
 0xa20   :  { %v9361_v20 = vcombine.high %v6572_v28, %v6576_v26 }
 0xa21   :  { %6460 = vmatpush1.bf16.msra.mxu0 %v9310_v49  ;;  %6503 = vmatpush1.bf16.msra.mxu1 %v9312_v35  ;;  %v9373_v49 = vcombine.high %v6586_v11, %v6590_v9  ;;  %v6593_v35 = vld [vmem:[#allocation2 + $0xaa0] sm:$0xff] }
 0xa22   :  { %6461 = vmatprep.subr.bf16.mxu0 %v9319_v46  ;;  %6504 = vmatprep.subr.bf16.mxu1 %v9321_v36  ;;  %v6597_v46 = vld [vmem:[#allocation2 + $0xac0] sm:$0xff]  ;;  %v6594_v36 = vld [vmem:[#allocation2 + $0xaa8] sm:$0xff] }
 0xa23   :  { %v9378_v54 = vcombine.low %v6593_v35, %v6597_v46  ;;  %v9380_v4 = vcombine.low %v6594_v36, %v6598_v13 }
 0xa25   :  { %6462 = vmatpush1.bf16.msra.mxu0 %v9318_v47  ;;  %6505 = vmatpush1.bf16.msra.mxu1 %v9320_v56  ;;  %v9372_v47 = vcombine.low %v6586_v11, %v6590_v9  ;;  %v9379_v56 = vcombine.high %v6593_v35, %v6597_v46  ;;  %v6579_v11 = vld [vmem:[#allocation2 + $0xa30] sm:$0xff] }
 0xa26   :  { %9334 = vmatprep.subr.msk.bf16.mxu0 %vm4124_vm1, %v9327_v57  ;;  %9336 = vmatprep.subr.msk.bf16.mxu1 %vm4124_vm1, %v9329_v14  ;;  %v9381_v57 = vcombine.high %v6594_v36, %v6598_v13  ;;  %v6605_v14 = vld [vmem:[#allocation2 + $0xb00] sm:$0xff]  ;;  %v6583_v9 = vld [vmem:[#allocation2 + $0xa50] sm:$0xff] }
 0xa27   :  { %v9387_v21 = vcombine.high %v6601_v58, %v6605_v14  ;;  %v9367_v35 = vcombine.high %v6579_v11, %v6583_v9  ;;  %v6587_v36 = vld [vmem:[#allocation2 + $0xa70] sm:$0xff] }
 0xa28   :  { %v6591_v13 = vld [vmem:[#allocation2 + $0xa90] sm:$0xff] }
 0xa29   :  { %6464 = vmatpush1.bf16.msra.mxu0 %v6352_v62  ;;  %6507 = vmatpush1.bf16.msra.mxu1 %v6358_v6  ;;  %v9389_v62 = vcombine.high %v6602_v41, %v6606_v51  ;;  %v6610_v6 = vld [vmem:[#allocation2 + $0xb28] sm:$0x77]  ;;  %v6595_v41 = vld [vmem:[#allocation2 + $0xab0] sm:$0xff] }
 0xa2a   :  { %6940 = vmatprep.subr.bf16.mxu0 %v9339_v59  ;;  %6983 = vmatprep.subr.bf16.mxu1 %v9341_v3  ;;  %v6609_v59 = vld [vmem:[#allocation2 + $0xb20] sm:$0x77]  ;;  %v9386_v3 = vcombine.low %v6601_v58, %v6605_v14  ;;  %v9397_v60 = vcombine.high %v6610_v6, %v6610_v6  ;;  %v9375_v58 = vcombine.high %v6587_v36, %v6591_v13  ;;  %v6599_v51 = vld [vmem:[#allocation2 + $0xad0] sm:$0xff] }
 0xa2b   :  { %v9395_v48 = vcombine.high %v6609_v59, %v6609_v59  ;;  %v9394_v63 = vcombine.low %v6609_v59, %v6609_v59  ;;  %v9383_v59 = vcombine.high %v6595_v41, %v6599_v51 }
 0xa2c   :  { %9335 = vmatmul.mubr.msk.bf16.vlgmr.msra.gmra.mrb[196].mxu0 %vm4120_vm2, %v12860_v44  ;;  %9337 = vmatmul.mubr.msk.bf16.vlgmr.msra.gmra.mrb[196].mxu1 %vm4120_vm2, %v12860_v44  ;;  %v9356_v44 = vcombine.low %v6570_v1, %v6574_v12 }
 0xa2d   :  { %6941 = vmatpush1.bf16.msra.mxu0 %v9338_v0  ;;  %6984 = vmatpush1.bf16.msra.mxu1 %v9340_v55  ;;  %v9396_v0 = vcombine.low %v6610_v6, %v6610_v6  ;;  %v6555_v55 = vld [vmem:[#allocation2 + $0x970] sm:$0xff]  ;;  %v6917_v8 = vsel %vm4124_vm1, %v9394_v63, 0  ;;  %v6608_v63 = vld [vmem:[#allocation2 + $0xb18] sm:$0xff] }
 0xa2e   :  { %6942 = vmatprep.subr.bf16.mxu0 %v9347_v16  ;;  %6985 = vmatprep.subr.bf16.mxu1 %v9349_v15  ;;  %v6559_v16 = vld [vmem:[#allocation2 + $0x990] sm:$0xff]  ;;  %v6556_v15 = vld [vmem:[#allocation2 + $0x978] sm:$0xff] }
 0xa2f   :  { %6972 = vmatprep.mubr.bf16.mxu0 %v9952_v33  ;;  %7015 = vmatprep.mubr.bf16.mxu1 %v9952_v33  ;;  %v9343_v1 = vcombine.high %v6555_v55, %v6559_v16  ;;  %v6923_v12 = vsel %vm4124_vm1, %v9396_v0, 0  ;;  %v9342_v2 = vcombine.low %v6555_v55, %v6559_v16  ;;  %v9344_v27 = vcombine.low %v6556_v15, %v6560_v50 }
 0xa31   :  { %6943 = vmatpush1.bf16.msra.mxu0 %v9346_v61  ;;  %6986 = vmatpush1.bf16.msra.mxu1 %v9348_v32  ;;  %v9345_v61 = vcombine.high %v6556_v15, %v6560_v50  ;;  %v6563_v32 = vld [vmem:[#allocation2 + $0x9b0] sm:$0xff]  ;;  %v6612_v50 = vld [vmem:[#allocation2 + $0xb38] sm:$0x77] }
 0xa32   :  { %6944 = vmatprep.subr.bf16.mxu0 %v9355_v37  ;;  %6987 = vmatprep.subr.bf16.mxu1 %v9357_v53  ;;  %v6567_v37 = vld [vmem:[#allocation2 + $0x9d0] sm:$0xff]  ;;  %v12886_v53 = vpack.c.bf16 %v3689_v18, %v2483_v30 }
 0xa33   :  { %v9350_v30 = vcombine.low %v6563_v32, %v6567_v37  ;;  %v6611_v15 = vld [vmem:[#allocation2 + $0xb30] sm:$0x77] }
 0xa35   :  { %6945 = vmatpush1.bf16.msra.mxu0 %v9354_v17  ;;  %6988 = vmatpush1.bf16.msra.mxu1 %v9356_v44  ;;  %v9351_v17 = vcombine.high %v6563_v32, %v6567_v37  ;;  %v9353_v44 = vcombine.high %v6564_v5, %v6568_v42  ;;  %v9401_v32 = vcombine.high %v6612_v50, %v6612_v50  ;;  %v7130_v5 = vld [vmem:[#allocation2 + $0xb40] sm:$0xff] }
 0xa36   :  { %6946 = vmatprep.subr.bf16.mxu0 %v9363_v34  ;;  %6989 = vmatprep.subr.bf16.mxu1 %v9365_v22  ;;  %v6571_v34 = vld [vmem:[#allocation2 + $0x9f0] sm:$0xff]  ;;  %v9400_v37 = vcombine.low %v6612_v50, %v6612_v50  ;;  %v7134_v42 = vld [vmem:[#allocation2 + $0xb60] sm:$0xff] }
 0xa37   :  { %v6575_v22 = vld [vmem:[#allocation2 + $0xa10] sm:$0xff]  ;;  %v7178_v50 = vld [vmem:[#allocation2 + $0xcc0] sm:$0xff] }
 0xa38   :  { %v9359_v18 = vcombine.high %v6571_v34, %v6575_v22 }
 0xa39   :  { %6947 = vmatpush1.bf16.msra.mxu0 %v9362_v43  ;;  %6990 = vmatpush1.bf16.msra.mxu1 %v9364_v25  ;;  %v6580_v43 = vld [vmem:[#allocation2 + $0xa38] sm:$0xff] }
 0xa3a   :  { %6948 = vmatprep.subr.bf16.mxu0 %v9371_v45  ;;  %6991 = vmatprep.subr.bf16.mxu1 %v9373_v49  ;;  %v6584_v25 = vld [vmem:[#allocation2 + $0xa58] sm:$0xff]  ;;  %v9358_v45 = vcombine.low %v6571_v34, %v6575_v22  ;;  %v9360_v49 = vcombine.low %v6572_v28, %v6576_v26  ;;  %v6935_v34 = vsel %vm4124_vm1, %v9400_v37, 0  ;;  %v7138_v28 = vld [vmem:[#allocation2 + $0xb80] sm:$0xff] }
 0xa3b   :  { %v9369_v46 = vcombine.high %v6580_v43, %v6584_v25  ;;  %v7142_v26 = vld [vmem:[#allocation2 + $0xba0] sm:$0xff] }
 0xa3d   :  { %6949 = vmatpush1.bf16.msra.mxu0 %v9370_v39  ;;  %6992 = vmatpush1.bf16.msra.mxu1 %v9372_v47  ;;  %v6588_v39 = vld [vmem:[#allocation2 + $0xa78] sm:$0xff] }
 0xa3e   :  { %6950 = vmatprep.subr.bf16.mxu0 %v9379_v56  ;;  %6993 = vmatprep.subr.bf16.mxu1 %v9381_v57  ;;  %v6592_v47 = vld [vmem:[#allocation2 + $0xa98] sm:$0xff]  ;;  %v9366_v56 = vcombine.low %v6579_v11, %v6583_v9  ;;  %v9368_v57 = vcombine.low %v6580_v43, %v6584_v25  ;;  %v9419_v11 = vcombine.high %v7138_v28, %v7142_v26  ;;  %v7146_v43 = vld [vmem:[#allocation2 + $0xbc0] sm:$0xff] }
 0xa3f   :  { %v9377_v14 = vcombine.high %v6588_v39, %v6592_v47  ;;  %v7150_v25 = vld [vmem:[#allocation2 + $0xbe0] sm:$0xff] }
 0xa41   :  { %6951 = vmatpush1.bf16.msra.mxu0 %v9378_v54  ;;  %6994 = vmatpush1.bf16.msra.mxu1 %v9380_v4  ;;  %v6596_v54 = vld [vmem:[#allocation2 + $0xab8] sm:$0xff] }
 0xa42   :  { %6952 = vmatprep.subr.bf16.mxu0 %v9387_v21  ;;  %6995 = vmatprep.subr.bf16.mxu1 %v9389_v62  ;;  %v6600_v4 = vld [vmem:[#allocation2 + $0xad8] sm:$0xff]  ;;  %v9374_v21 = vcombine.low %v6587_v36, %v6591_v13  ;;  %v9376_v62 = vcombine.low %v6588_v39, %v6592_v47  ;;  %v9427_v36 = vcombine.high %v7146_v43, %v7150_v25  ;;  %v7154_v39 = vld [vmem:[#allocation2 + $0xc00] sm:$0xff] }
 0xa43   :  { %v9385_v6 = vcombine.high %v6596_v54, %v6600_v4  ;;  %v9384_v0 = vcombine.low %v6596_v54, %v6600_v4  ;;  %v7158_v47 = vld [vmem:[#allocation2 + $0xc20] sm:$0xff]  ;;  %v7163_v4 = vld [vmem:[#allocation2 + $0xc48] sm:$0xff] }
 0xa44   :  { %v7166_v54 = vld [vmem:[#allocation2 + $0xc60] sm:$0xff] }
 0xa45   :  { %6953 = vmatpush1.bf16.msra.mxu0 %v9386_v3  ;;  %6996 = vmatpush1.bf16.msra.mxu1 %v9388_v38  ;;  %v6603_v3 = vld [vmem:[#allocation2 + $0xaf0] sm:$0xff] }
 0xa46   :  { %9402 = vmatprep.subr.msk.bf16.mxu0 %vm4124_vm1, %v9395_v48  ;;  %9404 = vmatprep.subr.msk.bf16.mxu1 %vm4124_vm1, %v9397_v60  ;;  %v6607_v38 = vld [vmem:[#allocation2 + $0xb10] sm:$0xff]  ;;  %v6604_v48 = vld [vmem:[#allocation2 + $0xaf8] sm:$0xff]  ;;  %v9382_v60 = vcombine.low %v6595_v41, %v6599_v51  ;;  %v7162_v51 = vld [vmem:[#allocation2 + $0xc40] sm:$0xff] }
 0xa47   :  { %v9391_v55 = vcombine.high %v6603_v3, %v6607_v38  ;;  %v9393_v16 = vcombine.high %v6604_v48, %v6608_v63 }
 0xa49   :  { %6955 = vmatpush1.bf16.msra.mxu0 %v6917_v8  ;;  %6998 = vmatpush1.bf16.msra.mxu1 %v6923_v12  ;;  %v9390_v8 = vcombine.low %v6603_v3, %v6607_v38  ;;  %v9399_v12 = vcombine.high %v6611_v15, %v6611_v15  ;;  %v7170_v38 = vld [vmem:[#allocation2 + $0xc80] sm:$0xff] }
 0xa4a   :  { %7026 = vmatprep.subr.bf16.mxu0 %v9343_v1  ;;  %7069 = vmatprep.subr.bf16.mxu1 %v9345_v61  ;;  %v9392_v1 = vcombine.low %v6604_v48, %v6608_v63  ;;  %v9398_v61 = vcombine.low %v6611_v15, %v6611_v15  ;;  %v7174_v48 = vld [vmem:[#allocation2 + $0xca0] sm:$0xff]  ;;  %v7171_v63 = vld [vmem:[#allocation2 + $0xc88] sm:$0xff] }
 0xa4c   :  { %9403 = vmatmul.mubr.msk.bf16.vlgmr.msra.gmra.mrb[192].mxu0 %vm4120_vm2, %v12886_v53  ;;  %9405 = vmatmul.mubr.msk.bf16.vlgmr.msra.gmra.mrb[192].mxu1 %vm4120_vm2, %v12886_v53 }
 0xa4d   :  { %7027 = vmatpush1.bf16.msra.mxu0 %v9342_v2  ;;  %7070 = vmatpush1.bf16.msra.mxu1 %v9344_v27  ;;  %v7131_v2 = vld [vmem:[#allocation2 + $0xb48] sm:$0xff] }
 0xa4e   :  { %7028 = vmatprep.subr.bf16.mxu0 %v9351_v17  ;;  %7071 = vmatprep.subr.bf16.mxu1 %v9353_v44  ;;  %v7135_v27 = vld [vmem:[#allocation2 + $0xb68] sm:$0xff]  ;;  %v6929_v17 = vsel %vm4124_vm1, %v9398_v61, 0  ;;  %v9411_v44 = vcombine.high %v7130_v5, %v7134_v42  ;;  %v9450_v61 = vcombine.low %v7170_v38, %v7174_v48 }
 0xa4f   :  { %7058 = vmatprep.mubr.bf16.mxu0 %v9952_v33  ;;  %7101 = vmatprep.mubr.bf16.mxu1 %v9952_v33  ;;  %v9413_v22 = vcombine.high %v7131_v2, %v7135_v27 }
 0xa51   :  { %7029 = vmatpush1.bf16.msra.mxu0 %v9350_v30  ;;  %7072 = vmatpush1.bf16.msra.mxu1 %v9352_v40  ;;  %v7139_v30 = vld [vmem:[#allocation2 + $0xb88] sm:$0xff] }
 0xa52   :  { %7030 = vmatprep.subr.bf16.mxu0 %v9359_v18  ;;  %7073 = vmatprep.subr.bf16.mxu1 %v9361_v20  ;;  %v7143_v40 = vld [vmem:[#allocation2 + $0xba8] sm:$0xff]  ;;  %v9410_v18 = vcombine.low %v7130_v5, %v7134_v42  ;;  %v9412_v20 = vcombine.low %v7131_v2, %v7135_v27  ;;  %v7186_v42 = vld [vmem:[#allocation2 + $0xd00] sm:$0x77] }
 0xa53   :  { %v9421_v9 = vcombine.high %v7139_v30, %v7143_v40  ;;  %v7187_v2 = vld [vmem:[#allocation2 + $0xd08] sm:$0x77] }
 0xa55   :  { %7031 = vmatpush1.bf16.msra.mxu0 %v9358_v45  ;;  %7074 = vmatpush1.bf16.msra.mxu1 %v9360_v49  ;;  %v7147_v45 = vld [vmem:[#allocation2 + $0xbc8] sm:$0xff] }
 0xa56   :  { %7032 = vmatprep.subr.bf16.mxu0 %v9367_v35  ;;  %7075 = vmatprep.subr.bf16.mxu1 %v9369_v46  ;;  %v7151_v49 = vld [vmem:[#allocation2 + $0xbe8] sm:$0xff]  ;;  %v9418_v35 = vcombine.low %v7138_v28, %v7142_v26  ;;  %v9420_v46 = vcombine.low %v7139_v30, %v7143_v40  ;;  %v9468_v28 = vcombine.low %v7187_v2, %v7187_v2  ;;  %v7132_v26 = vld [vmem:[#allocation2 + $0xb50] sm:$0xff]  ;;  %v7133_v40 = vld [vmem:[#allocation2 + $0xb58] sm:$0xff] }
 0xa57   :  { %v9429_v13 = vcombine.high %v7147_v45, %v7151_v49  ;;  %v7136_v30 = vld [vmem:[#allocation2 + $0xb70] sm:$0xff] }
 0xa59   :  { %7033 = vmatpush1.bf16.msra.mxu0 %v9366_v56  ;;  %7076 = vmatpush1.bf16.msra.mxu1 %v9368_v57  ;;  %v7155_v56 = vld [vmem:[#allocation2 + $0xc08] sm:$0xff] }
 0xa5a   :  { %7034 = vmatprep.subr.bf16.mxu0 %v9375_v58  ;;  %7077 = vmatprep.subr.bf16.mxu1 %v9377_v14  ;;  %v7159_v57 = vld [vmem:[#allocation2 + $0xc28] sm:$0xff]  ;;  %v9426_v58 = vcombine.low %v7146_v43, %v7150_v25  ;;  %v9435_v14 = vcombine.high %v7154_v39, %v7158_v47  ;;  %v7140_v25 = vld [vmem:[#allocation2 + $0xb90] sm:$0xff] }
 0xa5b   :  { %v9437_v41 = vcombine.high %v7155_v56, %v7159_v57 }
 0xa5d   :  { %7035 = vmatpush1.bf16.msra.mxu0 %v9374_v21  ;;  %7078 = vmatpush1.bf16.msra.mxu1 %v9376_v62  ;;  %v7167_v21 = vld [vmem:[#allocation2 + $0xc68] sm:$0xff]  ;;  %v9434_v62 = vcombine.low %v7154_v39, %v7158_v47 }
 0xa5e   :  { %7036 = vmatprep.subr.bf16.mxu0 %v9383_v59  ;;  %7079 = vmatprep.subr.bf16.mxu1 %v9385_v6  ;;  %v9436_v59 = vcombine.low %v7155_v56, %v7159_v57  ;;  %v9443_v6 = vcombine.high %v7162_v51, %v7166_v54  ;;  %v9445_v3 = vcombine.high %v7163_v4, %v7167_v21  ;;  %v7148_v56 = vld [vmem:[#allocation2 + $0xbd0] sm:$0xff] }
 0xa5f   :  { %v7152_v57 = vld [vmem:[#allocation2 + $0xbf0] sm:$0xff] }
 0xa61   :  { %7037 = vmatpush1.bf16.msra.mxu0 %v9382_v60  ;;  %7080 = vmatpush1.bf16.msra.mxu1 %v9384_v0  ;;  %v7175_v60 = vld [vmem:[#allocation2 + $0xca8] sm:$0xff]  ;;  %v9442_v0 = vcombine.low %v7162_v51, %v7166_v54  ;;  %v7157_v51 = vld [vmem:[#allocation2 + $0xc18] sm:$0xff] }
 0xa62   :  { %7038 = vmatprep.subr.bf16.mxu0 %v9391_v55  ;;  %7081 = vmatprep.subr.bf16.mxu1 %v9393_v16  ;;  %v9444_v55 = vcombine.low %v7163_v4, %v7167_v21  ;;  %v9451_v16 = vcombine.high %v7170_v38, %v7174_v48  ;;  %v9453_v15 = vcombine.high %v7171_v63, %v7175_v60  ;;  %v7161_v54 = vld [vmem:[#allocation2 + $0xc38] sm:$0xff] }
 0xa63   :  { %v9430_v4 = vcombine.low %v7148_v56, %v7152_v57  ;;  %v7165_v38 = vld [vmem:[#allocation2 + $0xc58] sm:$0xff] }
 0xa64   :  { %v7169_v48 = vld [vmem:[#allocation2 + $0xc78] sm:$0xff] }
 0xa65   :  { %7039 = vmatpush1.bf16.msra.mxu0 %v9390_v8  ;;  %7082 = vmatpush1.bf16.msra.mxu1 %v9392_v1  ;;  %v7182_v8 = vld [vmem:[#allocation2 + $0xce0] sm:$0xff]  ;;  %v7179_v1 = vld [vmem:[#allocation2 + $0xcc8] sm:$0xff] }
 0xa66   :  { %9406 = vmatprep.subr.msk.bf16.mxu0 %vm4124_vm1, %v9399_v12  ;;  %9408 = vmatprep.subr.msk.bf16.mxu1 %vm4124_vm1, %v9401_v32  ;;  %v7183_v12 = vld [vmem:[#allocation2 + $0xce8] sm:$0xff]  ;;  %v9452_v32 = vcombine.low %v7171_v63, %v7175_v60  ;;  %v9459_v37 = vcombine.high %v7178_v50, %v7182_v8  ;;  %v9458_v27 = vcombine.low %v7178_v50, %v7182_v8  ;;  %v7173_v50 = vld [vmem:[#allocation2 + $0xc98] sm:$0xff] }
 0xa67   :  { %v9461_v5 = vcombine.high %v7179_v1, %v7183_v12  ;;  %v9440_v60 = vcombine.low %v7157_v51, %v7161_v54  ;;  %v7177_v8 = vld [vmem:[#allocation2 + $0xcb8] sm:$0xff] }
 0xa69   :  { %7041 = vmatpush1.bf16.msra.mxu0 %v6929_v17  ;;  %7084 = vmatpush1.bf16.msra.mxu1 %v6935_v34  ;;  %v9460_v17 = vcombine.low %v7179_v1, %v7183_v12  ;;  %v9466_v34 = vcombine.low %v7186_v42, %v7186_v42  ;;  %v9448_v12 = vcombine.low %v7165_v38, %v7169_v48 }
 0xa6a   :  { %7517 = vmatprep.subr.bf16.mxu0 %v9411_v44  ;;  %7560 = vmatprep.subr.bf16.mxu1 %v9413_v22  ;;  %v9467_v44 = vcombine.high %v7186_v42, %v7186_v42  ;;  %v9469_v22 = vcombine.high %v7187_v2, %v7187_v2  ;;  %v7181_v42 = vld [vmem:[#allocation2 + $0xcd8] sm:$0xff] }
 0xa6b   :  { %v7185_v2 = vld [vmem:[#allocation2 + $0xcf8] sm:$0xff] }
 0xa6c   :  { %9407 = vmatmul.mubr.msk.bf16.vlgmr.msra.gmra.mrb[196].mxu0 %vm4120_vm2, %v12886_v53  ;;  %9409 = vmatmul.mubr.msk.bf16.vlgmr.msra.gmra.mrb[196].mxu1 %vm4120_vm2, %v12886_v53  ;;  %v9428_v53 = vcombine.low %v7147_v45, %v7151_v49  ;;  %v7144_v45 = vld [vmem:[#allocation2 + $0xbb0] sm:$0xff]  ;;  %v12912_v49 = vpack.c.bf16 %v3690_v7, %v2484_v29  ;;  %v9431_v7 = vcombine.high %v7148_v56, %v7152_v57  ;;  %v7716_v56 = vld [vmem:[#allocation2 + $0xd68] sm:$0xff] }
 0xa6d   :  { %7518 = vmatpush1.bf16.msra.mxu0 %v9410_v18  ;;  %7561 = vmatpush1.bf16.msra.mxu1 %v9412_v20  ;;  %v7137_v18 = vld [vmem:[#allocation2 + $0xb78] sm:$0xff]  ;;  %v7494_v20 = vsel %vm4124_vm1, %v9466_v34, 0  ;;  %v9423_v39 = vcombine.high %v7140_v25, %v7144_v45  ;;  %v9422_v29 = vcombine.low %v7140_v25, %v7144_v45  ;;  %v9465_v34 = vcombine.high %v7181_v42, %v7185_v2  ;;  %v7708_v25 = vld [vmem:[#allocation2 + $0xd28] sm:$0xff] }
 0xa6e   :  { %7519 = vmatprep.subr.bf16.mxu0 %v9419_v11  ;;  %7562 = vmatprep.subr.bf16.mxu1 %v9421_v9  ;;  %v9415_v11 = vcombine.high %v7132_v26, %v7136_v30  ;;  %v7500_v9 = vsel %vm4124_vm1, %v9468_v28, 0  ;;  %v9417_v43 = vcombine.high %v7133_v40, %v7137_v18  ;;  %v7189_v28 = vld [vmem:[#allocation2 + $0xd18] sm:$0x77]  ;;  %v7712_v45 = vld [vmem:[#allocation2 + $0xd48] sm:$0xff] }
 0xa6f   :  { %7549 = vmatprep.mubr.bf16.mxu0 %v9952_v33  ;;  %7592 = vmatprep.mubr.bf16.mxu1 %v9952_v33  ;;  %v7720_v57 = vld [vmem:[#allocation2 + $0xd88] sm:$0xff] }
 0xa71   :  { %7520 = vmatpush1.bf16.msra.mxu0 %v9418_v35  ;;  %7563 = vmatpush1.bf16.msra.mxu1 %v9420_v46  ;;  %v7141_v35 = vld [vmem:[#allocation2 + $0xb98] sm:$0xff] }
 0xa72   :  { %7521 = vmatprep.subr.bf16.mxu0 %v9427_v36  ;;  %7564 = vmatprep.subr.bf16.mxu1 %v9429_v13  ;;  %v7145_v46 = vld [vmem:[#allocation2 + $0xbb8] sm:$0xff]  ;;  %v9414_v36 = vcombine.low %v7132_v26, %v7136_v30  ;;  %v9416_v13 = vcombine.low %v7133_v40, %v7137_v18  ;;  %v9464_v30 = vcombine.low %v7181_v42, %v7185_v2 }
 0xa73   :  { %v9425_v47 = vcombine.high %v7141_v35, %v7145_v46  ;;  %v9424_v31 = vcombine.low %v7141_v35, %v7145_v46 }
 0xa75   :  { %7522 = vmatpush1.bf16.msra.mxu0 %v9426_v58  ;;  %7565 = vmatpush1.bf16.msra.mxu1 %v9428_v53  ;;  %v7153_v58 = vld [vmem:[#allocation2 + $0xbf8] sm:$0xff] }
 0xa76   :  { %7523 = vmatprep.subr.bf16.mxu0 %v9435_v14  ;;  %7566 = vmatprep.subr.bf16.mxu1 %v9437_v41  ;;  %v9433_v53 = vcombine.high %v7149_v10, %v7153_v58  ;;  %v7156_v14 = vld [vmem:[#allocation2 + $0xc10] sm:$0xff]  ;;  %v9432_v21 = vcombine.low %v7149_v10, %v7153_v58  ;;  %v9484_v58 = vcombine.low %v7708_v25, %v7712_v45 }
 0xa77   :  { %v7160_v41 = vld [vmem:[#allocation2 + $0xc30] sm:$0xff] }
 0xa78   :  { %v9438_v63 = vcombine.low %v7156_v14, %v7160_v41 }
 0xa79   :  { %7524 = vmatpush1.bf16.msra.mxu0 %v9434_v62  ;;  %7567 = vmatpush1.bf16.msra.mxu1 %v9436_v59  ;;  %v9439_v62 = vcombine.high %v7156_v14, %v7160_v41  ;;  %v9441_v59 = vcombine.high %v7157_v51, %v7161_v54  ;;  %v7724_v14 = vld [vmem:[#allocation2 + $0xda8] sm:$0xff]  ;;  %v9492_v54 = vcombine.low %v7716_v56, %v7720_v57 }
 0xa7a   :  { %7525 = vmatprep.subr.bf16.mxu0 %v9443_v6  ;;  %7568 = vmatprep.subr.bf16.mxu1 %v9445_v3  ;;  %v7164_v6 = vld [vmem:[#allocation2 + $0xc50] sm:$0xff]  ;;  %v7728_v41 = vld [vmem:[#allocation2 + $0xdc8] sm:$0xff] }
 0xa7b   :  { %v7168_v3 = vld [vmem:[#allocation2 + $0xc70] sm:$0xff] }
 0xa7c   :  { %v9446_v1 = vcombine.low %v7164_v6, %v7168_v3 }
 0xa7d   :  { %7526 = vmatpush1.bf16.msra.mxu0 %v9442_v0  ;;  %7569 = vmatpush1.bf16.msra.mxu1 %v9444_v55  ;;  %v9447_v0 = vcombine.high %v7164_v6, %v7168_v3  ;;  %v9449_v55 = vcombine.high %v7165_v38, %v7169_v48  ;;  %v7732_v6 = vld [vmem:[#allocation2 + $0xde8] sm:$0xff] }
 0xa7e   :  { %7527 = vmatprep.subr.bf16.mxu0 %v9451_v16  ;;  %7570 = vmatprep.subr.bf16.mxu1 %v9453_v15  ;;  %v7172_v16 = vld [vmem:[#allocation2 + $0xc90] sm:$0xff]  ;;  %v7736_v3 = vld [vmem:[#allocation2 + $0xe08] sm:$0xff] }
 0xa7f   :  { %v7176_v15 = vld [vmem:[#allocation2 + $0xcb0] sm:$0xff] }
 0xa81   :  { %7528 = vmatpush1.bf16.msra.mxu0 %v9450_v61  ;;  %7571 = vmatpush1.bf16.msra.mxu1 %v9452_v32  ;;  %v9455_v61 = vcombine.high %v7172_v16, %v7176_v15  ;;  %v9457_v32 = vcombine.high %v7173_v50, %v7177_v8 }
 0xa82   :  { %7529 = vmatprep.subr.bf16.mxu0 %v9459_v37  ;;  %7572 = vmatprep.subr.bf16.mxu1 %v9461_v5  ;;  %v7180_v37 = vld [vmem:[#allocation2 + $0xcd0] sm:$0xff] }
 0xa83   :  { %v7184_v5 = vld [vmem:[#allocation2 + $0xcf0] sm:$0xff] }
 0xa84   :  { %v9462_v26 = vcombine.low %v7180_v37, %v7184_v5 }
 0xa85   :  { %7530 = vmatpush1.bf16.msra.mxu0 %v9458_v27  ;;  %7573 = vmatpush1.bf16.msra.mxu1 %v9460_v17  ;;  %v9454_v27 = vcombine.low %v7172_v16, %v7176_v15  ;;  %v9456_v17 = vcombine.low %v7173_v50, %v7177_v8  ;;  %v7744_v16 = vld [vmem:[#allocation2 + $0xe48] sm:$0xff]  ;;  %v9508_v50 = vcombine.low %v7732_v6, %v7736_v3 }
 0xa86   :  { %9474 = vmatprep.subr.msk.bf16.mxu0 %vm4124_vm1, %v9467_v44  ;;  %9476 = vmatprep.subr.msk.bf16.mxu1 %vm4124_vm1, %v9469_v22  ;;  %v9463_v44 = vcombine.high %v7180_v37, %v7184_v5  ;;  %v7188_v22 = vld [vmem:[#allocation2 + $0xd10] sm:$0x77]  ;;  %v7752_v37 = vld [vmem:[#allocation2 + $0xe88] sm:$0xff] }
 0xa87   :  { %v9471_v40 = vcombine.high %v7188_v22, %v7188_v22  ;;  %v9470_v18 = vcombine.low %v7188_v22, %v7188_v22  ;;  %v7760_v22 = vld [vmem:[#allocation2 + $0xec8] sm:$0xff] }
 0xa89   :  { %7532 = vmatpush1.bf16.msra.mxu0 %v7494_v20  ;;  %7575 = vmatpush1.bf16.msra.mxu1 %v7500_v9  ;;  %v9473_v20 = vcombine.high %v7189_v28, %v7189_v28  ;;  %v7707_v9 = vld [vmem:[#allocation2 + $0xd20] sm:$0xff]  ;;  %v7506_v35 = vsel %vm4124_vm1, %v9470_v18, 0 }
 0xa8a   :  { %7603 = vmatprep.subr.bf16.mxu0 %v9415_v11  ;;  %7646 = vmatprep.subr.bf16.mxu1 %v9417_v43  ;;  %v9472_v11 = vcombine.low %v7189_v28, %v7189_v28  ;;  %v7711_v43 = vld [vmem:[#allocation2 + $0xd40] sm:$0xff] }
 0xa8b   :  { %v9483_v46 = vcombine.high %v7707_v9, %v7711_v43  ;;  %v9482_v10 = vcombine.low %v7707_v9, %v7711_v43  ;;  %v7763_v18 = vld [vmem:[#allocation2 + $0xee0] sm:$0x77] }
 0xa8c   :  { %9475 = vmatmul.mubr.msk.bf16.vlgmr.msra.gmra.mrb[192].mxu0 %vm4120_vm2, %v12912_v49  ;;  %9477 = vmatmul.mubr.msk.bf16.vlgmr.msra.gmra.mrb[192].mxu1 %vm4120_vm2, %v12912_v49  ;;  %v9539_v43 = vcombine.high %v7763_v18, %v7763_v18 }
 0xa8d   :  { %7604 = vmatpush1.bf16.msra.mxu0 %v9414_v36  ;;  %7647 = vmatpush1.bf16.msra.mxu1 %v9416_v13  ;;  %v7512_v36 = vsel %vm4124_vm1, %v9472_v11, 0  ;;  %v9485_v13 = vcombine.high %v7708_v25, %v7712_v45  ;;  %v9538_v25 = vcombine.low %v7763_v18, %v7763_v18 }
 0xa8e   :  { %7605 = vmatprep.subr.bf16.mxu0 %v9423_v39  ;;  %7648 = vmatprep.subr.bf16.mxu1 %v9425_v47  ;;  %v7715_v39 = vld [vmem:[#allocation2 + $0xd60] sm:$0xff] }
 0xa8f   :  { %7635 = vmatprep.mubr.bf16.mxu0 %v9952_v33  ;;  %7678 = vmatprep.mubr.bf16.mxu1 %v9952_v33  ;;  %v7719_v47 = vld [vmem:[#allocation2 + $0xd80] sm:$0xff] }
 0xa90   :  { %v9490_v51 = vcombine.low %v7715_v39, %v7719_v47 }
 0xa91   :  { %7606 = vmatpush1.bf16.msra.mxu0 %v9422_v29  ;;  %7649 = vmatpush1.bf16.msra.mxu1 %v9424_v31  ;;  %v9491_v29 = vcombine.high %v7715_v39, %v7719_v47  ;;  %v9493_v31 = vcombine.high %v7716_v56, %v7720_v57  ;;  %v7714_v39 = vld [vmem:[#allocation2 + $0xd58] sm:$0xff]  ;;  %v8071_v47 = vsel %vm4124_vm1, %v9538_v25, 0 }
 0xa92   :  { %7607 = vmatprep.subr.bf16.mxu0 %v9431_v7  ;;  %7650 = vmatprep.subr.bf16.mxu1 %v9433_v53  ;;  %v7723_v7 = vld [vmem:[#allocation2 + $0xda0] sm:$0xff] }
 0xa93   :  { %v7727_v53 = vld [vmem:[#allocation2 + $0xdc0] sm:$0xff] }
 0xa94   :  { %v9498_v38 = vcombine.low %v7723_v7, %v7727_v53 }
 0xa95   :  { %7608 = vmatpush1.bf16.msra.mxu0 %v9430_v4  ;;  %7651 = vmatpush1.bf16.msra.mxu1 %v9432_v21  ;;  %v9499_v4 = vcombine.high %v7723_v7, %v7727_v53  ;;  %v9501_v21 = vcombine.high %v7724_v14, %v7728_v41  ;;  %v7718_v7 = vld [vmem:[#allocation2 + $0xd78] sm:$0xff] }
 0xa96   :  { %7609 = vmatprep.subr.bf16.mxu0 %v9439_v62  ;;  %7652 = vmatprep.subr.bf16.mxu1 %v9441_v59  ;;  %v7731_v62 = vld [vmem:[#allocation2 + $0xde0] sm:$0xff]  ;;  %v7722_v53 = vld [vmem:[#allocation2 + $0xd98] sm:$0xff] }
 0xa97   :  { %v7735_v59 = vld [vmem:[#allocation2 + $0xe00] sm:$0xff]  ;;  %v9496_v19 = vcombine.low %v7718_v7, %v7722_v53 }
 0xa98   :  { %v9507_v48 = vcombine.high %v7731_v62, %v7735_v59  ;;  %v9506_v15 = vcombine.low %v7731_v62, %v7735_v59  ;;  %v7730_v62 = vld [vmem:[#allocation2 + $0xdd8] sm:$0xff] }
 0xa99   :  { %7610 = vmatpush1.bf16.msra.mxu0 %v9438_v63  ;;  %7653 = vmatpush1.bf16.msra.mxu1 %v9440_v60  ;;  %v9509_v63 = vcombine.high %v7732_v6, %v7736_v3  ;;  %v7739_v60 = vld [vmem:[#allocation2 + $0xe20] sm:$0xff]  ;;  %v9505_v59 = vcombine.high %v7726_v23, %v7730_v62  ;;  %v7733_v6 = vld [vmem:[#allocation2 + $0xdf0] sm:$0xff] }
 0xa9a   :  { %7611 = vmatprep.subr.bf16.mxu0 %v9447_v0  ;;  %7654 = vmatprep.subr.bf16.mxu1 %v9449_v55  ;;  %v7743_v0 = vld [vmem:[#allocation2 + $0xe40] sm:$0xff]  ;;  %v7740_v55 = vld [vmem:[#allocation2 + $0xe28] sm:$0xff]  ;;  %v7737_v3 = vld [vmem:[#allocation2 + $0xe10] sm:$0xff] }
 0xa9b   :  { %v9515_v8 = vcombine.high %v7739_v60, %v7743_v0  ;;  %v9514_v5 = vcombine.low %v7739_v60, %v7743_v0  ;;  %v9516_v42 = vcombine.low %v7740_v55, %v7744_v16  ;;  %v9511_v60 = vcombine.high %v7733_v6, %v7737_v3 }
 0xa9d   :  { %7612 = vmatpush1.bf16.msra.mxu0 %v9446_v1  ;;  %7655 = vmatpush1.bf16.msra.mxu1 %v9448_v12  ;;  %v9517_v1 = vcombine.high %v7740_v55, %v7744_v16  ;;  %v7747_v12 = vld [vmem:[#allocation2 + $0xe60] sm:$0xff]  ;;  %v7741_v55 = vld [vmem:[#allocation2 + $0xe30] sm:$0xff] }
 0xa9e   :  { %7613 = vmatprep.subr.bf16.mxu0 %v9455_v61  ;;  %7656 = vmatprep.subr.bf16.mxu1 %v9457_v32  ;;  %v7751_v61 = vld [vmem:[#allocation2 + $0xe80] sm:$0xff]  ;;  %v7748_v32 = vld [vmem:[#allocation2 + $0xe68] sm:$0xff]  ;;  %v7745_v16 = vld [vmem:[#allocation2 + $0xe50] sm:$0xff] }
 0xa9f   :  { %v9523_v2 = vcombine.high %v7747_v12, %v7751_v61  ;;  %v9522_v28 = vcombine.low %v7747_v12, %v7751_v61  ;;  %v9519_v12 = vcombine.high %v7741_v55, %v7745_v16  ;;  %v7749_v61 = vld [vmem:[#allocation2 + $0xe70] sm:$0xff] }
 0xaa1   :  { %7614 = vmatpush1.bf16.msra.mxu0 %v9454_v27  ;;  %7657 = vmatpush1.bf16.msra.mxu1 %v9456_v17  ;;  %v9525_v27 = vcombine.high %v7748_v32, %v7752_v37  ;;  %v7755_v17 = vld [vmem:[#allocation2 + $0xea0] sm:$0xff] }
 0xaa2   :  { %7615 = vmatprep.subr.bf16.mxu0 %v9463_v44  ;;  %7658 = vmatprep.subr.bf16.mxu1 %v9465_v34  ;;  %v7759_v44 = vld [vmem:[#allocation2 + $0xec0] sm:$0xff]  ;;  %v7756_v34 = vld [vmem:[#allocation2 + $0xea8] sm:$0xff] }
 0xaa3   :  { %v9530_v11 = vcombine.low %v7755_v17, %v7759_v44  ;;  %v9532_v9 = vcombine.low %v7756_v34, %v7760_v22 }
 0xaa5   :  { %7616 = vmatpush1.bf16.msra.mxu0 %v9462_v26  ;;  %7659 = vmatpush1.bf16.msra.mxu1 %v9464_v30  ;;  %v9524_v26 = vcombine.low %v7748_v32, %v7752_v37  ;;  %v9531_v30 = vcombine.high %v7755_v17, %v7759_v44  ;;  %v7753_v32 = vld [vmem:[#allocation2 + $0xe90] sm:$0xff]  ;;  %v7750_v37 = vld [vmem:[#allocation2 + $0xe78] sm:$0xff] }
 0xaa6   :  { %9478 = vmatprep.subr.msk.bf16.mxu0 %vm4124_vm1, %v9471_v40  ;;  %9480 = vmatprep.subr.msk.bf16.mxu1 %vm4124_vm1, %v9473_v20  ;;  %v9533_v40 = vcombine.high %v7756_v34, %v7760_v22  ;;  %v7764_v20 = vld [vmem:[#allocation2 + $0xee8] sm:$0x77]  ;;  %v7757_v44 = vld [vmem:[#allocation2 + $0xeb0] sm:$0xff]  ;;  %v7758_v22 = vld [vmem:[#allocation2 + $0xeb8] sm:$0xff] }
 0xaa7   :  { %v9541_v45 = vcombine.high %v7764_v20, %v7764_v20  ;;  %v7761_v34 = vld [vmem:[#allocation2 + $0xed0] sm:$0xff] }
 0xaa9   :  { %7618 = vmatpush1.bf16.msra.mxu0 %v7506_v35  ;;  %7661 = vmatpush1.bf16.msra.mxu1 %v7512_v36  ;;  %v9540_v35 = vcombine.low %v7764_v20, %v7764_v20  ;;  %v7713_v36 = vld [vmem:[#allocation2 + $0xd50] sm:$0xff] }
 0xaaa   :  { %8094 = vmatprep.subr.bf16.mxu0 %v9483_v46  ;;  %8137 = vmatprep.subr.bf16.mxu1 %v9485_v13  ;;  %v7709_v46 = vld [vmem:[#allocation2 + $0xd30] sm:$0xff]  ;;  %v7710_v13 = vld [vmem:[#allocation2 + $0xd38] sm:$0xff] }
 0xaab   :  { %v9487_v56 = vcombine.high %v7709_v46, %v7713_v36  ;;  %v8077_v57 = vsel %vm4124_vm1, %v9540_v35, 0  ;;  %v7765_v20 = vld [vmem:[#allocation2 + $0xef0] sm:$0x77] }
 0xaac   :  { %9479 = vmatmul.mubr.msk.bf16.vlgmr.msra.gmra.mrb[196].mxu0 %vm4120_vm2, %v12912_v49  ;;  %9481 = vmatmul.mubr.msk.bf16.vlgmr.msra.gmra.mrb[196].mxu1 %vm4120_vm2, %v12912_v49  ;;  %v9500_v49 = vcombine.low %v7724_v14, %v7728_v41  ;;  %v9486_v14 = vcombine.low %v7709_v46, %v7713_v36  ;;  %v9488_v41 = vcombine.low %v7710_v13, %v7714_v39 }
 0xaad   :  { %8095 = vmatpush1.bf16.msra.mxu0 %v9482_v10  ;;  %8138 = vmatpush1.bf16.msra.mxu1 %v9484_v58  ;;  %v9489_v10 = vcombine.high %v7710_v13, %v7714_v39  ;;  %v7717_v58 = vld [vmem:[#allocation2 + $0xd70] sm:$0xff]  ;;  %v9543_v25 = vcombine.high %v7765_v20, %v7765_v20  ;;  %v8556_v39 = vld [vmem:[%s13079_s9] sm:$0xff] }
 0xaae   :  { %8096 = vmatprep.subr.bf16.mxu0 %v9491_v29  ;;  %8139 = vmatprep.subr.bf16.mxu1 %v9493_v31  ;;  %v7721_v29 = vld [vmem:[#allocation2 + $0xd90] sm:$0xff]  ;;  %v12938_v31 = vpack.c.bf16 %v3691_v52, %v2485_v24 }
 0xaaf   :  { %8126 = vmatprep.mubr.bf16.mxu0 %v9952_v33  ;;  %8169 = vmatprep.mubr.bf16.mxu1 %v9952_v33  ;;  %v9494_v24 = vcombine.low %v7717_v58, %v7721_v29 }
 0xab1   :  { %8097 = vmatpush1.bf16.msra.mxu0 %v9490_v51  ;;  %8140 = vmatpush1.bf16.msra.mxu1 %v9492_v54  ;;  %v9495_v51 = vcombine.high %v7717_v58, %v7721_v29  ;;  %v9497_v54 = vcombine.high %v7718_v7, %v7722_v53  ;;  %v8559_v58 = vld [vmem:[%s13079_s9 + $0x18] sm:$0xff]  ;;  %v8561_v7 = vld [vmem:[%s13079_s9 + $0x28] sm:$0xff] }
 0xab2   :  { %8098 = vmatprep.subr.bf16.mxu0 %v9499_v4  ;;  %8141 = vmatprep.subr.bf16.mxu1 %v9501_v21  ;;  %v7725_v4 = vld [vmem:[#allocation2 + $0xdb0] sm:$0xff] }
 0xab3   :  { %v7729_v21 = vld [vmem:[#allocation2 + $0xdd0] sm:$0xff] }
 0xab4   :  { %v9503_v52 = vcombine.high %v7725_v4, %v7729_v21 }
 0xab5   :  { %8099 = vmatpush1.bf16.msra.mxu0 %v9498_v38  ;;  %8142 = vmatpush1.bf16.msra.mxu1 %v9500_v49  ;;  %v7734_v38 = vld [vmem:[#allocation2 + $0xdf8] sm:$0xff] }
 0xab6   :  { %8100 = vmatprep.subr.bf16.mxu0 %v9507_v48  ;;  %8143 = vmatprep.subr.bf16.mxu1 %v9509_v63  ;;  %v7738_v49 = vld [vmem:[#allocation2 + $0xe18] sm:$0xff]  ;;  %v9502_v48 = vcombine.low %v7725_v4, %v7729_v21  ;;  %v9504_v63 = vcombine.low %v7726_v23, %v7730_v62  ;;  %v8565_v4 = vld [vmem:[%s13079_s9 + $0x48] sm:$0xff]  ;;  %v8566_v23 = vld [vmem:[%s13079_s9 + $0x50] sm:$0xff] }
 0xab7   :  { %v9513_v0 = vcombine.high %v7734_v38, %v7738_v49  ;;  %v8567_v62 = vld [vmem:[%s13079_s9 + $0x58] sm:$0xff] }
 0xab9   :  { %8101 = vmatpush1.bf16.msra.mxu0 %v9506_v15  ;;  %8144 = vmatpush1.bf16.msra.mxu1 %v9508_v50  ;;  %v7742_v15 = vld [vmem:[#allocation2 + $0xe38] sm:$0xff] }
 0xaba   :  { %8102 = vmatprep.subr.bf16.mxu0 %v9515_v8  ;;  %8145 = vmatprep.subr.bf16.mxu1 %v9517_v1  ;;  %v7746_v50 = vld [vmem:[#allocation2 + $0xe58] sm:$0xff]  ;;  %v9510_v8 = vcombine.low %v7733_v6, %v7737_v3  ;;  %v9512_v1 = vcombine.low %v7734_v38, %v7738_v49  ;;  %v8570_v6 = vld [vmem:[%s13079_s9 + $0x70] sm:$0xff]  ;;  %v9957_v49 = vmov 0.0  }
 0xabb   :  { %v8571_v3 = vld [vmem:[%s13079_s9 + $0x78] sm:$0xff] }
 0xabc   :  { %v9648_v38 = vpack.c.bf16 %v8571_v3, %v8570_v6 }
 0xabd   :  { %8103 = vmatpush1.bf16.msra.mxu0 %v9514_v5  ;;  %8146 = vmatpush1.bf16.msra.mxu1 %v9516_v42  ;;  %v7754_v5 = vld [vmem:[#allocation2 + $0xe98] sm:$0xff]  ;;  %v9518_v42 = vcombine.low %v7741_v55, %v7745_v16 }
 0xabe   :  { %8104 = vmatprep.subr.bf16.mxu0 %v9523_v2  ;;  %8147 = vmatprep.subr.bf16.mxu1 %v9525_v27  ;;  %v9520_v2 = vcombine.low %v7742_v15, %v7746_v50  ;;  %v9527_v27 = vcombine.high %v7749_v61, %v7753_v32  ;;  %v9529_v17 = vcombine.high %v7750_v37, %v7754_v5  ;;  %v8652_v55 = vld [vmem:[%s13081_s11 + $0x18] sm:$0xff] }
 0xac1   :  { %8105 = vmatpush1.bf16.msra.mxu0 %v9522_v28  ;;  %8148 = vmatpush1.bf16.msra.mxu1 %v9524_v26  ;;  %v7762_v28 = vld [vmem:[#allocation2 + $0xed8] sm:$0xff]  ;;  %v9526_v26 = vcombine.low %v7749_v61, %v7753_v32 }
 0xac2   :  { %8106 = vmatprep.subr.bf16.mxu0 %v9531_v30  ;;  %8149 = vmatprep.subr.bf16.mxu1 %v9533_v40  ;;  %v9528_v30 = vcombine.low %v7750_v37, %v7754_v5  ;;  %v9535_v40 = vcombine.high %v7757_v44, %v7761_v34  ;;  %v9537_v18 = vcombine.high %v7758_v22, %v7762_v28 }
 0xac5   :  { %8107 = vmatpush1.bf16.msra.mxu0 %v9530_v11  ;;  %8150 = vmatpush1.bf16.msra.mxu1 %v9532_v9  ;;  %v7766_v11 = vld [vmem:[#allocation2 + $0xef8] sm:$0x77]  ;;  %v9534_v9 = vcombine.low %v7757_v44, %v7761_v34 }
 0xac6   :  { %9546 = vmatprep.subr.msk.bf16.mxu0 %vm4124_vm1, %v9539_v43  ;;  %9548 = vmatprep.subr.msk.bf16.mxu1 %vm4124_vm1, %v9541_v45  ;;  %v9536_v43 = vcombine.low %v7758_v22, %v7762_v28  ;;  %v9542_v45 = vcombine.low %v7765_v20, %v7765_v20  ;;  %v9545_v35 = vcombine.high %v7766_v11, %v7766_v11 }
 0xac7   :  { %v9544_v46 = vcombine.low %v7766_v11, %v7766_v11 }
 0xac8   :  { %v8083_v36 = vsel %vm4124_vm1, %v9542_v45, 0 }
 0xac9   :  { %8109 = vmatpush1.bf16.msra.mxu0 %v8071_v47  ;;  %8152 = vmatpush1.bf16.msra.mxu1 %v8077_v57  ;;  %v8089_v13 = vsel %vm4124_vm1, %v9544_v46, 0  ;;  %v8557_v47 = vld [vmem:[%s13079_s9 + $0x8] sm:$0xff]  ;;  %v9955_v57 = vmov 0.0|0.0  }
 0xaca   :  { %8180 = vmatprep.subr.bf16.mxu0 %v9487_v56  ;;  %8223 = vmatprep.subr.bf16.mxu1 %v9489_v10  ;;  %v8558_v56 = vld [vmem:[%s13079_s9 + $0x10] sm:$0xff]  ;;  %v9627_v10 = vpack.c.bf16 %v8557_v47, %v8556_v39 }
 0xacb   :  { %v9630_v29 = vpack.c.bf16 %v8559_v58, %v8558_v56 }
 0xacc   :  { %9547 = vmatmul.mubr.msk.bf16.vlgmr.msra.gmra.mrb[192].mxu0 %vm4120_vm2, %v12938_v31  ;;  %9549 = vmatmul.mubr.msk.bf16.vlgmr.msra.gmra.mrb[192].mxu1 %vm4120_vm2, %v12938_v31 }
 0xacd   :  { %8181 = vmatpush1.bf16.msra.mxu0 %v9486_v14  ;;  %8224 = vmatpush1.bf16.msra.mxu1 %v9488_v41  ;;  %v8562_v14 = vld [vmem:[%s13079_s9 + $0x30] sm:$0xff]  ;;  %v8563_v41 = vld [vmem:[%s13079_s9 + $0x38] sm:$0xff] }
 0xace   :  { %8182 = vmatprep.subr.bf16.mxu0 %v9495_v51  ;;  %8225 = vmatprep.subr.bf16.mxu1 %v9497_v54  ;;  %v9636_v51 = vpack.c.bf16 %v8563_v41, %v8562_v14  ;;  %v8564_v54 = vld [vmem:[%s13079_s9 + $0x40] sm:$0xff] }
 0xacf   :  { %8212 = vmatprep.mubr.bf16.mxu0 %v9952_v33  ;;  %8255 = vmatprep.mubr.bf16.mxu1 %v9952_v33  ;;  %v9521_v33 = vcombine.high %v7742_v15, %v7746_v50  ;;  %v9639_v21 = vpack.c.bf16 %v8565_v4, %v8564_v54  ;;  %v9958_v15 = vmov 1966171168  }
 0xad0   :  { %v8286_v50 = vunpack.c.l.s4 %v9958_v15 }
 0xad1   :  { %8183 = vmatpush1.bf16.msra.mxu0 %v9494_v24  ;;  %8226 = vmatpush1.bf16.msra.mxu1 %v9496_v19  ;;  %v9642_v24 = vpack.c.bf16 %v8567_v62, %v8566_v23  ;;  %v8568_v19 = vld [vmem:[%s13079_s9 + $0x60] sm:$0xff] }
 0xad2   :  { %8184 = vmatprep.subr.bf16.mxu0 %v9503_v52  ;;  %8227 = vmatprep.subr.bf16.mxu1 %v9505_v59  ;;  %v8569_v52 = vld [vmem:[%s13079_s9 + $0x68] sm:$0xff] }
 0xad3   :  { %v9645_v59 = vpack.c.bf16 %v8569_v52, %v8568_v19 }
 0xad5   :  { %8185 = vmatpush1.bf16.msra.mxu0 %v9502_v48  ;;  %8228 = vmatpush1.bf16.msra.mxu1 %v9504_v63  ;;  %v8649_v48 = vld [vmem:[%s13081_s11] sm:$0xff]  ;;  %v8650_v63 = vld [vmem:[%s13081_s11 + $0x8] sm:$0xff] }
 0xad6   :  { %8186 = vmatprep.subr.bf16.mxu0 %v9511_v60  ;;  %8229 = vmatprep.subr.bf16.mxu1 %v9513_v0  ;;  %v8651_v60 = vld [vmem:[%s13081_s11 + $0x10] sm:$0xff]  ;;  %v9651_v0 = vpack.c.bf16 %v8650_v63, %v8649_v48 }
 0xad7   :  { %v9654_v16 = vpack.c.bf16 %v8652_v55, %v8651_v60 }
 0xad9   :  { %8187 = vmatpush1.bf16.msra.mxu0 %v9510_v8  ;;  %8230 = vmatpush1.bf16.msra.mxu1 %v9512_v1  ;;  %v8288_v8 = vlaneseq  ;;  %v8287_v1 = vunpack.c.0.s8 %v8286_v50 }
 0xada   :  { %8188 = vmatprep.subr.bf16.mxu0 %v9519_v12  ;;  %8231 = vmatprep.subr.bf16.mxu1 %v9521_v33 }
 0xadb   :  { %v13014_v12 = vshrl.u32 %v8288_v8, 7 }
 0xadd   :  { %8189 = vmatpush1.bf16.msra.mxu0 %v9518_v42  ;;  %8232 = vmatpush1.bf16.msra.mxu1 %v9520_v2  ;;  %v13017_v33 = vsub.s32 %v8287_v1, %v13014_v12 }
 0xade   :  { %8190 = vmatprep.subr.bf16.mxu0 %v9527_v27  ;;  %8233 = vmatprep.subr.bf16.mxu1 %v9529_v17  ;;  %v8282_v17 = vld [vmem:[%s13078_s8] sm:$0x1] }
 0xae1   :  { %8191 = vmatpush1.bf16.msra.mxu0 %v9526_v26  ;;  %8234 = vmatpush1.bf16.msra.mxu1 %v9528_v30 }
 0xae2   :  { %8192 = vmatprep.subr.bf16.mxu0 %v9535_v40  ;;  %8235 = vmatprep.subr.bf16.mxu1 %v9537_v18 }
 0xae5   :  { %8193 = vmatpush1.bf16.msra.mxu0 %v9534_v9  ;;  %8236 = vmatpush1.bf16.msra.mxu1 %v9536_v43 }
 0xae6   :  { %9550 = vmatprep.subr.msk.bf16.mxu0 %vm4124_vm1, %v9543_v25  ;;  %9552 = vmatprep.subr.msk.bf16.mxu1 %vm4124_vm1, %v9545_v35 }
 0xae9   :  { %8195 = vmatpush1.bf16.msra.mxu0 %v8083_v36  ;;  %8238 = vmatpush1.bf16.msra.mxu1 %v8089_v13 }
 0xaea   :  { %9626 = vmatprep.subr.bf16.mxu0 %v9955_v57  ;;  %9650 = vmatprep.subr.bf16.mxu1 %v9955_v57 }
 0xaec   :  { %9551 = vmatmul.mubr.msk.bf16.vlgmr.msra.gmra.mrb[196].mxu0 %vm4120_vm2, %v12938_v31  ;;  %9553 = vmatmul.mubr.msk.bf16.vlgmr.msra.gmra.mrb[196].mxu1 %vm4120_vm2, %v12938_v31  ;;  %v8560_v31 = vld [vmem:[%s13079_s9 + $0x20] sm:$0xff] }
 0xaed   :  { %9628 = vmatpush3.bf16.msra.mxu0 %v9627_v10  ;;  %v9633_v53 = vpack.c.bf16 %v8561_v7, %v8560_v31  ;;  %9612 = vmatprep.mubr.msk.f32.mxu0 %vm9956_vm3, %v9957_v49 }
 0xaee   :  { %9629 = vmatprep.subr.bf16.mxu0 %v9955_v57  ;;  %9623 = vmatprep.mubr.msk.f32.mxu1 %vm9956_vm3, %v9957_v49 }
 0xaef   :  { %9652 = vmatpush3.bf16.msra.mxu1 %v9651_v0 }
 0xaf0   :  { %9653 = vmatprep.subr.bf16.mxu1 %v9955_v57 }
 0xaf1   :  { %9631 = vmatpush3.bf16.msra.mxu0 %v9630_v29 }
 0xaf2   :  { %9632 = vmatprep.subr.bf16.mxu0 %v9955_v57 }
 0xaf3   :  { %9655 = vmatpush3.bf16.msra.mxu1 %v9654_v16 }
 0xaf5   :  { %9634 = vmatpush3.bf16.msra.mxu0 %v9633_v53 }
 0xaf6   :  { %9635 = vmatprep.subr.bf16.mxu0 %v9955_v57 }
 0xaf9   :  { %9637 = vmatpush3.bf16.msra.mxu0 %v9636_v51 }
 0xafa   :  { %9638 = vmatprep.subr.bf16.mxu0 %v9955_v57 }
 0xafd   :  { %9640 = vmatpush3.bf16.msra.mxu0 %v9639_v21 }
 0xafe   :  { %9641 = vmatprep.subr.bf16.mxu0 %v9955_v57 }
 0xb01   :  { %9643 = vmatpush3.bf16.msra.mxu0 %v9642_v24 }
 0xb02   :  { %9644 = vmatprep.subr.bf16.mxu0 %v9955_v57 }
 0xb05   :  { %9646 = vmatpush3.bf16.msra.mxu0 %v9645_v59 }
 0xb06   :  { %9647 = vmatprep.subr.bf16.mxu0 %v9955_v57 }
 0xb09   :  { %9649 = vmatpush3.bf16.msra.mxu0 %v9648_v38 }
 0xb9f   :  { %v8128_v61 = vpop.f32.mrb[192].mxu0  ;;  %v8171_v32 = vpop.f32.mrb[192].mxu1 }
 0xba0   :  { %v8130_v37 = vpop.f32.mrb[193].mxu0  ;;  %v8309_v5 = vrot.slane %v8171_v32, %v13017_v33  ;;  %v8173_v2 = vpop.f32.mrb[193].mxu1  ;;  %v8283_v9 = vadd.f32 %v8282_v17, %v8128_v61 }
 0xba1   :  { %v8291_v42 = vrot.slane %v8130_v37, %v13017_v33  ;;  %v8132_v27 = vpop.f32.mrb[194].mxu0  ;;  %v8327_v44 = vrot.slane %v8173_v2, %v13017_v33  ;;  %v8175_v34 = vpop.f32.mrb[194].mxu1 }
 0xba2   :  { %v8134_v22 = vpop.f32.mrb[195].mxu0  ;;  %v8316_v28 = vrot.slane %v8309_v5, %v13017_v33  ;;  %v8441_v30 = vrot.slane %v8175_v34, %v13017_v33  ;;  %v8177_v18 = vpop.f32.mrb[195].mxu1  ;;  %v8415_v39 = vadd.f32 %v8282_v17, %v8132_v27 }
 0xba3   :  { %v8292_v26 = vcombine.high %v8291_v42, %v8291_v42  ;;  %v8423_v40 = vrot.slane %v8134_v22, %v13017_v33  ;;  %v8328_v20 = vcombine.high %v8327_v44, %v8327_v44  ;;  %v8459_v11 = vrot.slane %v8177_v18, %v13017_v33 }
 0xba4   :  { %v8448_v25 = vrot.slane %v8441_v30, %v13017_v33  ;;  %v8317_v36 = vcombine.high %v8316_v28, %v8316_v28 }
 0xba5   :  { %v8299_v43 = vrot.slane %v8292_v26, %v13017_v33  ;;  %v8424_v45 = vcombine.high %v8423_v40, %v8423_v40  ;;  %v8335_v35 = vrot.slane %v8328_v20, %v13017_v33  ;;  %v8460_v46 = vcombine.high %v8459_v11, %v8459_v11 }
 0xba6   :  { %v8449_v58 = vcombine.high %v8448_v25, %v8448_v25 }
 0xba7   :  { %v8301_v13 = vadd.f32 %v8299_v43, %v8283_v9  ;;  %v8431_v47 = vrot.slane %v8424_v45, %v13017_v33  ;;  %v8467_v56 = vrot.slane %v8460_v46, %v13017_v33  ;;  %v8336_v10 = vcombine.high %v8335_v35, %v8335_v35 }
 0xba8   :  { %v8550_v35 = vsub.s32 0, %v13014_v12 }
 0xba9   :  { %v8319_v57 = vadd.f32 %v8317_v36, %v8301_v13  ;;  %v8433_v29 = vadd.f32 %v8431_v47, %v8415_v39  ;;  %v8468_v53 = vcombine.high %v8467_v56, %v8467_v56  ;;  %v9554_v47 = vld [vmem:[%s13080_s10] ss:$0 sm:$0xff]  ;;  %s9959_s10 = smov [#allocation4]  }
 0xbaa   :  { %s8748_s4 = sshll.u32 %s9959_s10, 4  ;;  %s8749_s4 = int_to_ptr.vmem [resolvable:$true] %s8748_s4 }
 0xbab   :  { %v8338_v31 = vadd.f32 %v8336_v10, %v8319_v57  ;;  %v8451_v7 = vadd.f32 %v8449_v58, %v8433_v29  ;;  %v9555_v10 = vld [vmem:[%s13082_s12] ss:$0 sm:$0xff]  ;;  %s9926_s2 = scalar_lea.vmem %s8749_s4, 32  ;;  %p9931_p1 = scmp.lt.s32.totalorder %s8749_s4, %s8749_s4 }
 0xbac   :  { %p9927_p0 = scmp.ne.s32.totalorder %s8749_s4, %s9926_s2  ;;  %p9932_p2 = scmp.lt.s32.totalorder %s9926_s2, %s9926_s2 }
 0xbad   :  { %v8470_v14 = vadd.f32 %v8468_v53, %v8451_v7 }
 0xbae   :  { %p9933_p3 = por %p9932_p2, %p9931_p1 }
 0xbb0   :  { %p9934_p4 = pnand %p9933_p3, %p9927_p0 }
 0xbbf   :  { %v8214_v41 = vpop.f32.mrb[196].mxu0  ;;  %v8257_v54 = vpop.f32.mrb[196].mxu1 }
 0xbc0   :  { %v8340_v51 = vcombine.high %v8214_v41, %v8214_v41  ;;  %v8216_v4 = vpop.f32.mrb[197].mxu0  ;;  %v8377_v21 = vcombine.high %v8257_v54, %v8257_v54  ;;  %v8259_v62 = vpop.f32.mrb[197].mxu1 }
 0xbc1   :  { %v8358_v23 = vcombine.high %v8216_v4, %v8216_v4  ;;  %v8218_v24 = vpop.f32.mrb[198].mxu0  ;;  %v8396_v52 = vcombine.high %v8259_v62, %v8259_v62  ;;  %v8261_v6 = vpop.f32.mrb[198].mxu1 }
 0xbc2   :  { %v8347_v19 = vrot.slane %v8340_v51, %v13017_v33  ;;  %v8472_v59 = vcombine.high %v8218_v24, %v8218_v24  ;;  %v8220_v3 = vpop.f32.mrb[199].mxu0  ;;  %v8384_v38 = vrot.slane %v8377_v21, %v13017_v33  ;;  %v8509_v48 = vcombine.high %v8261_v6, %v8261_v6  ;;  %v8263_v60 = vpop.f32.mrb[199].mxu1 }
 0xbc3   :  { %v8365_v49 = vrot.slane %v8358_v23, %v13017_v33  ;;  %v8490_v63 = vcombine.high %v8220_v3, %v8220_v3  ;;  %v8403_v55 = vrot.slane %v8396_v52, %v13017_v33  ;;  %v8528_v15 = vcombine.high %v8263_v60, %v8263_v60 }
 0xbc4   :  { %v8354_v0 = vrot.slane %v8347_v19, %v13017_v33  ;;  %v8479_v16 = vrot.slane %v8472_v59, %v13017_v33  ;;  %v8391_v50 = vrot.slane %v8384_v38, %v13017_v33  ;;  %v8516_v1 = vrot.slane %v8509_v48, %v13017_v33 }
 0xbc5   :  { %v8366_v8 = vcombine.high %v8365_v49, %v8365_v49  ;;  %v8497_v61 = vrot.slane %v8490_v63, %v13017_v33  ;;  %v8404_v37 = vcombine.high %v8403_v55, %v8403_v55  ;;  %v8535_v42 = vrot.slane %v8528_v15, %v13017_v33 }
 0xbc6   :  { %v8356_v32 = vadd.f32 %v8354_v0, %v8338_v31  ;;  %v8486_v5 = vrot.slane %v8479_v16, %v13017_v33  ;;  %v8523_v27 = vrot.slane %v8516_v1, %v13017_v33  ;;  %v8392_v28 = vcombine.high %v8391_v50, %v8391_v50 }
 0xbc7   :  { %v8373_v2 = vrot.slane %v8366_v8, %v13017_v33  ;;  %v8498_v17 = vcombine.high %v8497_v61, %v8497_v61  ;;  %v8411_v44 = vrot.slane %v8404_v37, %v13017_v33  ;;  %v8536_v22 = vcombine.high %v8535_v42, %v8535_v42 }
 0xbc8   :  { %v8488_v34 = vadd.f32 %v8486_v5, %v8470_v14  ;;  %v8524_v11 = vcombine.high %v8523_v27, %v8523_v27 }
 0xbc9   :  { %v8375_v26 = vadd.f32 %v8373_v2, %v8356_v32  ;;  %v8505_v30 = vrot.slane %v8498_v17, %v13017_v33  ;;  %v8543_v40 = vrot.slane %v8536_v22, %v13017_v33  ;;  %v8412_v20 = vcombine.high %v8411_v44, %v8411_v44 }
 0xbcb   :  { %v8394_v18 = vadd.f32 %v8392_v28, %v8375_v26  ;;  %v8507_v9 = vadd.f32 %v8505_v30, %v8488_v34  ;;  %v8544_v45 = vcombine.high %v8543_v40, %v8543_v40 }
 0xbcd   :  { %v8414_v43 = vadd.f32 %v8412_v20, %v8394_v18  ;;  %v8526_v25 = vadd.f32 %v8524_v11, %v8507_v9 }
 0xbcf   :  { %v8546_v46 = vadd.f32 %v8544_v45, %v8526_v25 }
 0xbd1   :  { %v8551_v36 = vrot.slane %v8546_v46, %v8550_v35 }
 0xbd3   :  { %v8554_v13 = vsel %vm8553_vm4, %v8414_v43, %v8551_v36 }
 0xbd4   :  { %v8555_v39 = vmax.f32 %v8554_v13, 0.0 }
 0xbd6   :  { %9613 = vmatmul.mubr.f32.vlgmr.msra.gmra.mrb[200].mxu0 %v8555_v39 }
 0xca9   :  { %v8645_v33 = vpop.f32.mrb[200].mxu0 }
 0xcaa   :  { %v8646_v56 = vadd.f32 %v9554_v47, %v8645_v33  ;;  %v9614_v57 = vpop.f32.mrb[201].mxu0 }
 0xcac   :  { %9624 = vmatmul.mubr.msk.f32.vlgmr.msra.gmra.mrb[200].mxu1 %vm1187_vm0, %v8646_v56 }
 0xd7f   :  { %v8729_v12 = vpop.f32.mrb[200].mxu1 }
 0xd80   :  { %v8730_v58 = vadd.f32 %v9555_v10, %v8729_v12  ;;  %v9625_v29 = vpop.f32.mrb[201].mxu1 }
 0xd82   :  { %v8733_v31 = vmul.f32 %v8730_v58, %v8730_v58 }
 0xd84   :  { %v8735_v7 = vsel %vm8734_vm5, %v8733_v31, 0.0 }
 0xd85   :  { %8736 = vadd.xlane.f32.xlu0 %v8735_v7 }
 0xe12   :  { %v8737_v53 = vpop.xlane.xlu0 %8736 }
 0xe13   :  { %v8738_v14 = vmax.f32 %v8737_v53, 1e-24 }
 0xe15   :  { %9924 = vrsqrt.f32 %v8738_v14 }
 0xe1f   :  { %v9925_v41 = vpop.eup %9924 }
 0xe20   :  { %v8740_v51 = vmul.f32 %v9925_v41, %v8730_v58 }
 0xe22   :  { %8741 = vst.msk [vmem:[#allocation4] sm:$0x3] %vm8734_vm5, %v8740_v51 }
 0xe23   :  { %9937 = shalt.err (!%p9934_p4)
}
 0xe24   :  { %s9938_s17 = scalar_lea.hbm %s13083_s13, 32 }
 0xe25   :  { %p9939_p5 = scmp.ne.s32.totalorder %s13083_s13, %s9938_s17  ;;  %p9942_p6 = scmp.lt.u32.totalorder %s9938_s17, %s13083_s13 }
 0xe27   :  { %p9944_p7 = pnand %p9942_p6, %p9939_p5 }
 0xe29   :  { %9947 = shalt.err (!%p9944_p7)
}
 0xe2a   :  { %8751 = dma.vmem_to_hbm [thread:$0]  %s8749_s4, 32, %s13083_s13, [#allocation5]  }
 0xe2b   :  { %9950 = dma.done.wait [#allocation5], 32  }
 0xe2c   :  { %9951 = vsyncadd [#allocation5], 4294967264 }
 0xe2d   :  { %8755 = vsyncpa [#allocation5], 1 }
 0xe2e   :  { %8756 = vsyncmov [#allocation3] }
 0xe31   :  { %s8757_s22 = vpop.sfrf %8756 }
 0xe32   :  { %p9557_p8 = scmp.ne.s32.totalorder %s8757_s22, 0 }
 0xe34   :  { %8761 = shalt.err (%p9557_p8)  }

</bundles_post_ra>
